<compile_context>
chip_gen: v7x
topology: tpu7x:2x2x1
jax: 0.10.0
libtpu: 0.0.40
codegen_flags: <defaults>
</compile_context>

<pallas_src>
import functools

import jax
import jax.numpy as jnp
import numpy as np
from jax.experimental import pallas as pl
from jax.experimental.pallas import tpu as pltpu

EPS = 1e-5


def _vmem_capacity_bytes():
    try:
        info = pltpu.get_tpu_info()
        cap = getattr(info, "vmem_capacity_bytes", None)
        if cap:
            return int(cap)
    except Exception:
        pass
    return 64 * 1024 * 1024           # conservative (v7x per-core VMEM)


_VMEM_CAP = _vmem_capacity_bytes()
_VMEM_LIMIT = min((_VMEM_CAP * 3) // 4, 100 * 1024 * 1024)
_ROW_CAP = 1024 if _VMEM_CAP >= 96 * 1024 * 1024 else 512
_PARAMS = pltpu.CompilerParams(dimension_semantics=("parallel",),
                               vmem_limit_bytes=_VMEM_LIMIT)


# ------------------------------- helpers ------------------------------------ #

def _row_tile(m, cap=None):
    """Largest multiple-of-8 divisor of m that is <= cap (generation-aware)."""
    cap = _ROW_CAP if cap is None else cap
    if m <= cap:
        return m
    t = cap - cap % 8
    while t >= 8:
        if m % t == 0:
            return t
        t -= 8
    # TODO(synk): replace the full-extent fallback with a pl.cdiv grid + masked
    #             last tile for shapes with no small multiple-of-8 divisor.
    return m


def _affine_from_stats(st, count, gamma, beta):
    """Per-tile (sum, sum_sq) partials -> BN (scale, shift) vectors (f32).
    TODO(synk): switch to shifted/Welford sums if E[y^2]-E[y]^2 cancellation
    ever matters at full-network activation sizes."""
    s = jnp.sum(st, axis=0)                      # (2, C)
    mean = s[0] / count
    var = s[1] / count - mean * mean             # biased var (training-mode BN)
    inv = jax.lax.rsqrt(var + EPS)
    scale = gamma * inv
    shift = beta - mean * scale
    return scale, shift


# ------------------------------- kernels ------------------------------------ #

def _matmul_stats_kernel(x_ref, w_ref, s_ref, b_ref, y_ref, st_ref,
                         *, pre_affine, pre_relu):
    """1x1 conv as a row-tiled matmul (bf16 in/out, f32 accumulation).  Optionally
    applies the previous BN's (scale, shift) + ReLU to the input tile.  Emits y
    (bf16) and per-tile BN partials (f32) as two plain row stores."""
    h = x_ref[...]
    if pre_affine:
        h = h.astype(jnp.float32) * s_ref[...] + b_ref[...]
    if pre_relu:
        h = jnp.maximum(h, 0.0)
    y = jnp.dot(h.astype(w_ref.dtype), w_ref[...],
                preferred_element_type=jnp.float32)
    y_ref[...] = y.astype(y_ref.dtype)
    st_ref[0, 0:1, :] = jnp.sum(y, axis=0, keepdims=True)
    st_ref[0, 1:2, :] = jnp.sum(y * y, axis=0, keepdims=True)


def _conv3x3_stats_kernel(y1p_ref, w2_ref, s1_ref, b1_ref, m_ref,
                          y2_ref, st_ref, xpf, acc, *, H, W, stride):
    """One image per grid step: fuse bn1-affine + ReLU onto the (pre-padded)
    conv1 output, build a flat zero-padded image in VMEM with a single slab
    store, then run the 3x3 conv (pad=1) as 9 contiguous row-shifted matmuls."""
    Cin = y1p_ref.shape[-1]
    WP, HP = W + 2, H + 2
    Ho = (H - 1) // stride + 1
    Wo = (W - 1) // stride + 1

    # bn1 affine + ReLU fused (consumer-side, no extra HBM round trip).  The
    # lane mask re-zeroes the two flat pad columns per row that the affine's
    # shift would otherwise turn into relu(shift) != 0.
    h = y1p_ref[0].astype(jnp.float32) * s1_ref[...] + b1_ref[...]
    h = jnp.maximum(h, 0.0) * m_ref[...]

    # Zero only the small top/bottom halo slack each step (cheap, and correct
    # even if the grid axis is sharded across cores), then one contiguous slab
    # store of the whole padded image (gap columns arrive already zeroed).
    xpf[pl.ds(0, 2 * WP + 2), :] = jnp.zeros((2 * WP + 2, Cin), xpf.dtype)
    xpf[pl.ds(HP * WP + 2, 2 * WP), :] = jnp.zeros((2 * WP, Cin), xpf.dtype)
    xpf[pl.ds(2 * WP + 2, H * WP), :] = h.astype(xpf.dtype)

    # 9 contiguous row-shifted taps; first tap writes the accumulator directly
    # (no zero-fill pass, no extra read pass).
    w2 = w2_ref[...]                                          # (9, Cin, Cout)
    acc[...] = jnp.dot(xpf[pl.ds(0, HP * WP), :], w2[0],
                       preferred_element_type=jnp.float32)
    for tap in range(1, 9):
        dy, dx = divmod(tap, 3)
        acc[...] += jnp.dot(xpf[pl.ds(dy * WP + dx, HP * WP), :], w2[tap],
                            preferred_element_type=jnp.float32)

    # Gather the valid output pixels.  stride>1 uses a strided dynamic slice.
    # TODO(synk): for stride==2 compute only the kept Ho x Wo pixels (per-tap
    #             subsampled matmuls) instead of the dense HxW output.
    for ho in range(Ho):
        start = (ho * stride + 1) * WP + 1
        if stride == 1:
            row = acc[pl.ds(start, W), :]
        else:
            row = acc[pl.ds(start, Wo, stride=stride), :]
        y2_ref[0, pl.ds(ho * Wo, Wo), :] = row.astype(y2_ref.dtype)

    y2 = y2_ref[0].astype(jnp.float32)
    st_ref[0, 0:1, :] = jnp.sum(y2, axis=0, keepdims=True)
    st_ref[0, 1:2, :] = jnp.sum(y2 * y2, axis=0, keepdims=True)


def _bn_add_relu_kernel(y3_ref, s3_ref, b3_ref, sc_ref, ssc_ref, bsc_ref, o_ref):
    """Final fused epilogue: bn3 affine + (bn_sc affine of) shortcut + add + ReLU."""
    out = (y3_ref[...].astype(jnp.float32) * s3_ref[...] + b3_ref[...]
           + sc_ref[...].astype(jnp.float32) * ssc_ref[...] + bsc_ref[...])
    o_ref[...] = jnp.maximum(out, 0.0).astype(o_ref.dtype)


# --------------------------- pallas_call wrappers --------------------------- #

def _matmul_stats(x2d, w, scale, shift, *, pre_affine, pre_relu):
    M, Cin = x2d.shape
    Cout = w.shape[1]
    tm = _row_tile(M)
    nt = M // tm
    kernel = functools.partial(_matmul_stats_kernel,
                               pre_affine=pre_affine, pre_relu=pre_relu)
    y, st = pl.pallas_call(
        kernel,
        out_shape=(jax.ShapeDtypeStruct((M, Cout), jnp.bfloat16),
                   jax.ShapeDtypeStruct((nt, 2, Cout), jnp.float32)),
        grid=(nt,),
        in_specs=[pl.BlockSpec((tm, Cin), lambda i: (i, 0)),
                  pl.BlockSpec((Cin, Cout), lambda i: (0, 0)),
                  pl.BlockSpec((1, Cin), lambda i: (0, 0)),
                  pl.BlockSpec((1, Cin), lambda i: (0, 0))],
        out_specs=(pl.BlockSpec((tm, Cout), lambda i: (i, 0)),
                   pl.BlockSpec((1, 2, Cout), lambda i: (i, 0, 0))),
        compiler_params=_PARAMS,
    )(x2d, w, scale.reshape(1, Cin), shift.reshape(1, Cin))
    return y, st


def _conv3x3_stats(y1, N, H, W, w_hwio, scale1, shift1, stride):
    Cin = y1.shape[-1]
    Cout = w_hwio.shape[-1]
    WP, HP = W + 2, H + 2
    Ho = (H - 1) // stride + 1
    Wo = (W - 1) // stride + 1
    # Pre-pad the W dim of the conv1 output once in the wrapper so the kernel
    # can fill its flat padded-image scratch with a single slab store.
    y1p = jnp.pad(y1.reshape(N, H, W, Cin), ((0, 0), (0, 0), (0, 2), (0, 0)))
    y1p = y1p.reshape(N, H * WP, Cin)
    # Lane mask: 1 for real pixels, 0 for the two flat pad columns of every row.
    mask = (jnp.arange(H * WP, dtype=jnp.int32) % WP < W)
    mask = mask.astype(jnp.float32).reshape(H * WP, 1)
    w9 = w_hwio.reshape(9, Cin, Cout).astype(jnp.bfloat16)
    kernel = functools.partial(_conv3x3_stats_kernel, H=H, W=W, stride=stride)
    y2, st = pl.pallas_call(
        kernel,
        out_shape=(jax.ShapeDtypeStruct((N, Ho * Wo, Cout), jnp.bfloat16),
                   jax.ShapeDtypeStruct((N, 2, Cout), jnp.float32)),
        grid=(N,),
        in_specs=[pl.BlockSpec((1, H * WP, Cin), lambda i: (i, 0, 0)),
                  pl.BlockSpec((9, Cin, Cout), lambda i: (0, 0, 0)),
                  pl.BlockSpec((1, Cin), lambda i: (0, 0)),
                  pl.BlockSpec((1, Cin), lambda i: (0, 0)),
                  pl.BlockSpec((H * WP, 1), lambda i: (0, 0))],
        out_specs=(pl.BlockSpec((1, Ho * Wo, Cout), lambda i: (i, 0, 0)),
                   pl.BlockSpec((1, 2, Cout), lambda i: (i, 0, 0))),
        scratch_shapes=[pltpu.VMEM((HP * WP + 2 * WP + 2, Cin), jnp.float32),
                        pltpu.VMEM((HP * WP, Cout), jnp.float32)],
        compiler_params=_PARAMS,
    )(y1p, w9, scale1.reshape(1, Cin), shift1.reshape(1, Cin), mask)
    return y2.reshape(N * Ho * Wo, Cout), st, Ho, Wo


def _bn_add_relu(y3, scale3, shift3, sc, sc_scale, sc_shift):
    M, C = y3.shape
    tm = _row_tile(M)
    return pl.pallas_call(
        _bn_add_relu_kernel,
        out_shape=jax.ShapeDtypeStruct((M, C), jnp.float32),
        grid=(M // tm,),
        in_specs=[pl.BlockSpec((tm, C), lambda i: (i, 0)),
                  pl.BlockSpec((1, C), lambda i: (0, 0)),
                  pl.BlockSpec((1, C), lambda i: (0, 0)),
                  pl.BlockSpec((tm, C), lambda i: (i, 0)),
                  pl.BlockSpec((1, C), lambda i: (0, 0)),
                  pl.BlockSpec((1, C), lambda i: (0, 0))],
        out_specs=pl.BlockSpec((tm, C), lambda i: (i, 0)),
        compiler_params=_PARAMS,
    )(y3, scale3.reshape(1, C), shift3.reshape(1, C),
      sc, sc_scale.reshape(1, C), sc_shift.reshape(1, C))


# -------------------------------- forward ----------------------------------- #

def bottleneck_forward(x_nchw, params, stride=1):
    expansion = 4
    # TODO(synk): in a full network keep activations NHWC (and bf16) across
    #             blocks instead of transposing NCHW<->NHWC around every block.
    x = jnp.transpose(x_nchw, (0, 2, 3, 1))                       # NCHW -> NHWC
    N, H, W, Cin = x.shape
    planes = params["w1"].shape[1]
    Cout = expansion * planes
    x2d = x.reshape(N * H * W, Cin).astype(jnp.bfloat16)
    w1 = params["w1"].astype(jnp.bfloat16)
    w3 = params["w3"].astype(jnp.bfloat16)
    ones_c = jnp.ones((Cin,), jnp.float32)
    zeros_c = jnp.zeros((Cin,), jnp.float32)

    # conv1 (1x1) -> y1 (bf16) + BN1 partial stats
    y1, st1 = _matmul_stats(x2d, w1, ones_c, zeros_c,
                            pre_affine=False, pre_relu=False)
    scale1, shift1 = _affine_from_stats(st1, N * H * W, params["g1"], params["b1"])

    # conv2 (3x3, stride, pad=1); bn1-apply + ReLU fused onto its input
    y2, st2, Ho, Wo = _conv3x3_stats(y1, N, H, W, params["w2"], scale1, shift1, stride)
    M2 = N * Ho * Wo
    scale2, shift2 = _affine_from_stats(st2, M2, params["g2"], params["b2"])

    # conv3 (1x1); bn2-apply + ReLU fused onto its input
    y3, st3 = _matmul_stats(y2, w3, scale2, shift2,
                            pre_affine=True, pre_relu=True)
    scale3, shift3 = _affine_from_stats(st3, M2, params["g3"], params["b3"])

    # shortcut branch
    if "w_sc" in params:
        # TODO(synk): fold the stride-2 subsample into the shortcut kernel's
        #             BlockSpec / strided pl.ds read instead of this XLA slice.
        x_s = x[:, ::stride, ::stride, :].reshape(M2, Cin).astype(jnp.bfloat16)
        w_sc = params["w_sc"].astype(jnp.bfloat16)
        y_sc, st_sc = _matmul_stats(x_s, w_sc, ones_c, zeros_c,
                                    pre_affine=False, pre_relu=False)
        sc_scale, sc_shift = _affine_from_stats(st_sc, M2,
                                                params["g_sc"], params["b_sc"])
        sc = y_sc
    else:
        sc = x2d                      # identity: stride==1 and Cin == 4*planes
        sc_scale = jnp.ones((Cout,), jnp.float32)
        sc_shift = jnp.zeros((Cout,), jnp.float32)

    # bn3 affine + shortcut affine + add + ReLU (fused epilogue)
    out2d = _bn_add_relu(y3, scale3, shift3, sc, sc_scale, sc_shift)
    out = out2d.reshape(N, Ho, Wo, Cout)
    return jnp.transpose(out, (0, 3, 1, 2))                       # back to NCHW


# ------------------------- pure-JAX reference (check) ----------------------- #

def _bn_ref(y_nhwc, gamma, beta):
    mean = jnp.mean(y_nhwc, axis=(0, 1, 2), keepdims=True)
    var = jnp.mean((y_nhwc - mean) ** 2, axis=(0, 1, 2), keepdims=True)
    return (y_nhwc - mean) * jax.lax.rsqrt(var + EPS) * gamma + beta


def _conv_ref(x, w_hwio, stride, pad):
    return jax.lax.conv_general_dilated(
        x, w_hwio, (stride, stride), pad,
        dimension_numbers=("NHWC", "HWIO", "NHWC"))


def bottleneck_ref(x_nchw, params, stride=1):
    x = jnp.transpose(x_nchw, (0, 2, 3, 1)).astype(jnp.float32)
    Cin = x.shape[-1]
    planes = params["w1"].shape[1]
    h = jax.nn.relu(_bn_ref(_conv_ref(x, params["w1"].reshape(1, 1, Cin, planes), 1, "VALID"),
                            params["g1"], params["b1"]))
    h = jax.nn.relu(_bn_ref(_conv_ref(h, params["w2"], stride, ((1, 1), (1, 1))),
                            params["g2"], params["b2"]))
    h = _bn_ref(_conv_ref(h, params["w3"].reshape(1, 1, planes, 4 * planes), 1, "VALID"),
                params["g3"], params["b3"])
    if "w_sc" in params:
        sc = _bn_ref(_conv_ref(x, params["w_sc"].reshape(1, 1, Cin, 4 * planes), stride, "VALID"),
                     params["g_sc"], params["b_sc"])
    else:
        sc = x
    return jnp.transpose(jax.nn.relu(h + sc), (0, 3, 1, 2))


# ------------------------------ param init ---------------------------------- #

def init_params(key, in_planes, planes, stride):
    expansion = 4
    ks = jax.random.split(key, 12)
    p = {
        "w1": 0.2 * jax.random.normal(ks[0], (in_planes, planes), jnp.float32),
        "w2": 0.2 * jax.random.normal(ks[1], (3, 3, planes, planes), jnp.float32),
        "w3": 0.2 * jax.random.normal(ks[2], (planes, expansion * planes), jnp.float32),
        "g1": 1.0 + 0.1 * jax.random.normal(ks[3], (planes,), jnp.float32),
        "b1": 0.1 * jax.random.normal(ks[4], (planes,), jnp.float32),
        "g2": 1.0 + 0.1 * jax.random.normal(ks[5], (planes,), jnp.float32),
        "b2": 0.1 * jax.random.normal(ks[6], (planes,), jnp.float32),
        "g3": 1.0 + 0.1 * jax.random.normal(ks[7], (expansion * planes,), jnp.float32),
        "b3": 0.1 * jax.random.normal(ks[8], (expansion * planes,), jnp.float32),
    }
    if stride != 1 or in_planes != expansion * planes:
        p["w_sc"] = 0.2 * jax.random.normal(ks[9], (in_planes, expansion * planes), jnp.float32)
        p["g_sc"] = 1.0 + 0.1 * jax.random.normal(ks[10], (expansion * planes,), jnp.float32)
        p["b_sc"] = 0.1 * jax.random.normal(ks[11], (expansion * planes,), jnp.float32)
    return p


if __name__ == "__main__":
    key = jax.random.PRNGKey(0)
    configs = [
        (4, 4, 1, 16),    # conv shortcut (in_planes != 4*planes), stride 1
        (16, 4, 1, 16),   # identity shortcut
        (8, 4, 2, 16),    # conv shortcut with stride 2
    ]
    for in_planes, planes, stride, hw in configs:
        kx, kp, key = jax.random.split(key, 3)
        x = jax.random.normal(kx, (2, in_planes, hw, hw), jnp.float32)   # NCHW
        params = init_params(kp, in_planes, planes, stride)

        fwd = jax.jit(functools.partial(bottleneck_forward, stride=stride))
        out = jax.block_until_ready(fwd(x, params))
        ref = jax.block_until_ready(bottleneck_ref(x, params, stride))
        # bf16 activation storage + DEFAULT (single bf16 MXU pass) precision:
        # results intentionally agree with the f32 reference only to ~bf16 level.
        np.testing.assert_allclose(np.asarray(out), np.asarray(ref),
                                   rtol=5e-2, atol=5e-2)
    print("KERNEL_OK")
</pallas_src>

<mosaic_0001>
module attributes {stable_mosaic.version = 11 : i64} {
  func.func @_matmul_stats_kernel(%arg0: i32, %arg1: memref<512x4xbf16, #tpu.memory_space<vmem>>, %arg2: memref<4x4xbf16, #tpu.memory_space<vmem>>, %arg3: memref<1x4xf32, #tpu.memory_space<vmem>>, %arg4: memref<1x4xf32, #tpu.memory_space<vmem>>, %arg5: memref<512x4xbf16, #tpu.memory_space<vmem>>, %arg6: memref<1x2x4xf32, #tpu.memory_space<vmem>>) attributes {dimension_semantics = [#tpu.dimension_semantics<parallel>], iteration_bounds = array<i64: 1>, scalar_prefetch = 0 : i64, scratch_operands = 0 : i64, tpu.core_type = #tpu.core_type<tc>, window_params = [{transform_indices = @transform_0, window_bounds = array<i64: 512, 4>}, {pipeline_mode = #tpu.pipeline_mode<synchronous>, transform_indices = @transform_1, window_bounds = array<i64: 4, 4>}, {pipeline_mode = #tpu.pipeline_mode<synchronous>, transform_indices = @transform_2, window_bounds = array<i64: 1, 4>}, {pipeline_mode = #tpu.pipeline_mode<synchronous>, transform_indices = @transform_3, window_bounds = array<i64: 1, 4>}, {transform_indices = @transform_4, window_bounds = array<i64: 512, 4>}, {transform_indices = @transform_5, window_bounds = array<i64: 1, 2, 4>}]} {
    %c0 = arith.constant 0 : index
    %c0_0 = arith.constant 0 : index
    %0 = vector.load %arg1[%c0, %c0_0] : memref<512x4xbf16, #tpu.memory_space<vmem>>, vector<512x4xbf16>
    %c0_1 = arith.constant 0 : index
    %c0_2 = arith.constant 0 : index
    %1 = vector.load %arg2[%c0_1, %c0_2] : memref<4x4xbf16, #tpu.memory_space<vmem>>, vector<4x4xbf16>
    %cst = arith.constant dense<0.000000e+00> : vector<512x4xf32>
    %2 = tpu.matmul %0, %1, %cst {dimension_numbers = #tpu.dot_dimension_numbers<[1], [0], [0], [1], [0, 0, 1, 1], [], []>} : vector<512x4xbf16>, vector<4x4xbf16>, vector<512x4xf32> -> vector<512x4xf32>
    %3 = arith.truncf %2 : vector<512x4xf32> to vector<512x4xbf16>
    %c0_3 = arith.constant 0 : index
    %c0_4 = arith.constant 0 : index
    %4 = vector.load %arg5[%c0_3, %c0_4] : memref<512x4xbf16, #tpu.memory_space<vmem>>, vector<512x4xbf16>
    tpu.vector_store %arg5[%c0_3, %c0_4], %3 {strides = array<i32>} : memref<512x4xbf16, #tpu.memory_space<vmem>>, vector<512x4xbf16>,
    %cst_5 = arith.constant dense<0.000000e+00> : vector<4xf32>
    %5 = vector.multi_reduction <add>, %2, %cst_5 [0] : vector<512x4xf32> to vector<4xf32>
    %6 = vector.shape_cast %5 : vector<4xf32> to vector<1x4xf32>
    %c0_6 = arith.constant 0 : index
    %c0_7 = arith.constant 0 : index
    %c0_8 = arith.constant 0 : index
    %7 = vector.load %arg6[%c0_6, %c0_7, %c0_8] : memref<1x2x4xf32, #tpu.memory_space<vmem>>, vector<1x1x4xf32>
    %8 = vector.shape_cast %7 : vector<1x1x4xf32> to vector<1x4xf32>
    %9 = vector.shape_cast %6 : vector<1x4xf32> to vector<1x1x4xf32>
    tpu.vector_store %arg6[%c0_6, %c0_7, %c0_8], %9 {strides = array<i32>} : memref<1x2x4xf32, #tpu.memory_space<vmem>>, vector<1x1x4xf32>,
    %10 = arith.mulf %2, %2 : vector<512x4xf32>
    %cst_9 = arith.constant dense<0.000000e+00> : vector<4xf32>
    %11 = vector.multi_reduction <add>, %10, %cst_9 [0] : vector<512x4xf32> to vector<4xf32>
    %12 = vector.shape_cast %11 : vector<4xf32> to vector<1x4xf32>
    %c0_10 = arith.constant 0 : index
    %c1 = arith.constant 1 : index
    %c0_11 = arith.constant 0 : index
    %13 = vector.load %arg6[%c0_10, %c1, %c0_11] : memref<1x2x4xf32, #tpu.memory_space<vmem>>, vector<1x1x4xf32>
    %14 = vector.shape_cast %13 : vector<1x1x4xf32> to vector<1x4xf32>
    %15 = vector.shape_cast %12 : vector<1x4xf32> to vector<1x1x4xf32>
    tpu.vector_store %arg6[%c0_10, %c1, %c0_11], %15 {strides = array<i32>} : memref<1x2x4xf32, #tpu.memory_space<vmem>>, vector<1x1x4xf32>,
    return
  }
  func.func @transform_0(%arg0: i32) -> (i32, i32) {
    %c0_i32 = arith.constant 0 : i32
    %c0_i32_0 = arith.constant 0 : i32
    return %arg0, %c0_i32 : i32, i32
  }
  func.func @transform_1(%arg0: i32) -> (i32, i32) {
    %c0_i32 = arith.constant 0 : i32
    %c0_i32_0 = arith.constant 0 : i32
    %c0_i32_1 = arith.constant 0 : i32
    return %c0_i32, %c0_i32_0 : i32, i32
  }
  func.func @transform_2(%arg0: i32) -> (i32, i32) {
    %c0_i32 = arith.constant 0 : i32
    %c0_i32_0 = arith.constant 0 : i32
    %c0_i32_1 = arith.constant 0 : i32
    return %c0_i32, %c0_i32_0 : i32, i32
  }
  func.func @transform_3(%arg0: i32) -> (i32, i32) {
    %c0_i32 = arith.constant 0 : i32
    %c0_i32_0 = arith.constant 0 : i32
    %c0_i32_1 = arith.constant 0 : i32
    return %c0_i32, %c0_i32_0 : i32, i32
  }
  func.func @transform_4(%arg0: i32) -> (i32, i32) {
    %c0_i32 = arith.constant 0 : i32
    %c0_i32_0 = arith.constant 0 : i32
    return %arg0, %c0_i32 : i32, i32
  }
  func.func @transform_5(%arg0: i32) -> (i32, i32, i32) {
    %c0_i32 = arith.constant 0 : i32
    %c0_i32_0 = arith.constant 0 : i32
    %c0_i32_1 = arith.constant 0 : i32
    return %arg0, %c0_i32, %c0_i32_0 : i32, i32, i32
  }
}

module attributes {stable_mosaic.version = 11 : i64} {
  func.func @_conv3x3_stats_kernel(%arg0: i32, %arg1: memref<1x288x4xbf16, #tpu.memory_space<vmem>>, %arg2: memref<9x4x4xbf16, #tpu.memory_space<vmem>>, %arg3: memref<1x4xf32, #tpu.memory_space<vmem>>, %arg4: memref<1x4xf32, #tpu.memory_space<vmem>>, %arg5: memref<288x1xf32, #tpu.memory_space<vmem>>, %arg6: memref<1x256x4xbf16, #tpu.memory_space<vmem>>, %arg7: memref<1x2x4xf32, #tpu.memory_space<vmem>>, %arg8: memref<362x4xf32, #tpu.memory_space<vmem>>, %arg9: memref<324x4xf32, #tpu.memory_space<vmem>>) attributes {dimension_semantics = [#tpu.dimension_semantics<parallel>], iteration_bounds = array<i64: 2>, scalar_prefetch = 0 : i64, scratch_operands = 2 : i64, tpu.core_type = #tpu.core_type<tc>, window_params = [{transform_indices = @transform_0, window_bounds = array<i64: 1, 288, 4>}, {pipeline_mode = #tpu.pipeline_mode<synchronous>, transform_indices = @transform_1, window_bounds = array<i64: 9, 4, 4>}, {pipeline_mode = #tpu.pipeline_mode<synchronous>, transform_indices = @transform_2, window_bounds = array<i64: 1, 4>}, {pipeline_mode = #tpu.pipeline_mode<synchronous>, transform_indices = @transform_3, window_bounds = array<i64: 1, 4>}, {pipeline_mode = #tpu.pipeline_mode<synchronous>, transform_indices = @transform_4, window_bounds = array<i64: 288, 1>}, {transform_indices = @transform_5, window_bounds = array<i64: 1, 256, 4>}, {transform_indices = @transform_6, window_bounds = array<i64: 1, 2, 4>}]} {
    %c0 = arith.constant 0 : index
    %c0_0 = arith.constant 0 : index
    %c0_1 = arith.constant 0 : index
    %0 = vector.load %arg1[%c0, %c0_0, %c0_1] : memref<1x288x4xbf16, #tpu.memory_space<vmem>>, vector<1x288x4xbf16>
    %1 = vector.shape_cast %0 : vector<1x288x4xbf16> to vector<288x4xbf16>
    %2 = arith.extf %1 : vector<288x4xbf16> to vector<288x4xf32>
    %c0_2 = arith.constant 0 : index
    %c0_3 = arith.constant 0 : index
    %3 = vector.load %arg3[%c0_2, %c0_3] : memref<1x4xf32, #tpu.memory_space<vmem>>, vector<1x4xf32>
    %4 = vector.broadcast %3 : vector<1x4xf32> to vector<288x4xf32>
    %5 = arith.mulf %2, %4 : vector<288x4xf32>
    %c0_4 = arith.constant 0 : index
    %c0_5 = arith.constant 0 : index
    %6 = vector.load %arg4[%c0_4, %c0_5] : memref<1x4xf32, #tpu.memory_space<vmem>>, vector<1x4xf32>
    %7 = vector.broadcast %6 : vector<1x4xf32> to vector<288x4xf32>
    %8 = arith.addf %5, %7 : vector<288x4xf32>
    %cst = arith.constant 0.000000e+00 : f32
    %9 = vector.broadcast %cst : f32 to vector<288x4xf32>
    %10 = arith.maximumf %8, %9 : vector<288x4xf32>
    %c0_6 = arith.constant 0 : index
    %c0_7 = arith.constant 0 : index
    %11 = vector.load %arg5[%c0_6, %c0_7] : memref<288x1xf32, #tpu.memory_space<vmem>>, vector<288x1xf32>
    %12 = vector.broadcast %11 : vector<288x1xf32> to vector<288x4xf32>
    %13 = arith.mulf %10, %12 : vector<288x4xf32>
    %cst_8 = arith.constant 0.000000e+00 : f32
    %14 = vector.broadcast %cst_8 : f32 to vector<38x4xf32>
    %c0_9 = arith.constant 0 : index
    %c0_10 = arith.constant 0 : index
    %15 = vector.load %arg8[%c0_9, %c0_10] : memref<362x4xf32, #tpu.memory_space<vmem>>, vector<38x4xf32>
    tpu.vector_store %arg8[%c0_9, %c0_10], %14 {strides = array<i32>} : memref<362x4xf32, #tpu.memory_space<vmem>>, vector<38x4xf32>,
    %cst_11 = arith.constant 0.000000e+00 : f32
    %16 = vector.broadcast %cst_11 : f32 to vector<36x4xf32>
    %c326 = arith.constant 326 : index
    %c0_12 = arith.constant 0 : index
    %17 = vector.load %arg8[%c326, %c0_12] : memref<362x4xf32, #tpu.memory_space<vmem>>, vector<36x4xf32>
    tpu.vector_store %arg8[%c326, %c0_12], %16 {strides = array<i32>} : memref<362x4xf32, #tpu.memory_space<vmem>>, vector<36x4xf32>,
    %c38 = arith.constant 38 : index
    %c0_13 = arith.constant 0 : index
    %18 = vector.load %arg8[%c38, %c0_13] : memref<362x4xf32, #tpu.memory_space<vmem>>, vector<288x4xf32>
    tpu.vector_store %arg8[%c38, %c0_13], %13 {strides = array<i32>} : memref<362x4xf32, #tpu.memory_space<vmem>>, vector<288x4xf32>,
    %c0_14 = arith.constant 0 : index
    %c0_15 = arith.constant 0 : index
    %c0_16 = arith.constant 0 : index
    %19 = vector.load %arg2[%c0_14, %c0_15, %c0_16] : memref<9x4x4xbf16, #tpu.memory_space<vmem>>, vector<9x4x4xbf16>
    %c0_17 = arith.constant 0 : index
    %c0_18 = arith.constant 0 : index
    %20 = vector.load %arg8[%c0_17, %c0_18] : memref<362x4xf32, #tpu.memory_space<vmem>>, vector<324x4xf32>
    %21 = vector.extract_strided_slice %19 {offsets = [0, 0, 0], sizes = [1, 4, 4], strides = [1, 1, 1]} : vector<9x4x4xbf16> to vector<1x4x4xbf16>
    %22 = vector.shape_cast %21 : vector<1x4x4xbf16> to vector<4x4xbf16>
    %cst_19 = arith.constant dense<0.000000e+00> : vector<324x4xf32>
    %23 = tpu.matmul %20, %22, %cst_19 {dimension_numbers = #tpu.dot_dimension_numbers<[1], [0], [0], [1], [0, 0, 1, 1], [], []>} : vector<324x4xf32>, vector<4x4xbf16>, vector<324x4xf32> -> vector<324x4xf32>
    %c0_20 = arith.constant 0 : index
    %c0_21 = arith.constant 0 : index
    %24 = vector.load %arg9[%c0_20, %c0_21] : memref<324x4xf32, #tpu.memory_space<vmem>>, vector<324x4xf32>
    tpu.vector_store %arg9[%c0_20, %c0_21], %23 {strides = array<i32>} : memref<324x4xf32, #tpu.memory_space<vmem>>, vector<324x4xf32>,
    %c0_22 = arith.constant 0 : index
    %c0_23 = arith.constant 0 : index
    %25 = vector.load %arg9[%c0_22, %c0_23] : memref<324x4xf32, #tpu.memory_space<vmem>>, vector<324x4xf32>
    %c1 = arith.constant 1 : index
    %c0_24 = arith.constant 0 : index
    %26 = vector.load %arg8[%c1, %c0_24] : memref<362x4xf32, #tpu.memory_space<vmem>>, vector<324x4xf32>
    %27 = vector.extract_strided_slice %19 {offsets = [1, 0, 0], sizes = [1, 4, 4], strides = [1, 1, 1]} : vector<9x4x4xbf16> to vector<1x4x4xbf16>
    %28 = vector.shape_cast %27 : vector<1x4x4xbf16> to vector<4x4xbf16>
    %cst_25 = arith.constant dense<0.000000e+00> : vector<324x4xf32>
    %29 = tpu.matmul %26, %28, %cst_25 {dimension_numbers = #tpu.dot_dimension_numbers<[1], [0], [0], [1], [0, 0, 1, 1], [], []>} : vector<324x4xf32>, vector<4x4xbf16>, vector<324x4xf32> -> vector<324x4xf32>
    %30 = arith.addf %25, %29 : vector<324x4xf32>
    %c0_26 = arith.constant 0 : index
    %c0_27 = arith.constant 0 : index
    %31 = vector.load %arg9[%c0_26, %c0_27] : memref<324x4xf32, #tpu.memory_space<vmem>>, vector<324x4xf32>
    tpu.vector_store %arg9[%c0_26, %c0_27], %30 {strides = array<i32>} : memref<324x4xf32, #tpu.memory_space<vmem>>, vector<324x4xf32>,
    %c0_28 = arith.constant 0 : index
    %c0_29 = arith.constant 0 : index
    %32 = vector.load %arg9[%c0_28, %c0_29] : memref<324x4xf32, #tpu.memory_space<vmem>>, vector<324x4xf32>
    %c2 = arith.constant 2 : index
    %c0_30 = arith.constant 0 : index
    %33 = vector.load %arg8[%c2, %c0_30] : memref<362x4xf32, #tpu.memory_space<vmem>>, vector<324x4xf32>
    %34 = vector.extract_strided_slice %19 {offsets = [2, 0, 0], sizes = [1, 4, 4], strides = [1, 1, 1]} : vector<9x4x4xbf16> to vector<1x4x4xbf16>
    %35 = vector.shape_cast %34 : vector<1x4x4xbf16> to vector<4x4xbf16>
    %cst_31 = arith.constant dense<0.000000e+00> : vector<324x4xf32>
    %36 = tpu.matmul %33, %35, %cst_31 {dimension_numbers = #tpu.dot_dimension_numbers<[1], [0], [0], [1], [0, 0, 1, 1], [], []>} : vector<324x4xf32>, vector<4x4xbf16>, vector<324x4xf32> -> vector<324x4xf32>
    %37 = arith.addf %32, %36 : vector<324x4xf32>
    %c0_32 = arith.constant 0 : index
    %c0_33 = arith.constant 0 : index
    %38 = vector.load %arg9[%c0_32, %c0_33] : memref<324x4xf32, #tpu.memory_space<vmem>>, vector<324x4xf32>
    tpu.vector_store %arg9[%c0_32, %c0_33], %37 {strides = array<i32>} : memref<324x4xf32, #tpu.memory_space<vmem>>, vector<324x4xf32>,
    %c0_34 = arith.constant 0 : index
    %c0_35 = arith.constant 0 : index
    %39 = vector.load %arg9[%c0_34, %c0_35] : memref<324x4xf32, #tpu.memory_space<vmem>>, vector<324x4xf32>
    %c18 = arith.constant 18 : index
    %c0_36 = arith.constant 0 : index
    %40 = vector.load %arg8[%c18, %c0_36] : memref<362x4xf32, #tpu.memory_space<vmem>>, vector<324x4xf32>
    %41 = vector.extract_strided_slice %19 {offsets = [3, 0, 0], sizes = [1, 4, 4], strides = [1, 1, 1]} : vector<9x4x4xbf16> to vector<1x4x4xbf16>
    %42 = vector.shape_cast %41 : vector<1x4x4xbf16> to vector<4x4xbf16>
    %cst_37 = arith.constant dense<0.000000e+00> : vector<324x4xf32>
    %43 = tpu.matmul %40, %42, %cst_37 {dimension_numbers = #tpu.dot_dimension_numbers<[1], [0], [0], [1], [0, 0, 1, 1], [], []>} : vector<324x4xf32>, vector<4x4xbf16>, vector<324x4xf32> -> vector<324x4xf32>
    %44 = arith.addf %39, %43 : vector<324x4xf32>
    %c0_38 = arith.constant 0 : index
    %c0_39 = arith.constant 0 : index
    %45 = vector.load %arg9[%c0_38, %c0_39] : memref<324x4xf32, #tpu.memory_space<vmem>>, vector<324x4xf32>
    tpu.vector_store %arg9[%c0_38, %c0_39], %44 {strides = array<i32>} : memref<324x4xf32, #tpu.memory_space<vmem>>, vector<324x4xf32>,
    %c0_40 = arith.constant 0 : index
    %c0_41 = arith.constant 0 : index
    %46 = vector.load %arg9[%c0_40, %c0_41] : memref<324x4xf32, #tpu.memory_space<vmem>>, vector<324x4xf32>
    %c19 = arith.constant 19 : index
    %c0_42 = arith.constant 0 : index
    %47 = vector.load %arg8[%c19, %c0_42] : memref<362x4xf32, #tpu.memory_space<vmem>>, vector<324x4xf32>
    %48 = vector.extract_strided_slice %19 {offsets = [4, 0, 0], sizes = [1, 4, 4], strides = [1, 1, 1]} : vector<9x4x4xbf16> to vector<1x4x4xbf16>
    %49 = vector.shape_cast %48 : vector<1x4x4xbf16> to vector<4x4xbf16>
    %cst_43 = arith.constant dense<0.000000e+00> : vector<324x4xf32>
    %50 = tpu.matmul %47, %49, %cst_43 {dimension_numbers = #tpu.dot_dimension_numbers<[1], [0], [0], [1], [0, 0, 1, 1], [], []>} : vector<324x4xf32>, vector<4x4xbf16>, vector<324x4xf32> -> vector<324x4xf32>
    %51 = arith.addf %46, %50 : vector<324x4xf32>
    %c0_44 = arith.constant 0 : index
    %c0_45 = arith.constant 0 : index
    %52 = vector.load %arg9[%c0_44, %c0_45] : memref<324x4xf32, #tpu.memory_space<vmem>>, vector<324x4xf32>
    tpu.vector_store %arg9[%c0_44, %c0_45], %51 {strides = array<i32>} : memref<324x4xf32, #tpu.memory_space<vmem>>, vector<324x4xf32>,
    %c0_46 = arith.constant 0 : index
    %c0_47 = arith.constant 0 : index
    %53 = vector.load %arg9[%c0_46, %c0_47] : memref<324x4xf32, #tpu.memory_space<vmem>>, vector<324x4xf32>
    %c20 = arith.constant 20 : index
    %c0_48 = arith.constant 0 : index
    %54 = vector.load %arg8[%c20, %c0_48] : memref<362x4xf32, #tpu.memory_space<vmem>>, vector<324x4xf32>
    %55 = vector.extract_strided_slice %19 {offsets = [5, 0, 0], sizes = [1, 4, 4], strides = [1, 1, 1]} : vector<9x4x4xbf16> to vector<1x4x4xbf16>
    %56 = vector.shape_cast %55 : vector<1x4x4xbf16> to vector<4x4xbf16>
    %cst_49 = arith.constant dense<0.000000e+00> : vector<324x4xf32>
    %57 = tpu.matmul %54, %56, %cst_49 {dimension_numbers = #tpu.dot_dimension_numbers<[1], [0], [0], [1], [0, 0, 1, 1], [], []>} : vector<324x4xf32>, vector<4x4xbf16>, vector<324x4xf32> -> vector<324x4xf32>
    %58 = arith.addf %53, %57 : vector<324x4xf32>
    %c0_50 = arith.constant 0 : index
    %c0_51 = arith.constant 0 : index
    %59 = vector.load %arg9[%c0_50, %c0_51] : memref<324x4xf32, #tpu.memory_space<vmem>>, vector<324x4xf32>
    tpu.vector_store %arg9[%c0_50, %c0_51], %58 {strides = array<i32>} : memref<324x4xf32, #tpu.memory_space<vmem>>, vector<324x4xf32>,
    %c0_52 = arith.constant 0 : index
    %c0_53 = arith.constant 0 : index
    %60 = vector.load %arg9[%c0_52, %c0_53] : memref<324x4xf32, #tpu.memory_space<vmem>>, vector<324x4xf32>
    %c36 = arith.constant 36 : index
    %c0_54 = arith.constant 0 : index
    %61 = vector.load %arg8[%c36, %c0_54] : memref<362x4xf32, #tpu.memory_space<vmem>>, vector<324x4xf32>
    %62 = vector.extract_strided_slice %19 {offsets = [6, 0, 0], sizes = [1, 4, 4], strides = [1, 1, 1]} : vector<9x4x4xbf16> to vector<1x4x4xbf16>
    %63 = vector.shape_cast %62 : vector<1x4x4xbf16> to vector<4x4xbf16>
    %cst_55 = arith.constant dense<0.000000e+00> : vector<324x4xf32>
    %64 = tpu.matmul %61, %63, %cst_55 {dimension_numbers = #tpu.dot_dimension_numbers<[1], [0], [0], [1], [0, 0, 1, 1], [], []>} : vector<324x4xf32>, vector<4x4xbf16>, vector<324x4xf32> -> vector<324x4xf32>
    %65 = arith.addf %60, %64 : vector<324x4xf32>
    %c0_56 = arith.constant 0 : index
    %c0_57 = arith.constant 0 : index
    %66 = vector.load %arg9[%c0_56, %c0_57] : memref<324x4xf32, #tpu.memory_space<vmem>>, vector<324x4xf32>
    tpu.vector_store %arg9[%c0_56, %c0_57], %65 {strides = array<i32>} : memref<324x4xf32, #tpu.memory_space<vmem>>, vector<324x4xf32>,
    %c0_58 = arith.constant 0 : index
    %c0_59 = arith.constant 0 : index
    %67 = vector.load %arg9[%c0_58, %c0_59] : memref<324x4xf32, #tpu.memory_space<vmem>>, vector<324x4xf32>
    %c37 = arith.constant 37 : index
    %c0_60 = arith.constant 0 : index
    %68 = vector.load %arg8[%c37, %c0_60] : memref<362x4xf32, #tpu.memory_space<vmem>>, vector<324x4xf32>
    %69 = vector.extract_strided_slice %19 {offsets = [7, 0, 0], sizes = [1, 4, 4], strides = [1, 1, 1]} : vector<9x4x4xbf16> to vector<1x4x4xbf16>
    %70 = vector.shape_cast %69 : vector<1x4x4xbf16> to vector<4x4xbf16>
    %cst_61 = arith.constant dense<0.000000e+00> : vector<324x4xf32>
    %71 = tpu.matmul %68, %70, %cst_61 {dimension_numbers = #tpu.dot_dimension_numbers<[1], [0], [0], [1], [0, 0, 1, 1], [], []>} : vector<324x4xf32>, vector<4x4xbf16>, vector<324x4xf32> -> vector<324x4xf32>
    %72 = arith.addf %67, %71 : vector<324x4xf32>
    %c0_62 = arith.constant 0 : index
    %c0_63 = arith.constant 0 : index
    %73 = vector.load %arg9[%c0_62, %c0_63] : memref<324x4xf32, #tpu.memory_space<vmem>>, vector<324x4xf32>
    tpu.vector_store %arg9[%c0_62, %c0_63], %72 {strides = array<i32>} : memref<324x4xf32, #tpu.memory_space<vmem>>, vector<324x4xf32>,
    %c0_64 = arith.constant 0 : index
    %c0_65 = arith.constant 0 : index
    %74 = vector.load %arg9[%c0_64, %c0_65] : memref<324x4xf32, #tpu.memory_space<vmem>>, vector<324x4xf32>
    %c38_66 = arith.constant 38 : index
    %c0_67 = arith.constant 0 : index
    %75 = vector.load %arg8[%c38_66, %c0_67] : memref<362x4xf32, #tpu.memory_space<vmem>>, vector<324x4xf32>
    %76 = vector.extract_strided_slice %19 {offsets = [8, 0, 0], sizes = [1, 4, 4], strides = [1, 1, 1]} : vector<9x4x4xbf16> to vector<1x4x4xbf16>
    %77 = vector.shape_cast %76 : vector<1x4x4xbf16> to vector<4x4xbf16>
    %cst_68 = arith.constant dense<0.000000e+00> : vector<324x4xf32>
    %78 = tpu.matmul %75, %77, %cst_68 {dimension_numbers = #tpu.dot_dimension_numbers<[1], [0], [0], [1], [0, 0, 1, 1], [], []>} : vector<324x4xf32>, vector<4x4xbf16>, vector<324x4xf32> -> vector<324x4xf32>
    %79 = arith.addf %74, %78 : vector<324x4xf32>
    %c0_69 = arith.constant 0 : index
    %c0_70 = arith.constant 0 : index
    %80 = vector.load %arg9[%c0_69, %c0_70] : memref<324x4xf32, #tpu.memory_space<vmem>>, vector<324x4xf32>
    tpu.vector_store %arg9[%c0_69, %c0_70], %79 {strides = array<i32>} : memref<324x4xf32, #tpu.memory_space<vmem>>, vector<324x4xf32>,
    %c19_71 = arith.constant 19 : index
    %c0_72 = arith.constant 0 : index
    %81 = vector.load %arg9[%c19_71, %c0_72] : memref<324x4xf32, #tpu.memory_space<vmem>>, vector<16x4xf32>
    %82 = arith.truncf %81 : vector<16x4xf32> to vector<16x4xbf16>
    %c0_73 = arith.constant 0 : index
    %c0_74 = arith.constant 0 : index
    %c0_75 = arith.constant 0 : index
    %83 = vector.load %arg6[%c0_73, %c0_74, %c0_75] : memref<1x256x4xbf16, #tpu.memory_space<vmem>>, vector<1x16x4xbf16>
    %84 = vector.shape_cast %83 : vector<1x16x4xbf16> to vector<16x4xbf16>
    %85 = vector.shape_cast %82 : vector<16x4xbf16> to vector<1x16x4xbf16>
    tpu.vector_store %arg6[%c0_73, %c0_74, %c0_75], %85 {strides = array<i32>} : memref<1x256x4xbf16, #tpu.memory_space<vmem>>, vector<1x16x4xbf16>,
    %c37_76 = arith.constant 37 : index
    %c0_77 = arith.constant 0 : index
    %86 = vector.load %arg9[%c37_76, %c0_77] : memref<324x4xf32, #tpu.memory_space<vmem>>, vector<16x4xf32>
    %87 = arith.truncf %86 : vector<16x4xf32> to vector<16x4xbf16>
    %c0_78 = arith.constant 0 : index
    %c16 = arith.constant 16 : index
    %c0_79 = arith.constant 0 : index
    %88 = vector.load %arg6[%c0_78, %c16, %c0_79] : memref<1x256x4xbf16, #tpu.memory_space<vmem>>, vector<1x16x4xbf16>
    %89 = vector.shape_cast %88 : vector<1x16x4xbf16> to vector<16x4xbf16>
    %90 = vector.shape_cast %87 : vector<16x4xbf16> to vector<1x16x4xbf16>
    tpu.vector_store %arg6[%c0_78, %c16, %c0_79], %90 {strides = array<i32>} : memref<1x256x4xbf16, #tpu.memory_space<vmem>>, vector<1x16x4xbf16>,
    %c55 = arith.constant 55 : index
    %c0_80 = arith.constant 0 : index
    %91 = vector.load %arg9[%c55, %c0_80] : memref<324x4xf32, #tpu.memory_space<vmem>>, vector<16x4xf32>
    %92 = arith.truncf %91 : vector<16x4xf32> to vector<16x4xbf16>
    %c0_81 = arith.constant 0 : index
    %c32 = arith.constant 32 : index
    %c0_82 = arith.constant 0 : index
    %93 = vector.load %arg6[%c0_81, %c32, %c0_82] : memref<1x256x4xbf16, #tpu.memory_space<vmem>>, vector<1x16x4xbf16>
    %94 = vector.shape_cast %93 : vector<1x16x4xbf16> to vector<16x4xbf16>
    %95 = vector.shape_cast %92 : vector<16x4xbf16> to vector<1x16x4xbf16>
    tpu.vector_store %arg6[%c0_81, %c32, %c0_82], %95 {strides = array<i32>} : memref<1x256x4xbf16, #tpu.memory_space<vmem>>, vector<1x16x4xbf16>,
    %c73 = arith.constant 73 : index
    %c0_83 = arith.constant 0 : index
    %96 = vector.load %arg9[%c73, %c0_83] : memref<324x4xf32, #tpu.memory_space<vmem>>, vector<16x4xf32>
    %97 = arith.truncf %96 : vector<16x4xf32> to vector<16x4xbf16>
    %c0_84 = arith.constant 0 : index
    %c48 = arith.constant 48 : index
    %c0_85 = arith.constant 0 : index
    %98 = vector.load %arg6[%c0_84, %c48, %c0_85] : memref<1x256x4xbf16, #tpu.memory_space<vmem>>, vector<1x16x4xbf16>
    %99 = vector.shape_cast %98 : vector<1x16x4xbf16> to vector<16x4xbf16>
    %100 = vector.shape_cast %97 : vector<16x4xbf16> to vector<1x16x4xbf16>
    tpu.vector_store %arg6[%c0_84, %c48, %c0_85], %100 {strides = array<i32>} : memref<1x256x4xbf16, #tpu.memory_space<vmem>>, vector<1x16x4xbf16>,
    %c91 = arith.constant 91 : index
    %c0_86 = arith.constant 0 : index
    %101 = vector.load %arg9[%c91, %c0_86] : memref<324x4xf32, #tpu.memory_space<vmem>>, vector<16x4xf32>
    %102 = arith.truncf %101 : vector<16x4xf32> to vector<16x4xbf16>
    %c0_87 = arith.constant 0 : index
    %c64 = arith.constant 64 : index
    %c0_88 = arith.constant 0 : index
    %103 = vector.load %arg6[%c0_87, %c64, %c0_88] : memref<1x256x4xbf16, #tpu.memory_space<vmem>>, vector<1x16x4xbf16>
    %104 = vector.shape_cast %103 : vector<1x16x4xbf16> to vector<16x4xbf16>
    %105 = vector.shape_cast %102 : vector<16x4xbf16> to vector<1x16x4xbf16>
    tpu.vector_store %arg6[%c0_87, %c64, %c0_88], %105 {strides = array<i32>} : memref<1x256x4xbf16, #tpu.memory_space<vmem>>, vector<1x16x4xbf16>,
    %c109 = arith.constant 109 : index
    %c0_89 = arith.constant 0 : index
    %106 = vector.load %arg9[%c109, %c0_89] : memref<324x4xf32, #tpu.memory_space<vmem>>, vector<16x4xf32>
    %107 = arith.truncf %106 : vector<16x4xf32> to vector<16x4xbf16>
    %c0_90 = arith.constant 0 : index
    %c80 = arith.constant 80 : index
    %c0_91 = arith.constant 0 : index
    %108 = vector.load %arg6[%c0_90, %c80, %c0_91] : memref<1x256x4xbf16, #tpu.memory_space<vmem>>, vector<1x16x4xbf16>
    %109 = vector.shape_cast %108 : vector<1x16x4xbf16> to vector<16x4xbf16>
    %110 = vector.shape_cast %107 : vector<16x4xbf16> to vector<1x16x4xbf16>
    tpu.vector_store %arg6[%c0_90, %c80, %c0_91], %110 {strides = array<i32>} : memref<1x256x4xbf16, #tpu.memory_space<vmem>>, vector<1x16x4xbf16>,
    %c127 = arith.constant 127 : index
    %c0_92 = arith.constant 0 : index
    %111 = vector.load %arg9[%c127, %c0_92] : memref<324x4xf32, #tpu.memory_space<vmem>>, vector<16x4xf32>
    %112 = arith.truncf %111 : vector<16x4xf32> to vector<16x4xbf16>
    %c0_93 = arith.constant 0 : index
    %c96 = arith.constant 96 : index
    %c0_94 = arith.constant 0 : index
    %113 = vector.load %arg6[%c0_93, %c96, %c0_94] : memref<1x256x4xbf16, #tpu.memory_space<vmem>>, vector<1x16x4xbf16>
    %114 = vector.shape_cast %113 : vector<1x16x4xbf16> to vector<16x4xbf16>
    %115 = vector.shape_cast %112 : vector<16x4xbf16> to vector<1x16x4xbf16>
    tpu.vector_store %arg6[%c0_93, %c96, %c0_94], %115 {strides = array<i32>} : memref<1x256x4xbf16, #tpu.memory_space<vmem>>, vector<1x16x4xbf16>,
    %c145 = arith.constant 145 : index
    %c0_95 = arith.constant 0 : index
    %116 = vector.load %arg9[%c145, %c0_95] : memref<324x4xf32, #tpu.memory_space<vmem>>, vector<16x4xf32>
    %117 = arith.truncf %116 : vector<16x4xf32> to vector<16x4xbf16>
    %c0_96 = arith.constant 0 : index
    %c112 = arith.constant 112 : index
    %c0_97 = arith.constant 0 : index
    %118 = vector.load %arg6[%c0_96, %c112, %c0_97] : memref<1x256x4xbf16, #tpu.memory_space<vmem>>, vector<1x16x4xbf16>
    %119 = vector.shape_cast %118 : vector<1x16x4xbf16> to vector<16x4xbf16>
    %120 = vector.shape_cast %117 : vector<16x4xbf16> to vector<1x16x4xbf16>
    tpu.vector_store %arg6[%c0_96, %c112, %c0_97], %120 {strides = array<i32>} : memref<1x256x4xbf16, #tpu.memory_space<vmem>>, vector<1x16x4xbf16>,
    %c163 = arith.constant 163 : index
    %c0_98 = arith.constant 0 : index
    %121 = vector.load %arg9[%c163, %c0_98] : memref<324x4xf32, #tpu.memory_space<vmem>>, vector<16x4xf32>
    %122 = arith.truncf %121 : vector<16x4xf32> to vector<16x4xbf16>
    %c0_99 = arith.constant 0 : index
    %c128 = arith.constant 128 : index
    %c0_100 = arith.constant 0 : index
    %123 = vector.load %arg6[%c0_99, %c128, %c0_100] : memref<1x256x4xbf16, #tpu.memory_space<vmem>>, vector<1x16x4xbf16>
    %124 = vector.shape_cast %123 : vector<1x16x4xbf16> to vector<16x4xbf16>
    %125 = vector.shape_cast %122 : vector<16x4xbf16> to vector<1x16x4xbf16>
    tpu.vector_store %arg6[%c0_99, %c128, %c0_100], %125 {strides = array<i32>} : memref<1x256x4xbf16, #tpu.memory_space<vmem>>, vector<1x16x4xbf16>,
    %c181 = arith.constant 181 : index
    %c0_101 = arith.constant 0 : index
    %126 = vector.load %arg9[%c181, %c0_101] : memref<324x4xf32, #tpu.memory_space<vmem>>, vector<16x4xf32>
    %127 = arith.truncf %126 : vector<16x4xf32> to vector<16x4xbf16>
    %c0_102 = arith.constant 0 : index
    %c144 = arith.constant 144 : index
    %c0_103 = arith.constant 0 : index
    %128 = vector.load %arg6[%c0_102, %c144, %c0_103] : memref<1x256x4xbf16, #tpu.memory_space<vmem>>, vector<1x16x4xbf16>
    %129 = vector.shape_cast %128 : vector<1x16x4xbf16> to vector<16x4xbf16>
    %130 = vector.shape_cast %127 : vector<16x4xbf16> to vector<1x16x4xbf16>
    tpu.vector_store %arg6[%c0_102, %c144, %c0_103], %130 {strides = array<i32>} : memref<1x256x4xbf16, #tpu.memory_space<vmem>>, vector<1x16x4xbf16>,
    %c199 = arith.constant 199 : index
    %c0_104 = arith.constant 0 : index
    %131 = vector.load %arg9[%c199, %c0_104] : memref<324x4xf32, #tpu.memory_space<vmem>>, vector<16x4xf32>
    %132 = arith.truncf %131 : vector<16x4xf32> to vector<16x4xbf16>
    %c0_105 = arith.constant 0 : index
    %c160 = arith.constant 160 : index
    %c0_106 = arith.constant 0 : index
    %133 = vector.load %arg6[%c0_105, %c160, %c0_106] : memref<1x256x4xbf16, #tpu.memory_space<vmem>>, vector<1x16x4xbf16>
    %134 = vector.shape_cast %133 : vector<1x16x4xbf16> to vector<16x4xbf16>
    %135 = vector.shape_cast %132 : vector<16x4xbf16> to vector<1x16x4xbf16>
    tpu.vector_store %arg6[%c0_105, %c160, %c0_106], %135 {strides = array<i32>} : memref<1x256x4xbf16, #tpu.memory_space<vmem>>, vector<1x16x4xbf16>,
    %c217 = arith.constant 217 : index
    %c0_107 = arith.constant 0 : index
    %136 = vector.load %arg9[%c217, %c0_107] : memref<324x4xf32, #tpu.memory_space<vmem>>, vector<16x4xf32>
    %137 = arith.truncf %136 : vector<16x4xf32> to vector<16x4xbf16>
    %c0_108 = arith.constant 0 : index
    %c176 = arith.constant 176 : index
    %c0_109 = arith.constant 0 : index
    %138 = vector.load %arg6[%c0_108, %c176, %c0_109] : memref<1x256x4xbf16, #tpu.memory_space<vmem>>, vector<1x16x4xbf16>
    %139 = vector.shape_cast %138 : vector<1x16x4xbf16> to vector<16x4xbf16>
    %140 = vector.shape_cast %137 : vector<16x4xbf16> to vector<1x16x4xbf16>
    tpu.vector_store %arg6[%c0_108, %c176, %c0_109], %140 {strides = array<i32>} : memref<1x256x4xbf16, #tpu.memory_space<vmem>>, vector<1x16x4xbf16>,
    %c235 = arith.constant 235 : index
    %c0_110 = arith.constant 0 : index
    %141 = vector.load %arg9[%c235, %c0_110] : memref<324x4xf32, #tpu.memory_space<vmem>>, vector<16x4xf32>
    %142 = arith.truncf %141 : vector<16x4xf32> to vector<16x4xbf16>
    %c0_111 = arith.constant 0 : index
    %c192 = arith.constant 192 : index
    %c0_112 = arith.constant 0 : index
    %143 = vector.load %arg6[%c0_111, %c192, %c0_112] : memref<1x256x4xbf16, #tpu.memory_space<vmem>>, vector<1x16x4xbf16>
    %144 = vector.shape_cast %143 : vector<1x16x4xbf16> to vector<16x4xbf16>
    %145 = vector.shape_cast %142 : vector<16x4xbf16> to vector<1x16x4xbf16>
    tpu.vector_store %arg6[%c0_111, %c192, %c0_112], %145 {strides = array<i32>} : memref<1x256x4xbf16, #tpu.memory_space<vmem>>, vector<1x16x4xbf16>,
    %c253 = arith.constant 253 : index
    %c0_113 = arith.constant 0 : index
    %146 = vector.load %arg9[%c253, %c0_113] : memref<324x4xf32, #tpu.memory_space<vmem>>, vector<16x4xf32>
    %147 = arith.truncf %146 : vector<16x4xf32> to vector<16x4xbf16>
    %c0_114 = arith.constant 0 : index
    %c208 = arith.constant 208 : index
    %c0_115 = arith.constant 0 : index
    %148 = vector.load %arg6[%c0_114, %c208, %c0_115] : memref<1x256x4xbf16, #tpu.memory_space<vmem>>, vector<1x16x4xbf16>
    %149 = vector.shape_cast %148 : vector<1x16x4xbf16> to vector<16x4xbf16>
    %150 = vector.shape_cast %147 : vector<16x4xbf16> to vector<1x16x4xbf16>
    tpu.vector_store %arg6[%c0_114, %c208, %c0_115], %150 {strides = array<i32>} : memref<1x256x4xbf16, #tpu.memory_space<vmem>>, vector<1x16x4xbf16>,
    %c271 = arith.constant 271 : index
    %c0_116 = arith.constant 0 : index
    %151 = vector.load %arg9[%c271, %c0_116] : memref<324x4xf32, #tpu.memory_space<vmem>>, vector<16x4xf32>
    %152 = arith.truncf %151 : vector<16x4xf32> to vector<16x4xbf16>
    %c0_117 = arith.constant 0 : index
    %c224 = arith.constant 224 : index
    %c0_118 = arith.constant 0 : index
    %153 = vector.load %arg6[%c0_117, %c224, %c0_118] : memref<1x256x4xbf16, #tpu.memory_space<vmem>>, vector<1x16x4xbf16>
    %154 = vector.shape_cast %153 : vector<1x16x4xbf16> to vector<16x4xbf16>
    %155 = vector.shape_cast %152 : vector<16x4xbf16> to vector<1x16x4xbf16>
    tpu.vector_store %arg6[%c0_117, %c224, %c0_118], %155 {strides = array<i32>} : memref<1x256x4xbf16, #tpu.memory_space<vmem>>, vector<1x16x4xbf16>,
    %c289 = arith.constant 289 : index
    %c0_119 = arith.constant 0 : index
    %156 = vector.load %arg9[%c289, %c0_119] : memref<324x4xf32, #tpu.memory_space<vmem>>, vector<16x4xf32>
    %157 = arith.truncf %156 : vector<16x4xf32> to vector<16x4xbf16>
    %c0_120 = arith.constant 0 : index
    %c240 = arith.constant 240 : index
    %c0_121 = arith.constant 0 : index
    %158 = vector.load %arg6[%c0_120, %c240, %c0_121] : memref<1x256x4xbf16, #tpu.memory_space<vmem>>, vector<1x16x4xbf16>
    %159 = vector.shape_cast %158 : vector<1x16x4xbf16> to vector<16x4xbf16>
    %160 = vector.shape_cast %157 : vector<16x4xbf16> to vector<1x16x4xbf16>
    tpu.vector_store %arg6[%c0_120, %c240, %c0_121], %160 {strides = array<i32>} : memref<1x256x4xbf16, #tpu.memory_space<vmem>>, vector<1x16x4xbf16>,
    %c0_122 = arith.constant 0 : index
    %c0_123 = arith.constant 0 : index
    %c0_124 = arith.constant 0 : index
    %161 = vector.load %arg6[%c0_122, %c0_123, %c0_124] : memref<1x256x4xbf16, #tpu.memory_space<vmem>>, vector<1x256x4xbf16>
    %162 = vector.shape_cast %161 : vector<1x256x4xbf16> to vector<256x4xbf16>
    %163 = arith.extf %162 : vector<256x4xbf16> to vector<256x4xf32>
    %cst_125 = arith.constant dense<0.000000e+00> : vector<4xf32>
    %164 = vector.multi_reduction <add>, %163, %cst_125 [0] : vector<256x4xf32> to vector<4xf32>
    %165 = vector.shape_cast %164 : vector<4xf32> to vector<1x4xf32>
    %c0_126 = arith.constant 0 : index
    %c0_127 = arith.constant 0 : index
    %c0_128 = arith.constant 0 : index
    %166 = vector.load %arg7[%c0_126, %c0_127, %c0_128] : memref<1x2x4xf32, #tpu.memory_space<vmem>>, vector<1x1x4xf32>
    %167 = vector.shape_cast %166 : vector<1x1x4xf32> to vector<1x4xf32>
    %168 = vector.shape_cast %165 : vector<1x4xf32> to vector<1x1x4xf32>
    tpu.vector_store %arg7[%c0_126, %c0_127, %c0_128], %168 {strides = array<i32>} : memref<1x2x4xf32, #tpu.memory_space<vmem>>, vector<1x1x4xf32>,
    %169 = arith.mulf %163, %163 : vector<256x4xf32>
    %cst_129 = arith.constant dense<0.000000e+00> : vector<4xf32>
    %170 = vector.multi_reduction <add>, %169, %cst_129 [0] : vector<256x4xf32> to vector<4xf32>
    %171 = vector.shape_cast %170 : vector<4xf32> to vector<1x4xf32>
    %c0_130 = arith.constant 0 : index
    %c1_131 = arith.constant 1 : index
    %c0_132 = arith.constant 0 : index
    %172 = vector.load %arg7[%c0_130, %c1_131, %c0_132] : memref<1x2x4xf32, #tpu.memory_space<vmem>>, vector<1x1x4xf32>
    %173 = vector.shape_cast %172 : vector<1x1x4xf32> to vector<1x4xf32>
    %174 = vector.shape_cast %171 : vector<1x4xf32> to vector<1x1x4xf32>
    tpu.vector_store %arg7[%c0_130, %c1_131, %c0_132], %174 {strides = array<i32>} : memref<1x2x4xf32, #tpu.memory_space<vmem>>, vector<1x1x4xf32>,
    return
  }
  func.func @transform_0(%arg0: i32) -> (i32, i32, i32) {
    %c0_i32 = arith.constant 0 : i32
    %c0_i32_0 = arith.constant 0 : i32
    %c0_i32_1 = arith.constant 0 : i32
    return %arg0, %c0_i32, %c0_i32_0 : i32, i32, i32
  }
  func.func @transform_1(%arg0: i32) -> (i32, i32, i32) {
    %c0_i32 = arith.constant 0 : i32
    %c0_i32_0 = arith.constant 0 : i32
    %c0_i32_1 = arith.constant 0 : i32
    %c0_i32_2 = arith.constant 0 : i32
    return %c0_i32, %c0_i32_0, %c0_i32_1 : i32, i32, i32
  }
  func.func @transform_2(%arg0: i32) -> (i32, i32) {
    %c0_i32 = arith.constant 0 : i32
    %c0_i32_0 = arith.constant 0 : i32
    %c0_i32_1 = arith.constant 0 : i32
    return %c0_i32, %c0_i32_0 : i32, i32
  }
  func.func @transform_3(%arg0: i32) -> (i32, i32) {
    %c0_i32 = arith.constant 0 : i32
    %c0_i32_0 = arith.constant 0 : i32
    %c0_i32_1 = arith.constant 0 : i32
    return %c0_i32, %c0_i32_0 : i32, i32
  }
  func.func @transform_4(%arg0: i32) -> (i32, i32) {
    %c0_i32 = arith.constant 0 : i32
    %c0_i32_0 = arith.constant 0 : i32
    %c0_i32_1 = arith.constant 0 : i32
    return %c0_i32, %c0_i32_0 : i32, i32
  }
  func.func @transform_5(%arg0: i32) -> (i32, i32, i32) {
    %c0_i32 = arith.constant 0 : i32
    %c0_i32_0 = arith.constant 0 : i32
    %c0_i32_1 = arith.constant 0 : i32
    return %arg0, %c0_i32, %c0_i32_0 : i32, i32, i32
  }
  func.func @transform_6(%arg0: i32) -> (i32, i32, i32) {
    %c0_i32 = arith.constant 0 : i32
    %c0_i32_0 = arith.constant 0 : i32
    %c0_i32_1 = arith.constant 0 : i32
    return %arg0, %c0_i32, %c0_i32_0 : i32, i32, i32
  }
}

module attributes {stable_mosaic.version = 11 : i64} {
  func.func @_matmul_stats_kernel(%arg0: i32, %arg1: memref<512x4xbf16, #tpu.memory_space<vmem>>, %arg2: memref<4x16xbf16, #tpu.memory_space<vmem>>, %arg3: memref<1x4xf32, #tpu.memory_space<vmem>>, %arg4: memref<1x4xf32, #tpu.memory_space<vmem>>, %arg5: memref<512x16xbf16, #tpu.memory_space<vmem>>, %arg6: memref<1x2x16xf32, #tpu.memory_space<vmem>>) attributes {dimension_semantics = [#tpu.dimension_semantics<parallel>], iteration_bounds = array<i64: 1>, scalar_prefetch = 0 : i64, scratch_operands = 0 : i64, tpu.core_type = #tpu.core_type<tc>, window_params = [{transform_indices = @transform_0, window_bounds = array<i64: 512, 4>}, {pipeline_mode = #tpu.pipeline_mode<synchronous>, transform_indices = @transform_1, window_bounds = array<i64: 4, 16>}, {pipeline_mode = #tpu.pipeline_mode<synchronous>, transform_indices = @transform_2, window_bounds = array<i64: 1, 4>}, {pipeline_mode = #tpu.pipeline_mode<synchronous>, transform_indices = @transform_3, window_bounds = array<i64: 1, 4>}, {transform_indices = @transform_4, window_bounds = array<i64: 512, 16>}, {transform_indices = @transform_5, window_bounds = array<i64: 1, 2, 16>}]} {
    %c0 = arith.constant 0 : index
    %c0_0 = arith.constant 0 : index
    %0 = vector.load %arg1[%c0, %c0_0] : memref<512x4xbf16, #tpu.memory_space<vmem>>, vector<512x4xbf16>
    %1 = arith.extf %0 : vector<512x4xbf16> to vector<512x4xf32>
    %c0_1 = arith.constant 0 : index
    %c0_2 = arith.constant 0 : index
    %2 = vector.load %arg3[%c0_1, %c0_2] : memref<1x4xf32, #tpu.memory_space<vmem>>, vector<1x4xf32>
    %3 = vector.broadcast %2 : vector<1x4xf32> to vector<512x4xf32>
    %4 = arith.mulf %1, %3 : vector<512x4xf32>
    %c0_3 = arith.constant 0 : index
    %c0_4 = arith.constant 0 : index
    %5 = vector.load %arg4[%c0_3, %c0_4] : memref<1x4xf32, #tpu.memory_space<vmem>>, vector<1x4xf32>
    %6 = vector.broadcast %5 : vector<1x4xf32> to vector<512x4xf32>
    %7 = arith.addf %4, %6 : vector<512x4xf32>
    %cst = arith.constant 0.000000e+00 : f32
    %8 = vector.broadcast %cst : f32 to vector<512x4xf32>
    %9 = arith.maximumf %7, %8 : vector<512x4xf32>
    %10 = arith.truncf %9 : vector<512x4xf32> to vector<512x4xbf16>
    %c0_5 = arith.constant 0 : index
    %c0_6 = arith.constant 0 : index
    %11 = vector.load %arg2[%c0_5, %c0_6] : memref<4x16xbf16, #tpu.memory_space<vmem>>, vector<4x16xbf16>
    %cst_7 = arith.constant dense<0.000000e+00> : vector<512x16xf32>
    %12 = tpu.matmul %10, %11, %cst_7 {dimension_numbers = #tpu.dot_dimension_numbers<[1], [0], [0], [1], [0, 0, 1, 1], [], []>} : vector<512x4xbf16>, vector<4x16xbf16>, vector<512x16xf32> -> vector<512x16xf32>
    %13 = arith.truncf %12 : vector<512x16xf32> to vector<512x16xbf16>
    %c0_8 = arith.constant 0 : index
    %c0_9 = arith.constant 0 : index
    %14 = vector.load %arg5[%c0_8, %c0_9] : memref<512x16xbf16, #tpu.memory_space<vmem>>, vector<512x16xbf16>
    tpu.vector_store %arg5[%c0_8, %c0_9], %13 {strides = array<i32>} : memref<512x16xbf16, #tpu.memory_space<vmem>>, vector<512x16xbf16>,
    %cst_10 = arith.constant dense<0.000000e+00> : vector<16xf32>
    %15 = vector.multi_reduction <add>, %12, %cst_10 [0] : vector<512x16xf32> to vector<16xf32>
    %16 = vector.shape_cast %15 : vector<16xf32> to vector<1x16xf32>
    %c0_11 = arith.constant 0 : index
    %c0_12 = arith.constant 0 : index
    %c0_13 = arith.constant 0 : index
    %17 = vector.load %arg6[%c0_11, %c0_12, %c0_13] : memref<1x2x16xf32, #tpu.memory_space<vmem>>, vector<1x1x16xf32>
    %18 = vector.shape_cast %17 : vector<1x1x16xf32> to vector<1x16xf32>
    %19 = vector.shape_cast %16 : vector<1x16xf32> to vector<1x1x16xf32>
    tpu.vector_store %arg6[%c0_11, %c0_12, %c0_13], %19 {strides = array<i32>} : memref<1x2x16xf32, #tpu.memory_space<vmem>>, vector<1x1x16xf32>,
    %20 = arith.mulf %12, %12 : vector<512x16xf32>
    %cst_14 = arith.constant dense<0.000000e+00> : vector<16xf32>
    %21 = vector.multi_reduction <add>, %20, %cst_14 [0] : vector<512x16xf32> to vector<16xf32>
    %22 = vector.shape_cast %21 : vector<16xf32> to vector<1x16xf32>
    %c0_15 = arith.constant 0 : index
    %c1 = arith.constant 1 : index
    %c0_16 = arith.constant 0 : index
    %23 = vector.load %arg6[%c0_15, %c1, %c0_16] : memref<1x2x16xf32, #tpu.memory_space<vmem>>, vector<1x1x16xf32>
    %24 = vector.shape_cast %23 : vector<1x1x16xf32> to vector<1x16xf32>
    %25 = vector.shape_cast %22 : vector<1x16xf32> to vector<1x1x16xf32>
    tpu.vector_store %arg6[%c0_15, %c1, %c0_16], %25 {strides = array<i32>} : memref<1x2x16xf32, #tpu.memory_space<vmem>>, vector<1x1x16xf32>,
    return
  }
  func.func @transform_0(%arg0: i32) -> (i32, i32) {
    %c0_i32 = arith.constant 0 : i32
    %c0_i32_0 = arith.constant 0 : i32
    return %arg0, %c0_i32 : i32, i32
  }
  func.func @transform_1(%arg0: i32) -> (i32, i32) {
    %c0_i32 = arith.constant 0 : i32
    %c0_i32_0 = arith.constant 0 : i32
    %c0_i32_1 = arith.constant 0 : i32
    return %c0_i32, %c0_i32_0 : i32, i32
  }
  func.func @transform_2(%arg0: i32) -> (i32, i32) {
    %c0_i32 = arith.constant 0 : i32
    %c0_i32_0 = arith.constant 0 : i32
    %c0_i32_1 = arith.constant 0 : i32
    return %c0_i32, %c0_i32_0 : i32, i32
  }
  func.func @transform_3(%arg0: i32) -> (i32, i32) {
    %c0_i32 = arith.constant 0 : i32
    %c0_i32_0 = arith.constant 0 : i32
    %c0_i32_1 = arith.constant 0 : i32
    return %c0_i32, %c0_i32_0 : i32, i32
  }
  func.func @transform_4(%arg0: i32) -> (i32, i32) {
    %c0_i32 = arith.constant 0 : i32
    %c0_i32_0 = arith.constant 0 : i32
    return %arg0, %c0_i32 : i32, i32
  }
  func.func @transform_5(%arg0: i32) -> (i32, i32, i32) {
    %c0_i32 = arith.constant 0 : i32
    %c0_i32_0 = arith.constant 0 : i32
    %c0_i32_1 = arith.constant 0 : i32
    return %arg0, %c0_i32, %c0_i32_0 : i32, i32, i32
  }
}

module attributes {stable_mosaic.version = 11 : i64} {
  func.func @_matmul_stats_kernel(%arg0: i32, %arg1: memref<512x4xbf16, #tpu.memory_space<vmem>>, %arg2: memref<4x16xbf16, #tpu.memory_space<vmem>>, %arg3: memref<1x4xf32, #tpu.memory_space<vmem>>, %arg4: memref<1x4xf32, #tpu.memory_space<vmem>>, %arg5: memref<512x16xbf16, #tpu.memory_space<vmem>>, %arg6: memref<1x2x16xf32, #tpu.memory_space<vmem>>) attributes {dimension_semantics = [#tpu.dimension_semantics<parallel>], iteration_bounds = array<i64: 1>, scalar_prefetch = 0 : i64, scratch_operands = 0 : i64, tpu.core_type = #tpu.core_type<tc>, window_params = [{transform_indices = @transform_0, window_bounds = array<i64: 512, 4>}, {pipeline_mode = #tpu.pipeline_mode<synchronous>, transform_indices = @transform_1, window_bounds = array<i64: 4, 16>}, {pipeline_mode = #tpu.pipeline_mode<synchronous>, transform_indices = @transform_2, window_bounds = array<i64: 1, 4>}, {pipeline_mode = #tpu.pipeline_mode<synchronous>, transform_indices = @transform_3, window_bounds = array<i64: 1, 4>}, {transform_indices = @transform_4, window_bounds = array<i64: 512, 16>}, {transform_indices = @transform_5, window_bounds = array<i64: 1, 2, 16>}]} {
    %c0 = arith.constant 0 : index
    %c0_0 = arith.constant 0 : index
    %0 = vector.load %arg1[%c0, %c0_0] : memref<512x4xbf16, #tpu.memory_space<vmem>>, vector<512x4xbf16>
    %c0_1 = arith.constant 0 : index
    %c0_2 = arith.constant 0 : index
    %1 = vector.load %arg2[%c0_1, %c0_2] : memref<4x16xbf16, #tpu.memory_space<vmem>>, vector<4x16xbf16>
    %cst = arith.constant dense<0.000000e+00> : vector<512x16xf32>
    %2 = tpu.matmul %0, %1, %cst {dimension_numbers = #tpu.dot_dimension_numbers<[1], [0], [0], [1], [0, 0, 1, 1], [], []>} : vector<512x4xbf16>, vector<4x16xbf16>, vector<512x16xf32> -> vector<512x16xf32>
    %3 = arith.truncf %2 : vector<512x16xf32> to vector<512x16xbf16>
    %c0_3 = arith.constant 0 : index
    %c0_4 = arith.constant 0 : index
    %4 = vector.load %arg5[%c0_3, %c0_4] : memref<512x16xbf16, #tpu.memory_space<vmem>>, vector<512x16xbf16>
    tpu.vector_store %arg5[%c0_3, %c0_4], %3 {strides = array<i32>} : memref<512x16xbf16, #tpu.memory_space<vmem>>, vector<512x16xbf16>,
    %cst_5 = arith.constant dense<0.000000e+00> : vector<16xf32>
    %5 = vector.multi_reduction <add>, %2, %cst_5 [0] : vector<512x16xf32> to vector<16xf32>
    %6 = vector.shape_cast %5 : vector<16xf32> to vector<1x16xf32>
    %c0_6 = arith.constant 0 : index
    %c0_7 = arith.constant 0 : index
    %c0_8 = arith.constant 0 : index
    %7 = vector.load %arg6[%c0_6, %c0_7, %c0_8] : memref<1x2x16xf32, #tpu.memory_space<vmem>>, vector<1x1x16xf32>
    %8 = vector.shape_cast %7 : vector<1x1x16xf32> to vector<1x16xf32>
    %9 = vector.shape_cast %6 : vector<1x16xf32> to vector<1x1x16xf32>
    tpu.vector_store %arg6[%c0_6, %c0_7, %c0_8], %9 {strides = array<i32>} : memref<1x2x16xf32, #tpu.memory_space<vmem>>, vector<1x1x16xf32>,
    %10 = arith.mulf %2, %2 : vector<512x16xf32>
    %cst_9 = arith.constant dense<0.000000e+00> : vector<16xf32>
    %11 = vector.multi_reduction <add>, %10, %cst_9 [0] : vector<512x16xf32> to vector<16xf32>
    %12 = vector.shape_cast %11 : vector<16xf32> to vector<1x16xf32>
    %c0_10 = arith.constant 0 : index
    %c1 = arith.constant 1 : index
    %c0_11 = arith.constant 0 : index
    %13 = vector.load %arg6[%c0_10, %c1, %c0_11] : memref<1x2x16xf32, #tpu.memory_space<vmem>>, vector<1x1x16xf32>
    %14 = vector.shape_cast %13 : vector<1x1x16xf32> to vector<1x16xf32>
    %15 = vector.shape_cast %12 : vector<1x16xf32> to vector<1x1x16xf32>
    tpu.vector_store %arg6[%c0_10, %c1, %c0_11], %15 {strides = array<i32>} : memref<1x2x16xf32, #tpu.memory_space<vmem>>, vector<1x1x16xf32>,
    return
  }
  func.func @transform_0(%arg0: i32) -> (i32, i32) {
    %c0_i32 = arith.constant 0 : i32
    %c0_i32_0 = arith.constant 0 : i32
    return %arg0, %c0_i32 : i32, i32
  }
  func.func @transform_1(%arg0: i32) -> (i32, i32) {
    %c0_i32 = arith.constant 0 : i32
    %c0_i32_0 = arith.constant 0 : i32
    %c0_i32_1 = arith.constant 0 : i32
    return %c0_i32, %c0_i32_0 : i32, i32
  }
  func.func @transform_2(%arg0: i32) -> (i32, i32) {
    %c0_i32 = arith.constant 0 : i32
    %c0_i32_0 = arith.constant 0 : i32
    %c0_i32_1 = arith.constant 0 : i32
    return %c0_i32, %c0_i32_0 : i32, i32
  }
  func.func @transform_3(%arg0: i32) -> (i32, i32) {
    %c0_i32 = arith.constant 0 : i32
    %c0_i32_0 = arith.constant 0 : i32
    %c0_i32_1 = arith.constant 0 : i32
    return %c0_i32, %c0_i32_0 : i32, i32
  }
  func.func @transform_4(%arg0: i32) -> (i32, i32) {
    %c0_i32 = arith.constant 0 : i32
    %c0_i32_0 = arith.constant 0 : i32
    return %arg0, %c0_i32 : i32, i32
  }
  func.func @transform_5(%arg0: i32) -> (i32, i32, i32) {
    %c0_i32 = arith.constant 0 : i32
    %c0_i32_0 = arith.constant 0 : i32
    %c0_i32_1 = arith.constant 0 : i32
    return %arg0, %c0_i32, %c0_i32_0 : i32, i32, i32
  }
}

module attributes {stable_mosaic.version = 11 : i64} {
  func.func @_bn_add_relu_kernel(%arg0: i32, %arg1: memref<512x16xbf16, #tpu.memory_space<vmem>>, %arg2: memref<1x16xf32, #tpu.memory_space<vmem>>, %arg3: memref<1x16xf32, #tpu.memory_space<vmem>>, %arg4: memref<512x16xbf16, #tpu.memory_space<vmem>>, %arg5: memref<1x16xf32, #tpu.memory_space<vmem>>, %arg6: memref<1x16xf32, #tpu.memory_space<vmem>>, %arg7: memref<512x16xf32, #tpu.memory_space<vmem>>) attributes {dimension_semantics = [#tpu.dimension_semantics<parallel>], iteration_bounds = array<i64: 1>, scalar_prefetch = 0 : i64, scratch_operands = 0 : i64, tpu.core_type = #tpu.core_type<tc>, window_params = [{transform_indices = @transform_0, window_bounds = array<i64: 512, 16>}, {pipeline_mode = #tpu.pipeline_mode<synchronous>, transform_indices = @transform_1, window_bounds = array<i64: 1, 16>}, {pipeline_mode = #tpu.pipeline_mode<synchronous>, transform_indices = @transform_2, window_bounds = array<i64: 1, 16>}, {transform_indices = @transform_3, window_bounds = array<i64: 512, 16>}, {pipeline_mode = #tpu.pipeline_mode<synchronous>, transform_indices = @transform_4, window_bounds = array<i64: 1, 16>}, {pipeline_mode = #tpu.pipeline_mode<synchronous>, transform_indices = @transform_5, window_bounds = array<i64: 1, 16>}, {transform_indices = @transform_6, window_bounds = array<i64: 512, 16>}]} {
    %c0 = arith.constant 0 : index
    %c0_0 = arith.constant 0 : index
    %0 = vector.load %arg1[%c0, %c0_0] : memref<512x16xbf16, #tpu.memory_space<vmem>>, vector<512x16xbf16>
    %1 = arith.extf %0 : vector<512x16xbf16> to vector<512x16xf32>
    %c0_1 = arith.constant 0 : index
    %c0_2 = arith.constant 0 : index
    %2 = vector.load %arg2[%c0_1, %c0_2] : memref<1x16xf32, #tpu.memory_space<vmem>>, vector<1x16xf32>
    %3 = vector.broadcast %2 : vector<1x16xf32> to vector<512x16xf32>
    %4 = arith.mulf %1, %3 : vector<512x16xf32>
    %c0_3 = arith.constant 0 : index
    %c0_4 = arith.constant 0 : index
    %5 = vector.load %arg3[%c0_3, %c0_4] : memref<1x16xf32, #tpu.memory_space<vmem>>, vector<1x16xf32>
    %6 = vector.broadcast %5 : vector<1x16xf32> to vector<512x16xf32>
    %7 = arith.addf %4, %6 : vector<512x16xf32>
    %c0_5 = arith.constant 0 : index
    %c0_6 = arith.constant 0 : index
    %8 = vector.load %arg4[%c0_5, %c0_6] : memref<512x16xbf16, #tpu.memory_space<vmem>>, vector<512x16xbf16>
    %9 = arith.extf %8 : vector<512x16xbf16> to vector<512x16xf32>
    %c0_7 = arith.constant 0 : index
    %c0_8 = arith.constant 0 : index
    %10 = vector.load %arg5[%c0_7, %c0_8] : memref<1x16xf32, #tpu.memory_space<vmem>>, vector<1x16xf32>
    %11 = vector.broadcast %10 : vector<1x16xf32> to vector<512x16xf32>
    %12 = arith.mulf %9, %11 : vector<512x16xf32>
    %13 = arith.addf %7, %12 : vector<512x16xf32>
    %c0_9 = arith.constant 0 : index
    %c0_10 = arith.constant 0 : index
    %14 = vector.load %arg6[%c0_9, %c0_10] : memref<1x16xf32, #tpu.memory_space<vmem>>, vector<1x16xf32>
    %15 = vector.broadcast %14 : vector<1x16xf32> to vector<512x16xf32>
    %16 = arith.addf %13, %15 : vector<512x16xf32>
    %cst = arith.constant 0.000000e+00 : f32
    %17 = vector.broadcast %cst : f32 to vector<512x16xf32>
    %18 = arith.maximumf %16, %17 : vector<512x16xf32>
    %c0_11 = arith.constant 0 : index
    %c0_12 = arith.constant 0 : index
    %19 = vector.load %arg7[%c0_11, %c0_12] : memref<512x16xf32, #tpu.memory_space<vmem>>, vector<512x16xf32>
    tpu.vector_store %arg7[%c0_11, %c0_12], %18 {strides = array<i32>} : memref<512x16xf32, #tpu.memory_space<vmem>>, vector<512x16xf32>,
    return
  }
  func.func @transform_0(%arg0: i32) -> (i32, i32) {
    %c0_i32 = arith.constant 0 : i32
    %c0_i32_0 = arith.constant 0 : i32
    return %arg0, %c0_i32 : i32, i32
  }
  func.func @transform_1(%arg0: i32) -> (i32, i32) {
    %c0_i32 = arith.constant 0 : i32
    %c0_i32_0 = arith.constant 0 : i32
    %c0_i32_1 = arith.constant 0 : i32
    return %c0_i32, %c0_i32_0 : i32, i32
  }
  func.func @transform_2(%arg0: i32) -> (i32, i32) {
    %c0_i32 = arith.constant 0 : i32
    %c0_i32_0 = arith.constant 0 : i32
    %c0_i32_1 = arith.constant 0 : i32
    return %c0_i32, %c0_i32_0 : i32, i32
  }
  func.func @transform_3(%arg0: i32) -> (i32, i32) {
    %c0_i32 = arith.constant 0 : i32
    %c0_i32_0 = arith.constant 0 : i32
    return %arg0, %c0_i32 : i32, i32
  }
  func.func @transform_4(%arg0: i32) -> (i32, i32) {
    %c0_i32 = arith.constant 0 : i32
    %c0_i32_0 = arith.constant 0 : i32
    %c0_i32_1 = arith.constant 0 : i32
    return %c0_i32, %c0_i32_0 : i32, i32
  }
  func.func @transform_5(%arg0: i32) -> (i32, i32) {
    %c0_i32 = arith.constant 0 : i32
    %c0_i32_0 = arith.constant 0 : i32
    %c0_i32_1 = arith.constant 0 : i32
    return %c0_i32, %c0_i32_0 : i32, i32
  }
  func.func @transform_6(%arg0: i32) -> (i32, i32) {
    %c0_i32 = arith.constant 0 : i32
    %c0_i32_0 = arith.constant 0 : i32
    return %arg0, %c0_i32 : i32, i32
  }
}

</mosaic_0001>

<bundles_post_ra>
// kernel: bottleneck_forward.8
= control target key start
LH: loop header
LB: loop body
LE: loop exit
PB: predicated region body
PF: predicated region fallthrough
CT: control target
= control target key end

     0   :  { %vm342_vm0 = vcmask 1041408   ;;  %vm245_vm1 = vcmask 31744   ;;  %vm891_vm2 = vcmask 125952   ;;  %vm956_vm3 = vcmask 130048   ;;  %s2400_s1 = inlined_call_operand.vmem [shape: bf16[4,16], index: 1, kind: input, shape index: {}]   ;;  %s2401_s2 = inlined_call_operand.vmem [shape: f32[1,4], index: 2, kind: input, shape index: {}]   ;;  %s2402_s3 = inlined_call_operand.vmem [shape: f32[1,4], index: 3, kind: input, shape index: {}]   ;;  %s2403_s0 = inlined_call_operand.vmem [shape: bf16[512,4], index: 0, kind: input, shape index: {}]   ;;  %s2404_s4 = inlined_call_operand.vmem [shape: bf16[512,16], index: 4, kind: output, shape index: {0}]   ;;  %s2405_s5 = inlined_call_operand.vmem [shape: f32[1,2,16], index: 5, kind: output, shape index: {1}]  }
   0x1   :  { %v84_v0 = vld [vmem:[%s2400_s1] sm:$0x3]  ;;  %v1594_v3 = vld [vmem:[%s2403_s0 + $0x8] sm:$0xff]   ;;  %v1595_v4 = vld [vmem:[%s2403_s0 + $0x10] sm:$0xff]   ;;  %vm1090_vm4 = vcmask 122880  }
   0x2   :  { %1591 = vmatprep.subr.msk.bf16.mxu0 %vm342_vm0, %v84_v0  ;;  %v344_v1 = vsel %vm342_vm0, %v84_v0, 0  ;;  %v1593_v2 = vld [vmem:[%s2403_s0] sm:$0xff]   ;;  %1592 = vmatprep.subr.msk.bf16.mxu1 %vm342_vm0, %v84_v0  ;;  %v1596_v5 = vld [vmem:[%s2403_s0 + $0x18] sm:$0xff]   ;;  %v1598_v7 = vld [vmem:[%s2403_s0 + $0x28] sm:$0xff]  }
   0x3   :  { %1524 = vmatpush3.bf16.msra.mxu0 %v344_v1  ;;  %1590 = vmatpush3.bf16.msra.mxu1 %v344_v1  ;;  %v1597_v6 = vld [vmem:[%s2403_s0 + $0x20] sm:$0xff]   ;;  %v1599_v8 = vld [vmem:[%s2403_s0 + $0x30] sm:$0xff]   ;;  %v1610_v10 = vld [vmem:[%s2403_s0 + $0x88] sm:$0xff]  }
   0x4   :  { %1525 = vmatprep.mubr.msk.bf16.mxu0 %vm245_vm1, %v1593_v2  ;;  %v1609_v9 = vld [vmem:[%s2403_s0 + $0x80] sm:$0xff]   ;;  %v1611_v11 = vld [vmem:[%s2403_s0 + $0x90] sm:$0xff]   ;;  %v1600_v12 = vld [vmem:[%s2403_s0 + $0x38] sm:$0xff]  }
   0x5   :  { %1557 = vmatprep.mubr.msk.bf16.mxu1 %vm245_vm1, %v1609_v9  ;;  %v1612_v13 = vld [vmem:[%s2403_s0 + $0x98] sm:$0xff]   ;;  %v1613_v14 = vld [vmem:[%s2403_s0 + $0xa0] sm:$0xff]   ;;  %v1614_v16 = vld [vmem:[%s2403_s0 + $0xa8] sm:$0xff]  }
   0x6   :  { %1526 = vmatmul.mubr.msk.bf16.vlgmr.msra.gmra.mrb[0].mxu0 %vm245_vm1, %v1594_v3  ;;  %1558 = vmatmul.mubr.msk.bf16.vlgmr.msra.gmra.mrb[0].mxu1 %vm245_vm1, %v1610_v10  ;;  %v1601_v15 = vld [vmem:[%s2403_s0 + $0x40] sm:$0xff]   ;;  %v1602_v17 = vld [vmem:[%s2403_s0 + $0x48] sm:$0xff]   ;;  %v1615_v18 = vld [vmem:[%s2403_s0 + $0xb0] sm:$0xff]  }
   0x7   :  { %1529 = vmatprep.mubr.msk.bf16.mxu0 %vm245_vm1, %v1595_v4  ;;  %1561 = vmatprep.mubr.msk.bf16.mxu1 %vm245_vm1, %v1611_v11  ;;  %v1603_v19 = vld [vmem:[%s2403_s0 + $0x50] sm:$0xff]   ;;  %v1616_v20 = vld [vmem:[%s2403_s0 + $0xb8] sm:$0xff]   ;;  %v1617_v22 = vld [vmem:[%s2403_s0 + $0xc0] sm:$0xff]  }
   0x8   :  { %v1604_v21 = vld [vmem:[%s2403_s0 + $0x58] sm:$0xff]   ;;  %v1605_v23 = vld [vmem:[%s2403_s0 + $0x60] sm:$0xff]   ;;  %v1618_v24 = vld [vmem:[%s2403_s0 + $0xc8] sm:$0xff]  }
   0x9   :  { %v1606_v25 = vld [vmem:[%s2403_s0 + $0x68] sm:$0xff]   ;;  %v1619_v26 = vld [vmem:[%s2403_s0 + $0xd0] sm:$0xff]   ;;  %v1620_v28 = vld [vmem:[%s2403_s0 + $0xd8] sm:$0xff]  }
   0xa   :  { %v1607_v27 = vld [vmem:[%s2403_s0 + $0x70] sm:$0xff]   ;;  %v1608_v29 = vld [vmem:[%s2403_s0 + $0x78] sm:$0xff]   ;;  %v1621_v30 = vld [vmem:[%s2403_s0 + $0xe0] sm:$0xff]  }
   0xb   :  { %v1622_v31 = vld [vmem:[%s2403_s0 + $0xe8] sm:$0xff]   ;;  %v1623_v32 = vld [vmem:[%s2403_s0 + $0xf0] sm:$0xff]   ;;  %v1624_v33 = vld [vmem:[%s2403_s0 + $0xf8] sm:$0xff]  }
   0xe   :  { %1530 = vmatmul.mubr.msk.bf16.gmra.mrb[4].mxu0 %vm245_vm1, %v1596_v5  ;;  %1562 = vmatmul.mubr.msk.bf16.gmra.mrb[4].mxu1 %vm245_vm1, %v1612_v13 }
   0xf   :  { %1533 = vmatprep.mubr.msk.bf16.mxu0 %vm245_vm1, %v1597_v6  ;;  %1565 = vmatprep.mubr.msk.bf16.mxu1 %vm245_vm1, %v1613_v14 }
  0x16   :  { %1534 = vmatmul.mubr.msk.bf16.gmra.mrb[8].mxu0 %vm245_vm1, %v1598_v7  ;;  %1566 = vmatmul.mubr.msk.bf16.gmra.mrb[8].mxu1 %vm245_vm1, %v1614_v16 }
  0x17   :  { %1537 = vmatprep.mubr.msk.bf16.mxu0 %vm245_vm1, %v1599_v8  ;;  %1569 = vmatprep.mubr.msk.bf16.mxu1 %vm245_vm1, %v1615_v18 }
  0x1e   :  { %1538 = vmatmul.mubr.msk.bf16.gmra.mrb[12].mxu0 %vm245_vm1, %v1600_v12  ;;  %1570 = vmatmul.mubr.msk.bf16.gmra.mrb[12].mxu1 %vm245_vm1, %v1616_v20 }
  0x1f   :  { %1541 = vmatprep.mubr.msk.bf16.mxu0 %vm245_vm1, %v1601_v15  ;;  %1573 = vmatprep.mubr.msk.bf16.mxu1 %vm245_vm1, %v1617_v22 }
  0x26   :  { %1542 = vmatmul.mubr.msk.bf16.gmra.mrb[16].mxu0 %vm245_vm1, %v1602_v17  ;;  %1574 = vmatmul.mubr.msk.bf16.gmra.mrb[16].mxu1 %vm245_vm1, %v1618_v24 }
  0x27   :  { %1545 = vmatprep.mubr.msk.bf16.mxu0 %vm245_vm1, %v1603_v19  ;;  %1577 = vmatprep.mubr.msk.bf16.mxu1 %vm245_vm1, %v1619_v26 }
  0x2e   :  { %1546 = vmatmul.mubr.msk.bf16.gmra.mrb[20].mxu0 %vm245_vm1, %v1604_v21  ;;  %1578 = vmatmul.mubr.msk.bf16.gmra.mrb[20].mxu1 %vm245_vm1, %v1620_v28 }
  0x2f   :  { %1549 = vmatprep.mubr.msk.bf16.mxu0 %vm245_vm1, %v1605_v23  ;;  %1581 = vmatprep.mubr.msk.bf16.mxu1 %vm245_vm1, %v1621_v30 }
  0x36   :  { %1550 = vmatmul.mubr.msk.bf16.gmra.mrb[24].mxu0 %vm245_vm1, %v1606_v25  ;;  %1582 = vmatmul.mubr.msk.bf16.gmra.mrb[24].mxu1 %vm245_vm1, %v1622_v31 }
  0x37   :  { %1553 = vmatprep.mubr.msk.bf16.mxu0 %vm245_vm1, %v1607_v27  ;;  %1585 = vmatprep.mubr.msk.bf16.mxu1 %vm245_vm1, %v1623_v32 }
  0x3e   :  { %1554 = vmatmul.mubr.msk.bf16.gmra.mrb[28].mxu0 %vm245_vm1, %v1608_v29  ;;  %1586 = vmatmul.mubr.msk.bf16.gmra.mrb[28].mxu1 %vm245_vm1, %v1624_v33 }
  0xd9   :  { %v1527_v34 = vpop.f32.mrb[0].mxu0  ;;  %v1831_v16 = vpop.f32.mrb[0].mxu1 }
  0xda   :  { %v1428_v35 = vpack.c.bf16 %v1527_v34, %v1527_v34  ;;  %v380_v36 = vpop.f32.mrb[1].mxu0  ;;  %v1094_v40 = vmul.f32 %v1527_v34, %v1527_v34  ;;  %v960_v49 = vsel %vm956_vm3, %v1527_v34, 0.0  ;;  %v1460_v20 = vpack.c.bf16 %v1831_v16, %v1831_v16  ;;  %v1835_v21 = vpop.f32.mrb[1].mxu1 }
  0xdb   :  { %v1426_v37 = vpack.c.bf16 %v380_v36, %v380_v36  ;;  %v1092_v38 = vmul.f32 %v380_v36, %v380_v36  ;;  %v1528_v39 = vpop.f32.mrb[2].mxu0  ;;  %v957_v43 = vsel %vm956_vm3, %v380_v36, 0.0  ;;  %v1839_v26 = vpop.f32.mrb[2].mxu1 }
  0xdc   :  { %894 = vst.msk [vmem:[%s2404_s4 + $0x8] sm:$0xf] %vm891_vm2, %v1428_v35  ;;  %v1429_v41 = vpack.c.bf16 %v1528_v39, %v1528_v39  ;;  %v383_v42 = vpop.f32.mrb[3].mxu0  ;;  %v1095_v47 = vmul.f32 %v1528_v39, %v1528_v39  ;;  %v1159_v54 = vsel %vm956_vm3, %v1094_v40, 0.0  ;;  %v962_v56 = vsel %vm956_vm3, %v1528_v39, 0.0  ;;  %v1846_v32 = vpop.f32.mrb[3].mxu1 }
  0xdd   :  { %892 = vst.msk [vmem:[%s2404_s4] sm:$0xf] %vm891_vm2, %v1426_v37  ;;  %v1427_v44 = vpack.c.bf16 %v383_v42, %v383_v42  ;;  %v958_v45 = vsel %vm956_vm3, %v383_v42, 0.0  ;;  %v1093_v46 = vmul.f32 %v383_v42, %v383_v42  ;;  %v1156_v50 = vsel %vm956_vm3, %v1092_v38, 0.0  ;;  %926 = vst.msk [vmem:[%s2404_s4 + $0x88] sm:$0xf] %vm891_vm2, %v1460_v20 }
  0xde   :  { %895 = vst.msk [vmem:[%s2404_s4 + $0xc] sm:$0xf] %vm891_vm2, %v1429_v41  ;;  %v959_v48 = vadd.f32 %v958_v45, %v957_v43  ;;  %v1161_v57 = vsel %vm956_vm3, %v1095_v47, 0.0 }
  0xdf   :  { %893 = vst.msk [vmem:[%s2404_s4 + $0x4] sm:$0xf] %vm891_vm2, %v1427_v44  ;;  %v1157_v51 = vsel %vm956_vm3, %v1093_v46, 0.0  ;;  %v1458_v46 = vpack.c.bf16 %v1835_v21, %v1835_v21 }
  0xe0   :  { %v961_v52 = vadd.f32 %v960_v49, %v959_v48  ;;  %v1158_v53 = vadd.f32 %v1157_v51, %v1156_v50  ;;  %v1461_v50 = vpack.c.bf16 %v1839_v26, %v1839_v26 }
  0xe1   :  { %v1531_v55 = vpop.f32.mrb[4].mxu0  ;;  %v1873_v51 = vpop.f32.mrb[4].mxu1  ;;  %924 = vst.msk [vmem:[%s2404_s4 + $0x80] sm:$0xf] %vm891_vm2, %v1458_v46 }
  0xe2   :  { %v1160_v58 = vadd.f32 %v1159_v54, %v1158_v53  ;;  %v1432_v59 = vpack.c.bf16 %v1531_v55, %v1531_v55  ;;  %v396_v60 = vpop.f32.mrb[5].mxu0  ;;  %v963_v62 = vadd.f32 %v962_v56, %v961_v52  ;;  %v1098_v8 = vmul.f32 %v1531_v55, %v1531_v55  ;;  %927 = vst.msk [vmem:[%s2404_s4 + $0x8c] sm:$0xf] %vm891_vm2, %v1461_v50 }
  0xe3   :  { %v1430_v61 = vpack.c.bf16 %v396_v60, %v396_v60  ;;  %v964_v63 = vsel %vm956_vm3, %v396_v60, 0.0  ;;  %v1096_v0 = vmul.f32 %v396_v60, %v396_v60  ;;  %v1532_v1 = vpop.f32.mrb[6].mxu0  ;;  %v968_v13 = vsel %vm956_vm3, %v1531_v55, 0.0  ;;  %v1879_v55 = vpop.f32.mrb[5].mxu1 }
  0xe4   :  { %898 = vst.msk [vmem:[%s2404_s4 + $0x18] sm:$0xf] %vm891_vm2, %v1432_v59  ;;  %v1162_v2 = vadd.f32 %v1161_v57, %v1160_v58  ;;  %v1433_v3 = vpack.c.bf16 %v1532_v1, %v1532_v1  ;;  %v399_v4 = vpop.f32.mrb[7].mxu0  ;;  %v965_v5 = vadd.f32 %v964_v63, %v963_v62  ;;  %v1099_v14 = vmul.f32 %v1532_v1, %v1532_v1  ;;  %v1887_v60 = vpop.f32.mrb[6].mxu1 }
  0xe5   :  { %896 = vst.msk [vmem:[%s2404_s4 + $0x10] sm:$0xf] %vm891_vm2, %v1430_v61  ;;  %v1163_v6 = vsel %vm956_vm3, %v1096_v0, 0.0  ;;  %v1431_v7 = vpack.c.bf16 %v399_v4, %v399_v4  ;;  %v966_v10 = vsel %vm956_vm3, %v399_v4, 0.0  ;;  %v1097_v11 = vmul.f32 %v399_v4, %v399_v4 }
  0xe6   :  { %v1164_v9 = vadd.f32 %v1163_v6, %v1162_v2  ;;  %899 = vst.msk [vmem:[%s2404_s4 + $0x1c] sm:$0xf] %vm891_vm2, %v1433_v3  ;;  %v967_v12 = vadd.f32 %v966_v10, %v965_v5  ;;  %v1167_v22 = vsel %vm956_vm3, %v1098_v8, 0.0  ;;  %v970_v23 = vsel %vm956_vm3, %v1532_v1, 0.0  ;;  %v1890_v2 = vpop.f32.mrb[7].mxu1 }
  0xe7   :  { %897 = vst.msk [vmem:[%s2404_s4 + $0x14] sm:$0xf] %vm891_vm2, %v1431_v7  ;;  %v1165_v15 = vsel %vm956_vm3, %v1097_v11, 0.0  ;;  %v1169_v33 = vsel %vm956_vm3, %v1099_v14, 0.0 }
  0xe8   :  { %v969_v17 = vadd.f32 %v968_v13, %v967_v12  ;;  %v1166_v18 = vadd.f32 %v1165_v15, %v1164_v9 }
  0xe9   :  { %v1535_v19 = vpop.f32.mrb[8].mxu0 }
  0xea   :  { %v1436_v24 = vpack.c.bf16 %v1535_v19, %v1535_v19  ;;  %v412_v25 = vpop.f32.mrb[9].mxu0  ;;  %v1168_v27 = vadd.f32 %v1167_v22, %v1166_v18  ;;  %v971_v29 = vadd.f32 %v970_v23, %v969_v17  ;;  %v1102_v40 = vmul.f32 %v1535_v19, %v1535_v19  ;;  %v1917_v23 = vpop.f32.mrb[8].mxu1 }
  0xeb   :  { %v1434_v28 = vpack.c.bf16 %v412_v25, %v412_v25  ;;  %v972_v30 = vsel %vm956_vm3, %v412_v25, 0.0  ;;  %v1536_v31 = vpop.f32.mrb[10].mxu0  ;;  %v1100_v34 = vmul.f32 %v412_v25, %v412_v25  ;;  %v976_v47 = vsel %vm956_vm3, %v1535_v19, 0.0 }
  0xec   :  { %902 = vst.msk [vmem:[%s2404_s4 + $0x28] sm:$0xf] %vm891_vm2, %v1436_v24  ;;  %v1437_v35 = vpack.c.bf16 %v1536_v31, %v1536_v31  ;;  %v415_v36 = vpop.f32.mrb[11].mxu0  ;;  %v973_v37 = vadd.f32 %v972_v30, %v971_v29  ;;  %v1170_v38 = vadd.f32 %v1169_v33, %v1168_v27  ;;  %v1103_v48 = vmul.f32 %v1536_v31, %v1536_v31 }
  0xed   :  { %900 = vst.msk [vmem:[%s2404_s4 + $0x20] sm:$0xf] %vm891_vm2, %v1434_v28  ;;  %v1435_v39 = vpack.c.bf16 %v415_v36, %v415_v36  ;;  %v1171_v41 = vsel %vm956_vm3, %v1100_v34, 0.0  ;;  %v974_v42 = vsel %vm956_vm3, %v415_v36, 0.0  ;;  %v1101_v43 = vmul.f32 %v415_v36, %v415_v36  ;;  %v1923_v28 = vpop.f32.mrb[9].mxu1 }
  0xee   :  { %903 = vst.msk [vmem:[%s2404_s4 + $0x2c] sm:$0xf] %vm891_vm2, %v1437_v35  ;;  %v1172_v44 = vadd.f32 %v1171_v41, %v1170_v38  ;;  %v975_v45 = vadd.f32 %v974_v42, %v973_v37  ;;  %v1175_v56 = vsel %vm956_vm3, %v1102_v40, 0.0  ;;  %v978_v57 = vsel %vm956_vm3, %v1536_v31, 0.0  ;;  %v1931_v34 = vpop.f32.mrb[10].mxu1 }
  0xef   :  { %901 = vst.msk [vmem:[%s2404_s4 + $0x24] sm:$0xf] %vm891_vm2, %v1435_v39  ;;  %v1173_v49 = vsel %vm956_vm3, %v1101_v43, 0.0  ;;  %v1177_v3 = vsel %vm956_vm3, %v1103_v48, 0.0  ;;  %v1459_v17 = vpack.c.bf16 %v1846_v32, %v1846_v32  ;;  %v1464_v22 = vpack.c.bf16 %v1873_v51, %v1873_v51  ;;  %v1934_v40 = vpop.f32.mrb[11].mxu1 }
  0xf0   :  { %v977_v52 = vadd.f32 %v976_v47, %v975_v45  ;;  %v1174_v53 = vadd.f32 %v1173_v49, %v1172_v44 }
  0xf1   :  { %v1539_v54 = vpop.f32.mrb[12].mxu0  ;;  %925 = vst.msk [vmem:[%s2404_s4 + $0x84] sm:$0xf] %vm891_vm2, %v1459_v17  ;;  %930 = vst.msk [vmem:[%s2404_s4 + $0x98] sm:$0xf] %vm891_vm2, %v1464_v22 }
  0xf2   :  { %v1440_v58 = vpack.c.bf16 %v1539_v54, %v1539_v54  ;;  %v428_v59 = vpop.f32.mrb[13].mxu0  ;;  %v1176_v61 = vadd.f32 %v1175_v56, %v1174_v53  ;;  %v979_v63 = vadd.f32 %v978_v57, %v977_v52  ;;  %v1106_v10 = vmul.f32 %v1539_v54, %v1539_v54 }
  0xf3   :  { %v1438_v62 = vpack.c.bf16 %v428_v59, %v428_v59  ;;  %v980_v0 = vsel %vm956_vm3, %v428_v59, 0.0  ;;  %v1540_v1 = vpop.f32.mrb[14].mxu0  ;;  %v1104_v4 = vmul.f32 %v428_v59, %v428_v59  ;;  %v984_v18 = vsel %vm956_vm3, %v1539_v54, 0.0 }
  0xf4   :  { %906 = vst.msk [vmem:[%s2404_s4 + $0x38] sm:$0xf] %vm891_vm2, %v1440_v58  ;;  %v1441_v5 = vpack.c.bf16 %v1540_v1, %v1540_v1  ;;  %v431_v6 = vpop.f32.mrb[15].mxu0  ;;  %v981_v7 = vadd.f32 %v980_v0, %v979_v63  ;;  %v1178_v8 = vadd.f32 %v1177_v3, %v1176_v61  ;;  %v1107_v19 = vmul.f32 %v1540_v1, %v1540_v1 }
  0xf5   :  { %904 = vst.msk [vmem:[%s2404_s4 + $0x30] sm:$0xf] %vm891_vm2, %v1438_v62  ;;  %v1439_v9 = vpack.c.bf16 %v431_v6, %v431_v6  ;;  %v1179_v11 = vsel %vm956_vm3, %v1104_v4, 0.0  ;;  %v982_v12 = vsel %vm956_vm3, %v431_v6, 0.0  ;;  %v1105_v13 = vmul.f32 %v431_v6, %v431_v6  ;;  %v1961_v62 = vpop.f32.mrb[12].mxu1 }
  0xf6   :  { %907 = vst.msk [vmem:[%s2404_s4 + $0x3c] sm:$0xf] %vm891_vm2, %v1441_v5  ;;  %v1180_v14 = vadd.f32 %v1179_v11, %v1178_v8  ;;  %v983_v15 = vadd.f32 %v982_v12, %v981_v7  ;;  %v1183_v29 = vsel %vm956_vm3, %v1106_v10, 0.0  ;;  %v986_v30 = vsel %vm956_vm3, %v1540_v1, 0.0  ;;  %v1967_v3 = vpop.f32.mrb[13].mxu1 }
  0xf7   :  { %905 = vst.msk [vmem:[%s2404_s4 + $0x34] sm:$0xf] %vm891_vm2, %v1439_v9  ;;  %v1181_v20 = vsel %vm956_vm3, %v1105_v13, 0.0  ;;  %v1185_v41 = vsel %vm956_vm3, %v1107_v19, 0.0  ;;  %v1462_v56 = vpack.c.bf16 %v1879_v55, %v1879_v55  ;;  %v1465_v61 = vpack.c.bf16 %v1887_v60, %v1887_v60  ;;  %v1975_v8 = vpop.f32.mrb[14].mxu1 }
  0xf8   :  { %v985_v24 = vadd.f32 %v984_v18, %v983_v15  ;;  %v1182_v25 = vadd.f32 %v1181_v20, %v1180_v14  ;;  %v1978_v14 = vpop.f32.mrb[15].mxu1 }
  0xf9   :  { %v1543_v27 = vpop.f32.mrb[16].mxu0  ;;  %928 = vst.msk [vmem:[%s2404_s4 + $0x90] sm:$0xf] %vm891_vm2, %v1462_v56  ;;  %931 = vst.msk [vmem:[%s2404_s4 + $0x9c] sm:$0xf] %vm891_vm2, %v1465_v61 }
  0xfa   :  { %v1444_v31 = vpack.c.bf16 %v1543_v27, %v1543_v27  ;;  %v444_v33 = vpop.f32.mrb[17].mxu0  ;;  %v1184_v35 = vadd.f32 %v1183_v29, %v1182_v25  ;;  %v987_v37 = vadd.f32 %v986_v30, %v985_v24  ;;  %v1110_v48 = vmul.f32 %v1543_v27, %v1543_v27 }
  0xfb   :  { %v1442_v36 = vpack.c.bf16 %v444_v33, %v444_v33  ;;  %v988_v38 = vsel %vm956_vm3, %v444_v33, 0.0  ;;  %v1544_v39 = vpop.f32.mrb[18].mxu0  ;;  %v1108_v42 = vmul.f32 %v444_v33, %v444_v33  ;;  %v992_v57 = vsel %vm956_vm3, %v1543_v27, 0.0 }
  0xfc   :  { %910 = vst.msk [vmem:[%s2404_s4 + $0x48] sm:$0xf] %vm891_vm2, %v1444_v31  ;;  %v1445_v43 = vpack.c.bf16 %v1544_v39, %v1544_v39  ;;  %v447_v44 = vpop.f32.mrb[19].mxu0  ;;  %v989_v45 = vadd.f32 %v988_v38, %v987_v37  ;;  %v1186_v46 = vadd.f32 %v1185_v41, %v1184_v35  ;;  %v1111_v58 = vmul.f32 %v1544_v39, %v1544_v39  ;;  %v2005_v41 = vpop.f32.mrb[16].mxu1 }
  0xfd   :  { %908 = vst.msk [vmem:[%s2404_s4 + $0x40] sm:$0xf] %vm891_vm2, %v1442_v36  ;;  %v1443_v47 = vpack.c.bf16 %v447_v44, %v447_v44  ;;  %v1187_v49 = vsel %vm956_vm3, %v1108_v42, 0.0  ;;  %v990_v50 = vsel %vm956_vm3, %v447_v44, 0.0  ;;  %v1109_v52 = vmul.f32 %v447_v44, %v447_v44 }
  0xfe   :  { %911 = vst.msk [vmem:[%s2404_s4 + $0x4c] sm:$0xf] %vm891_vm2, %v1445_v43  ;;  %v1188_v53 = vadd.f32 %v1187_v49, %v1186_v46  ;;  %v991_v54 = vadd.f32 %v990_v50, %v989_v45  ;;  %v1191_v4 = vsel %vm956_vm3, %v1110_v48, 0.0  ;;  %v994_v5 = vsel %vm956_vm3, %v1544_v39, 0.0  ;;  %v2011_v45 = vpop.f32.mrb[17].mxu1 }
  0xff   :  { %909 = vst.msk [vmem:[%s2404_s4 + $0x44] sm:$0xf] %vm891_vm2, %v1443_v47  ;;  %v1189_v59 = vsel %vm956_vm3, %v1109_v52, 0.0  ;;  %v1193_v15 = vsel %vm956_vm3, %v1111_v58, 0.0  ;;  %v1463_v35 = vpack.c.bf16 %v1890_v2, %v1890_v2  ;;  %v1468_v39 = vpack.c.bf16 %v1917_v23, %v1917_v23  ;;  %v2019_v50 = vpop.f32.mrb[18].mxu1 }
 0x100   :  { %v993_v63 = vadd.f32 %v992_v57, %v991_v54  ;;  %v1190_v0 = vadd.f32 %v1189_v59, %v1188_v53  ;;  %v2022_v58 = vpop.f32.mrb[19].mxu1 }
 0x101   :  { %v1547_v1 = vpop.f32.mrb[20].mxu0  ;;  %929 = vst.msk [vmem:[%s2404_s4 + $0x94] sm:$0xf] %vm891_vm2, %v1463_v35  ;;  %934 = vst.msk [vmem:[%s2404_s4 + $0xa8] sm:$0xf] %vm891_vm2, %v1468_v39 }
 0x102   :  { %v1448_v6 = vpack.c.bf16 %v1547_v1, %v1547_v1  ;;  %v460_v7 = vpop.f32.mrb[21].mxu0  ;;  %v1192_v9 = vadd.f32 %v1191_v4, %v1190_v0  ;;  %v995_v11 = vadd.f32 %v994_v5, %v993_v63  ;;  %v1114_v25 = vmul.f32 %v1547_v1, %v1547_v1 }
 0x103   :  { %v1446_v10 = vpack.c.bf16 %v460_v7, %v460_v7  ;;  %v996_v12 = vsel %vm956_vm3, %v460_v7, 0.0  ;;  %v1548_v13 = vpop.f32.mrb[22].mxu0  ;;  %v1112_v17 = vmul.f32 %v460_v7, %v460_v7  ;;  %v1000_v36 = vsel %vm956_vm3, %v1547_v1, 0.0 }
 0x104   :  { %914 = vst.msk [vmem:[%s2404_s4 + $0x58] sm:$0xf] %vm891_vm2, %v1448_v6  ;;  %v1449_v18 = vpack.c.bf16 %v1548_v13, %v1548_v13  ;;  %v463_v19 = vpop.f32.mrb[23].mxu0  ;;  %v997_v20 = vadd.f32 %v996_v12, %v995_v11  ;;  %v1194_v22 = vadd.f32 %v1193_v15, %v1192_v9  ;;  %v1115_v37 = vmul.f32 %v1548_v13, %v1548_v13 }
 0x105   :  { %912 = vst.msk [vmem:[%s2404_s4 + $0x50] sm:$0xf] %vm891_vm2, %v1446_v10  ;;  %v1447_v24 = vpack.c.bf16 %v463_v19, %v463_v19  ;;  %v1195_v27 = vsel %vm956_vm3, %v1112_v17, 0.0  ;;  %v998_v29 = vsel %vm956_vm3, %v463_v19, 0.0  ;;  %v1113_v30 = vmul.f32 %v463_v19, %v463_v19 }
 0x106   :  { %915 = vst.msk [vmem:[%s2404_s4 + $0x5c] sm:$0xf] %vm891_vm2, %v1449_v18  ;;  %v1196_v31 = vadd.f32 %v1195_v27, %v1194_v22  ;;  %v999_v33 = vadd.f32 %v998_v29, %v997_v20  ;;  %v1199_v46 = vsel %vm956_vm3, %v1114_v25, 0.0  ;;  %v1002_v47 = vsel %vm956_vm3, %v1548_v13, 0.0  ;;  %v2049_v20 = vpop.f32.mrb[20].mxu1 }
 0x107   :  { %913 = vst.msk [vmem:[%s2404_s4 + $0x54] sm:$0xf] %vm891_vm2, %v1447_v24  ;;  %v1197_v38 = vsel %vm956_vm3, %v1113_v30, 0.0  ;;  %v1201_v59 = vsel %vm956_vm3, %v1115_v37, 0.0  ;;  %v1466_v13 = vpack.c.bf16 %v1923_v28, %v1923_v28  ;;  %v1469_v19 = vpack.c.bf16 %v1931_v34, %v1931_v34  ;;  %v2055_v27 = vpop.f32.mrb[21].mxu1 }
 0x108   :  { %v1001_v42 = vadd.f32 %v1000_v36, %v999_v33  ;;  %v1198_v43 = vadd.f32 %v1197_v38, %v1196_v31  ;;  %v2063_v35 = vpop.f32.mrb[22].mxu1 }
 0x109   :  { %v1551_v44 = vpop.f32.mrb[24].mxu0  ;;  %932 = vst.msk [vmem:[%s2404_s4 + $0xa0] sm:$0xf] %vm891_vm2, %v1466_v13  ;;  %935 = vst.msk [vmem:[%s2404_s4 + $0xac] sm:$0xf] %vm891_vm2, %v1469_v19 }
 0x10a   :  { %v1452_v48 = vpack.c.bf16 %v1551_v44, %v1551_v44  ;;  %v476_v49 = vpop.f32.mrb[25].mxu0  ;;  %v1200_v52 = vadd.f32 %v1199_v46, %v1198_v43  ;;  %v1003_v54 = vadd.f32 %v1002_v47, %v1001_v42  ;;  %v1118_v6 = vmul.f32 %v1551_v44, %v1551_v44  ;;  %v2066_v43 = vpop.f32.mrb[23].mxu1 }
 0x10b   :  { %v1450_v53 = vpack.c.bf16 %v476_v49, %v476_v49  ;;  %v1004_v56 = vsel %vm956_vm3, %v476_v49, 0.0  ;;  %v1552_v57 = vpop.f32.mrb[26].mxu0  ;;  %v1116_v61 = vmul.f32 %v476_v49, %v476_v49  ;;  %v1008_v15 = vsel %vm956_vm3, %v1551_v44, 0.0 }
 0x10c   :  { %918 = vst.msk [vmem:[%s2404_s4 + $0x68] sm:$0xf] %vm891_vm2, %v1452_v48  ;;  %v1453_v63 = vpack.c.bf16 %v1552_v57, %v1552_v57  ;;  %v479_v0 = vpop.f32.mrb[27].mxu0  ;;  %v1005_v1 = vadd.f32 %v1004_v56, %v1003_v54  ;;  %v1202_v4 = vadd.f32 %v1201_v59, %v1200_v52  ;;  %v1119_v17 = vmul.f32 %v1552_v57, %v1552_v57 }
 0x10d   :  { %916 = vst.msk [vmem:[%s2404_s4 + $0x60] sm:$0xf] %vm891_vm2, %v1450_v53  ;;  %v1451_v5 = vpack.c.bf16 %v479_v0, %v479_v0  ;;  %v1203_v7 = vsel %vm956_vm3, %v1116_v61, 0.0  ;;  %v1006_v9 = vsel %vm956_vm3, %v479_v0, 0.0  ;;  %v1117_v10 = vmul.f32 %v479_v0, %v479_v0 }
 0x10e   :  { %919 = vst.msk [vmem:[%s2404_s4 + $0x6c] sm:$0xf] %vm891_vm2, %v1453_v63  ;;  %v1204_v11 = vadd.f32 %v1203_v7, %v1202_v4  ;;  %v1007_v12 = vadd.f32 %v1006_v9, %v1005_v1  ;;  %v1207_v29 = vsel %vm956_vm3, %v1118_v6, 0.0  ;;  %v1010_v30 = vsel %vm956_vm3, %v1552_v57, 0.0  ;;  %v2095_v9 = vpop.f32.mrb[24].mxu1 }
 0x10f   :  { %917 = vst.msk [vmem:[%s2404_s4 + $0x64] sm:$0xf] %vm891_vm2, %v1451_v5  ;;  %v1205_v18 = vsel %vm956_vm3, %v1117_v10, 0.0  ;;  %v1209_v44 = vsel %vm956_vm3, %v1119_v17, 0.0  ;;  %v1124_v0 = vmul.f32 %v1835_v21, %v1835_v21  ;;  %v1467_v1 = vpack.c.bf16 %v1934_v40, %v1934_v40 }
 0x110   :  { %v1009_v22 = vadd.f32 %v1008_v15, %v1007_v12  ;;  %v1206_v24 = vadd.f32 %v1205_v18, %v1204_v11  ;;  %v1472_v7 = vpack.c.bf16 %v1961_v62, %v1961_v62  ;;  %v2101_v12 = vpop.f32.mrb[25].mxu1  ;;  %v1020_v17 = vsel %vm956_vm3, %v1835_v21, 0.0 }
 0x111   :  { %v1555_v25 = vpop.f32.mrb[28].mxu0  ;;  %933 = vst.msk [vmem:[%s2404_s4 + $0xa4] sm:$0xf] %vm891_vm2, %v1467_v1  ;;  %v1470_v18 = vpack.c.bf16 %v1967_v3, %v1967_v3  ;;  %v2113_v19 = vpop.f32.mrb[26].mxu1  ;;  %v1219_v21 = vsel %vm956_vm3, %v1124_v0, 0.0  ;;  %v1475_v0 = vpack.c.bf16 %v2022_v58, %v2022_v58 }
 0x112   :  { %v1456_v31 = vpack.c.bf16 %v1555_v25, %v1555_v25  ;;  %v492_v33 = vpop.f32.mrb[29].mxu0  ;;  %v1208_v36 = vadd.f32 %v1207_v29, %v1206_v24  ;;  %v1011_v38 = vadd.f32 %v1010_v30, %v1009_v22  ;;  %v1122_v54 = vmul.f32 %v1555_v25, %v1555_v25  ;;  %938 = vst.msk [vmem:[%s2404_s4 + $0xb8] sm:$0xf] %vm891_vm2, %v1472_v7  ;;  %v2117_v29 = vpop.f32.mrb[27].mxu1 }
 0x113   :  { %v1454_v37 = vpack.c.bf16 %v492_v33, %v492_v33  ;;  %v1012_v39 = vsel %vm956_vm3, %v492_v33, 0.0  ;;  %v1556_v42 = vpop.f32.mrb[30].mxu0  ;;  %v1120_v46 = vmul.f32 %v492_v33, %v492_v33  ;;  %v1016_v4 = vsel %vm956_vm3, %v1555_v25, 0.0  ;;  %936 = vst.msk [vmem:[%s2404_s4 + $0xb0] sm:$0xf] %vm891_vm2, %v1470_v18 }
 0x114   :  { %922 = vst.msk [vmem:[%s2404_s4 + $0x78] sm:$0xf] %vm891_vm2, %v1456_v31  ;;  %v1457_v47 = vpack.c.bf16 %v1556_v42, %v1556_v42  ;;  %v495_v48 = vpop.f32.mrb[31].mxu0  ;;  %v1013_v49 = vadd.f32 %v1012_v39, %v1011_v38  ;;  %v1210_v52 = vadd.f32 %v1209_v44, %v1208_v36  ;;  %v1123_v5 = vmul.f32 %v1556_v42, %v1556_v42 }
 0x115   :  { %920 = vst.msk [vmem:[%s2404_s4 + $0x70] sm:$0xf] %vm891_vm2, %v1454_v37  ;;  %v1455_v53 = vpack.c.bf16 %v495_v48, %v495_v48  ;;  %v1211_v56 = vsel %vm956_vm3, %v1120_v46, 0.0  ;;  %v1014_v57 = vsel %vm956_vm3, %v495_v48, 0.0  ;;  %v1121_v59 = vmul.f32 %v495_v48, %v495_v48  ;;  %941 = vst.msk [vmem:[%s2404_s4 + $0xc4] sm:$0xf] %vm891_vm2, %v1475_v0 }
 0x116   :  { %923 = vst.msk [vmem:[%s2404_s4 + $0x7c] sm:$0xf] %vm891_vm2, %v1457_v47  ;;  %v1212_v61 = vadd.f32 %v1211_v56, %v1210_v52  ;;  %v1015_v63 = vadd.f32 %v1014_v57, %v1013_v49  ;;  %v1215_v13 = vsel %vm956_vm3, %v1122_v54, 0.0  ;;  %v1018_v15 = vsel %vm956_vm3, %v1556_v42, 0.0 }
 0x117   :  { %921 = vst.msk [vmem:[%s2404_s4 + $0x74] sm:$0xf] %vm891_vm2, %v1455_v53  ;;  %v1213_v6 = vsel %vm956_vm3, %v1121_v59, 0.0  ;;  %v1473_v25 = vpack.c.bf16 %v1975_v8, %v1975_v8  ;;  %v1217_v30 = vsel %vm956_vm3, %v1123_v5, 0.0  ;;  %v1125_v31 = vmul.f32 %v1846_v32, %v1846_v32  ;;  %v2158_v53 = vpop.f32.mrb[28].mxu1 }
 0x118   :  { %v1017_v10 = vadd.f32 %v1016_v4, %v1015_v63  ;;  %v1214_v11 = vadd.f32 %v1213_v6, %v1212_v61  ;;  %v1471_v33 = vpack.c.bf16 %v1978_v14, %v1978_v14  ;;  %v1126_v38 = vmul.f32 %v1831_v16, %v1831_v16  ;;  %v2164_v57 = vpop.f32.mrb[29].mxu1 }
 0x119   :  { %939 = vst.msk [vmem:[%s2404_s4 + $0xbc] sm:$0xf] %vm891_vm2, %v1473_v25  ;;  %v1022_v39 = vsel %vm956_vm3, %v1846_v32, 0.0  ;;  %v1476_v42 = vpack.c.bf16 %v2005_v41, %v2005_v41  ;;  %v1024_v44 = vsel %vm956_vm3, %v1831_v16, 0.0  ;;  %v1474_v48 = vpack.c.bf16 %v2011_v45, %v2011_v45  ;;  %v2177_v1 = vpop.f32.mrb[30].mxu1 }
 0x11a   :  { %v1216_v22 = vadd.f32 %v1215_v13, %v1214_v11  ;;  %v1019_v24 = vadd.f32 %v1018_v15, %v1017_v10  ;;  %937 = vst.msk [vmem:[%s2404_s4 + $0xb4] sm:$0xf] %vm891_vm2, %v1471_v33  ;;  %v1127_v49 = vmul.f32 %v1839_v26, %v1839_v26  ;;  %v1221_v32 = vsel %vm956_vm3, %v1125_v31, 0.0  ;;  %v2181_v7 = vpop.f32.mrb[31].mxu1 }
 0x11b   :  { %v1128_v52 = vmul.f32 %v1879_v55, %v1879_v55  ;;  %942 = vst.msk [vmem:[%s2404_s4 + $0xc8] sm:$0xf] %vm891_vm2, %v1476_v42  ;;  %v1477_v16 = vpack.c.bf16 %v2019_v50, %v2019_v50  ;;  %940 = vst.msk [vmem:[%s2404_s4 + $0xc0] sm:$0xf] %vm891_vm2, %v1474_v48  ;;  %v1223_v59 = vsel %vm956_vm3, %v1126_v38, 0.0  ;;  %v1026_v61 = vsel %vm956_vm3, %v1839_v26, 0.0 }
 0x11c   :  { %v1021_v36 = vadd.f32 %v1020_v17, %v1019_v24  ;;  %v1218_v37 = vadd.f32 %v1217_v30, %v1216_v22  ;;  %v1028_v63 = vsel %vm956_vm3, %v1879_v55, 0.0  ;;  %v1480_v6 = vpack.c.bf16 %v2049_v20, %v2049_v20 }
 0x11d   :  { %943 = vst.msk [vmem:[%s2404_s4 + $0xcc] sm:$0xf] %vm891_vm2, %v1477_v16  ;;  %v1225_v26 = vsel %vm956_vm3, %v1127_v49, 0.0  ;;  %v1227_v55 = vsel %vm956_vm3, %v1128_v52, 0.0  ;;  %v1129_v10 = vmul.f32 %v1890_v2, %v1890_v2  ;;  %v1478_v11 = vpack.c.bf16 %v2055_v27, %v2055_v27 }
 0x11e   :  { %v1220_v46 = vadd.f32 %v1219_v21, %v1218_v37  ;;  %v1023_v47 = vadd.f32 %v1022_v39, %v1021_v36  ;;  %946 = vst.msk [vmem:[%s2404_s4 + $0xd8] sm:$0xf] %vm891_vm2, %v1480_v6  ;;  %v1130_v17 = vmul.f32 %v1873_v51, %v1873_v51  ;;  %v1030_v18 = vsel %vm956_vm3, %v1890_v2, 0.0 }
 0x11f   :  { %944 = vst.msk [vmem:[%s2404_s4 + $0xd0] sm:$0xf] %vm891_vm2, %v1478_v11  ;;  %v1481_v22 = vpack.c.bf16 %v2063_v35, %v2063_v35  ;;  %v1032_v24 = vsel %vm956_vm3, %v1873_v51, 0.0  ;;  %v1479_v21 = vpack.c.bf16 %v2066_v43, %v2066_v43  ;;  %v1131_v31 = vmul.f32 %v1887_v60, %v1887_v60 }
 0x120   :  { %v1025_v54 = vadd.f32 %v1024_v44, %v1023_v47  ;;  %v1222_v56 = vadd.f32 %v1221_v32, %v1220_v46  ;;  %v1229_v2 = vsel %vm956_vm3, %v1129_v10, 0.0  ;;  %v1132_v33 = vmul.f32 %v1923_v28, %v1923_v28 }
 0x121   :  { %947 = vst.msk [vmem:[%s2404_s4 + $0xdc] sm:$0xf] %vm891_vm2, %v1481_v22  ;;  %v1484_v51 = vpack.c.bf16 %v2095_v9, %v2095_v9  ;;  %945 = vst.msk [vmem:[%s2404_s4 + $0xd4] sm:$0xf] %vm891_vm2, %v1479_v21  ;;  %v1231_v38 = vsel %vm956_vm3, %v1130_v17, 0.0  ;;  %v1034_v39 = vsel %vm956_vm3, %v1887_v60, 0.0  ;;  %v1482_v44 = vpack.c.bf16 %v2101_v12, %v2101_v12 }
 0x122   :  { %v1224_v4 = vadd.f32 %v1223_v59, %v1222_v56  ;;  %v1027_v5 = vadd.f32 %v1026_v61, %v1025_v54  ;;  %v1036_v42 = vsel %vm956_vm3, %v1923_v28, 0.0  ;;  %v1485_v48 = vpack.c.bf16 %v2113_v19, %v2113_v19 }
 0x123   :  { %950 = vst.msk [vmem:[%s2404_s4 + $0xe8] sm:$0xf] %vm891_vm2, %v1484_v51  ;;  %v1233_v49 = vsel %vm956_vm3, %v1131_v31, 0.0  ;;  %v1235_v60 = vsel %vm956_vm3, %v1132_v33, 0.0  ;;  %v1133_v28 = vmul.f32 %v1934_v40, %v1934_v40  ;;  %948 = vst.msk [vmem:[%s2404_s4 + $0xe0] sm:$0xf] %vm891_vm2, %v1482_v44  ;;  %v1483_v32 = vpack.c.bf16 %v2117_v29, %v2117_v29 }
 0x124   :  { %v1029_v13 = vadd.f32 %v1028_v63, %v1027_v5  ;;  %v1226_v15 = vadd.f32 %v1225_v26, %v1224_v4  ;;  %951 = vst.msk [vmem:[%s2404_s4 + $0xec] sm:$0xf] %vm891_vm2, %v1485_v48  ;;  %v1134_v54 = vmul.f32 %v1917_v23, %v1917_v23  ;;  %v1038_v56 = vsel %vm956_vm3, %v1934_v40, 0.0 }
 0x125   :  { %949 = vst.msk [vmem:[%s2404_s4 + $0xe4] sm:$0xf] %vm891_vm2, %v1483_v32  ;;  %v1488_v59 = vpack.c.bf16 %v2158_v53, %v2158_v53  ;;  %v1040_v61 = vsel %vm956_vm3, %v1917_v23, 0.0  ;;  %v1486_v4 = vpack.c.bf16 %v2164_v57, %v2164_v57  ;;  %v1135_v5 = vmul.f32 %v1931_v34, %v1931_v34 }
 0x126   :  { %v1228_v25 = vadd.f32 %v1227_v55, %v1226_v15  ;;  %v1031_v30 = vadd.f32 %v1030_v18, %v1029_v13  ;;  %v1237_v40 = vsel %vm956_vm3, %v1133_v28, 0.0  ;;  %v1136_v6 = vmul.f32 %v1967_v3, %v1967_v3 }
 0x127   :  { %954 = vst.msk [vmem:[%s2404_s4 + $0xf8] sm:$0xf] %vm891_vm2, %v1488_v59  ;;  %v1489_v23 = vpack.c.bf16 %v2177_v1, %v2177_v1  ;;  %952 = vst.msk [vmem:[%s2404_s4 + $0xf0] sm:$0xf] %vm891_vm2, %v1486_v4  ;;  %v1239_v10 = vsel %vm956_vm3, %v1134_v54, 0.0  ;;  %v1042_v11 = vsel %vm956_vm3, %v1931_v34, 0.0  ;;  %v1487_v15 = vpack.c.bf16 %v2181_v7, %v2181_v7 }
 0x128   :  { %v1033_v36 = vadd.f32 %v1032_v24, %v1031_v30  ;;  %v1230_v37 = vadd.f32 %v1229_v2, %v1228_v25  ;;  %v1044_v13 = vsel %vm956_vm3, %v1967_v3, 0.0  ;;  %v1241_v22 = vsel %vm956_vm3, %v1135_v5, 0.0 }
 0x129   :  { %955 = vst.msk [vmem:[%s2404_s4 + $0xfc] sm:$0xf] %vm891_vm2, %v1489_v23  ;;  %v1243_v24 = vsel %vm956_vm3, %v1136_v6, 0.0  ;;  %v1137_v34 = vmul.f32 %v1978_v14, %v1978_v14  ;;  %953 = vst.msk [vmem:[%s2404_s4 + $0xf4] sm:$0xf] %vm891_vm2, %v1487_v15  ;;  %v1138_v30 = vmul.f32 %v1961_v62, %v1961_v62  ;;  %v1046_v21 = vsel %vm956_vm3, %v1978_v14, 0.0 }
 0x12a   :  { %v1232_v46 = vadd.f32 %v1231_v38, %v1230_v37  ;;  %v1035_v47 = vadd.f32 %v1034_v39, %v1033_v36  ;;  %v1048_v33 = vsel %vm956_vm3, %v1961_v62, 0.0  ;;  %v1139_v51 = vmul.f32 %v1975_v8, %v1975_v8 }
 0x12b   :  { %v1245_v36 = vsel %vm956_vm3, %v1137_v34, 0.0  ;;  %v1140_v37 = vmul.f32 %v2011_v45, %v2011_v45  ;;  %v1050_v14 = vsel %vm956_vm3, %v1975_v8, 0.0  ;;  %v1052_v44 = vsel %vm956_vm3, %v2011_v45, 0.0 }
 0x12c   :  { %v1037_v52 = vadd.f32 %v1036_v42, %v1035_v47  ;;  %v1234_v16 = vadd.f32 %v1233_v49, %v1232_v46  ;;  %v1247_v42 = vsel %vm956_vm3, %v1138_v30, 0.0  ;;  %v1249_v47 = vsel %vm956_vm3, %v1139_v51, 0.0 }
 0x12d   :  { %v1251_v48 = vsel %vm956_vm3, %v1140_v37, 0.0  ;;  %v1141_v49 = vmul.f32 %v2022_v58, %v2022_v58  ;;  %v1142_v32 = vmul.f32 %v2005_v41, %v2005_v41  ;;  %v1054_v8 = vsel %vm956_vm3, %v2022_v58, 0.0 }
 0x12e   :  { %v1236_v63 = vadd.f32 %v1235_v60, %v1234_v16  ;;  %v1039_v0 = vadd.f32 %v1038_v56, %v1037_v52  ;;  %v1056_v45 = vsel %vm956_vm3, %v2005_v41, 0.0  ;;  %v1143_v54 = vmul.f32 %v2019_v50, %v2019_v50 }
 0x12f   :  { %v1253_v56 = vsel %vm956_vm3, %v1141_v49, 0.0  ;;  %v1144_v59 = vmul.f32 %v2055_v27, %v2055_v27  ;;  %v1058_v58 = vsel %vm956_vm3, %v2019_v50, 0.0  ;;  %v1060_v4 = vsel %vm956_vm3, %v2055_v27, 0.0 }
 0x130   :  { %v1041_v26 = vadd.f32 %v1040_v61, %v1039_v0  ;;  %v1238_v55 = vadd.f32 %v1237_v40, %v1236_v63  ;;  %v1255_v0 = vsel %vm956_vm3, %v1142_v32, 0.0  ;;  %v1257_v40 = vsel %vm956_vm3, %v1143_v54, 0.0 }
 0x131   :  { %v1259_v6 = vsel %vm956_vm3, %v1144_v59, 0.0  ;;  %v1145_v23 = vmul.f32 %v2066_v43, %v2066_v43  ;;  %v1062_v50 = vsel %vm956_vm3, %v2066_v43, 0.0  ;;  %v1064_v27 = vsel %vm956_vm3, %v2049_v20, 0.0 }
 0x132   :  { %v1240_v17 = vadd.f32 %v1239_v10, %v1238_v55  ;;  %v1043_v18 = vadd.f32 %v1042_v11, %v1041_v26  ;;  %v1146_v10 = vmul.f32 %v2049_v20, %v2049_v20  ;;  %v1147_v15 = vmul.f32 %v2063_v35, %v2063_v35 }
 0x133   :  { %v1066_v43 = vsel %vm956_vm3, %v2063_v35, 0.0  ;;  %v1150_v51 = vmul.f32 %v2095_v9, %v2095_v9  ;;  %v1070_v35 = vsel %vm956_vm3, %v2117_v29, 0.0 }
 0x134   :  { %v1045_v3 = vadd.f32 %v1044_v13, %v1043_v18  ;;  %v1242_v25 = vadd.f32 %v1241_v22, %v1240_v17  ;;  %v1261_v17 = vsel %vm956_vm3, %v1145_v23, 0.0  ;;  %v1148_v18 = vmul.f32 %v2101_v12, %v2101_v12 }
 0x135   :  { %v1263_v34 = vsel %vm956_vm3, %v1146_v10, 0.0  ;;  %v1265_v30 = vsel %vm956_vm3, %v1147_v15, 0.0 }
 0x136   :  { %v1244_v31 = vadd.f32 %v1243_v24, %v1242_v25  ;;  %v1047_v2 = vadd.f32 %v1046_v21, %v1045_v3  ;;  %v1068_v3 = vsel %vm956_vm3, %v2101_v12, 0.0  ;;  %v1267_v21 = vsel %vm956_vm3, %v1148_v18, 0.0 }
 0x137   :  { %v1072_v12 = vsel %vm956_vm3, %v2095_v9, 0.0 }
 0x138   :  { %v1049_v38 = vadd.f32 %v1048_v33, %v1047_v2  ;;  %v1246_v39 = vadd.f32 %v1245_v36, %v1244_v31  ;;  %v1149_v31 = vmul.f32 %v2117_v29, %v2117_v29  ;;  %v1074_v29 = vsel %vm956_vm3, %v2113_v19, 0.0 }
 0x13a   :  { %v1248_v46 = vadd.f32 %v1247_v42, %v1246_v39  ;;  %v1051_v62 = vadd.f32 %v1050_v14, %v1049_v38  ;;  %v1151_v38 = vmul.f32 %v2113_v19, %v2113_v19  ;;  %v1269_v39 = vsel %vm956_vm3, %v1149_v31, 0.0 }
 0x13b   :  { %v1152_v42 = vmul.f32 %v2164_v57, %v2164_v57  ;;  %v1078_v19 = vsel %vm956_vm3, %v2181_v7, 0.0 }
 0x13c   :  { %v1053_v60 = vadd.f32 %v1052_v44, %v1051_v62  ;;  %v1250_v28 = vadd.f32 %v1249_v47, %v1248_v46  ;;  %v1271_v46 = vsel %vm956_vm3, %v1150_v51, 0.0  ;;  %v1076_v62 = vsel %vm956_vm3, %v2164_v57, 0.0 }
 0x13d   :  { %v1275_v49 = vsel %vm956_vm3, %v1152_v42, 0.0  ;;  %v1080_v57 = vsel %vm956_vm3, %v2158_v53, 0.0 }
 0x13e   :  { %v1252_v52 = vadd.f32 %v1251_v48, %v1250_v28  ;;  %v1055_v16 = vadd.f32 %v1054_v8, %v1053_v60  ;;  %v1273_v48 = vsel %vm956_vm3, %v1151_v38, 0.0  ;;  %v1153_v60 = vmul.f32 %v2181_v7, %v2181_v7 }
 0x13f   :  { %v1154_v8 = vmul.f32 %v2158_v53, %v2158_v53 }
 0x140   :  { %v1057_v61 = vadd.f32 %v1056_v45, %v1055_v16  ;;  %v1254_v63 = vadd.f32 %v1253_v56, %v1252_v52  ;;  %v1155_v45 = vmul.f32 %v2177_v1, %v2177_v1  ;;  %v1277_v54 = vsel %vm956_vm3, %v1153_v60, 0.0 }
 0x142   :  { %v1256_v5 = vadd.f32 %v1255_v0, %v1254_v63  ;;  %v1059_v41 = vadd.f32 %v1058_v58, %v1057_v61  ;;  %v1279_v61 = vsel %vm956_vm3, %v1154_v8, 0.0  ;;  %v1082_v63 = vsel %vm956_vm3, %v2177_v1, 0.0 }
 0x143   :  { %v1281_v7 = vsel %vm956_vm3, %v1155_v45, 0.0 }
 0x144   :  { %v1061_v26 = vadd.f32 %v1060_v4, %v1059_v41  ;;  %v1258_v55 = vadd.f32 %v1257_v40, %v1256_v5 }
 0x146   :  { %v1260_v11 = vadd.f32 %v1259_v6, %v1258_v55  ;;  %v1063_v13 = vadd.f32 %v1062_v50, %v1061_v26 }
 0x148   :  { %v1065_v22 = vadd.f32 %v1064_v27, %v1063_v13  ;;  %v1262_v24 = vadd.f32 %v1261_v17, %v1260_v11 }
 0x14a   :  { %v1264_v25 = vadd.f32 %v1263_v34, %v1262_v24  ;;  %v1067_v20 = vadd.f32 %v1066_v43, %v1065_v22 }
 0x14c   :  { %v1069_v2 = vadd.f32 %v1068_v3, %v1067_v20  ;;  %v1266_v33 = vadd.f32 %v1265_v30, %v1264_v25 }
 0x14e   :  { %v1268_v36 = vadd.f32 %v1267_v21, %v1266_v33  ;;  %v1071_v37 = vadd.f32 %v1070_v35, %v1069_v2 }
 0x150   :  { %v1073_v14 = vadd.f32 %v1072_v12, %v1071_v37  ;;  %v1270_v44 = vadd.f32 %v1269_v39, %v1268_v36 }
 0x152   :  { %v1272_v47 = vadd.f32 %v1271_v46, %v1270_v44  ;;  %v1075_v9 = vadd.f32 %v1074_v29, %v1073_v14 }
 0x154   :  { %v1077_v28 = vadd.f32 %v1076_v62, %v1075_v9  ;;  %v1274_v32 = vadd.f32 %v1273_v48, %v1272_v47 }
 0x156   :  { %v1276_v52 = vadd.f32 %v1275_v49, %v1274_v32  ;;  %v1079_v16 = vadd.f32 %v1078_v19, %v1077_v28 }
 0x158   :  { %v1081_v56 = vadd.f32 %v1080_v57, %v1079_v16  ;;  %v1278_v59 = vadd.f32 %v1277_v54, %v1276_v52 }
 0x15a   :  { %v1083_v0 = vadd.f32 %v1082_v63, %v1081_v56  ;;  %v1280_v58 = vadd.f32 %v1279_v61, %v1278_v59 }
 0x15c   :  { %v1084_v4 = vrot.slane %v1083_v0, 4  ;;  %v1282_v5 = vadd.f32 %v1281_v7, %v1280_v58 }
 0x15e   :  { %v1085_v41 = vadd.f32 %v1084_v4, %v1083_v0  ;;  %v1283_v53 = vrot.slane %v1282_v5, 4 }
 0x160   :  { %v1086_v40 = vrot.slane %v1085_v41, 2  ;;  %v1284_v6 = vadd.f32 %v1283_v53, %v1282_v5 }
 0x162   :  { %v1087_v23 = vadd.f32 %v1086_v40, %v1085_v41  ;;  %v1285_v26 = vrot.slane %v1284_v6, 2 }
 0x164   :  { %v1088_v55 = vrot.slane %v1087_v23, 1  ;;  %v1286_v10 = vadd.f32 %v1285_v26, %v1284_v6 }
 0x166   :  { %v1089_v50 = vadd.f32 %v1088_v55, %v1087_v23  ;;  %v1287_v11 = vrot.slane %v1286_v10, 1 }
 0x168   :  { %1091 = vst.msk [vmem:[%s2405_s5] sm:$0x1] %vm1090_vm4, %v1089_v50  ;;  %v1288_v1 = vadd.f32 %v1287_v11, %v1286_v10 }
 0x16a   :  { %1289 = vst.msk [vmem:[%s2405_s5 + $0x1] sm:$0x1] %vm1090_vm4, %v1288_v1 }

// kernel: bottleneck_forward.5
= control target key start
LH: loop header
LB: loop body
LE: loop exit
PB: predicated region body
PF: predicated region fallthrough
CT: control target
= control target key end

     0   :  { %vm342_vm0 = vcmask 1041408   ;;  %vm245_vm1 = vcmask 31744   ;;  %vm891_vm2 = vcmask 27648   ;;  %vm1089_vm3 = vcmask 24576   ;;  %s2399_s1 = inlined_call_operand.vmem [shape: bf16[4,4], index: 1, kind: input, shape index: {}]   ;;  %s2400_s2 = inlined_call_operand.vmem [shape: f32[1,4], index: 2, kind: input, shape index: {}]   ;;  %s2401_s3 = inlined_call_operand.vmem [shape: f32[1,4], index: 3, kind: input, shape index: {}]   ;;  %s2402_s0 = inlined_call_operand.vmem [shape: bf16[512,4], index: 0, kind: input, shape index: {}]   ;;  %s2403_s4 = inlined_call_operand.vmem [shape: bf16[512,4], index: 4, kind: output, shape index: {0}]   ;;  %s2404_s5 = inlined_call_operand.vmem [shape: f32[1,2,4], index: 5, kind: output, shape index: {1}]  }
   0x1   :  { %v84_v0 = vld [vmem:[%s2399_s1] sm:$0x3]  ;;  %v1593_v3 = vld [vmem:[%s2402_s0 + $0x8] sm:$0xff]   ;;  %v1594_v4 = vld [vmem:[%s2402_s0 + $0x10] sm:$0xff]  }
   0x2   :  { %1590 = vmatprep.subr.msk.bf16.mxu0 %vm342_vm0, %v84_v0  ;;  %v344_v1 = vsel %vm342_vm0, %v84_v0, 0  ;;  %v1592_v2 = vld [vmem:[%s2402_s0] sm:$0xff]   ;;  %1591 = vmatprep.subr.msk.bf16.mxu1 %vm342_vm0, %v84_v0  ;;  %v1595_v5 = vld [vmem:[%s2402_s0 + $0x18] sm:$0xff]   ;;  %v1597_v7 = vld [vmem:[%s2402_s0 + $0x28] sm:$0xff]  }
   0x3   :  { %1523 = vmatpush3.bf16.msra.mxu0 %v344_v1  ;;  %1589 = vmatpush3.bf16.msra.mxu1 %v344_v1  ;;  %v1596_v6 = vld [vmem:[%s2402_s0 + $0x20] sm:$0xff]   ;;  %v1598_v8 = vld [vmem:[%s2402_s0 + $0x30] sm:$0xff]   ;;  %v1609_v10 = vld [vmem:[%s2402_s0 + $0x88] sm:$0xff]  }
   0x4   :  { %1524 = vmatprep.mubr.msk.bf16.mxu0 %vm245_vm1, %v1592_v2  ;;  %v1608_v9 = vld [vmem:[%s2402_s0 + $0x80] sm:$0xff]   ;;  %v1610_v11 = vld [vmem:[%s2402_s0 + $0x90] sm:$0xff]   ;;  %v1599_v12 = vld [vmem:[%s2402_s0 + $0x38] sm:$0xff]  }
   0x5   :  { %1556 = vmatprep.mubr.msk.bf16.mxu1 %vm245_vm1, %v1608_v9  ;;  %v1611_v13 = vld [vmem:[%s2402_s0 + $0x98] sm:$0xff]   ;;  %v1612_v14 = vld [vmem:[%s2402_s0 + $0xa0] sm:$0xff]   ;;  %v1613_v16 = vld [vmem:[%s2402_s0 + $0xa8] sm:$0xff]  }
   0x6   :  { %1525 = vmatmul.mubr.msk.bf16.vlgmr.msra.gmra.mrb[0].mxu0 %vm245_vm1, %v1593_v3  ;;  %1557 = vmatmul.mubr.msk.bf16.vlgmr.msra.gmra.mrb[0].mxu1 %vm245_vm1, %v1609_v10  ;;  %v1600_v15 = vld [vmem:[%s2402_s0 + $0x40] sm:$0xff]   ;;  %v1601_v17 = vld [vmem:[%s2402_s0 + $0x48] sm:$0xff]   ;;  %v1614_v18 = vld [vmem:[%s2402_s0 + $0xb0] sm:$0xff]  }
   0x7   :  { %1528 = vmatprep.mubr.msk.bf16.mxu0 %vm245_vm1, %v1594_v4  ;;  %1560 = vmatprep.mubr.msk.bf16.mxu1 %vm245_vm1, %v1610_v11  ;;  %v1602_v19 = vld [vmem:[%s2402_s0 + $0x50] sm:$0xff]   ;;  %v1615_v20 = vld [vmem:[%s2402_s0 + $0xb8] sm:$0xff]   ;;  %v1616_v22 = vld [vmem:[%s2402_s0 + $0xc0] sm:$0xff]  }
   0x8   :  { %v1603_v21 = vld [vmem:[%s2402_s0 + $0x58] sm:$0xff]   ;;  %v1604_v23 = vld [vmem:[%s2402_s0 + $0x60] sm:$0xff]   ;;  %v1617_v24 = vld [vmem:[%s2402_s0 + $0xc8] sm:$0xff]  }
   0x9   :  { %v1605_v25 = vld [vmem:[%s2402_s0 + $0x68] sm:$0xff]   ;;  %v1618_v26 = vld [vmem:[%s2402_s0 + $0xd0] sm:$0xff]   ;;  %v1619_v28 = vld [vmem:[%s2402_s0 + $0xd8] sm:$0xff]  }
   0xa   :  { %v1606_v27 = vld [vmem:[%s2402_s0 + $0x70] sm:$0xff]   ;;  %v1607_v29 = vld [vmem:[%s2402_s0 + $0x78] sm:$0xff]   ;;  %v1620_v30 = vld [vmem:[%s2402_s0 + $0xe0] sm:$0xff]  }
   0xb   :  { %v1621_v31 = vld [vmem:[%s2402_s0 + $0xe8] sm:$0xff]   ;;  %v1622_v32 = vld [vmem:[%s2402_s0 + $0xf0] sm:$0xff]   ;;  %v1623_v33 = vld [vmem:[%s2402_s0 + $0xf8] sm:$0xff]  }
   0xe   :  { %1529 = vmatmul.mubr.msk.bf16.gmra.mrb[4].mxu0 %vm245_vm1, %v1595_v5  ;;  %1561 = vmatmul.mubr.msk.bf16.gmra.mrb[4].mxu1 %vm245_vm1, %v1611_v13 }
   0xf   :  { %1532 = vmatprep.mubr.msk.bf16.mxu0 %vm245_vm1, %v1596_v6  ;;  %1564 = vmatprep.mubr.msk.bf16.mxu1 %vm245_vm1, %v1612_v14 }
  0x16   :  { %1533 = vmatmul.mubr.msk.bf16.gmra.mrb[8].mxu0 %vm245_vm1, %v1597_v7  ;;  %1565 = vmatmul.mubr.msk.bf16.gmra.mrb[8].mxu1 %vm245_vm1, %v1613_v16 }
  0x17   :  { %1536 = vmatprep.mubr.msk.bf16.mxu0 %vm245_vm1, %v1598_v8  ;;  %1568 = vmatprep.mubr.msk.bf16.mxu1 %vm245_vm1, %v1614_v18 }
  0x1e   :  { %1537 = vmatmul.mubr.msk.bf16.gmra.mrb[12].mxu0 %vm245_vm1, %v1599_v12  ;;  %1569 = vmatmul.mubr.msk.bf16.gmra.mrb[12].mxu1 %vm245_vm1, %v1615_v20 }
  0x1f   :  { %1540 = vmatprep.mubr.msk.bf16.mxu0 %vm245_vm1, %v1600_v15  ;;  %1572 = vmatprep.mubr.msk.bf16.mxu1 %vm245_vm1, %v1616_v22 }
  0x26   :  { %1541 = vmatmul.mubr.msk.bf16.gmra.mrb[16].mxu0 %vm245_vm1, %v1601_v17  ;;  %1573 = vmatmul.mubr.msk.bf16.gmra.mrb[16].mxu1 %vm245_vm1, %v1617_v24 }
  0x27   :  { %1544 = vmatprep.mubr.msk.bf16.mxu0 %vm245_vm1, %v1602_v19  ;;  %1576 = vmatprep.mubr.msk.bf16.mxu1 %vm245_vm1, %v1618_v26 }
  0x2e   :  { %1545 = vmatmul.mubr.msk.bf16.gmra.mrb[20].mxu0 %vm245_vm1, %v1603_v21  ;;  %1577 = vmatmul.mubr.msk.bf16.gmra.mrb[20].mxu1 %vm245_vm1, %v1619_v28 }
  0x2f   :  { %1548 = vmatprep.mubr.msk.bf16.mxu0 %vm245_vm1, %v1604_v23  ;;  %1580 = vmatprep.mubr.msk.bf16.mxu1 %vm245_vm1, %v1620_v30 }
  0x36   :  { %1549 = vmatmul.mubr.msk.bf16.gmra.mrb[24].mxu0 %vm245_vm1, %v1605_v25  ;;  %1581 = vmatmul.mubr.msk.bf16.gmra.mrb[24].mxu1 %vm245_vm1, %v1621_v31 }
  0x37   :  { %1552 = vmatprep.mubr.msk.bf16.mxu0 %vm245_vm1, %v1606_v27  ;;  %1584 = vmatprep.mubr.msk.bf16.mxu1 %vm245_vm1, %v1622_v32 }
  0x3e   :  { %1553 = vmatmul.mubr.msk.bf16.gmra.mrb[28].mxu0 %vm245_vm1, %v1607_v29  ;;  %1585 = vmatmul.mubr.msk.bf16.gmra.mrb[28].mxu1 %vm245_vm1, %v1623_v33 }
  0xd9   :  { %v1526_v34 = vpop.f32.mrb[0].mxu0  ;;  %v1830_v16 = vpop.f32.mrb[0].mxu1 }
  0xda   :  { %v1427_v35 = vpack.c.bf16 %v1526_v34, %v1526_v34  ;;  %v380_v36 = vpop.f32.mrb[1].mxu0  ;;  %v1093_v40 = vmul.f32 %v1526_v34, %v1526_v34  ;;  %v959_v49 = vsel %vm245_vm1, %v1526_v34, 0.0  ;;  %v1459_v20 = vpack.c.bf16 %v1830_v16, %v1830_v16  ;;  %v1834_v21 = vpop.f32.mrb[1].mxu1 }
  0xdb   :  { %v1425_v37 = vpack.c.bf16 %v380_v36, %v380_v36  ;;  %v1091_v38 = vmul.f32 %v380_v36, %v380_v36  ;;  %v1527_v39 = vpop.f32.mrb[2].mxu0  ;;  %v956_v43 = vsel %vm245_vm1, %v380_v36, 0.0  ;;  %v1838_v26 = vpop.f32.mrb[2].mxu1 }
  0xdc   :  { %894 = vst.msk [vmem:[%s2403_s4 + $0x8] sm:$0xf] %vm891_vm2, %v1427_v35  ;;  %v1428_v41 = vpack.c.bf16 %v1527_v39, %v1527_v39  ;;  %v383_v42 = vpop.f32.mrb[3].mxu0  ;;  %v1094_v47 = vmul.f32 %v1527_v39, %v1527_v39  ;;  %v1158_v54 = vsel %vm245_vm1, %v1093_v40, 0.0  ;;  %v961_v56 = vsel %vm245_vm1, %v1527_v39, 0.0  ;;  %v1845_v32 = vpop.f32.mrb[3].mxu1 }
  0xdd   :  { %892 = vst.msk [vmem:[%s2403_s4] sm:$0xf] %vm891_vm2, %v1425_v37  ;;  %v1426_v44 = vpack.c.bf16 %v383_v42, %v383_v42  ;;  %v957_v45 = vsel %vm245_vm1, %v383_v42, 0.0  ;;  %v1092_v46 = vmul.f32 %v383_v42, %v383_v42  ;;  %v1155_v50 = vsel %vm245_vm1, %v1091_v38, 0.0  ;;  %926 = vst.msk [vmem:[%s2403_s4 + $0x88] sm:$0xf] %vm891_vm2, %v1459_v20 }
  0xde   :  { %895 = vst.msk [vmem:[%s2403_s4 + $0xc] sm:$0xf] %vm891_vm2, %v1428_v41  ;;  %v958_v48 = vadd.f32 %v957_v45, %v956_v43  ;;  %v1160_v57 = vsel %vm245_vm1, %v1094_v47, 0.0 }
  0xdf   :  { %893 = vst.msk [vmem:[%s2403_s4 + $0x4] sm:$0xf] %vm891_vm2, %v1426_v44  ;;  %v1156_v51 = vsel %vm245_vm1, %v1092_v46, 0.0  ;;  %v1457_v46 = vpack.c.bf16 %v1834_v21, %v1834_v21 }
  0xe0   :  { %v960_v52 = vadd.f32 %v959_v49, %v958_v48  ;;  %v1157_v53 = vadd.f32 %v1156_v51, %v1155_v50  ;;  %v1460_v50 = vpack.c.bf16 %v1838_v26, %v1838_v26 }
  0xe1   :  { %v1530_v55 = vpop.f32.mrb[4].mxu0  ;;  %v1872_v51 = vpop.f32.mrb[4].mxu1  ;;  %924 = vst.msk [vmem:[%s2403_s4 + $0x80] sm:$0xf] %vm891_vm2, %v1457_v46 }
  0xe2   :  { %v1159_v58 = vadd.f32 %v1158_v54, %v1157_v53  ;;  %v1431_v59 = vpack.c.bf16 %v1530_v55, %v1530_v55  ;;  %v396_v60 = vpop.f32.mrb[5].mxu0  ;;  %v962_v62 = vadd.f32 %v961_v56, %v960_v52  ;;  %v1097_v8 = vmul.f32 %v1530_v55, %v1530_v55  ;;  %927 = vst.msk [vmem:[%s2403_s4 + $0x8c] sm:$0xf] %vm891_vm2, %v1460_v50 }
  0xe3   :  { %v1429_v61 = vpack.c.bf16 %v396_v60, %v396_v60  ;;  %v963_v63 = vsel %vm245_vm1, %v396_v60, 0.0  ;;  %v1095_v0 = vmul.f32 %v396_v60, %v396_v60  ;;  %v1531_v1 = vpop.f32.mrb[6].mxu0  ;;  %v967_v13 = vsel %vm245_vm1, %v1530_v55, 0.0  ;;  %v1878_v55 = vpop.f32.mrb[5].mxu1 }
  0xe4   :  { %898 = vst.msk [vmem:[%s2403_s4 + $0x18] sm:$0xf] %vm891_vm2, %v1431_v59  ;;  %v1161_v2 = vadd.f32 %v1160_v57, %v1159_v58  ;;  %v1432_v3 = vpack.c.bf16 %v1531_v1, %v1531_v1  ;;  %v399_v4 = vpop.f32.mrb[7].mxu0  ;;  %v964_v5 = vadd.f32 %v963_v63, %v962_v62  ;;  %v1098_v14 = vmul.f32 %v1531_v1, %v1531_v1  ;;  %v1886_v60 = vpop.f32.mrb[6].mxu1 }
  0xe5   :  { %896 = vst.msk [vmem:[%s2403_s4 + $0x10] sm:$0xf] %vm891_vm2, %v1429_v61  ;;  %v1162_v6 = vsel %vm245_vm1, %v1095_v0, 0.0  ;;  %v1430_v7 = vpack.c.bf16 %v399_v4, %v399_v4  ;;  %v965_v10 = vsel %vm245_vm1, %v399_v4, 0.0  ;;  %v1096_v11 = vmul.f32 %v399_v4, %v399_v4 }
  0xe6   :  { %v1163_v9 = vadd.f32 %v1162_v6, %v1161_v2  ;;  %899 = vst.msk [vmem:[%s2403_s4 + $0x1c] sm:$0xf] %vm891_vm2, %v1432_v3  ;;  %v966_v12 = vadd.f32 %v965_v10, %v964_v5  ;;  %v1166_v22 = vsel %vm245_vm1, %v1097_v8, 0.0  ;;  %v969_v23 = vsel %vm245_vm1, %v1531_v1, 0.0  ;;  %v1889_v2 = vpop.f32.mrb[7].mxu1 }
  0xe7   :  { %897 = vst.msk [vmem:[%s2403_s4 + $0x14] sm:$0xf] %vm891_vm2, %v1430_v7  ;;  %v1164_v15 = vsel %vm245_vm1, %v1096_v11, 0.0  ;;  %v1168_v33 = vsel %vm245_vm1, %v1098_v14, 0.0 }
  0xe8   :  { %v968_v17 = vadd.f32 %v967_v13, %v966_v12  ;;  %v1165_v18 = vadd.f32 %v1164_v15, %v1163_v9 }
  0xe9   :  { %v1534_v19 = vpop.f32.mrb[8].mxu0 }
  0xea   :  { %v1435_v24 = vpack.c.bf16 %v1534_v19, %v1534_v19  ;;  %v412_v25 = vpop.f32.mrb[9].mxu0  ;;  %v1167_v27 = vadd.f32 %v1166_v22, %v1165_v18  ;;  %v970_v29 = vadd.f32 %v969_v23, %v968_v17  ;;  %v1101_v40 = vmul.f32 %v1534_v19, %v1534_v19  ;;  %v1916_v23 = vpop.f32.mrb[8].mxu1 }
  0xeb   :  { %v1433_v28 = vpack.c.bf16 %v412_v25, %v412_v25  ;;  %v971_v30 = vsel %vm245_vm1, %v412_v25, 0.0  ;;  %v1535_v31 = vpop.f32.mrb[10].mxu0  ;;  %v1099_v34 = vmul.f32 %v412_v25, %v412_v25  ;;  %v975_v47 = vsel %vm245_vm1, %v1534_v19, 0.0 }
  0xec   :  { %902 = vst.msk [vmem:[%s2403_s4 + $0x28] sm:$0xf] %vm891_vm2, %v1435_v24  ;;  %v1436_v35 = vpack.c.bf16 %v1535_v31, %v1535_v31  ;;  %v415_v36 = vpop.f32.mrb[11].mxu0  ;;  %v972_v37 = vadd.f32 %v971_v30, %v970_v29  ;;  %v1169_v38 = vadd.f32 %v1168_v33, %v1167_v27  ;;  %v1102_v48 = vmul.f32 %v1535_v31, %v1535_v31 }
  0xed   :  { %900 = vst.msk [vmem:[%s2403_s4 + $0x20] sm:$0xf] %vm891_vm2, %v1433_v28  ;;  %v1434_v39 = vpack.c.bf16 %v415_v36, %v415_v36  ;;  %v1170_v41 = vsel %vm245_vm1, %v1099_v34, 0.0  ;;  %v973_v42 = vsel %vm245_vm1, %v415_v36, 0.0  ;;  %v1100_v43 = vmul.f32 %v415_v36, %v415_v36  ;;  %v1922_v28 = vpop.f32.mrb[9].mxu1 }
  0xee   :  { %903 = vst.msk [vmem:[%s2403_s4 + $0x2c] sm:$0xf] %vm891_vm2, %v1436_v35  ;;  %v1171_v44 = vadd.f32 %v1170_v41, %v1169_v38  ;;  %v974_v45 = vadd.f32 %v973_v42, %v972_v37  ;;  %v1174_v56 = vsel %vm245_vm1, %v1101_v40, 0.0  ;;  %v977_v57 = vsel %vm245_vm1, %v1535_v31, 0.0  ;;  %v1930_v34 = vpop.f32.mrb[10].mxu1 }
  0xef   :  { %901 = vst.msk [vmem:[%s2403_s4 + $0x24] sm:$0xf] %vm891_vm2, %v1434_v39  ;;  %v1172_v49 = vsel %vm245_vm1, %v1100_v43, 0.0  ;;  %v1176_v3 = vsel %vm245_vm1, %v1102_v48, 0.0  ;;  %v1458_v17 = vpack.c.bf16 %v1845_v32, %v1845_v32  ;;  %v1463_v22 = vpack.c.bf16 %v1872_v51, %v1872_v51  ;;  %v1933_v40 = vpop.f32.mrb[11].mxu1 }
  0xf0   :  { %v976_v52 = vadd.f32 %v975_v47, %v974_v45  ;;  %v1173_v53 = vadd.f32 %v1172_v49, %v1171_v44 }
  0xf1   :  { %v1538_v54 = vpop.f32.mrb[12].mxu0  ;;  %925 = vst.msk [vmem:[%s2403_s4 + $0x84] sm:$0xf] %vm891_vm2, %v1458_v17  ;;  %930 = vst.msk [vmem:[%s2403_s4 + $0x98] sm:$0xf] %vm891_vm2, %v1463_v22 }
  0xf2   :  { %v1439_v58 = vpack.c.bf16 %v1538_v54, %v1538_v54  ;;  %v428_v59 = vpop.f32.mrb[13].mxu0  ;;  %v1175_v61 = vadd.f32 %v1174_v56, %v1173_v53  ;;  %v978_v63 = vadd.f32 %v977_v57, %v976_v52  ;;  %v1105_v10 = vmul.f32 %v1538_v54, %v1538_v54 }
  0xf3   :  { %v1437_v62 = vpack.c.bf16 %v428_v59, %v428_v59  ;;  %v979_v0 = vsel %vm245_vm1, %v428_v59, 0.0  ;;  %v1539_v1 = vpop.f32.mrb[14].mxu0  ;;  %v1103_v4 = vmul.f32 %v428_v59, %v428_v59  ;;  %v983_v18 = vsel %vm245_vm1, %v1538_v54, 0.0 }
  0xf4   :  { %906 = vst.msk [vmem:[%s2403_s4 + $0x38] sm:$0xf] %vm891_vm2, %v1439_v58  ;;  %v1440_v5 = vpack.c.bf16 %v1539_v1, %v1539_v1  ;;  %v431_v6 = vpop.f32.mrb[15].mxu0  ;;  %v980_v7 = vadd.f32 %v979_v0, %v978_v63  ;;  %v1177_v8 = vadd.f32 %v1176_v3, %v1175_v61  ;;  %v1106_v19 = vmul.f32 %v1539_v1, %v1539_v1 }
  0xf5   :  { %904 = vst.msk [vmem:[%s2403_s4 + $0x30] sm:$0xf] %vm891_vm2, %v1437_v62  ;;  %v1438_v9 = vpack.c.bf16 %v431_v6, %v431_v6  ;;  %v1178_v11 = vsel %vm245_vm1, %v1103_v4, 0.0  ;;  %v981_v12 = vsel %vm245_vm1, %v431_v6, 0.0  ;;  %v1104_v13 = vmul.f32 %v431_v6, %v431_v6  ;;  %v1960_v62 = vpop.f32.mrb[12].mxu1 }
  0xf6   :  { %907 = vst.msk [vmem:[%s2403_s4 + $0x3c] sm:$0xf] %vm891_vm2, %v1440_v5  ;;  %v1179_v14 = vadd.f32 %v1178_v11, %v1177_v8  ;;  %v982_v15 = vadd.f32 %v981_v12, %v980_v7  ;;  %v1182_v29 = vsel %vm245_vm1, %v1105_v10, 0.0  ;;  %v985_v30 = vsel %vm245_vm1, %v1539_v1, 0.0  ;;  %v1966_v3 = vpop.f32.mrb[13].mxu1 }
  0xf7   :  { %905 = vst.msk [vmem:[%s2403_s4 + $0x34] sm:$0xf] %vm891_vm2, %v1438_v9  ;;  %v1180_v20 = vsel %vm245_vm1, %v1104_v13, 0.0  ;;  %v1184_v41 = vsel %vm245_vm1, %v1106_v19, 0.0  ;;  %v1461_v56 = vpack.c.bf16 %v1878_v55, %v1878_v55  ;;  %v1464_v61 = vpack.c.bf16 %v1886_v60, %v1886_v60  ;;  %v1974_v8 = vpop.f32.mrb[14].mxu1 }
  0xf8   :  { %v984_v24 = vadd.f32 %v983_v18, %v982_v15  ;;  %v1181_v25 = vadd.f32 %v1180_v20, %v1179_v14  ;;  %v1977_v14 = vpop.f32.mrb[15].mxu1 }
  0xf9   :  { %v1542_v27 = vpop.f32.mrb[16].mxu0  ;;  %928 = vst.msk [vmem:[%s2403_s4 + $0x90] sm:$0xf] %vm891_vm2, %v1461_v56  ;;  %931 = vst.msk [vmem:[%s2403_s4 + $0x9c] sm:$0xf] %vm891_vm2, %v1464_v61 }
  0xfa   :  { %v1443_v31 = vpack.c.bf16 %v1542_v27, %v1542_v27  ;;  %v444_v33 = vpop.f32.mrb[17].mxu0  ;;  %v1183_v35 = vadd.f32 %v1182_v29, %v1181_v25  ;;  %v986_v37 = vadd.f32 %v985_v30, %v984_v24  ;;  %v1109_v48 = vmul.f32 %v1542_v27, %v1542_v27 }
  0xfb   :  { %v1441_v36 = vpack.c.bf16 %v444_v33, %v444_v33  ;;  %v987_v38 = vsel %vm245_vm1, %v444_v33, 0.0  ;;  %v1543_v39 = vpop.f32.mrb[18].mxu0  ;;  %v1107_v42 = vmul.f32 %v444_v33, %v444_v33  ;;  %v991_v57 = vsel %vm245_vm1, %v1542_v27, 0.0 }
  0xfc   :  { %910 = vst.msk [vmem:[%s2403_s4 + $0x48] sm:$0xf] %vm891_vm2, %v1443_v31  ;;  %v1444_v43 = vpack.c.bf16 %v1543_v39, %v1543_v39  ;;  %v447_v44 = vpop.f32.mrb[19].mxu0  ;;  %v988_v45 = vadd.f32 %v987_v38, %v986_v37  ;;  %v1185_v46 = vadd.f32 %v1184_v41, %v1183_v35  ;;  %v1110_v58 = vmul.f32 %v1543_v39, %v1543_v39  ;;  %v2004_v41 = vpop.f32.mrb[16].mxu1 }
  0xfd   :  { %908 = vst.msk [vmem:[%s2403_s4 + $0x40] sm:$0xf] %vm891_vm2, %v1441_v36  ;;  %v1442_v47 = vpack.c.bf16 %v447_v44, %v447_v44  ;;  %v1186_v49 = vsel %vm245_vm1, %v1107_v42, 0.0  ;;  %v989_v50 = vsel %vm245_vm1, %v447_v44, 0.0  ;;  %v1108_v52 = vmul.f32 %v447_v44, %v447_v44 }
  0xfe   :  { %911 = vst.msk [vmem:[%s2403_s4 + $0x4c] sm:$0xf] %vm891_vm2, %v1444_v43  ;;  %v1187_v53 = vadd.f32 %v1186_v49, %v1185_v46  ;;  %v990_v54 = vadd.f32 %v989_v50, %v988_v45  ;;  %v1190_v4 = vsel %vm245_vm1, %v1109_v48, 0.0  ;;  %v993_v5 = vsel %vm245_vm1, %v1543_v39, 0.0  ;;  %v2010_v45 = vpop.f32.mrb[17].mxu1 }
  0xff   :  { %909 = vst.msk [vmem:[%s2403_s4 + $0x44] sm:$0xf] %vm891_vm2, %v1442_v47  ;;  %v1188_v59 = vsel %vm245_vm1, %v1108_v52, 0.0  ;;  %v1192_v15 = vsel %vm245_vm1, %v1110_v58, 0.0  ;;  %v1462_v35 = vpack.c.bf16 %v1889_v2, %v1889_v2  ;;  %v1467_v39 = vpack.c.bf16 %v1916_v23, %v1916_v23  ;;  %v2018_v50 = vpop.f32.mrb[18].mxu1 }
 0x100   :  { %v992_v63 = vadd.f32 %v991_v57, %v990_v54  ;;  %v1189_v0 = vadd.f32 %v1188_v59, %v1187_v53  ;;  %v2021_v58 = vpop.f32.mrb[19].mxu1 }
 0x101   :  { %v1546_v1 = vpop.f32.mrb[20].mxu0  ;;  %929 = vst.msk [vmem:[%s2403_s4 + $0x94] sm:$0xf] %vm891_vm2, %v1462_v35  ;;  %934 = vst.msk [vmem:[%s2403_s4 + $0xa8] sm:$0xf] %vm891_vm2, %v1467_v39 }
 0x102   :  { %v1447_v6 = vpack.c.bf16 %v1546_v1, %v1546_v1  ;;  %v460_v7 = vpop.f32.mrb[21].mxu0  ;;  %v1191_v9 = vadd.f32 %v1190_v4, %v1189_v0  ;;  %v994_v11 = vadd.f32 %v993_v5, %v992_v63  ;;  %v1113_v25 = vmul.f32 %v1546_v1, %v1546_v1 }
 0x103   :  { %v1445_v10 = vpack.c.bf16 %v460_v7, %v460_v7  ;;  %v995_v12 = vsel %vm245_vm1, %v460_v7, 0.0  ;;  %v1547_v13 = vpop.f32.mrb[22].mxu0  ;;  %v1111_v17 = vmul.f32 %v460_v7, %v460_v7  ;;  %v999_v36 = vsel %vm245_vm1, %v1546_v1, 0.0 }
 0x104   :  { %914 = vst.msk [vmem:[%s2403_s4 + $0x58] sm:$0xf] %vm891_vm2, %v1447_v6  ;;  %v1448_v18 = vpack.c.bf16 %v1547_v13, %v1547_v13  ;;  %v463_v19 = vpop.f32.mrb[23].mxu0  ;;  %v996_v20 = vadd.f32 %v995_v12, %v994_v11  ;;  %v1193_v22 = vadd.f32 %v1192_v15, %v1191_v9  ;;  %v1114_v37 = vmul.f32 %v1547_v13, %v1547_v13 }
 0x105   :  { %912 = vst.msk [vmem:[%s2403_s4 + $0x50] sm:$0xf] %vm891_vm2, %v1445_v10  ;;  %v1446_v24 = vpack.c.bf16 %v463_v19, %v463_v19  ;;  %v1194_v27 = vsel %vm245_vm1, %v1111_v17, 0.0  ;;  %v997_v29 = vsel %vm245_vm1, %v463_v19, 0.0  ;;  %v1112_v30 = vmul.f32 %v463_v19, %v463_v19 }
 0x106   :  { %915 = vst.msk [vmem:[%s2403_s4 + $0x5c] sm:$0xf] %vm891_vm2, %v1448_v18  ;;  %v1195_v31 = vadd.f32 %v1194_v27, %v1193_v22  ;;  %v998_v33 = vadd.f32 %v997_v29, %v996_v20  ;;  %v1198_v46 = vsel %vm245_vm1, %v1113_v25, 0.0  ;;  %v1001_v47 = vsel %vm245_vm1, %v1547_v13, 0.0  ;;  %v2048_v20 = vpop.f32.mrb[20].mxu1 }
 0x107   :  { %913 = vst.msk [vmem:[%s2403_s4 + $0x54] sm:$0xf] %vm891_vm2, %v1446_v24  ;;  %v1196_v38 = vsel %vm245_vm1, %v1112_v30, 0.0  ;;  %v1200_v59 = vsel %vm245_vm1, %v1114_v37, 0.0  ;;  %v1465_v13 = vpack.c.bf16 %v1922_v28, %v1922_v28  ;;  %v1468_v19 = vpack.c.bf16 %v1930_v34, %v1930_v34  ;;  %v2054_v27 = vpop.f32.mrb[21].mxu1 }
 0x108   :  { %v1000_v42 = vadd.f32 %v999_v36, %v998_v33  ;;  %v1197_v43 = vadd.f32 %v1196_v38, %v1195_v31  ;;  %v2062_v35 = vpop.f32.mrb[22].mxu1 }
 0x109   :  { %v1550_v44 = vpop.f32.mrb[24].mxu0  ;;  %932 = vst.msk [vmem:[%s2403_s4 + $0xa0] sm:$0xf] %vm891_vm2, %v1465_v13  ;;  %935 = vst.msk [vmem:[%s2403_s4 + $0xac] sm:$0xf] %vm891_vm2, %v1468_v19 }
 0x10a   :  { %v1451_v48 = vpack.c.bf16 %v1550_v44, %v1550_v44  ;;  %v476_v49 = vpop.f32.mrb[25].mxu0  ;;  %v1199_v52 = vadd.f32 %v1198_v46, %v1197_v43  ;;  %v1002_v54 = vadd.f32 %v1001_v47, %v1000_v42  ;;  %v1117_v6 = vmul.f32 %v1550_v44, %v1550_v44  ;;  %v2065_v43 = vpop.f32.mrb[23].mxu1 }
 0x10b   :  { %v1449_v53 = vpack.c.bf16 %v476_v49, %v476_v49  ;;  %v1003_v56 = vsel %vm245_vm1, %v476_v49, 0.0  ;;  %v1551_v57 = vpop.f32.mrb[26].mxu0  ;;  %v1115_v61 = vmul.f32 %v476_v49, %v476_v49  ;;  %v1007_v15 = vsel %vm245_vm1, %v1550_v44, 0.0 }
 0x10c   :  { %918 = vst.msk [vmem:[%s2403_s4 + $0x68] sm:$0xf] %vm891_vm2, %v1451_v48  ;;  %v1452_v63 = vpack.c.bf16 %v1551_v57, %v1551_v57  ;;  %v479_v0 = vpop.f32.mrb[27].mxu0  ;;  %v1004_v1 = vadd.f32 %v1003_v56, %v1002_v54  ;;  %v1201_v4 = vadd.f32 %v1200_v59, %v1199_v52  ;;  %v1118_v17 = vmul.f32 %v1551_v57, %v1551_v57 }
 0x10d   :  { %916 = vst.msk [vmem:[%s2403_s4 + $0x60] sm:$0xf] %vm891_vm2, %v1449_v53  ;;  %v1450_v5 = vpack.c.bf16 %v479_v0, %v479_v0  ;;  %v1202_v7 = vsel %vm245_vm1, %v1115_v61, 0.0  ;;  %v1005_v9 = vsel %vm245_vm1, %v479_v0, 0.0  ;;  %v1116_v10 = vmul.f32 %v479_v0, %v479_v0 }
 0x10e   :  { %919 = vst.msk [vmem:[%s2403_s4 + $0x6c] sm:$0xf] %vm891_vm2, %v1452_v63  ;;  %v1203_v11 = vadd.f32 %v1202_v7, %v1201_v4  ;;  %v1006_v12 = vadd.f32 %v1005_v9, %v1004_v1  ;;  %v1206_v29 = vsel %vm245_vm1, %v1117_v6, 0.0  ;;  %v1009_v30 = vsel %vm245_vm1, %v1551_v57, 0.0  ;;  %v2094_v9 = vpop.f32.mrb[24].mxu1 }
 0x10f   :  { %917 = vst.msk [vmem:[%s2403_s4 + $0x64] sm:$0xf] %vm891_vm2, %v1450_v5  ;;  %v1204_v18 = vsel %vm245_vm1, %v1116_v10, 0.0  ;;  %v1208_v44 = vsel %vm245_vm1, %v1118_v17, 0.0  ;;  %v1123_v0 = vmul.f32 %v1834_v21, %v1834_v21  ;;  %v1466_v1 = vpack.c.bf16 %v1933_v40, %v1933_v40 }
 0x110   :  { %v1008_v22 = vadd.f32 %v1007_v15, %v1006_v12  ;;  %v1205_v24 = vadd.f32 %v1204_v18, %v1203_v11  ;;  %v1471_v7 = vpack.c.bf16 %v1960_v62, %v1960_v62  ;;  %v2100_v12 = vpop.f32.mrb[25].mxu1  ;;  %v1019_v17 = vsel %vm245_vm1, %v1834_v21, 0.0 }
 0x111   :  { %v1554_v25 = vpop.f32.mrb[28].mxu0  ;;  %933 = vst.msk [vmem:[%s2403_s4 + $0xa4] sm:$0xf] %vm891_vm2, %v1466_v1  ;;  %v1469_v18 = vpack.c.bf16 %v1966_v3, %v1966_v3  ;;  %v2112_v19 = vpop.f32.mrb[26].mxu1  ;;  %v1218_v21 = vsel %vm245_vm1, %v1123_v0, 0.0  ;;  %v1474_v0 = vpack.c.bf16 %v2021_v58, %v2021_v58 }
 0x112   :  { %v1455_v31 = vpack.c.bf16 %v1554_v25, %v1554_v25  ;;  %v492_v33 = vpop.f32.mrb[29].mxu0  ;;  %v1207_v36 = vadd.f32 %v1206_v29, %v1205_v24  ;;  %v1010_v38 = vadd.f32 %v1009_v30, %v1008_v22  ;;  %v1121_v54 = vmul.f32 %v1554_v25, %v1554_v25  ;;  %938 = vst.msk [vmem:[%s2403_s4 + $0xb8] sm:$0xf] %vm891_vm2, %v1471_v7  ;;  %v2116_v29 = vpop.f32.mrb[27].mxu1 }
 0x113   :  { %v1453_v37 = vpack.c.bf16 %v492_v33, %v492_v33  ;;  %v1011_v39 = vsel %vm245_vm1, %v492_v33, 0.0  ;;  %v1555_v42 = vpop.f32.mrb[30].mxu0  ;;  %v1119_v46 = vmul.f32 %v492_v33, %v492_v33  ;;  %v1015_v4 = vsel %vm245_vm1, %v1554_v25, 0.0  ;;  %936 = vst.msk [vmem:[%s2403_s4 + $0xb0] sm:$0xf] %vm891_vm2, %v1469_v18 }
 0x114   :  { %922 = vst.msk [vmem:[%s2403_s4 + $0x78] sm:$0xf] %vm891_vm2, %v1455_v31  ;;  %v1456_v47 = vpack.c.bf16 %v1555_v42, %v1555_v42  ;;  %v495_v48 = vpop.f32.mrb[31].mxu0  ;;  %v1012_v49 = vadd.f32 %v1011_v39, %v1010_v38  ;;  %v1209_v52 = vadd.f32 %v1208_v44, %v1207_v36  ;;  %v1122_v5 = vmul.f32 %v1555_v42, %v1555_v42 }
 0x115   :  { %920 = vst.msk [vmem:[%s2403_s4 + $0x70] sm:$0xf] %vm891_vm2, %v1453_v37  ;;  %v1454_v53 = vpack.c.bf16 %v495_v48, %v495_v48  ;;  %v1210_v56 = vsel %vm245_vm1, %v1119_v46, 0.0  ;;  %v1013_v57 = vsel %vm245_vm1, %v495_v48, 0.0  ;;  %v1120_v59 = vmul.f32 %v495_v48, %v495_v48  ;;  %941 = vst.msk [vmem:[%s2403_s4 + $0xc4] sm:$0xf] %vm891_vm2, %v1474_v0 }
 0x116   :  { %923 = vst.msk [vmem:[%s2403_s4 + $0x7c] sm:$0xf] %vm891_vm2, %v1456_v47  ;;  %v1211_v61 = vadd.f32 %v1210_v56, %v1209_v52  ;;  %v1014_v63 = vadd.f32 %v1013_v57, %v1012_v49  ;;  %v1214_v13 = vsel %vm245_vm1, %v1121_v54, 0.0  ;;  %v1017_v15 = vsel %vm245_vm1, %v1555_v42, 0.0 }
 0x117   :  { %921 = vst.msk [vmem:[%s2403_s4 + $0x74] sm:$0xf] %vm891_vm2, %v1454_v53  ;;  %v1212_v6 = vsel %vm245_vm1, %v1120_v59, 0.0  ;;  %v1472_v25 = vpack.c.bf16 %v1974_v8, %v1974_v8  ;;  %v1216_v30 = vsel %vm245_vm1, %v1122_v5, 0.0  ;;  %v1124_v31 = vmul.f32 %v1845_v32, %v1845_v32  ;;  %v2157_v53 = vpop.f32.mrb[28].mxu1 }
 0x118   :  { %v1016_v10 = vadd.f32 %v1015_v4, %v1014_v63  ;;  %v1213_v11 = vadd.f32 %v1212_v6, %v1211_v61  ;;  %v1470_v33 = vpack.c.bf16 %v1977_v14, %v1977_v14  ;;  %v1125_v38 = vmul.f32 %v1830_v16, %v1830_v16  ;;  %v2163_v57 = vpop.f32.mrb[29].mxu1 }
 0x119   :  { %939 = vst.msk [vmem:[%s2403_s4 + $0xbc] sm:$0xf] %vm891_vm2, %v1472_v25  ;;  %v1021_v39 = vsel %vm245_vm1, %v1845_v32, 0.0  ;;  %v1475_v42 = vpack.c.bf16 %v2004_v41, %v2004_v41  ;;  %v1023_v44 = vsel %vm245_vm1, %v1830_v16, 0.0  ;;  %v1473_v48 = vpack.c.bf16 %v2010_v45, %v2010_v45  ;;  %v2176_v1 = vpop.f32.mrb[30].mxu1 }
 0x11a   :  { %v1215_v22 = vadd.f32 %v1214_v13, %v1213_v11  ;;  %v1018_v24 = vadd.f32 %v1017_v15, %v1016_v10  ;;  %937 = vst.msk [vmem:[%s2403_s4 + $0xb4] sm:$0xf] %vm891_vm2, %v1470_v33  ;;  %v1126_v49 = vmul.f32 %v1838_v26, %v1838_v26  ;;  %v1220_v32 = vsel %vm245_vm1, %v1124_v31, 0.0  ;;  %v2180_v7 = vpop.f32.mrb[31].mxu1 }
 0x11b   :  { %v1127_v52 = vmul.f32 %v1878_v55, %v1878_v55  ;;  %942 = vst.msk [vmem:[%s2403_s4 + $0xc8] sm:$0xf] %vm891_vm2, %v1475_v42  ;;  %v1476_v16 = vpack.c.bf16 %v2018_v50, %v2018_v50  ;;  %940 = vst.msk [vmem:[%s2403_s4 + $0xc0] sm:$0xf] %vm891_vm2, %v1473_v48  ;;  %v1222_v59 = vsel %vm245_vm1, %v1125_v38, 0.0  ;;  %v1025_v61 = vsel %vm245_vm1, %v1838_v26, 0.0 }
 0x11c   :  { %v1020_v36 = vadd.f32 %v1019_v17, %v1018_v24  ;;  %v1217_v37 = vadd.f32 %v1216_v30, %v1215_v22  ;;  %v1027_v63 = vsel %vm245_vm1, %v1878_v55, 0.0  ;;  %v1479_v6 = vpack.c.bf16 %v2048_v20, %v2048_v20 }
 0x11d   :  { %943 = vst.msk [vmem:[%s2403_s4 + $0xcc] sm:$0xf] %vm891_vm2, %v1476_v16  ;;  %v1224_v26 = vsel %vm245_vm1, %v1126_v49, 0.0  ;;  %v1226_v55 = vsel %vm245_vm1, %v1127_v52, 0.0  ;;  %v1128_v10 = vmul.f32 %v1889_v2, %v1889_v2  ;;  %v1477_v11 = vpack.c.bf16 %v2054_v27, %v2054_v27 }
 0x11e   :  { %v1219_v46 = vadd.f32 %v1218_v21, %v1217_v37  ;;  %v1022_v47 = vadd.f32 %v1021_v39, %v1020_v36  ;;  %946 = vst.msk [vmem:[%s2403_s4 + $0xd8] sm:$0xf] %vm891_vm2, %v1479_v6  ;;  %v1129_v17 = vmul.f32 %v1872_v51, %v1872_v51  ;;  %v1029_v18 = vsel %vm245_vm1, %v1889_v2, 0.0 }
 0x11f   :  { %944 = vst.msk [vmem:[%s2403_s4 + $0xd0] sm:$0xf] %vm891_vm2, %v1477_v11  ;;  %v1480_v22 = vpack.c.bf16 %v2062_v35, %v2062_v35  ;;  %v1031_v24 = vsel %vm245_vm1, %v1872_v51, 0.0  ;;  %v1478_v21 = vpack.c.bf16 %v2065_v43, %v2065_v43  ;;  %v1130_v31 = vmul.f32 %v1886_v60, %v1886_v60 }
 0x120   :  { %v1024_v54 = vadd.f32 %v1023_v44, %v1022_v47  ;;  %v1221_v56 = vadd.f32 %v1220_v32, %v1219_v46  ;;  %v1228_v2 = vsel %vm245_vm1, %v1128_v10, 0.0  ;;  %v1131_v33 = vmul.f32 %v1922_v28, %v1922_v28 }
 0x121   :  { %947 = vst.msk [vmem:[%s2403_s4 + $0xdc] sm:$0xf] %vm891_vm2, %v1480_v22  ;;  %v1483_v51 = vpack.c.bf16 %v2094_v9, %v2094_v9  ;;  %945 = vst.msk [vmem:[%s2403_s4 + $0xd4] sm:$0xf] %vm891_vm2, %v1478_v21  ;;  %v1230_v38 = vsel %vm245_vm1, %v1129_v17, 0.0  ;;  %v1033_v39 = vsel %vm245_vm1, %v1886_v60, 0.0  ;;  %v1481_v44 = vpack.c.bf16 %v2100_v12, %v2100_v12 }
 0x122   :  { %v1223_v4 = vadd.f32 %v1222_v59, %v1221_v56  ;;  %v1026_v5 = vadd.f32 %v1025_v61, %v1024_v54  ;;  %v1035_v42 = vsel %vm245_vm1, %v1922_v28, 0.0  ;;  %v1484_v48 = vpack.c.bf16 %v2112_v19, %v2112_v19 }
 0x123   :  { %950 = vst.msk [vmem:[%s2403_s4 + $0xe8] sm:$0xf] %vm891_vm2, %v1483_v51  ;;  %v1232_v49 = vsel %vm245_vm1, %v1130_v31, 0.0  ;;  %v1234_v60 = vsel %vm245_vm1, %v1131_v33, 0.0  ;;  %v1132_v28 = vmul.f32 %v1933_v40, %v1933_v40  ;;  %948 = vst.msk [vmem:[%s2403_s4 + $0xe0] sm:$0xf] %vm891_vm2, %v1481_v44  ;;  %v1482_v32 = vpack.c.bf16 %v2116_v29, %v2116_v29 }
 0x124   :  { %v1028_v13 = vadd.f32 %v1027_v63, %v1026_v5  ;;  %v1225_v15 = vadd.f32 %v1224_v26, %v1223_v4  ;;  %951 = vst.msk [vmem:[%s2403_s4 + $0xec] sm:$0xf] %vm891_vm2, %v1484_v48  ;;  %v1133_v54 = vmul.f32 %v1916_v23, %v1916_v23  ;;  %v1037_v56 = vsel %vm245_vm1, %v1933_v40, 0.0 }
 0x125   :  { %949 = vst.msk [vmem:[%s2403_s4 + $0xe4] sm:$0xf] %vm891_vm2, %v1482_v32  ;;  %v1487_v59 = vpack.c.bf16 %v2157_v53, %v2157_v53  ;;  %v1039_v61 = vsel %vm245_vm1, %v1916_v23, 0.0  ;;  %v1485_v4 = vpack.c.bf16 %v2163_v57, %v2163_v57  ;;  %v1134_v5 = vmul.f32 %v1930_v34, %v1930_v34 }
 0x126   :  { %v1227_v25 = vadd.f32 %v1226_v55, %v1225_v15  ;;  %v1030_v30 = vadd.f32 %v1029_v18, %v1028_v13  ;;  %v1236_v40 = vsel %vm245_vm1, %v1132_v28, 0.0  ;;  %v1135_v6 = vmul.f32 %v1966_v3, %v1966_v3 }
 0x127   :  { %954 = vst.msk [vmem:[%s2403_s4 + $0xf8] sm:$0xf] %vm891_vm2, %v1487_v59  ;;  %v1488_v23 = vpack.c.bf16 %v2176_v1, %v2176_v1  ;;  %952 = vst.msk [vmem:[%s2403_s4 + $0xf0] sm:$0xf] %vm891_vm2, %v1485_v4  ;;  %v1238_v10 = vsel %vm245_vm1, %v1133_v54, 0.0  ;;  %v1041_v11 = vsel %vm245_vm1, %v1930_v34, 0.0  ;;  %v1486_v15 = vpack.c.bf16 %v2180_v7, %v2180_v7 }
 0x128   :  { %v1032_v36 = vadd.f32 %v1031_v24, %v1030_v30  ;;  %v1229_v37 = vadd.f32 %v1228_v2, %v1227_v25  ;;  %v1043_v13 = vsel %vm245_vm1, %v1966_v3, 0.0  ;;  %v1240_v22 = vsel %vm245_vm1, %v1134_v5, 0.0 }
 0x129   :  { %955 = vst.msk [vmem:[%s2403_s4 + $0xfc] sm:$0xf] %vm891_vm2, %v1488_v23  ;;  %v1242_v24 = vsel %vm245_vm1, %v1135_v6, 0.0  ;;  %v1136_v34 = vmul.f32 %v1977_v14, %v1977_v14  ;;  %953 = vst.msk [vmem:[%s2403_s4 + $0xf4] sm:$0xf] %vm891_vm2, %v1486_v15  ;;  %v1137_v30 = vmul.f32 %v1960_v62, %v1960_v62  ;;  %v1045_v21 = vsel %vm245_vm1, %v1977_v14, 0.0 }
 0x12a   :  { %v1231_v46 = vadd.f32 %v1230_v38, %v1229_v37  ;;  %v1034_v47 = vadd.f32 %v1033_v39, %v1032_v36  ;;  %v1047_v33 = vsel %vm245_vm1, %v1960_v62, 0.0  ;;  %v1138_v51 = vmul.f32 %v1974_v8, %v1974_v8 }
 0x12b   :  { %v1244_v36 = vsel %vm245_vm1, %v1136_v34, 0.0  ;;  %v1139_v37 = vmul.f32 %v2010_v45, %v2010_v45  ;;  %v1049_v14 = vsel %vm245_vm1, %v1974_v8, 0.0  ;;  %v1051_v44 = vsel %vm245_vm1, %v2010_v45, 0.0 }
 0x12c   :  { %v1036_v52 = vadd.f32 %v1035_v42, %v1034_v47  ;;  %v1233_v16 = vadd.f32 %v1232_v49, %v1231_v46  ;;  %v1246_v42 = vsel %vm245_vm1, %v1137_v30, 0.0  ;;  %v1248_v47 = vsel %vm245_vm1, %v1138_v51, 0.0 }
 0x12d   :  { %v1250_v48 = vsel %vm245_vm1, %v1139_v37, 0.0  ;;  %v1140_v49 = vmul.f32 %v2021_v58, %v2021_v58  ;;  %v1141_v32 = vmul.f32 %v2004_v41, %v2004_v41  ;;  %v1053_v8 = vsel %vm245_vm1, %v2021_v58, 0.0 }
 0x12e   :  { %v1235_v63 = vadd.f32 %v1234_v60, %v1233_v16  ;;  %v1038_v0 = vadd.f32 %v1037_v56, %v1036_v52  ;;  %v1055_v45 = vsel %vm245_vm1, %v2004_v41, 0.0  ;;  %v1142_v54 = vmul.f32 %v2018_v50, %v2018_v50 }
 0x12f   :  { %v1252_v56 = vsel %vm245_vm1, %v1140_v49, 0.0  ;;  %v1143_v59 = vmul.f32 %v2054_v27, %v2054_v27  ;;  %v1057_v58 = vsel %vm245_vm1, %v2018_v50, 0.0  ;;  %v1059_v4 = vsel %vm245_vm1, %v2054_v27, 0.0 }
 0x130   :  { %v1040_v26 = vadd.f32 %v1039_v61, %v1038_v0  ;;  %v1237_v55 = vadd.f32 %v1236_v40, %v1235_v63  ;;  %v1254_v0 = vsel %vm245_vm1, %v1141_v32, 0.0  ;;  %v1256_v40 = vsel %vm245_vm1, %v1142_v54, 0.0 }
 0x131   :  { %v1258_v6 = vsel %vm245_vm1, %v1143_v59, 0.0  ;;  %v1144_v23 = vmul.f32 %v2065_v43, %v2065_v43  ;;  %v1061_v50 = vsel %vm245_vm1, %v2065_v43, 0.0  ;;  %v1063_v27 = vsel %vm245_vm1, %v2048_v20, 0.0 }
 0x132   :  { %v1239_v17 = vadd.f32 %v1238_v10, %v1237_v55  ;;  %v1042_v18 = vadd.f32 %v1041_v11, %v1040_v26  ;;  %v1145_v10 = vmul.f32 %v2048_v20, %v2048_v20  ;;  %v1146_v15 = vmul.f32 %v2062_v35, %v2062_v35 }
 0x133   :  { %v1065_v43 = vsel %vm245_vm1, %v2062_v35, 0.0  ;;  %v1149_v51 = vmul.f32 %v2094_v9, %v2094_v9  ;;  %v1069_v35 = vsel %vm245_vm1, %v2116_v29, 0.0 }
 0x134   :  { %v1044_v3 = vadd.f32 %v1043_v13, %v1042_v18  ;;  %v1241_v25 = vadd.f32 %v1240_v22, %v1239_v17  ;;  %v1260_v17 = vsel %vm245_vm1, %v1144_v23, 0.0  ;;  %v1147_v18 = vmul.f32 %v2100_v12, %v2100_v12 }
 0x135   :  { %v1262_v34 = vsel %vm245_vm1, %v1145_v10, 0.0  ;;  %v1264_v30 = vsel %vm245_vm1, %v1146_v15, 0.0 }
 0x136   :  { %v1243_v31 = vadd.f32 %v1242_v24, %v1241_v25  ;;  %v1046_v2 = vadd.f32 %v1045_v21, %v1044_v3  ;;  %v1067_v3 = vsel %vm245_vm1, %v2100_v12, 0.0  ;;  %v1266_v21 = vsel %vm245_vm1, %v1147_v18, 0.0 }
 0x137   :  { %v1071_v12 = vsel %vm245_vm1, %v2094_v9, 0.0 }
 0x138   :  { %v1048_v38 = vadd.f32 %v1047_v33, %v1046_v2  ;;  %v1245_v39 = vadd.f32 %v1244_v36, %v1243_v31  ;;  %v1148_v31 = vmul.f32 %v2116_v29, %v2116_v29  ;;  %v1073_v29 = vsel %vm245_vm1, %v2112_v19, 0.0 }
 0x13a   :  { %v1247_v46 = vadd.f32 %v1246_v42, %v1245_v39  ;;  %v1050_v62 = vadd.f32 %v1049_v14, %v1048_v38  ;;  %v1150_v38 = vmul.f32 %v2112_v19, %v2112_v19  ;;  %v1268_v39 = vsel %vm245_vm1, %v1148_v31, 0.0 }
 0x13b   :  { %v1151_v42 = vmul.f32 %v2163_v57, %v2163_v57  ;;  %v1077_v19 = vsel %vm245_vm1, %v2180_v7, 0.0 }
 0x13c   :  { %v1052_v60 = vadd.f32 %v1051_v44, %v1050_v62  ;;  %v1249_v28 = vadd.f32 %v1248_v47, %v1247_v46  ;;  %v1270_v46 = vsel %vm245_vm1, %v1149_v51, 0.0  ;;  %v1075_v62 = vsel %vm245_vm1, %v2163_v57, 0.0 }
 0x13d   :  { %v1274_v49 = vsel %vm245_vm1, %v1151_v42, 0.0  ;;  %v1079_v57 = vsel %vm245_vm1, %v2157_v53, 0.0 }
 0x13e   :  { %v1251_v52 = vadd.f32 %v1250_v48, %v1249_v28  ;;  %v1054_v16 = vadd.f32 %v1053_v8, %v1052_v60  ;;  %v1272_v48 = vsel %vm245_vm1, %v1150_v38, 0.0  ;;  %v1152_v60 = vmul.f32 %v2180_v7, %v2180_v7 }
 0x13f   :  { %v1153_v8 = vmul.f32 %v2157_v53, %v2157_v53 }
 0x140   :  { %v1056_v61 = vadd.f32 %v1055_v45, %v1054_v16  ;;  %v1253_v63 = vadd.f32 %v1252_v56, %v1251_v52  ;;  %v1154_v45 = vmul.f32 %v2176_v1, %v2176_v1  ;;  %v1276_v54 = vsel %vm245_vm1, %v1152_v60, 0.0 }
 0x142   :  { %v1255_v5 = vadd.f32 %v1254_v0, %v1253_v63  ;;  %v1058_v41 = vadd.f32 %v1057_v58, %v1056_v61  ;;  %v1278_v61 = vsel %vm245_vm1, %v1153_v8, 0.0  ;;  %v1081_v63 = vsel %vm245_vm1, %v2176_v1, 0.0 }
 0x143   :  { %v1280_v7 = vsel %vm245_vm1, %v1154_v45, 0.0 }
 0x144   :  { %v1060_v26 = vadd.f32 %v1059_v4, %v1058_v41  ;;  %v1257_v55 = vadd.f32 %v1256_v40, %v1255_v5 }
 0x146   :  { %v1259_v11 = vadd.f32 %v1258_v6, %v1257_v55  ;;  %v1062_v13 = vadd.f32 %v1061_v50, %v1060_v26 }
 0x148   :  { %v1064_v22 = vadd.f32 %v1063_v27, %v1062_v13  ;;  %v1261_v24 = vadd.f32 %v1260_v17, %v1259_v11 }
 0x14a   :  { %v1263_v25 = vadd.f32 %v1262_v34, %v1261_v24  ;;  %v1066_v20 = vadd.f32 %v1065_v43, %v1064_v22 }
 0x14c   :  { %v1068_v2 = vadd.f32 %v1067_v3, %v1066_v20  ;;  %v1265_v33 = vadd.f32 %v1264_v30, %v1263_v25 }
 0x14e   :  { %v1267_v36 = vadd.f32 %v1266_v21, %v1265_v33  ;;  %v1070_v37 = vadd.f32 %v1069_v35, %v1068_v2 }
 0x150   :  { %v1072_v14 = vadd.f32 %v1071_v12, %v1070_v37  ;;  %v1269_v44 = vadd.f32 %v1268_v39, %v1267_v36 }
 0x152   :  { %v1271_v47 = vadd.f32 %v1270_v46, %v1269_v44  ;;  %v1074_v9 = vadd.f32 %v1073_v29, %v1072_v14 }
 0x154   :  { %v1076_v28 = vadd.f32 %v1075_v62, %v1074_v9  ;;  %v1273_v32 = vadd.f32 %v1272_v48, %v1271_v47 }
 0x156   :  { %v1275_v52 = vadd.f32 %v1274_v49, %v1273_v32  ;;  %v1078_v16 = vadd.f32 %v1077_v19, %v1076_v28 }
 0x158   :  { %v1080_v56 = vadd.f32 %v1079_v57, %v1078_v16  ;;  %v1277_v59 = vadd.f32 %v1276_v54, %v1275_v52 }
 0x15a   :  { %v1082_v0 = vadd.f32 %v1081_v63, %v1080_v56  ;;  %v1279_v58 = vadd.f32 %v1278_v61, %v1277_v59 }
 0x15c   :  { %v1083_v4 = vrot.slane %v1082_v0, 4  ;;  %v1281_v5 = vadd.f32 %v1280_v7, %v1279_v58 }
 0x15e   :  { %v1084_v41 = vadd.f32 %v1083_v4, %v1082_v0  ;;  %v1282_v53 = vrot.slane %v1281_v5, 4 }
 0x160   :  { %v1085_v40 = vrot.slane %v1084_v41, 2  ;;  %v1283_v6 = vadd.f32 %v1282_v53, %v1281_v5 }
 0x162   :  { %v1086_v23 = vadd.f32 %v1085_v40, %v1084_v41  ;;  %v1284_v26 = vrot.slane %v1283_v6, 2 }
 0x164   :  { %v1087_v55 = vrot.slane %v1086_v23, 1  ;;  %v1285_v10 = vadd.f32 %v1284_v26, %v1283_v6 }
 0x166   :  { %v1088_v50 = vadd.f32 %v1087_v55, %v1086_v23  ;;  %v1286_v11 = vrot.slane %v1285_v10, 1 }
 0x168   :  { %1090 = vst.msk [vmem:[%s2404_s5] sm:$0x1] %vm1089_vm3, %v1088_v50  ;;  %v1287_v1 = vadd.f32 %v1286_v11, %v1285_v10 }
 0x16a   :  { %1288 = vst.msk [vmem:[%s2404_s5 + $0x1] sm:$0x1] %vm1089_vm3, %v1287_v1 }

// kernel: bottleneck_forward.7
= control target key start
LH: loop header
LB: loop body
LE: loop exit
PB: predicated region body
PF: predicated region fallthrough
CT: control target
= control target key end

     0   :  { %vm484_vm0 = vcmask 1041408   ;;  %vm387_vm1 = vcmask 31744   ;;  %vm1033_vm2 = vcmask 125952   ;;  %vm1098_vm3 = vcmask 130048   ;;  %s2811_s1 = inlined_call_operand.vmem [shape: bf16[4,16], index: 1, kind: input, shape index: {}]   ;;  %s2812_s0 = inlined_call_operand.vmem [shape: bf16[512,4], index: 0, kind: input, shape index: {}]   ;;  %s2813_s2 = inlined_call_operand.vmem [shape: f32[1,4], index: 2, kind: input, shape index: {}]   ;;  %s2814_s3 = inlined_call_operand.vmem [shape: f32[1,4], index: 3, kind: input, shape index: {}]   ;;  %s2815_s4 = inlined_call_operand.vmem [shape: bf16[512,16], index: 4, kind: output, shape index: {0}]   ;;  %s2816_s5 = inlined_call_operand.vmem [shape: f32[1,2,16], index: 5, kind: output, shape index: {1}]  }
   0x1   :  { %v386_v0 = vld [vmem:[%s2811_s1] sm:$0x3]  ;;  %v1730_v6 = vld [vmem:[%s2812_s0 + $0x8] sm:$0xff]   ;;  %v1731_v7 = vld [vmem:[%s2812_s0 + $0x10] sm:$0xff]   ;;  %vm1232_vm4 = vcmask 122880  }
   0x2   :  { %v1603_v1 = vld [vmem:[%s2812_s0] sm:$0xff]   ;;  %1862 = vmatprep.subr.msk.bf16.mxu0 %vm484_vm0, %v386_v0  ;;  %v486_v3 = vsel %vm484_vm0, %v386_v0, 0  ;;  %1863 = vmatprep.subr.msk.bf16.mxu1 %vm484_vm0, %v386_v0  ;;  %v1608_v9 = vunpack.c.l.bf16 %v1730_v6  ;;  %v1609_v10 = vunpack.c.h.bf16 %v1730_v6  ;;  %v1612_v11 = vunpack.c.l.bf16 %v1731_v7  ;;  %v1732_v13 = vld [vmem:[%s2812_s0 + $0x18] sm:$0xff]   ;;  %v1734_v35 = vld [vmem:[%s2812_s0 + $0x28] sm:$0xff]  }
   0x3   :  { %v1903_v2 = vld [vmem:[%s2813_s2] ss:$0 sm:$0xff]  ;;  %v1604_v4 = vunpack.c.l.bf16 %v1603_v1  ;;  %v1605_v5 = vunpack.c.h.bf16 %v1603_v1  ;;  %1795 = vmatpush3.bf16.msra.mxu0 %v486_v3  ;;  %v1613_v12 = vunpack.c.h.bf16 %v1731_v7  ;;  %1861 = vmatpush3.bf16.msra.mxu1 %v486_v3  ;;  %v1616_v16 = vunpack.c.l.bf16 %v1732_v13  ;;  %v1735_v40 = vld [vmem:[%s2812_s0 + $0x30] sm:$0xff]   ;;  %v1736_v51 = vld [vmem:[%s2812_s0 + $0x38] sm:$0xff]  }
   0x4   :  { %v1914_v8 = vld [vmem:[%s2814_s3] ss:$0 sm:$0xff]  ;;  %v1617_v17 = vunpack.c.h.bf16 %v1732_v13  ;;  %v157_v18 = vmul.f32 %v1608_v9, %v1903_v2  ;;  %v158_v19 = vmul.f32 %v1609_v10, %v1903_v2  ;;  %v159_v20 = vmul.f32 %v1612_v11, %v1903_v2  ;;  %v1738_v9 = vld [vmem:[%s2812_s0 + $0x48] sm:$0xff]   ;;  %v1739_v11 = vld [vmem:[%s2812_s0 + $0x50] sm:$0xff]  }
   0x5   :  { %v155_v14 = vmul.f32 %v1604_v4, %v1903_v2  ;;  %v156_v15 = vmul.f32 %v1605_v5, %v1903_v2  ;;  %v160_v21 = vmul.f32 %v1613_v12, %v1903_v2  ;;  %v161_v24 = vmul.f32 %v1616_v16, %v1903_v2  ;;  %v1733_v30 = vld [vmem:[%s2812_s0 + $0x20] sm:$0xff]  }
   0x6   :  { %v162_v25 = vmul.f32 %v1617_v17, %v1903_v2  ;;  %v228_v26 = vadd.f32 %v1914_v8, %v157_v18  ;;  %v229_v27 = vadd.f32 %v1914_v8, %v158_v19  ;;  %v230_v28 = vadd.f32 %v1914_v8, %v159_v20  ;;  %v1737_v63 = vld [vmem:[%s2812_s0 + $0x40] sm:$0xff]   ;;  %v1740_v20 = vld [vmem:[%s2812_s0 + $0x58] sm:$0xff]  }
   0x7   :  { %v226_v22 = vadd.f32 %v1914_v8, %v155_v14  ;;  %v227_v23 = vadd.f32 %v1914_v8, %v156_v15  ;;  %v231_v29 = vadd.f32 %v1914_v8, %v160_v21  ;;  %v232_v33 = vadd.f32 %v1914_v8, %v161_v24 }
   0x8   :  { %v233_v34 = vadd.f32 %v1914_v8, %v162_v25  ;;  %v292_v36 = vmax.f32 %v228_v26, 0.0  ;;  %v293_v37 = vmax.f32 %v229_v27, 0.0  ;;  %v294_v38 = vmax.f32 %v230_v28, 0.0 }
   0x9   :  { %v290_v31 = vmax.f32 %v226_v22, 0.0  ;;  %v291_v32 = vmax.f32 %v227_v23, 0.0  ;;  %v295_v39 = vmax.f32 %v231_v29, 0.0  ;;  %v1620_v42 = vunpack.c.l.bf16 %v1733_v30 }
   0xa   :  { %v355_v43 = vpack.c.bf16 %v293_v37, %v292_v36  ;;  %v1621_v45 = vunpack.c.h.bf16 %v1733_v30  ;;  %v1624_v46 = vunpack.c.l.bf16 %v1734_v35  ;;  %v296_v47 = vmax.f32 %v232_v33, 0.0 }
   0xb   :  { %v354_v41 = vpack.c.bf16 %v291_v32, %v290_v31  ;;  %v356_v44 = vpack.c.bf16 %v295_v39, %v294_v38  ;;  %v163_v48 = vmul.f32 %v1620_v42, %v1903_v2  ;;  %v1625_v49 = vunpack.c.h.bf16 %v1734_v35  ;;  %v1741_v31 = vld [vmem:[%s2812_s0 + $0x60] sm:$0xff]  }
   0xc   :  { %v1628_v50 = vunpack.c.l.bf16 %v1735_v40  ;;  %v297_v52 = vmax.f32 %v233_v34, 0.0  ;;  %v164_v53 = vmul.f32 %v1621_v45, %v1903_v2  ;;  %v165_v54 = vmul.f32 %v1624_v46, %v1903_v2 }
   0xd   :  { %1796 = vmatprep.mubr.msk.bf16.mxu0 %vm387_vm1, %v354_v41  ;;  %v1629_v55 = vunpack.c.h.bf16 %v1735_v40  ;;  %v234_v56 = vadd.f32 %v1914_v8, %v163_v48  ;;  %v166_v57 = vmul.f32 %v1625_v49, %v1903_v2  ;;  %v1632_v61 = vunpack.c.l.bf16 %v1736_v51 }
   0xe   :  { %1797 = vmatmul.mubr.msk.bf16.vlgmr.msra.gmra.mrb[0].mxu0 %vm387_vm1, %v355_v43  ;;  %v167_v58 = vmul.f32 %v1628_v50, %v1903_v2  ;;  %v235_v59 = vadd.f32 %v1914_v8, %v164_v53  ;;  %v1633_v62 = vunpack.c.h.bf16 %v1736_v51  ;;  %v236_v1 = vadd.f32 %v1914_v8, %v165_v54 }
   0xf   :  { %1800 = vmatprep.mubr.msk.bf16.mxu0 %vm387_vm1, %v356_v44  ;;  %v168_v60 = vmul.f32 %v1629_v55, %v1903_v2  ;;  %v298_v0 = vmax.f32 %v234_v56, 0.0  ;;  %v237_v3 = vadd.f32 %v1914_v8, %v166_v57  ;;  %v357_v5 = vpack.c.bf16 %v297_v52, %v296_v47  ;;  %v1742_v44 = vld [vmem:[%s2812_s0 + $0x68] sm:$0xff]   ;;  %v1743_v56 = vld [vmem:[%s2812_s0 + $0x70] sm:$0xff]  }
  0x10   :  { %v238_v4 = vadd.f32 %v1914_v8, %v167_v58  ;;  %v299_v6 = vmax.f32 %v235_v59, 0.0  ;;  %v1636_v10 = vunpack.c.l.bf16 %v1737_v63  ;;  %v169_v13 = vmul.f32 %v1632_v61, %v1903_v2 }
  0x11   :  { %v239_v7 = vadd.f32 %v1914_v8, %v168_v60  ;;  %v170_v14 = vmul.f32 %v1633_v62, %v1903_v2  ;;  %v1637_v15 = vunpack.c.h.bf16 %v1737_v63  ;;  %v300_v16 = vmax.f32 %v236_v1, 0.0  ;;  %v2013_v1 = vld [vmem:[%s2812_s0 + $0x78] sm:$0xff]  }
  0x12   :  { %v358_v12 = vpack.c.bf16 %v299_v6, %v298_v0  ;;  %v301_v17 = vmax.f32 %v237_v3, 0.0  ;;  %v302_v18 = vmax.f32 %v238_v4, 0.0  ;;  %v1640_v19 = vunpack.c.l.bf16 %v1738_v9  ;;  %v1745_v3 = vld [vmem:[%s2812_s0 + $0x80] sm:$0xff]  }
  0x13   :  { %v303_v21 = vmax.f32 %v239_v7, 0.0  ;;  %v171_v22 = vmul.f32 %v1636_v10, %v1903_v2  ;;  %v1641_v23 = vunpack.c.h.bf16 %v1738_v9  ;;  %v1644_v24 = vunpack.c.l.bf16 %v1739_v11 }
  0x14   :  { %v172_v25 = vmul.f32 %v1637_v15, %v1903_v2  ;;  %v173_v26 = vmul.f32 %v1640_v19, %v1903_v2  ;;  %v1645_v27 = vunpack.c.h.bf16 %v1739_v11  ;;  %v1648_v30 = vunpack.c.l.bf16 %v1740_v20  ;;  %v1746_v19 = vld [vmem:[%s2812_s0 + $0x88] sm:$0xff]  }
  0x15   :  { %v174_v28 = vmul.f32 %v1641_v23, %v1903_v2  ;;  %v175_v29 = vmul.f32 %v1644_v24, %v1903_v2  ;;  %v240_v32 = vadd.f32 %v1914_v8, %v169_v13  ;;  %v241_v33 = vadd.f32 %v1914_v8, %v170_v14  ;;  %v1747_v24 = vld [vmem:[%s2812_s0 + $0x90] sm:$0xff]  }
  0x16   :  { %1801 = vmatmul.mubr.msk.bf16.gmra.mrb[4].mxu0 %vm387_vm1, %v357_v5  ;;  %v176_v34 = vmul.f32 %v1645_v27, %v1903_v2  ;;  %v1649_v35 = vunpack.c.h.bf16 %v1740_v20  ;;  %v359_v36 = vpack.c.bf16 %v301_v17, %v300_v16  ;;  %v360_v37 = vpack.c.bf16 %v303_v21, %v302_v18 }
  0x17   :  { %1804 = vmatprep.mubr.msk.bf16.mxu0 %vm387_vm1, %v358_v12  ;;  %v242_v38 = vadd.f32 %v1914_v8, %v171_v22  ;;  %v177_v39 = vmul.f32 %v1648_v30, %v1903_v2  ;;  %v243_v40 = vadd.f32 %v1914_v8, %v172_v25  ;;  %v244_v41 = vadd.f32 %v1914_v8, %v173_v26 }
  0x18   :  { %v178_v42 = vmul.f32 %v1649_v35, %v1903_v2  ;;  %v1652_v43 = vunpack.c.l.bf16 %v1741_v31  ;;  %v245_v45 = vadd.f32 %v1914_v8, %v174_v28  ;;  %v246_v46 = vadd.f32 %v1914_v8, %v175_v29 }
  0x19   :  { %v247_v47 = vadd.f32 %v1914_v8, %v176_v34  ;;  %v248_v48 = vadd.f32 %v1914_v8, %v177_v39  ;;  %v1653_v50 = vunpack.c.h.bf16 %v1741_v31  ;;  %v304_v52 = vmax.f32 %v240_v32, 0.0 }
  0x1a   :  { %v249_v49 = vadd.f32 %v1914_v8, %v178_v42  ;;  %v179_v51 = vmul.f32 %v1652_v43, %v1903_v2  ;;  %v305_v53 = vmax.f32 %v241_v33, 0.0  ;;  %v1656_v54 = vunpack.c.l.bf16 %v1742_v44  ;;  %v1748_v33 = vld [vmem:[%s2812_s0 + $0x98] sm:$0xff]  }
  0x1b   :  { %v1657_v55 = vunpack.c.h.bf16 %v1742_v44  ;;  %v306_v57 = vmax.f32 %v242_v38, 0.0  ;;  %v307_v58 = vmax.f32 %v243_v40, 0.0  ;;  %v308_v59 = vmax.f32 %v244_v41, 0.0 }
  0x1c   :  { %v180_v60 = vmul.f32 %v1653_v50, %v1903_v2  ;;  %v309_v61 = vmax.f32 %v245_v45, 0.0  ;;  %v310_v62 = vmax.f32 %v246_v46, 0.0  ;;  %v311_v63 = vmax.f32 %v247_v47, 0.0  ;;  %v1749_v46 = vld [vmem:[%s2812_s0 + $0xa0] sm:$0xff]  }
  0x1d   :  { %v181_v0 = vmul.f32 %v1656_v54, %v1903_v2  ;;  %v312_v4 = vmax.f32 %v248_v48, 0.0  ;;  %v313_v5 = vmax.f32 %v249_v49, 0.0  ;;  %v2019_v6 = vadd.f32 %v1914_v8, %v179_v51 }
  0x1e   :  { %1805 = vmatmul.mubr.msk.bf16.gmra.mrb[8].mxu0 %vm387_vm1, %v359_v36  ;;  %v1660_v7 = vunpack.c.l.bf16 %v1743_v56  ;;  %v361_v9 = vpack.c.bf16 %v305_v53, %v304_v52  ;;  %v2022_v10 = vadd.f32 %v1914_v8, %v180_v60  ;;  %v182_v11 = vmul.f32 %v1657_v55, %v1903_v2  ;;  %v1750_v55 = vld [vmem:[%s2812_s0 + $0xa8] sm:$0xff]  }
  0x1f   :  { %1808 = vmatprep.mubr.msk.bf16.mxu0 %vm387_vm1, %v360_v37  ;;  %v1661_v12 = vunpack.c.h.bf16 %v1743_v56  ;;  %v362_v13 = vpack.c.bf16 %v307_v58, %v306_v57  ;;  %v1664_v14 = vunpack.c.l.bf16 %v2013_v1  ;;  %v1668_v15 = vunpack.c.l.bf16 %v1745_v3 }
  0x20   :  { %v363_v16 = vpack.c.bf16 %v309_v61, %v308_v59  ;;  %v364_v17 = vpack.c.bf16 %v311_v63, %v310_v62  ;;  %v2027_v18 = vadd.f32 %v1914_v8, %v181_v0  ;;  %v2032_v20 = vpack.c.bf16 %v313_v5, %v312_v4 }
  0x21   :  { %v314_v21 = vmax.f32 %v2019_v6, 0.0  ;;  %v183_v22 = vmul.f32 %v1660_v7, %v1903_v2  ;;  %v1669_v23 = vunpack.c.h.bf16 %v1745_v3  ;;  %v315_v25 = vmax.f32 %v2022_v10, 0.0  ;;  %v1751_v7 = vld [vmem:[%s2812_s0 + $0xb0] sm:$0xff]   ;;  %v1753_v6 = vld [vmem:[%s2812_s0 + $0xc0] sm:$0xff]  }
  0x22   :  { %v2042_v26 = vadd.f32 %v1914_v8, %v182_v11  ;;  %v184_v27 = vmul.f32 %v1661_v12, %v1903_v2  ;;  %v187_v28 = vmul.f32 %v1668_v15, %v1903_v2  ;;  %v1665_v29 = vunpack.c.h.bf16 %v2013_v1 }
  0x23   :  { %v2049_v30 = vmul.f32 %v1664_v14, %v1903_v2  ;;  %v188_v31 = vmul.f32 %v1669_v23, %v1903_v2  ;;  %v1672_v32 = vunpack.c.l.bf16 %v1746_v19  ;;  %v316_v34 = vmax.f32 %v2027_v18, 0.0  ;;  %v1755_v18 = vld [vmem:[%s2812_s0 + $0xd0] sm:$0xff]  }
  0x24   :  { %v258_v35 = vadd.f32 %v1914_v8, %v187_v28  ;;  %v1673_v36 = vunpack.c.h.bf16 %v1746_v19  ;;  %v1676_v37 = vunpack.c.l.bf16 %v1747_v24  ;;  %v2058_v38 = vadd.f32 %v1914_v8, %v183_v22 }
  0x25   :  { %v259_v39 = vadd.f32 %v1914_v8, %v188_v31  ;;  %v189_v40 = vmul.f32 %v1672_v32, %v1903_v2  ;;  %v1677_v41 = vunpack.c.h.bf16 %v1747_v24  ;;  %v1680_v45 = vunpack.c.l.bf16 %v1748_v33  ;;  %v1752_v24 = vld [vmem:[%s2812_s0 + $0xb8] sm:$0xff]  }
  0x26   :  { %1809 = vmatmul.mubr.msk.bf16.gmra.mrb[12].mxu0 %vm387_vm1, %v361_v9  ;;  %v322_v42 = vmax.f32 %v258_v35, 0.0  ;;  %v190_v43 = vmul.f32 %v1673_v36, %v1903_v2  ;;  %v191_v44 = vmul.f32 %v1676_v37, %v1903_v2  ;;  %v2068_v47 = vadd.f32 %v1914_v8, %v184_v27 }
  0x27   :  { %1812 = vmatprep.mubr.msk.bf16.mxu0 %vm387_vm1, %v362_v13  ;;  %v323_v48 = vmax.f32 %v259_v39, 0.0  ;;  %v260_v49 = vadd.f32 %v1914_v8, %v189_v40  ;;  %v192_v50 = vmul.f32 %v1677_v41, %v1903_v2  ;;  %v1681_v53 = vunpack.c.h.bf16 %v1748_v33 }
  0x28   :  { %v261_v51 = vadd.f32 %v1914_v8, %v190_v43  ;;  %v262_v52 = vadd.f32 %v1914_v8, %v191_v44  ;;  %v193_v54 = vmul.f32 %v1680_v45, %v1903_v2  ;;  %v1684_v59 = vunpack.c.l.bf16 %v1749_v46 }
  0x29   :  { %v370_v56 = vpack.c.bf16 %v323_v48, %v322_v42  ;;  %v324_v57 = vmax.f32 %v260_v49, 0.0  ;;  %v263_v58 = vadd.f32 %v1914_v8, %v192_v50  ;;  %v194_v62 = vmul.f32 %v1681_v53, %v1903_v2 }
  0x2a   :  { %v325_v60 = vmax.f32 %v261_v51, 0.0  ;;  %v326_v61 = vmax.f32 %v262_v52, 0.0  ;;  %v264_v63 = vadd.f32 %v1914_v8, %v193_v54  ;;  %v1685_v3 = vunpack.c.h.bf16 %v1749_v46  ;;  %v1754_v52 = vld [vmem:[%s2812_s0 + $0xc8] sm:$0xff]  }
  0x2b   :  { %1828 = vmatprep.mubr.msk.bf16.mxu1 %vm387_vm1, %v370_v56  ;;  %v327_v0 = vmax.f32 %v263_v58, 0.0  ;;  %v195_v4 = vmul.f32 %v1684_v59, %v1903_v2  ;;  %v1688_v5 = vunpack.c.l.bf16 %v1750_v55  ;;  %v265_v10 = vadd.f32 %v1914_v8, %v194_v62 }
  0x2c   :  { %v371_v9 = vpack.c.bf16 %v325_v60, %v324_v57  ;;  %v328_v11 = vmax.f32 %v264_v63, 0.0  ;;  %v1689_v12 = vunpack.c.h.bf16 %v1750_v55  ;;  %v196_v14 = vmul.f32 %v1685_v3, %v1903_v2 }
  0x2d   :  { %v372_v13 = vpack.c.bf16 %v327_v0, %v326_v61  ;;  %v266_v15 = vadd.f32 %v1914_v8, %v195_v4  ;;  %v1692_v22 = vunpack.c.l.bf16 %v1751_v7  ;;  %v1693_v23 = vunpack.c.h.bf16 %v1751_v7 }
  0x2e   :  { %1813 = vmatmul.mubr.msk.bf16.gmra.mrb[16].mxu0 %vm387_vm1, %v363_v16  ;;  %v197_v16 = vmul.f32 %v1688_v5, %v1903_v2  ;;  %1829 = vmatmul.mubr.msk.bf16.vlgmr.msra.gmra.mrb[0].mxu1 %vm387_vm1, %v371_v9  ;;  %v198_v19 = vmul.f32 %v1689_v12, %v1903_v2  ;;  %v366_v27 = vpack.c.bf16 %v315_v25, %v314_v21  ;;  %v317_v28 = vmax.f32 %v2042_v26, 0.0 }
  0x2f   :  { %1816 = vmatprep.mubr.msk.bf16.mxu0 %vm387_vm1, %v364_v17  ;;  %v329_v17 = vmax.f32 %v265_v10, 0.0  ;;  %1832 = vmatprep.mubr.msk.bf16.mxu1 %vm387_vm1, %v372_v13  ;;  %v267_v31 = vadd.f32 %v1914_v8, %v196_v14  ;;  %v330_v32 = vmax.f32 %v266_v15, 0.0  ;;  %v318_v33 = vmax.f32 %v2058_v38, 0.0  ;;  %v1756_v14 = vld [vmem:[%s2812_s0 + $0xd8] sm:$0xff]  }
  0x30   :  { %v186_v35 = vmul.f32 %v1665_v29, %v1903_v2  ;;  %v199_v36 = vmul.f32 %v1692_v22, %v1903_v2  ;;  %v200_v37 = vmul.f32 %v1693_v23, %v1903_v2  ;;  %v319_v21 = vmax.f32 %v2068_v47, 0.0 }
  0x31   :  { %v331_v25 = vmax.f32 %v267_v31, 0.0  ;;  %v1696_v26 = vunpack.c.l.bf16 %v1752_v24  ;;  %v1697_v39 = vunpack.c.h.bf16 %v1752_v24  ;;  %v373_v38 = vpack.c.bf16 %v329_v17, %v328_v11  ;;  %v1757_v17 = vld [vmem:[%s2812_s0 + $0xe0] sm:$0xff]  }
  0x32   :  { %v268_v1 = vadd.f32 %v1914_v8, %v197_v16  ;;  %v269_v29 = vadd.f32 %v1914_v8, %v198_v19  ;;  %v270_v40 = vadd.f32 %v1914_v8, %v199_v36  ;;  %v271_v42 = vadd.f32 %v1914_v8, %v200_v37 }
  0x33   :  { %v374_v41 = vpack.c.bf16 %v331_v25, %v330_v32  ;;  %v1700_v43 = vunpack.c.l.bf16 %v1753_v6  ;;  %v1701_v44 = vunpack.c.h.bf16 %v1753_v6  ;;  %v256_v45 = vadd.f32 %v1914_v8, %v2049_v30 }
  0x34   :  { %v257_v46 = vadd.f32 %v1914_v8, %v186_v35  ;;  %v202_v47 = vmul.f32 %v1697_v39, %v1903_v2  ;;  %v367_v48 = vpack.c.bf16 %v317_v28, %v316_v34  ;;  %v368_v49 = vpack.c.bf16 %v319_v21, %v318_v33  ;;  %v1758_v39 = vld [vmem:[%s2812_s0 + $0xe8] sm:$0xff]  }
  0x35   :  { %v332_v50 = vmax.f32 %v268_v1, 0.0  ;;  %v333_v51 = vmax.f32 %v269_v29, 0.0  ;;  %v334_v30 = vmax.f32 %v270_v40, 0.0  ;;  %v335_v53 = vmax.f32 %v271_v42, 0.0  ;;  %v1759_v29 = vld [vmem:[%s2812_s0 + $0xf0] sm:$0xff]  }
  0x36   :  { %1817 = vmatmul.mubr.msk.bf16.gmra.mrb[20].mxu0 %vm387_vm1, %v2032_v20  ;;  %v201_v20 = vmul.f32 %v1696_v26, %v1903_v2  ;;  %1833 = vmatmul.mubr.msk.bf16.gmra.mrb[4].mxu1 %vm387_vm1, %v373_v38  ;;  %v203_v54 = vmul.f32 %v1700_v43, %v1903_v2  ;;  %v204_v55 = vmul.f32 %v1701_v44, %v1903_v2  ;;  %v320_v34 = vmax.f32 %v256_v45, 0.0 }
  0x37   :  { %1820 = vmatprep.mubr.msk.bf16.mxu0 %vm387_vm1, %v366_v27  ;;  %1836 = vmatprep.mubr.msk.bf16.mxu1 %vm387_vm1, %v374_v41  ;;  %v321_v56 = vmax.f32 %v257_v46, 0.0  ;;  %v273_v58 = vadd.f32 %v1914_v8, %v202_v47  ;;  %v1704_v59 = vunpack.c.l.bf16 %v1754_v52  ;;  %v375_v60 = vpack.c.bf16 %v333_v51, %v332_v50 }
  0x38   :  { %v272_v57 = vadd.f32 %v1914_v8, %v201_v20  ;;  %v1705_v61 = vunpack.c.h.bf16 %v1754_v52  ;;  %v1708_v62 = vunpack.c.l.bf16 %v1755_v18  ;;  %v1709_v63 = vunpack.c.h.bf16 %v1755_v18  ;;  %v1760_v18 = vld [vmem:[%s2812_s0 + $0xf8] sm:$0xff]  }
  0x39   :  { %v376_v0 = vpack.c.bf16 %v335_v53, %v334_v30  ;;  %v274_v3 = vadd.f32 %v1914_v8, %v203_v54  ;;  %v275_v4 = vadd.f32 %v1914_v8, %v204_v55  ;;  %v337_v7 = vmax.f32 %v273_v58, 0.0 }
  0x3a   :  { %v336_v5 = vmax.f32 %v272_v57, 0.0  ;;  %v205_v9 = vmul.f32 %v1704_v59, %v1903_v2  ;;  %v369_v10 = vpack.c.bf16 %v321_v56, %v320_v34  ;;  %v206_v11 = vmul.f32 %v1705_v61, %v1903_v2 }
  0x3b   :  { %v207_v12 = vmul.f32 %v1708_v62, %v1903_v2  ;;  %v208_v13 = vmul.f32 %v1709_v63, %v1903_v2  ;;  %v338_v15 = vmax.f32 %v274_v3, 0.0  ;;  %v339_v16 = vmax.f32 %v275_v4, 0.0 }
  0x3c   :  { %v377_v19 = vpack.c.bf16 %v337_v7, %v336_v5  ;;  %v276_v22 = vadd.f32 %v1914_v8, %v205_v9  ;;  %v1712_v23 = vunpack.c.l.bf16 %v1756_v14  ;;  %v277_v24 = vadd.f32 %v1914_v8, %v206_v11 }
  0x3d   :  { %v278_v27 = vadd.f32 %v1914_v8, %v207_v12  ;;  %v279_v28 = vadd.f32 %v1914_v8, %v208_v13  ;;  %v1713_v31 = vunpack.c.h.bf16 %v1756_v14  ;;  %v378_v32 = vpack.c.bf16 %v339_v16, %v338_v15 }
  0x3e   :  { %1821 = vmatmul.mubr.msk.bf16.gmra.mrb[24].mxu0 %vm387_vm1, %v367_v48  ;;  %1837 = vmatmul.mubr.msk.bf16.gmra.mrb[8].mxu1 %vm387_vm1, %v375_v60  ;;  %v1716_v33 = vunpack.c.l.bf16 %v1757_v17  ;;  %v1717_v35 = vunpack.c.h.bf16 %v1757_v17  ;;  %v340_v36 = vmax.f32 %v276_v22, 0.0  ;;  %v209_v37 = vmul.f32 %v1712_v23, %v1903_v2 }
  0x3f   :  { %1824 = vmatprep.mubr.msk.bf16.mxu0 %vm387_vm1, %v368_v49  ;;  %1840 = vmatprep.mubr.msk.bf16.mxu1 %vm387_vm1, %v376_v0  ;;  %v341_v6 = vmax.f32 %v277_v24, 0.0  ;;  %v342_v21 = vmax.f32 %v278_v27, 0.0  ;;  %v343_v25 = vmax.f32 %v279_v28, 0.0  ;;  %v210_v26 = vmul.f32 %v1713_v31, %v1903_v2 }
  0x40   :  { %v211_v38 = vmul.f32 %v1716_v33, %v1903_v2  ;;  %v212_v1 = vmul.f32 %v1717_v35, %v1903_v2  ;;  %v280_v40 = vadd.f32 %v1914_v8, %v209_v37  ;;  %v1720_v41 = vunpack.c.l.bf16 %v1758_v39 }
  0x41   :  { %v379_v42 = vpack.c.bf16 %v341_v6, %v340_v36  ;;  %v380_v43 = vpack.c.bf16 %v343_v25, %v342_v21  ;;  %v281_v44 = vadd.f32 %v1914_v8, %v210_v26  ;;  %v1721_v45 = vunpack.c.h.bf16 %v1758_v39 }
  0x42   :  { %v282_v46 = vadd.f32 %v1914_v8, %v211_v38  ;;  %v283_v20 = vadd.f32 %v1914_v8, %v212_v1  ;;  %v1724_v47 = vunpack.c.l.bf16 %v1759_v29  ;;  %v1725_v48 = vunpack.c.h.bf16 %v1759_v29 }
  0x43   :  { %v213_v49 = vmul.f32 %v1720_v41, %v1903_v2  ;;  %v344_v50 = vmax.f32 %v280_v40, 0.0  ;;  %v345_v51 = vmax.f32 %v281_v44, 0.0  ;;  %v214_v52 = vmul.f32 %v1721_v45, %v1903_v2 }
  0x44   :  { %v346_v30 = vmax.f32 %v282_v46, 0.0  ;;  %v347_v53 = vmax.f32 %v283_v20, 0.0  ;;  %v215_v54 = vmul.f32 %v1724_v47, %v1903_v2  ;;  %v216_v55 = vmul.f32 %v1725_v48, %v1903_v2 }
  0x45   :  { %v284_v34 = vadd.f32 %v1914_v8, %v213_v49  ;;  %v381_v56 = vpack.c.bf16 %v345_v51, %v344_v50  ;;  %v285_v57 = vadd.f32 %v1914_v8, %v214_v52  ;;  %v1728_v58 = vunpack.c.l.bf16 %v1760_v18 }
  0x46   :  { %1825 = vmatmul.mubr.msk.bf16.gmra.mrb[28].mxu0 %vm387_vm1, %v369_v10  ;;  %1841 = vmatmul.mubr.msk.bf16.gmra.mrb[12].mxu1 %vm387_vm1, %v377_v19  ;;  %v1729_v59 = vunpack.c.h.bf16 %v1760_v18  ;;  %v382_v60 = vpack.c.bf16 %v347_v53, %v346_v30  ;;  %v286_v61 = vadd.f32 %v1914_v8, %v215_v54  ;;  %v287_v62 = vadd.f32 %v1914_v8, %v216_v55 }
  0x47   :  { %1844 = vmatprep.mubr.msk.bf16.mxu1 %vm387_vm1, %v378_v32  ;;  %v348_v63 = vmax.f32 %v284_v34, 0.0  ;;  %v349_v0 = vmax.f32 %v285_v57, 0.0  ;;  %v217_v3 = vmul.f32 %v1728_v58, %v1903_v2 }
  0x48   :  { %v218_v4 = vmul.f32 %v1729_v59, %v1903_v2  ;;  %v350_v5 = vmax.f32 %v286_v61, 0.0  ;;  %v351_v7 = vmax.f32 %v287_v62, 0.0 }
  0x49   :  { %v383_v9 = vpack.c.bf16 %v349_v0, %v348_v63  ;;  %v288_v10 = vadd.f32 %v1914_v8, %v217_v3 }
  0x4a   :  { %v289_v11 = vadd.f32 %v1914_v8, %v218_v4  ;;  %v384_v12 = vpack.c.bf16 %v351_v7, %v350_v5 }
  0x4b   :  { %v352_v13 = vmax.f32 %v288_v10, 0.0 }
  0x4c   :  { %v353_v14 = vmax.f32 %v289_v11, 0.0 }
  0x4e   :  { %1845 = vmatmul.mubr.msk.bf16.gmra.mrb[16].mxu1 %vm387_vm1, %v379_v42  ;;  %v385_v15 = vpack.c.bf16 %v353_v14, %v352_v13 }
  0x4f   :  { %1848 = vmatprep.mubr.msk.bf16.mxu1 %vm387_vm1, %v380_v43 }
  0x56   :  { %1849 = vmatmul.mubr.msk.bf16.gmra.mrb[20].mxu1 %vm387_vm1, %v381_v56 }
  0x57   :  { %1852 = vmatprep.mubr.msk.bf16.mxu1 %vm387_vm1, %v382_v60 }
  0x5e   :  { %1853 = vmatmul.mubr.msk.bf16.gmra.mrb[24].mxu1 %vm387_vm1, %v383_v9 }
  0x5f   :  { %1856 = vmatprep.mubr.msk.bf16.mxu1 %vm387_vm1, %v384_v12 }
  0x66   :  { %1857 = vmatmul.mubr.msk.bf16.gmra.mrb[28].mxu1 %vm387_vm1, %v385_v15 }
  0xe1   :  { %v1798_v2 = vpop.f32.mrb[0].mxu0 }
  0xe2   :  { %v1540_v16 = vpack.c.bf16 %v1798_v2, %v1798_v2  ;;  %v522_v17 = vpop.f32.mrb[1].mxu0  ;;  %v1236_v8 = vmul.f32 %v1798_v2, %v1798_v2  ;;  %v1102_v37 = vsel %vm1098_vm3, %v1798_v2, 0.0 }
  0xe3   :  { %v1538_v19 = vpack.c.bf16 %v522_v17, %v522_v17  ;;  %v1234_v22 = vmul.f32 %v522_v17, %v522_v17  ;;  %v1799_v23 = vpop.f32.mrb[2].mxu0  ;;  %v1099_v28 = vsel %vm1098_vm3, %v522_v17, 0.0 }
  0xe4   :  { %1036 = vst.msk [vmem:[%s2815_s4 + $0x8] sm:$0xf] %vm1033_vm2, %v1540_v16  ;;  %v1541_v24 = vpack.c.bf16 %v1799_v23, %v1799_v23  ;;  %v525_v27 = vpop.f32.mrb[3].mxu0  ;;  %v1237_v35 = vmul.f32 %v1799_v23, %v1799_v23  ;;  %v1301_v39 = vsel %vm1098_vm3, %v1236_v8, 0.0  ;;  %v1104_v1 = vsel %vm1098_vm3, %v1799_v23, 0.0 }
  0xe5   :  { %1034 = vst.msk [vmem:[%s2815_s4] sm:$0xf] %vm1033_vm2, %v1538_v19  ;;  %v1539_v31 = vpack.c.bf16 %v525_v27, %v525_v27  ;;  %v1100_v32 = vsel %vm1098_vm3, %v525_v27, 0.0  ;;  %v1235_v33 = vmul.f32 %v525_v27, %v525_v27  ;;  %v1298_v6 = vsel %vm1098_vm3, %v1234_v22, 0.0 }
  0xe6   :  { %1037 = vst.msk [vmem:[%s2815_s4 + $0xc] sm:$0xf] %vm1033_vm2, %v1541_v24  ;;  %v1101_v36 = vadd.f32 %v1100_v32, %v1099_v28  ;;  %v1303_v29 = vsel %vm1098_vm3, %v1237_v35, 0.0 }
  0xe7   :  { %1035 = vst.msk [vmem:[%s2815_s4 + $0x4] sm:$0xf] %vm1033_vm2, %v1539_v31  ;;  %v1299_v21 = vsel %vm1098_vm3, %v1235_v33, 0.0 }
  0xe8   :  { %v1103_v25 = vadd.f32 %v1102_v37, %v1101_v36  ;;  %v1300_v26 = vadd.f32 %v1299_v21, %v1298_v6 }
  0xe9   :  { %v1802_v38 = vpop.f32.mrb[4].mxu0 }
  0xea   :  { %v1302_v40 = vadd.f32 %v1301_v39, %v1300_v26  ;;  %v1544_v41 = vpack.c.bf16 %v1802_v38, %v1802_v38  ;;  %v538_v42 = vpop.f32.mrb[5].mxu0  ;;  %v1105_v44 = vadd.f32 %v1104_v1, %v1103_v25  ;;  %v1240_v30 = vmul.f32 %v1802_v38, %v1802_v38 }
  0xeb   :  { %v1542_v43 = vpack.c.bf16 %v538_v42, %v538_v42  ;;  %v1106_v45 = vsel %vm1098_vm3, %v538_v42, 0.0  ;;  %v1238_v46 = vmul.f32 %v538_v42, %v538_v42  ;;  %v1803_v20 = vpop.f32.mrb[6].mxu0  ;;  %v1110_v34 = vsel %vm1098_vm3, %v1802_v38, 0.0 }
  0xec   :  { %1040 = vst.msk [vmem:[%s2815_s4 + $0x18] sm:$0xf] %vm1033_vm2, %v1544_v41  ;;  %v1304_v47 = vadd.f32 %v1303_v29, %v1302_v40  ;;  %v1545_v48 = vpack.c.bf16 %v1803_v20, %v1803_v20  ;;  %v541_v49 = vpop.f32.mrb[7].mxu0  ;;  %v1107_v50 = vadd.f32 %v1106_v45, %v1105_v44  ;;  %v1241_v56 = vmul.f32 %v1803_v20, %v1803_v20 }
  0xed   :  { %1038 = vst.msk [vmem:[%s2815_s4 + $0x10] sm:$0xf] %vm1033_vm2, %v1542_v43  ;;  %v1305_v51 = vsel %vm1098_vm3, %v1238_v46, 0.0  ;;  %v1543_v52 = vpack.c.bf16 %v541_v49, %v541_v49  ;;  %v1108_v54 = vsel %vm1098_vm3, %v541_v49, 0.0  ;;  %v1239_v55 = vmul.f32 %v541_v49, %v541_v49 }
  0xee   :  { %v1306_v53 = vadd.f32 %v1305_v51, %v1304_v47  ;;  %1041 = vst.msk [vmem:[%s2815_s4 + $0x1c] sm:$0xf] %vm1033_vm2, %v1545_v48  ;;  %v1109_v18 = vadd.f32 %v1108_v54, %v1107_v50  ;;  %v1309_v61 = vsel %vm1098_vm3, %v1240_v30, 0.0  ;;  %v1112_v62 = vsel %vm1098_vm3, %v1803_v20, 0.0 }
  0xef   :  { %1039 = vst.msk [vmem:[%s2815_s4 + $0x14] sm:$0xf] %vm1033_vm2, %v1543_v52  ;;  %v1307_v57 = vsel %vm1098_vm3, %v1239_v55, 0.0  ;;  %v1311_v10 = vsel %vm1098_vm3, %v1241_v56, 0.0 }
  0xf0   :  { %v1111_v58 = vadd.f32 %v1110_v34, %v1109_v18  ;;  %v1308_v59 = vadd.f32 %v1307_v57, %v1306_v53 }
  0xf1   :  { %v1806_v60 = vpop.f32.mrb[8].mxu0 }
  0xf2   :  { %v1548_v63 = vpack.c.bf16 %v1806_v60, %v1806_v60  ;;  %v554_v0 = vpop.f32.mrb[9].mxu0  ;;  %v1310_v3 = vadd.f32 %v1309_v61, %v1308_v59  ;;  %v1113_v5 = vadd.f32 %v1112_v62, %v1111_v58  ;;  %v1244_v16 = vmul.f32 %v1806_v60, %v1806_v60 }
  0xf3   :  { %v1546_v4 = vpack.c.bf16 %v554_v0, %v554_v0  ;;  %v1114_v7 = vsel %vm1098_vm3, %v554_v0, 0.0  ;;  %v1807_v9 = vpop.f32.mrb[10].mxu0  ;;  %v1242_v11 = vmul.f32 %v554_v0, %v554_v0  ;;  %v1118_v24 = vsel %vm1098_vm3, %v1806_v60, 0.0 }
  0xf4   :  { %1044 = vst.msk [vmem:[%s2815_s4 + $0x28] sm:$0xf] %vm1033_vm2, %v1548_v63  ;;  %v1549_v12 = vpack.c.bf16 %v1807_v9, %v1807_v9  ;;  %v557_v13 = vpop.f32.mrb[11].mxu0  ;;  %v1115_v14 = vadd.f32 %v1114_v7, %v1113_v5  ;;  %v1312_v15 = vadd.f32 %v1311_v10, %v1310_v3  ;;  %v1245_v27 = vmul.f32 %v1807_v9, %v1807_v9 }
  0xf5   :  { %1042 = vst.msk [vmem:[%s2815_s4 + $0x20] sm:$0xf] %vm1033_vm2, %v1546_v4  ;;  %v1547_v2 = vpack.c.bf16 %v557_v13, %v557_v13  ;;  %v1313_v17 = vsel %vm1098_vm3, %v1242_v11, 0.0  ;;  %v1116_v19 = vsel %vm1098_vm3, %v557_v13, 0.0  ;;  %v1243_v22 = vmul.f32 %v557_v13, %v557_v13 }
  0xf6   :  { %1045 = vst.msk [vmem:[%s2815_s4 + $0x2c] sm:$0xf] %vm1033_vm2, %v1549_v12  ;;  %v1314_v23 = vadd.f32 %v1313_v17, %v1312_v15  ;;  %v1117_v8 = vadd.f32 %v1116_v19, %v1115_v14  ;;  %v1317_v35 = vsel %vm1098_vm3, %v1244_v16, 0.0  ;;  %v1120_v36 = vsel %vm1098_vm3, %v1807_v9, 0.0 }
  0xf7   :  { %1043 = vst.msk [vmem:[%s2815_s4 + $0x24] sm:$0xf] %vm1033_vm2, %v1547_v2  ;;  %v1315_v28 = vsel %vm1098_vm3, %v1243_v22, 0.0  ;;  %v1319_v1 = vsel %vm1098_vm3, %v1245_v27, 0.0 }
  0xf8   :  { %v1119_v31 = vadd.f32 %v1118_v24, %v1117_v8  ;;  %v1316_v32 = vadd.f32 %v1315_v28, %v1314_v23 }
  0xf9   :  { %v1810_v33 = vpop.f32.mrb[12].mxu0 }
  0xfa   :  { %v1552_v37 = vpack.c.bf16 %v1810_v33, %v1810_v33  ;;  %v570_v6 = vpop.f32.mrb[13].mxu0  ;;  %v1318_v21 = vadd.f32 %v1317_v35, %v1316_v32  ;;  %v1121_v26 = vadd.f32 %v1120_v36, %v1119_v31  ;;  %v1248_v45 = vmul.f32 %v1810_v33, %v1810_v33 }
  0xfb   :  { %v1550_v25 = vpack.c.bf16 %v570_v6, %v570_v6  ;;  %v1122_v39 = vsel %vm1098_vm3, %v570_v6, 0.0  ;;  %v1811_v38 = vpop.f32.mrb[14].mxu0  ;;  %v1246_v29 = vmul.f32 %v570_v6, %v570_v6  ;;  %v1126_v50 = vsel %vm1098_vm3, %v1810_v33, 0.0 }
  0xfc   :  { %1048 = vst.msk [vmem:[%s2815_s4 + $0x38] sm:$0xf] %vm1033_vm2, %v1552_v37  ;;  %v1553_v40 = vpack.c.bf16 %v1811_v38, %v1811_v38  ;;  %v573_v41 = vpop.f32.mrb[15].mxu0  ;;  %v1123_v42 = vadd.f32 %v1122_v39, %v1121_v26  ;;  %v1320_v43 = vadd.f32 %v1319_v1, %v1318_v21  ;;  %v1249_v51 = vmul.f32 %v1811_v38, %v1811_v38 }
  0xfd   :  { %1046 = vst.msk [vmem:[%s2815_s4 + $0x30] sm:$0xf] %vm1033_vm2, %v1550_v25  ;;  %v1551_v44 = vpack.c.bf16 %v573_v41, %v573_v41  ;;  %v1321_v46 = vsel %vm1098_vm3, %v1246_v29, 0.0  ;;  %v1124_v20 = vsel %vm1098_vm3, %v573_v41, 0.0  ;;  %v1247_v47 = vmul.f32 %v573_v41, %v573_v41 }
  0xfe   :  { %1049 = vst.msk [vmem:[%s2815_s4 + $0x3c] sm:$0xf] %vm1033_vm2, %v1553_v40  ;;  %v1322_v48 = vadd.f32 %v1321_v46, %v1320_v43  ;;  %v1125_v49 = vadd.f32 %v1124_v20, %v1123_v42  ;;  %v1325_v55 = vsel %vm1098_vm3, %v1248_v45, 0.0  ;;  %v1128_v18 = vsel %vm1098_vm3, %v1811_v38, 0.0 }
  0xff   :  { %1047 = vst.msk [vmem:[%s2815_s4 + $0x34] sm:$0xf] %vm1033_vm2, %v1551_v44  ;;  %v1323_v52 = vsel %vm1098_vm3, %v1247_v47, 0.0  ;;  %v1327_v62 = vsel %vm1098_vm3, %v1249_v51, 0.0 }
 0x100   :  { %v1127_v30 = vadd.f32 %v1126_v50, %v1125_v49  ;;  %v1324_v53 = vadd.f32 %v1323_v52, %v1322_v48 }
 0x101   :  { %v1814_v54 = vpop.f32.mrb[16].mxu0  ;;  %v2302_v10 = vpop.f32.mrb[0].mxu1 }
 0x102   :  { %v1556_v34 = vpack.c.bf16 %v1814_v54, %v1814_v54  ;;  %v586_v56 = vpop.f32.mrb[17].mxu0  ;;  %v1326_v57 = vadd.f32 %v1325_v55, %v1324_v53  ;;  %v1129_v59 = vadd.f32 %v1128_v18, %v1127_v30  ;;  %v1252_v4 = vmul.f32 %v1814_v54, %v1814_v54  ;;  %v2312_v15 = vpop.f32.mrb[1].mxu1 }
 0x103   :  { %v1554_v58 = vpack.c.bf16 %v586_v56, %v586_v56  ;;  %v1130_v60 = vsel %vm1098_vm3, %v586_v56, 0.0  ;;  %v1815_v61 = vpop.f32.mrb[18].mxu0  ;;  %v1250_v63 = vmul.f32 %v586_v56, %v586_v56  ;;  %v1572_v14 = vpack.c.bf16 %v2302_v10, %v2302_v10  ;;  %v2318_v17 = vpop.f32.mrb[2].mxu1 }
 0x104   :  { %1052 = vst.msk [vmem:[%s2815_s4 + $0x48] sm:$0xf] %vm1033_vm2, %v1556_v34  ;;  %v1557_v0 = vpack.c.bf16 %v1815_v61, %v1815_v61  ;;  %v589_v3 = vpop.f32.mrb[19].mxu0  ;;  %v1131_v5 = vadd.f32 %v1130_v60, %v1129_v59  ;;  %v1328_v7 = vadd.f32 %v1327_v62, %v1326_v57  ;;  %v1134_v19 = vsel %vm1098_vm3, %v1814_v54, 0.0  ;;  %v2328_v24 = vpop.f32.mrb[3].mxu1 }
 0x105   :  { %1050 = vst.msk [vmem:[%s2815_s4 + $0x40] sm:$0xf] %vm1033_vm2, %v1554_v58  ;;  %v1555_v9 = vpack.c.bf16 %v589_v3, %v589_v3  ;;  %v1329_v11 = vsel %vm1098_vm3, %v1250_v63, 0.0  ;;  %v1132_v12 = vsel %vm1098_vm3, %v589_v3, 0.0  ;;  %v1251_v13 = vmul.f32 %v589_v3, %v589_v3  ;;  %1068 = vst.msk [vmem:[%s2815_s4 + $0x88] sm:$0xf] %vm1033_vm2, %v1572_v14 }
 0x106   :  { %1053 = vst.msk [vmem:[%s2815_s4 + $0x4c] sm:$0xf] %vm1033_vm2, %v1557_v0  ;;  %v1330_v2 = vadd.f32 %v1329_v11, %v1328_v7  ;;  %v1133_v16 = vadd.f32 %v1132_v12, %v1131_v5  ;;  %v1253_v22 = vmul.f32 %v1815_v61, %v1815_v61  ;;  %v1570_v8 = vpack.c.bf16 %v2312_v15, %v2312_v15 }
 0x107   :  { %1051 = vst.msk [vmem:[%s2815_s4 + $0x44] sm:$0xf] %vm1033_vm2, %v1555_v9  ;;  %v1331_v23 = vsel %vm1098_vm3, %v1251_v13, 0.0  ;;  %v1573_v32 = vpack.c.bf16 %v2318_v17, %v2318_v17  ;;  %v1333_v33 = vsel %vm1098_vm3, %v1252_v4, 0.0  ;;  %v1136_v35 = vsel %vm1098_vm3, %v1815_v61, 0.0 }
 0x108   :  { %v1135_v27 = vadd.f32 %v1134_v19, %v1133_v16  ;;  %v1332_v28 = vadd.f32 %v1331_v23, %v1330_v2  ;;  %1066 = vst.msk [vmem:[%s2815_s4 + $0x80] sm:$0xf] %vm1033_vm2, %v1570_v8  ;;  %v1335_v38 = vsel %vm1098_vm3, %v1253_v22, 0.0  ;;  %v1571_v54 = vpack.c.bf16 %v2328_v24, %v2328_v24 }
 0x109   :  { %v1818_v31 = vpop.f32.mrb[20].mxu0  ;;  %1069 = vst.msk [vmem:[%s2815_s4 + $0x8c] sm:$0xf] %vm1033_vm2, %v1573_v32  ;;  %v2352_v44 = vpop.f32.mrb[4].mxu1 }
 0x10a   :  { %v1560_v36 = vpack.c.bf16 %v1818_v31, %v1818_v31  ;;  %v602_v37 = vpop.f32.mrb[21].mxu0  ;;  %v1334_v6 = vadd.f32 %v1333_v33, %v1332_v28  ;;  %v1137_v25 = vadd.f32 %v1136_v35, %v1135_v27  ;;  %v1256_v45 = vmul.f32 %v1818_v31, %v1818_v31  ;;  %v2360_v48 = vpop.f32.mrb[5].mxu1  ;;  %1067 = vst.msk [vmem:[%s2815_s4 + $0x84] sm:$0xf] %vm1033_vm2, %v1571_v54 }
 0x10b   :  { %v1558_v21 = vpack.c.bf16 %v602_v37, %v602_v37  ;;  %v1138_v26 = vsel %vm1098_vm3, %v602_v37, 0.0  ;;  %v1819_v39 = vpop.f32.mrb[22].mxu0  ;;  %v1254_v1 = vmul.f32 %v602_v37, %v602_v37  ;;  %v2366_v51 = vpop.f32.mrb[6].mxu1  ;;  %v1142_v52 = vsel %vm1098_vm3, %v1818_v31, 0.0 }
 0x10c   :  { %1056 = vst.msk [vmem:[%s2815_s4 + $0x58] sm:$0xf] %vm1033_vm2, %v1560_v36  ;;  %v1561_v29 = vpack.c.bf16 %v1819_v39, %v1819_v39  ;;  %v605_v40 = vpop.f32.mrb[23].mxu0  ;;  %v1139_v41 = vadd.f32 %v1138_v26, %v1137_v25  ;;  %v1336_v42 = vadd.f32 %v1335_v38, %v1334_v6  ;;  %v1257_v30 = vmul.f32 %v1819_v39, %v1819_v39  ;;  %v2372_v55 = vpop.f32.mrb[7].mxu1 }
 0x10d   :  { %1054 = vst.msk [vmem:[%s2815_s4 + $0x50] sm:$0xf] %vm1033_vm2, %v1558_v21  ;;  %v1559_v43 = vpack.c.bf16 %v605_v40, %v605_v40  ;;  %v1337_v46 = vsel %vm1098_vm3, %v1254_v1, 0.0  ;;  %v1140_v20 = vsel %vm1098_vm3, %v605_v40, 0.0  ;;  %v1255_v47 = vmul.f32 %v605_v40, %v605_v40 }
 0x10e   :  { %1057 = vst.msk [vmem:[%s2815_s4 + $0x5c] sm:$0xf] %vm1033_vm2, %v1561_v29  ;;  %v1338_v49 = vadd.f32 %v1337_v46, %v1336_v42  ;;  %v1141_v50 = vadd.f32 %v1140_v20, %v1139_v41  ;;  %v1576_v57 = vpack.c.bf16 %v2352_v44, %v2352_v44  ;;  %v1341_v58 = vsel %vm1098_vm3, %v1256_v45, 0.0 }
 0x10f   :  { %1055 = vst.msk [vmem:[%s2815_s4 + $0x54] sm:$0xf] %vm1033_vm2, %v1559_v43  ;;  %v1339_v53 = vsel %vm1098_vm3, %v1255_v47, 0.0  ;;  %v1144_v59 = vsel %vm1098_vm3, %v1819_v39, 0.0  ;;  %v1343_v5 = vsel %vm1098_vm3, %v1257_v30, 0.0  ;;  %v1574_v36 = vpack.c.bf16 %v2360_v48, %v2360_v48 }
 0x110   :  { %v1143_v18 = vadd.f32 %v1142_v52, %v1141_v50  ;;  %v1340_v34 = vadd.f32 %v1339_v53, %v1338_v49  ;;  %1072 = vst.msk [vmem:[%s2815_s4 + $0x98] sm:$0xf] %vm1033_vm2, %v1576_v57  ;;  %v1577_v26 = vpack.c.bf16 %v2366_v51, %v2366_v51 }
 0x111   :  { %v1822_v56 = vpop.f32.mrb[24].mxu0  ;;  %v2396_v2 = vpop.f32.mrb[8].mxu1  ;;  %1070 = vst.msk [vmem:[%s2815_s4 + $0x90] sm:$0xf] %vm1033_vm2, %v1574_v36  ;;  %v1268_v36 = vmul.f32 %v2302_v10, %v2302_v10 }
 0x112   :  { %v1564_v60 = vpack.c.bf16 %v1822_v56, %v1822_v56  ;;  %v618_v61 = vpop.f32.mrb[25].mxu0  ;;  %v1342_v62 = vadd.f32 %v1341_v58, %v1340_v34  ;;  %v1145_v0 = vadd.f32 %v1144_v59, %v1143_v18  ;;  %v1260_v16 = vmul.f32 %v1822_v56, %v1822_v56  ;;  %v2404_v8 = vpop.f32.mrb[9].mxu1  ;;  %1073 = vst.msk [vmem:[%s2815_s4 + $0x9c] sm:$0xf] %vm1033_vm2, %v1577_v26 }
 0x113   :  { %v1562_v63 = vpack.c.bf16 %v618_v61, %v618_v61  ;;  %v1146_v3 = vsel %vm1098_vm3, %v618_v61, 0.0  ;;  %v1823_v4 = vpop.f32.mrb[26].mxu0  ;;  %v1258_v7 = vmul.f32 %v618_v61, %v618_v61  ;;  %v2410_v31 = vpop.f32.mrb[10].mxu1  ;;  %v1150_v32 = vsel %vm1098_vm3, %v1822_v56, 0.0 }
 0x114   :  { %1060 = vst.msk [vmem:[%s2815_s4 + $0x68] sm:$0xf] %vm1033_vm2, %v1564_v60  ;;  %v1565_v9 = vpack.c.bf16 %v1823_v4, %v1823_v4  ;;  %v621_v11 = vpop.f32.mrb[27].mxu0  ;;  %v1147_v12 = vadd.f32 %v1146_v3, %v1145_v0  ;;  %v1344_v13 = vadd.f32 %v1343_v5, %v1342_v62  ;;  %v1261_v33 = vmul.f32 %v1823_v4, %v1823_v4  ;;  %v2416_v37 = vpop.f32.mrb[11].mxu1 }
 0x115   :  { %1058 = vst.msk [vmem:[%s2815_s4 + $0x60] sm:$0xf] %vm1033_vm2, %v1562_v63  ;;  %v1563_v14 = vpack.c.bf16 %v621_v11, %v621_v11  ;;  %v1345_v19 = vsel %vm1098_vm3, %v1258_v7, 0.0  ;;  %v1148_v22 = vsel %vm1098_vm3, %v621_v11, 0.0  ;;  %v1259_v23 = vmul.f32 %v621_v11, %v621_v11 }
 0x116   :  { %1061 = vst.msk [vmem:[%s2815_s4 + $0x6c] sm:$0xf] %vm1033_vm2, %v1565_v9  ;;  %v1346_v27 = vadd.f32 %v1345_v19, %v1344_v13  ;;  %v1149_v28 = vadd.f32 %v1148_v22, %v1147_v12  ;;  %v1349_v39 = vsel %vm1098_vm3, %v1260_v16, 0.0  ;;  %v1152_v38 = vsel %vm1098_vm3, %v1823_v4, 0.0 }
 0x117   :  { %1059 = vst.msk [vmem:[%s2815_s4 + $0x64] sm:$0xf] %vm1033_vm2, %v1563_v14  ;;  %v1347_v35 = vsel %vm1098_vm3, %v1259_v23, 0.0  ;;  %v1351_v46 = vsel %vm1098_vm3, %v1261_v33, 0.0  ;;  %v1266_v60 = vmul.f32 %v2312_v15, %v2312_v15  ;;  %v1575_v3 = vpack.c.bf16 %v2372_v55, %v2372_v55 }
 0x118   :  { %v1151_v6 = vadd.f32 %v1150_v32, %v1149_v28  ;;  %v1348_v21 = vadd.f32 %v1347_v35, %v1346_v27  ;;  %v1580_v9 = vpack.c.bf16 %v2396_v2, %v2396_v2  ;;  %v1162_v13 = vsel %vm1098_vm3, %v2312_v15, 0.0 }
 0x119   :  { %v1826_v25 = vpop.f32.mrb[28].mxu0  ;;  %v2440_v53 = vpop.f32.mrb[12].mxu1  ;;  %1071 = vst.msk [vmem:[%s2815_s4 + $0x94] sm:$0xf] %vm1033_vm2, %v1575_v3  ;;  %v1578_v14 = vpack.c.bf16 %v2404_v8, %v2404_v8  ;;  %v1361_v23 = vsel %vm1098_vm3, %v1266_v60, 0.0  ;;  %v1267_v15 = vmul.f32 %v2328_v24, %v2328_v24  ;;  %v1581_v27 = vpack.c.bf16 %v2410_v31, %v2410_v31 }
 0x11a   :  { %v1568_v1 = vpack.c.bf16 %v1826_v25, %v1826_v25  ;;  %v634_v29 = vpop.f32.mrb[29].mxu0  ;;  %v1350_v40 = vadd.f32 %v1349_v39, %v1348_v21  ;;  %v1153_v42 = vadd.f32 %v1152_v38, %v1151_v6  ;;  %v1264_v54 = vmul.f32 %v1826_v25, %v1826_v25  ;;  %v2448_v57 = vpop.f32.mrb[13].mxu1  ;;  %1076 = vst.msk [vmem:[%s2815_s4 + $0xa8] sm:$0xf] %vm1033_vm2, %v1580_v9 }
 0x11b   :  { %v1566_v41 = vpack.c.bf16 %v634_v29, %v634_v29  ;;  %v1154_v43 = vsel %vm1098_vm3, %v634_v29, 0.0  ;;  %v1827_v45 = vpop.f32.mrb[30].mxu0  ;;  %v1262_v20 = vmul.f32 %v634_v29, %v634_v29  ;;  %v2456_v61 = vpop.f32.mrb[14].mxu1  ;;  %v1158_v62 = vsel %vm1098_vm3, %v1826_v25, 0.0  ;;  %1074 = vst.msk [vmem:[%s2815_s4 + $0xa0] sm:$0xf] %vm1033_vm2, %v1578_v14 }
 0x11c   :  { %1064 = vst.msk [vmem:[%s2815_s4 + $0x78] sm:$0xf] %vm1033_vm2, %v1568_v1  ;;  %v1569_v47 = vpack.c.bf16 %v1827_v45, %v1827_v45  ;;  %v637_v49 = vpop.f32.mrb[31].mxu0  ;;  %v1155_v50 = vadd.f32 %v1154_v43, %v1153_v42  ;;  %v1352_v52 = vadd.f32 %v1351_v46, %v1350_v40  ;;  %v1265_v63 = vmul.f32 %v1827_v45, %v1827_v45  ;;  %v2462_v4 = vpop.f32.mrb[15].mxu1 }
 0x11d   :  { %1062 = vst.msk [vmem:[%s2815_s4 + $0x70] sm:$0xf] %vm1033_vm2, %v1566_v41  ;;  %v1567_v30 = vpack.c.bf16 %v637_v49, %v637_v49  ;;  %v1353_v18 = vsel %vm1098_vm3, %v1262_v20, 0.0  ;;  %v1156_v34 = vsel %vm1098_vm3, %v637_v49, 0.0  ;;  %v1263_v56 = vmul.f32 %v637_v49, %v637_v49  ;;  %1077 = vst.msk [vmem:[%s2815_s4 + $0xac] sm:$0xf] %vm1033_vm2, %v1581_v27 }
 0x11e   :  { %1065 = vst.msk [vmem:[%s2815_s4 + $0x7c] sm:$0xf] %vm1033_vm2, %v1569_v47  ;;  %v1354_v58 = vadd.f32 %v1353_v18, %v1352_v52  ;;  %v1157_v59 = vadd.f32 %v1156_v34, %v1155_v50  ;;  %v1357_v11 = vsel %vm1098_vm3, %v1264_v54, 0.0  ;;  %v1160_v12 = vsel %vm1098_vm3, %v1827_v45, 0.0 }
 0x11f   :  { %1063 = vst.msk [vmem:[%s2815_s4 + $0x74] sm:$0xf] %vm1033_vm2, %v1567_v30  ;;  %v1355_v0 = vsel %vm1098_vm3, %v1263_v56, 0.0  ;;  %v1359_v22 = vsel %vm1098_vm3, %v1265_v63, 0.0  ;;  %v1579_v33 = vpack.c.bf16 %v2416_v37, %v2416_v37  ;;  %v1164_v6 = vsel %vm1098_vm3, %v2328_v24, 0.0 }
 0x120   :  { %v1159_v5 = vadd.f32 %v1158_v62, %v1157_v59  ;;  %v1356_v7 = vadd.f32 %v1355_v0, %v1354_v58  ;;  %v1584_v21 = vpack.c.bf16 %v2440_v53, %v2440_v53  ;;  %v1166_v26 = vsel %vm1098_vm3, %v2302_v10, 0.0 }
 0x121   :  { %v2492_v35 = vpop.f32.mrb[16].mxu1  ;;  %1075 = vst.msk [vmem:[%s2815_s4 + $0xa4] sm:$0xf] %vm1033_vm2, %v1579_v33  ;;  %v1269_v1 = vmul.f32 %v2318_v17, %v2318_v17  ;;  %v1363_v29 = vsel %vm1098_vm3, %v1267_v15, 0.0  ;;  %v1270_v40 = vmul.f32 %v2360_v48, %v2360_v48  ;;  %v1582_v10 = vpack.c.bf16 %v2448_v57, %v2448_v57 }
 0x122   :  { %v1358_v16 = vadd.f32 %v1357_v11, %v1356_v7  ;;  %v1161_v19 = vadd.f32 %v1160_v12, %v1159_v5  ;;  %v2504_v25 = vpop.f32.mrb[17].mxu1  ;;  %1080 = vst.msk [vmem:[%s2815_s4 + $0xb8] sm:$0xf] %vm1033_vm2, %v1584_v21  ;;  %v1585_v45 = vpack.c.bf16 %v2456_v61, %v2456_v61  ;;  %v1365_v46 = vsel %vm1098_vm3, %v1268_v36, 0.0 }
 0x123   :  { %v2512_v24 = vpop.f32.mrb[18].mxu1  ;;  %v1168_v20 = vsel %vm1098_vm3, %v2318_v17, 0.0  ;;  %v1170_v47 = vsel %vm1098_vm3, %v2360_v48, 0.0  ;;  %1078 = vst.msk [vmem:[%s2815_s4 + $0xb0] sm:$0xf] %vm1033_vm2, %v1582_v10  ;;  %v1583_v49 = vpack.c.bf16 %v2462_v4, %v2462_v4  ;;  %v1367_v17 = vsel %vm1098_vm3, %v1269_v1, 0.0 }
 0x124   :  { %v1163_v28 = vadd.f32 %v1162_v13, %v1161_v19  ;;  %v1360_v32 = vadd.f32 %v1359_v22, %v1358_v16  ;;  %v2525_v41 = vpop.f32.mrb[19].mxu1  ;;  %1081 = vst.msk [vmem:[%s2815_s4 + $0xbc] sm:$0xf] %vm1033_vm2, %v1585_v45  ;;  %v1369_v30 = vsel %vm1098_vm3, %v1270_v40, 0.0  ;;  %v1271_v48 = vmul.f32 %v2372_v55, %v2372_v55 }
 0x125   :  { %1079 = vst.msk [vmem:[%s2815_s4 + $0xb4] sm:$0xf] %vm1033_vm2, %v1583_v49  ;;  %v1588_v54 = vpack.c.bf16 %v2492_v35, %v2492_v35  ;;  %v1586_v56 = vpack.c.bf16 %v2504_v25, %v2504_v25  ;;  %v1272_v59 = vmul.f32 %v2352_v44, %v2352_v44  ;;  %v1172_v60 = vsel %vm1098_vm3, %v2372_v55, 0.0 }
 0x126   :  { %v1362_v39 = vadd.f32 %v1361_v23, %v1360_v32  ;;  %v1165_v38 = vadd.f32 %v1164_v6, %v1163_v28  ;;  %v1589_v62 = vpack.c.bf16 %v2512_v24, %v2512_v24  ;;  %v1174_v0 = vsel %vm1098_vm3, %v2352_v44, 0.0 }
 0x127   :  { %1084 = vst.msk [vmem:[%s2815_s4 + $0xc8] sm:$0xf] %vm1033_vm2, %v1588_v54  ;;  %1082 = vst.msk [vmem:[%s2815_s4 + $0xc0] sm:$0xf] %vm1033_vm2, %v1586_v56  ;;  %v1273_v7 = vmul.f32 %v2366_v51, %v2366_v51  ;;  %v1371_v9 = vsel %vm1098_vm3, %v1271_v48, 0.0  ;;  %v1274_v11 = vmul.f32 %v2404_v8, %v2404_v8  ;;  %v1587_v44 = vpack.c.bf16 %v2525_v41, %v2525_v41 }
 0x128   :  { %v1167_v42 = vadd.f32 %v1166_v26, %v1165_v38  ;;  %v1364_v43 = vadd.f32 %v1363_v29, %v1362_v39  ;;  %1085 = vst.msk [vmem:[%s2815_s4 + $0xcc] sm:$0xf] %vm1033_vm2, %v1589_v62  ;;  %v1373_v19 = vsel %vm1098_vm3, %v1272_v59, 0.0  ;;  %v1176_v22 = vsel %vm1098_vm3, %v2366_v51, 0.0 }
 0x129   :  { %v2556_v58 = vpop.f32.mrb[20].mxu1  ;;  %v1178_v23 = vsel %vm1098_vm3, %v2404_v8, 0.0  ;;  %1083 = vst.msk [vmem:[%s2815_s4 + $0xc4] sm:$0xf] %vm1033_vm2, %v1587_v44  ;;  %v1375_v51 = vsel %vm1098_vm3, %v1273_v7, 0.0  ;;  %v1377_v32 = vsel %vm1098_vm3, %v1274_v11, 0.0  ;;  %v1275_v8 = vmul.f32 %v2416_v37, %v2416_v37 }
 0x12a   :  { %v1366_v50 = vadd.f32 %v1365_v46, %v1364_v43  ;;  %v1169_v52 = vadd.f32 %v1168_v20, %v1167_v42  ;;  %v2568_v63 = vpop.f32.mrb[21].mxu1  ;;  %v1592_v16 = vpack.c.bf16 %v2556_v58, %v2556_v58  ;;  %v1276_v39 = vmul.f32 %v2396_v2, %v2396_v2 }
 0x12b   :  { %v2576_v55 = vpop.f32.mrb[22].mxu1  ;;  %v1590_v15 = vpack.c.bf16 %v2568_v63, %v2568_v63  ;;  %v1180_v38 = vsel %vm1098_vm3, %v2416_v37, 0.0  ;;  %v1182_v40 = vsel %vm1098_vm3, %v2396_v2, 0.0  ;;  %v1277_v43 = vmul.f32 %v2410_v31, %v2410_v31 }
 0x12c   :  { %v1171_v18 = vadd.f32 %v1170_v47, %v1169_v52  ;;  %v1368_v34 = vadd.f32 %v1367_v17, %v1366_v50  ;;  %v2589_v12 = vpop.f32.mrb[23].mxu1  ;;  %1088 = vst.msk [vmem:[%s2815_s4 + $0xd8] sm:$0xf] %vm1033_vm2, %v1592_v16  ;;  %v1593_v33 = vpack.c.bf16 %v2576_v55, %v2576_v55  ;;  %v1379_v45 = vsel %vm1098_vm3, %v1275_v8, 0.0 }
 0x12d   :  { %1086 = vst.msk [vmem:[%s2815_s4 + $0xd0] sm:$0xf] %vm1033_vm2, %v1590_v15  ;;  %v1591_v21 = vpack.c.bf16 %v2589_v12, %v2589_v12  ;;  %v1278_v46 = vmul.f32 %v2448_v57, %v2448_v57  ;;  %v1381_v52 = vsel %vm1098_vm3, %v1276_v39, 0.0  ;;  %v1184_v17 = vsel %vm1098_vm3, %v2410_v31, 0.0 }
 0x12e   :  { %v1370_v3 = vadd.f32 %v1369_v30, %v1368_v34  ;;  %v1173_v5 = vadd.f32 %v1172_v60, %v1171_v18  ;;  %1089 = vst.msk [vmem:[%s2815_s4 + $0xdc] sm:$0xf] %vm1033_vm2, %v1593_v33  ;;  %v1186_v30 = vsel %vm1098_vm3, %v2448_v57, 0.0  ;;  %v1383_v31 = vsel %vm1098_vm3, %v1277_v43, 0.0 }
 0x12f   :  { %1087 = vst.msk [vmem:[%s2815_s4 + $0xd4] sm:$0xf] %vm1033_vm2, %v1591_v21  ;;  %v1385_v34 = vsel %vm1098_vm3, %v1278_v46, 0.0  ;;  %v1279_v57 = vmul.f32 %v2462_v4, %v2462_v4  ;;  %v1280_v62 = vmul.f32 %v2440_v53, %v2440_v53  ;;  %v1190_v7 = vsel %vm1098_vm3, %v2440_v53, 0.0 }
 0x130   :  { %v1175_v13 = vadd.f32 %v1174_v0, %v1173_v5  ;;  %v1372_v14 = vadd.f32 %v1371_v9, %v1370_v3  ;;  %v1188_v0 = vsel %vm1098_vm3, %v2462_v4, 0.0  ;;  %v1282_v16 = vmul.f32 %v2504_v25, %v2504_v25 }
 0x131   :  { %v2620_v26 = vpop.f32.mrb[24].mxu1  ;;  %v1387_v4 = vsel %vm1098_vm3, %v1279_v57, 0.0  ;;  %v1284_v21 = vmul.f32 %v2492_v35, %v2492_v35  ;;  %v1196_v39 = vsel %vm1098_vm3, %v2525_v41, 0.0  ;;  %v1286_v43 = vmul.f32 %v2568_v63, %v2568_v63 }
 0x132   :  { %v1374_v27 = vadd.f32 %v1373_v19, %v1372_v14  ;;  %v1177_v28 = vadd.f32 %v1176_v22, %v1175_v13  ;;  %v1596_v1 = vpack.c.bf16 %v2620_v26, %v2620_v26  ;;  %v2632_v29 = vpop.f32.mrb[25].mxu1  ;;  %v1281_v14 = vmul.f32 %v2456_v61, %v2456_v61 }
 0x133   :  { %v2640_v37 = vpop.f32.mrb[26].mxu1  ;;  %v1594_v2 = vpack.c.bf16 %v2632_v29, %v2632_v29 }
 0x134   :  { %v1179_v36 = vadd.f32 %v1178_v23, %v1177_v28  ;;  %v1376_v6 = vadd.f32 %v1375_v51, %v1374_v27  ;;  %1092 = vst.msk [vmem:[%s2815_s4 + $0xe8] sm:$0xf] %vm1033_vm2, %v1596_v1  ;;  %v2653_v20 = vpop.f32.mrb[27].mxu1  ;;  %v1597_v50 = vpack.c.bf16 %v2640_v37, %v2640_v37  ;;  %v1389_v27 = vsel %vm1098_vm3, %v1280_v62, 0.0 }
 0x135   :  { %1090 = vst.msk [vmem:[%s2815_s4 + $0xe0] sm:$0xf] %vm1033_vm2, %v1594_v2  ;;  %v1595_v48 = vpack.c.bf16 %v2653_v20, %v2653_v20  ;;  %v1192_v28 = vsel %vm1098_vm3, %v2456_v61, 0.0  ;;  %v1194_v51 = vsel %vm1098_vm3, %v2504_v25, 0.0  ;;  %v1391_v33 = vsel %vm1098_vm3, %v1281_v14, 0.0 }
 0x136   :  { %v1378_v10 = vadd.f32 %v1377_v32, %v1376_v6  ;;  %v1181_v42 = vadd.f32 %v1180_v38, %v1179_v36  ;;  %1093 = vst.msk [vmem:[%s2815_s4 + $0xec] sm:$0xf] %vm1033_vm2, %v1597_v50  ;;  %v1393_v36 = vsel %vm1098_vm3, %v1282_v16, 0.0  ;;  %v1283_v61 = vmul.f32 %v2525_v41, %v2525_v41 }
 0x137   :  { %1091 = vst.msk [vmem:[%s2815_s4 + $0xe4] sm:$0xf] %vm1033_vm2, %v1595_v48  ;;  %v1397_v2 = vsel %vm1098_vm3, %v1284_v21, 0.0  ;;  %v1200_v41 = vsel %vm1098_vm3, %v2512_v24, 0.0  ;;  %v1292_v16 = vmul.f32 %v2620_v26, %v2620_v26 }
 0x138   :  { %v1183_v47 = vadd.f32 %v1182_v40, %v1181_v42  ;;  %v1380_v49 = vadd.f32 %v1379_v45, %v1378_v10  ;;  %v1198_v40 = vsel %vm1098_vm3, %v2492_v35, 0.0  ;;  %v1285_v10 = vmul.f32 %v2512_v24, %v2512_v24 }
 0x139   :  { %v2680_v60 = vpop.f32.mrb[28].mxu1  ;;  %v1395_v42 = vsel %vm1098_vm3, %v1283_v61, 0.0  ;;  %v1204_v24 = vsel %vm1098_vm3, %v2589_v12, 0.0 }
 0x13a   :  { %v1382_v54 = vadd.f32 %v1381_v52, %v1380_v49  ;;  %v1185_v18 = vadd.f32 %v1184_v17, %v1183_v47  ;;  %v1600_v3 = vpack.c.bf16 %v2680_v60, %v2680_v60  ;;  %v2688_v5 = vpop.f32.mrb[29].mxu1  ;;  %v1202_v47 = vsel %vm1098_vm3, %v2568_v63, 0.0 }
 0x13b   :  { %v1598_v44 = vpack.c.bf16 %v2688_v5, %v2688_v5  ;;  %v2694_v13 = vpop.f32.mrb[30].mxu1  ;;  %v1399_v50 = vsel %vm1098_vm3, %v1285_v10, 0.0  ;;  %v1401_v52 = vsel %vm1098_vm3, %v1286_v43, 0.0  ;;  %v1287_v17 = vmul.f32 %v2589_v12, %v2589_v12 }
 0x13c   :  { %v1187_v56 = vadd.f32 %v1186_v30, %v1185_v18  ;;  %v1384_v59 = vadd.f32 %v1383_v31, %v1382_v54  ;;  %1096 = vst.msk [vmem:[%s2815_s4 + $0xf8] sm:$0xf] %vm1033_vm2, %v1600_v3  ;;  %v1601_v53 = vpack.c.bf16 %v2694_v13, %v2694_v13  ;;  %v2707_v19 = vpop.f32.mrb[31].mxu1  ;;  %v1288_v54 = vmul.f32 %v2556_v58, %v2556_v58 }
 0x13d   :  { %1094 = vst.msk [vmem:[%s2815_s4 + $0xf0] sm:$0xf] %vm1033_vm2, %v1598_v44  ;;  %v1599_v15 = vpack.c.bf16 %v2707_v19, %v2707_v19  ;;  %v1206_v63 = vsel %vm1098_vm3, %v2556_v58, 0.0  ;;  %v1403_v57 = vsel %vm1098_vm3, %v1287_v17, 0.0  ;;  %v1208_v12 = vsel %vm1098_vm3, %v2576_v55, 0.0 }
 0x13e   :  { %v1386_v9 = vadd.f32 %v1385_v34, %v1384_v59  ;;  %v1189_v11 = vadd.f32 %v1188_v0, %v1187_v56  ;;  %1097 = vst.msk [vmem:[%s2815_s4 + $0xfc] sm:$0xf] %vm1033_vm2, %v1601_v53  ;;  %v1289_v34 = vmul.f32 %v2576_v55, %v2576_v55  ;;  %v1290_v56 = vmul.f32 %v2632_v29, %v2632_v29 }
 0x13f   :  { %1095 = vst.msk [vmem:[%s2815_s4 + $0xf4] sm:$0xf] %vm1033_vm2, %v1599_v15  ;;  %v1405_v0 = vsel %vm1098_vm3, %v1288_v54, 0.0  ;;  %v1210_v3 = vsel %vm1098_vm3, %v2632_v29, 0.0  ;;  %v1291_v44 = vmul.f32 %v2653_v20, %v2653_v20  ;;  %v1212_v55 = vsel %vm1098_vm3, %v2653_v20, 0.0 }
 0x140   :  { %v1191_v22 = vadd.f32 %v1190_v7, %v1189_v11  ;;  %v1388_v23 = vadd.f32 %v1387_v4, %v1386_v9  ;;  %v1407_v9 = vsel %vm1098_vm3, %v1289_v34, 0.0  ;;  %v1409_v11 = vsel %vm1098_vm3, %v1290_v56, 0.0 }
 0x141   :  { %v1214_v29 = vsel %vm1098_vm3, %v2620_v26, 0.0  ;;  %v1411_v15 = vsel %vm1098_vm3, %v1291_v44, 0.0  ;;  %v1216_v20 = vsel %vm1098_vm3, %v2640_v37, 0.0 }
 0x142   :  { %v1390_v32 = vadd.f32 %v1389_v27, %v1388_v23  ;;  %v1193_v8 = vadd.f32 %v1192_v28, %v1191_v22  ;;  %v1293_v23 = vmul.f32 %v2640_v37, %v2640_v37  ;;  %v1294_v27 = vmul.f32 %v2688_v5, %v2688_v5 }
 0x143   :  { %v1220_v37 = vsel %vm1098_vm3, %v2707_v19, 0.0 }
 0x144   :  { %v1195_v25 = vadd.f32 %v1194_v51, %v1193_v8  ;;  %v1392_v6 = vadd.f32 %v1391_v33, %v1390_v32  ;;  %v1413_v32 = vsel %vm1098_vm3, %v1292_v16, 0.0  ;;  %v1218_v8 = vsel %vm1098_vm3, %v2688_v5, 0.0 }
 0x145   :  { %v1417_v61 = vsel %vm1098_vm3, %v1294_v27, 0.0  ;;  %v1222_v5 = vsel %vm1098_vm3, %v2680_v60, 0.0 }
 0x146   :  { %v1394_v38 = vadd.f32 %v1393_v36, %v1392_v6  ;;  %v1197_v1 = vadd.f32 %v1196_v39, %v1195_v25  ;;  %v1415_v36 = vsel %vm1098_vm3, %v1293_v23, 0.0  ;;  %v1295_v25 = vmul.f32 %v2707_v19, %v2707_v19 }
 0x147   :  { %v1296_v39 = vmul.f32 %v2680_v60, %v2680_v60 }
 0x148   :  { %v1199_v45 = vadd.f32 %v1198_v40, %v1197_v1  ;;  %v1396_v46 = vadd.f32 %v1395_v42, %v1394_v38  ;;  %v1297_v40 = vmul.f32 %v2694_v13, %v2694_v13  ;;  %v1419_v10 = vsel %vm1098_vm3, %v1295_v25, 0.0 }
 0x14a   :  { %v1398_v49 = vadd.f32 %v1397_v2, %v1396_v46  ;;  %v1201_v35 = vadd.f32 %v1200_v41, %v1199_v45  ;;  %v1421_v45 = vsel %vm1098_vm3, %v1296_v39, 0.0  ;;  %v1224_v46 = vsel %vm1098_vm3, %v2694_v13, 0.0 }
 0x14b   :  { %v1423_v19 = vsel %vm1098_vm3, %v1297_v40, 0.0 }
 0x14c   :  { %v1203_v30 = vadd.f32 %v1202_v47, %v1201_v35  ;;  %v1400_v48 = vadd.f32 %v1399_v50, %v1398_v49 }
 0x14e   :  { %v1402_v18 = vadd.f32 %v1401_v52, %v1400_v48  ;;  %v1205_v31 = vadd.f32 %v1204_v24, %v1203_v30 }
 0x150   :  { %v1207_v59 = vadd.f32 %v1206_v63, %v1205_v31  ;;  %v1404_v62 = vadd.f32 %v1403_v57, %v1402_v18 }
 0x152   :  { %v1406_v7 = vadd.f32 %v1405_v0, %v1404_v62  ;;  %v1209_v58 = vadd.f32 %v1208_v12, %v1207_v59 }
 0x154   :  { %v1211_v14 = vadd.f32 %v1210_v3, %v1209_v58  ;;  %v1408_v4 = vadd.f32 %v1407_v9, %v1406_v7 }
 0x156   :  { %v1410_v53 = vadd.f32 %v1409_v11, %v1408_v4  ;;  %v1213_v22 = vadd.f32 %v1212_v55, %v1211_v14 }
 0x158   :  { %v1215_v28 = vadd.f32 %v1214_v29, %v1213_v22  ;;  %v1412_v51 = vadd.f32 %v1411_v15, %v1410_v53 }
 0x15a   :  { %v1414_v33 = vadd.f32 %v1413_v32, %v1412_v51  ;;  %v1217_v26 = vadd.f32 %v1216_v20, %v1215_v28 }
 0x15c   :  { %v1219_v6 = vadd.f32 %v1218_v8, %v1217_v26  ;;  %v1416_v21 = vadd.f32 %v1415_v36, %v1414_v33 }
 0x15e   :  { %v1418_v38 = vadd.f32 %v1417_v61, %v1416_v21  ;;  %v1221_v1 = vadd.f32 %v1220_v37, %v1219_v6 }
 0x160   :  { %v1223_v42 = vadd.f32 %v1222_v5, %v1221_v1  ;;  %v1420_v43 = vadd.f32 %v1419_v10, %v1418_v38 }
 0x162   :  { %v1225_v2 = vadd.f32 %v1224_v46, %v1223_v42  ;;  %v1422_v41 = vadd.f32 %v1421_v45, %v1420_v43 }
 0x164   :  { %v1226_v47 = vrot.slane %v1225_v2, 4  ;;  %v1424_v49 = vadd.f32 %v1423_v19, %v1422_v41 }
 0x166   :  { %v1227_v35 = vadd.f32 %v1226_v47, %v1225_v2  ;;  %v1425_v60 = vrot.slane %v1424_v49, 4 }
 0x168   :  { %v1228_v50 = vrot.slane %v1227_v35, 2  ;;  %v1426_v52 = vadd.f32 %v1425_v60, %v1424_v49 }
 0x16a   :  { %v1229_v17 = vadd.f32 %v1228_v50, %v1227_v35  ;;  %v1427_v30 = vrot.slane %v1426_v52, 2 }
 0x16c   :  { %v1230_v48 = vrot.slane %v1229_v17, 1  ;;  %v1428_v54 = vadd.f32 %v1427_v30, %v1426_v52 }
 0x16e   :  { %v1231_v24 = vadd.f32 %v1230_v48, %v1229_v17  ;;  %v1429_v18 = vrot.slane %v1428_v54, 1 }
 0x170   :  { %1233 = vst.msk [vmem:[%s2816_s5] sm:$0x1] %vm1232_vm4, %v1231_v24  ;;  %v1430_v13 = vadd.f32 %v1429_v18, %v1428_v54 }
 0x172   :  { %1431 = vst.msk [vmem:[%s2816_s5 + $0x1] sm:$0x1] %vm1232_vm4, %v1430_v13 }

// kernel: bottleneck_forward.9
= control target key start
LH: loop header
LB: loop body
LE: loop exit
PB: predicated region body
PF: predicated region fallthrough
CT: control target
= control target key end

     0   :  { %vm691_vm0 = vcmask 130048   ;;  %s1865_s0 = inlined_call_operand.vmem [shape: bf16[512,16], index: 0, kind: input, shape index: {}]   ;;  %s1866_s1 = inlined_call_operand.vmem [shape: f32[1,16], index: 1, kind: input, shape index: {}]   ;;  %s1867_s2 = inlined_call_operand.vmem [shape: f32[1,16], index: 2, kind: input, shape index: {}]   ;;  %s1868_s3 = inlined_call_operand.vmem [shape: bf16[512,16], index: 3, kind: input, shape index: {}]   ;;  %s1869_s4 = inlined_call_operand.vmem [shape: f32[1,16], index: 4, kind: input, shape index: {}]   ;;  %s1870_s5 = inlined_call_operand.vmem [shape: f32[1,16], index: 5, kind: input, shape index: {}]   ;;  %s1871_s6 = inlined_call_operand.vmem [shape: f32[512,16], index: 6, kind: output, shape index: {}]  }
   0x1   :  { %v765_v0 = vld [vmem:[%s1865_s0] sm:$0xff]   ;;  %v1020_v9 = vld [vmem:[%s1865_s0 + $0x8] sm:$0xff]   ;;  %v1021_v15 = vld [vmem:[%s1865_s0 + $0x10] sm:$0xff]  }
   0x2   :  { %v1127_v1 = vld [vmem:[%s1866_s1] ss:$0 sm:$0xff]  ;;  %v766_v2 = vunpack.c.l.bf16 %v765_v0  ;;  %v767_v5 = vunpack.c.h.bf16 %v765_v0  ;;  %v1051_v10 = vld [vmem:[%s1868_s3 + $0x8] sm:$0xff]   ;;  %v770_v13 = vunpack.c.l.bf16 %v1020_v9  ;;  %v1052_v16 = vld [vmem:[%s1868_s3 + $0x10] sm:$0xff]   ;;  %v771_v19 = vunpack.c.h.bf16 %v1020_v9 }
   0x3   :  { %v893_v3 = vld [vmem:[%s1868_s3] sm:$0xff]   ;;  %v898_v14 = vunpack.c.l.bf16 %v1051_v10  ;;  %v899_v20 = vunpack.c.h.bf16 %v1051_v10  ;;  %v774_v28 = vunpack.c.l.bf16 %v1021_v15  ;;  %v902_v29 = vunpack.c.l.bf16 %v1052_v16  ;;  %v1022_v34 = vld [vmem:[%s1865_s0 + $0x18] sm:$0xff]   ;;  %v1024_v9 = vld [vmem:[%s1865_s0 + $0x28] sm:$0xff]  }
   0x4   :  { %v1135_v4 = vld [vmem:[%s1869_s4] ss:$0 sm:$0xff]  ;;  %v894_v7 = vunpack.c.l.bf16 %v893_v3  ;;  %v895_v8 = vunpack.c.h.bf16 %v893_v3  ;;  %v158_v11 = vmul.f32 %v766_v2, %v1127_v1  ;;  %v159_v12 = vmul.f32 %v767_v5, %v1127_v1  ;;  %v1053_v43 = vld [vmem:[%s1868_s3 + $0x18] sm:$0xff]  }
   0x5   :  { %v1140_v6 = vld [vmem:[%s1867_s2] ss:$0 sm:$0xff]  ;;  %v160_v23 = vmul.f32 %v770_v13, %v1127_v1  ;;  %v430_v24 = vmul.f32 %v898_v14, %v1135_v4  ;;  %v161_v26 = vmul.f32 %v771_v19, %v1127_v1  ;;  %v431_v27 = vmul.f32 %v899_v20, %v1135_v4  ;;  %v1055_v14 = vld [vmem:[%s1868_s3 + $0x28] sm:$0xff]  }
   0x6   :  { %v428_v17 = vmul.f32 %v894_v7, %v1135_v4  ;;  %v429_v18 = vmul.f32 %v895_v8, %v1135_v4  ;;  %v229_v21 = vadd.f32 %v1140_v6, %v158_v11  ;;  %v230_v22 = vadd.f32 %v1140_v6, %v159_v12  ;;  %v1165_v25 = vld [vmem:[%s1870_s5] ss:$0 sm:$0xff] }
   0x7   :  { %v231_v32 = vadd.f32 %v1140_v6, %v160_v23  ;;  %v775_v33 = vunpack.c.h.bf16 %v1021_v15  ;;  %v232_v35 = vadd.f32 %v1140_v6, %v161_v26  ;;  %v162_v36 = vmul.f32 %v774_v28, %v1127_v1  ;;  %v1023_v56 = vld [vmem:[%s1865_s0 + $0x20] sm:$0xff]   ;;  %v1025_v28 = vld [vmem:[%s1865_s0 + $0x30] sm:$0xff]  }
   0x8   :  { %v492_v30 = vadd.f32 %v428_v17, %v229_v21  ;;  %v493_v31 = vadd.f32 %v429_v18, %v230_v22  ;;  %v432_v37 = vmul.f32 %v902_v29, %v1135_v4  ;;  %v903_v38 = vunpack.c.h.bf16 %v1052_v16  ;;  %v1054_v61 = vld [vmem:[%s1868_s3 + $0x20] sm:$0xff]  }
   0x9   :  { %v494_v41 = vadd.f32 %v430_v24, %v231_v32  ;;  %v163_v42 = vmul.f32 %v775_v33, %v1127_v1  ;;  %v495_v44 = vadd.f32 %v431_v27, %v232_v35  ;;  %v233_v45 = vadd.f32 %v1140_v6, %v162_v36  ;;  %v1056_v33 = vld [vmem:[%s1868_s3 + $0x30] sm:$0xff]  }
   0xa   :  { %v563_v39 = vadd.f32 %v1165_v25, %v492_v30  ;;  %v564_v40 = vadd.f32 %v1165_v25, %v493_v31  ;;  %v433_v46 = vmul.f32 %v903_v38, %v1135_v4  ;;  %v778_v47 = vunpack.c.l.bf16 %v1022_v34 }
   0xb   :  { %v565_v50 = vadd.f32 %v1165_v25, %v494_v41  ;;  %v234_v51 = vadd.f32 %v1140_v6, %v163_v42  ;;  %v566_v52 = vadd.f32 %v1165_v25, %v495_v44  ;;  %v496_v53 = vadd.f32 %v432_v37, %v233_v45 }
   0xc   :  { %v627_v48 = vmax.f32 %v563_v39, 0.0  ;;  %v628_v49 = vmax.f32 %v564_v40, 0.0  ;;  %v164_v54 = vmul.f32 %v778_v47, %v1127_v1  ;;  %v906_v55 = vunpack.c.l.bf16 %v1053_v43 }
   0xd   :  { %v629_v57 = vmax.f32 %v565_v50, 0.0  ;;  %v497_v58 = vadd.f32 %v433_v46, %v234_v51  ;;  %v779_v59 = vunpack.c.h.bf16 %v1022_v34  ;;  %v907_v60 = vunpack.c.h.bf16 %v1053_v43  ;;  %v1026_v50 = vld [vmem:[%s1865_s0 + $0x38] sm:$0xff]  }
   0xe   :  { %692 = vst.msk [vmem:[%s1871_s6] sm:$0xff] %vm691_vm0, %v627_v48  ;;  %693 = vst.msk [vmem:[%s1871_s6 + $0x8] sm:$0xff] %vm691_vm0, %v628_v49  ;;  %v630_v62 = vmax.f32 %v566_v52, 0.0  ;;  %v567_v63 = vadd.f32 %v1165_v25, %v496_v53  ;;  %v235_v0 = vadd.f32 %v1140_v6, %v164_v54  ;;  %v434_v2 = vmul.f32 %v906_v55, %v1135_v4  ;;  %v1057_v51 = vld [vmem:[%s1868_s3 + $0x38] sm:$0xff]  }
   0xf   :  { %694 = vst.msk [vmem:[%s1871_s6 + $0x10] sm:$0xff] %vm691_vm0, %v629_v57  ;;  %v568_v3 = vadd.f32 %v1165_v25, %v497_v58  ;;  %v165_v5 = vmul.f32 %v779_v59, %v1127_v1  ;;  %v435_v7 = vmul.f32 %v907_v60, %v1135_v4  ;;  %v782_v8 = vunpack.c.l.bf16 %v1023_v56 }
  0x10   :  { %695 = vst.msk [vmem:[%s1871_s6 + $0x18] sm:$0xff] %vm691_vm0, %v630_v62  ;;  %v631_v10 = vmax.f32 %v567_v63, 0.0  ;;  %v498_v11 = vadd.f32 %v434_v2, %v235_v0  ;;  %v910_v12 = vunpack.c.l.bf16 %v1054_v61  ;;  %v783_v13 = vunpack.c.h.bf16 %v1023_v56  ;;  %v1027_v0 = vld [vmem:[%s1865_s0 + $0x40] sm:$0xff]  }
  0x11   :  { %v632_v15 = vmax.f32 %v568_v3, 0.0  ;;  %v236_v16 = vadd.f32 %v1140_v6, %v165_v5  ;;  %v166_v17 = vmul.f32 %v782_v8, %v1127_v1  ;;  %v911_v18 = vunpack.c.h.bf16 %v1054_v61  ;;  %v1058_v8 = vld [vmem:[%s1868_s3 + $0x40] sm:$0xff]  }
  0x12   :  { %696 = vst.msk [vmem:[%s1871_s6 + $0x20] sm:$0xff] %vm691_vm0, %v631_v10  ;;  %v569_v19 = vadd.f32 %v1165_v25, %v498_v11  ;;  %v436_v20 = vmul.f32 %v910_v12, %v1135_v4  ;;  %v167_v21 = vmul.f32 %v783_v13, %v1127_v1  ;;  %v786_v22 = vunpack.c.l.bf16 %v1024_v9 }
  0x13   :  { %697 = vst.msk [vmem:[%s1871_s6 + $0x28] sm:$0xff] %vm691_vm0, %v632_v15  ;;  %v499_v23 = vadd.f32 %v435_v7, %v236_v16  ;;  %v237_v24 = vadd.f32 %v1140_v6, %v166_v17  ;;  %v437_v26 = vmul.f32 %v911_v18, %v1135_v4  ;;  %v914_v27 = vunpack.c.l.bf16 %v1055_v14 }
  0x14   :  { %v633_v29 = vmax.f32 %v569_v19, 0.0  ;;  %v238_v30 = vadd.f32 %v1140_v6, %v167_v21  ;;  %v168_v31 = vmul.f32 %v786_v22, %v1127_v1  ;;  %v787_v32 = vunpack.c.h.bf16 %v1024_v9  ;;  %v1028_v21 = vld [vmem:[%s1865_s0 + $0x48] sm:$0xff]  }
  0x15   :  { %v570_v34 = vadd.f32 %v1165_v25, %v499_v23  ;;  %v500_v35 = vadd.f32 %v436_v20, %v237_v24  ;;  %v438_v36 = vmul.f32 %v914_v27, %v1135_v4  ;;  %v915_v37 = vunpack.c.h.bf16 %v1055_v14  ;;  %v1059_v27 = vld [vmem:[%s1868_s3 + $0x48] sm:$0xff]  }
  0x16   :  { %698 = vst.msk [vmem:[%s1871_s6 + $0x30] sm:$0xff] %vm691_vm0, %v633_v29  ;;  %v501_v38 = vadd.f32 %v437_v26, %v238_v30  ;;  %v239_v39 = vadd.f32 %v1140_v6, %v168_v31  ;;  %v169_v40 = vmul.f32 %v787_v32, %v1127_v1  ;;  %v790_v41 = vunpack.c.l.bf16 %v1025_v28 }
  0x17   :  { %v634_v42 = vmax.f32 %v570_v34, 0.0  ;;  %v571_v43 = vadd.f32 %v1165_v25, %v500_v35  ;;  %v439_v44 = vmul.f32 %v915_v37, %v1135_v4  ;;  %v918_v45 = vunpack.c.l.bf16 %v1056_v33 }
  0x18   :  { %v572_v46 = vadd.f32 %v1165_v25, %v501_v38  ;;  %v502_v47 = vadd.f32 %v438_v36, %v239_v39  ;;  %v240_v48 = vadd.f32 %v1140_v6, %v169_v40  ;;  %v170_v49 = vmul.f32 %v790_v41, %v1127_v1 }
  0x19   :  { %699 = vst.msk [vmem:[%s1871_s6 + $0x38] sm:$0xff] %vm691_vm0, %v634_v42  ;;  %v635_v52 = vmax.f32 %v571_v43, 0.0  ;;  %v440_v53 = vmul.f32 %v918_v45, %v1135_v4  ;;  %v791_v54 = vunpack.c.h.bf16 %v1025_v28  ;;  %v919_v55 = vunpack.c.h.bf16 %v1056_v33  ;;  %v1060_v45 = vld [vmem:[%s1868_s3 + $0x50] sm:$0xff]  }
  0x1a   :  { %v636_v56 = vmax.f32 %v572_v46, 0.0  ;;  %v573_v57 = vadd.f32 %v1165_v25, %v502_v47  ;;  %v503_v58 = vadd.f32 %v439_v44, %v240_v48  ;;  %v241_v59 = vadd.f32 %v1140_v6, %v170_v49  ;;  %v1029_v44 = vld [vmem:[%s1865_s0 + $0x50] sm:$0xff]  }
  0x1b   :  { %700 = vst.msk [vmem:[%s1871_s6 + $0x40] sm:$0xff] %vm691_vm0, %v635_v52  ;;  %v171_v60 = vmul.f32 %v791_v54, %v1127_v1  ;;  %v441_v61 = vmul.f32 %v919_v55, %v1135_v4  ;;  %v794_v62 = vunpack.c.l.bf16 %v1026_v50  ;;  %v922_v63 = vunpack.c.l.bf16 %v1057_v51 }
  0x1c   :  { %701 = vst.msk [vmem:[%s1871_s6 + $0x48] sm:$0xff] %vm691_vm0, %v636_v56  ;;  %v637_v2 = vmax.f32 %v573_v57, 0.0  ;;  %v574_v3 = vadd.f32 %v1165_v25, %v503_v58  ;;  %v504_v5 = vadd.f32 %v440_v53, %v241_v59  ;;  %v795_v7 = vunpack.c.h.bf16 %v1026_v50  ;;  %v1030_v58 = vld [vmem:[%s1865_s0 + $0x58] sm:$0xff]  }
  0x1d   :  { %v242_v9 = vadd.f32 %v1140_v6, %v171_v60  ;;  %v172_v10 = vmul.f32 %v794_v62, %v1127_v1  ;;  %v442_v11 = vmul.f32 %v922_v63, %v1135_v4  ;;  %v923_v12 = vunpack.c.h.bf16 %v1057_v51  ;;  %v1061_v63 = vld [vmem:[%s1868_s3 + $0x58] sm:$0xff]  }
  0x1e   :  { %702 = vst.msk [vmem:[%s1871_s6 + $0x50] sm:$0xff] %vm691_vm0, %v637_v2  ;;  %v638_v13 = vmax.f32 %v574_v3, 0.0  ;;  %v575_v14 = vadd.f32 %v1165_v25, %v504_v5  ;;  %v173_v15 = vmul.f32 %v795_v7, %v1127_v1  ;;  %v798_v16 = vunpack.c.l.bf16 %v1027_v0 }
  0x1f   :  { %v505_v17 = vadd.f32 %v441_v61, %v242_v9  ;;  %v243_v18 = vadd.f32 %v1140_v6, %v172_v10  ;;  %v443_v19 = vmul.f32 %v923_v12, %v1135_v4  ;;  %v926_v20 = vunpack.c.l.bf16 %v1058_v8 }
  0x20   :  { %703 = vst.msk [vmem:[%s1871_s6 + $0x58] sm:$0xff] %vm691_vm0, %v638_v13  ;;  %v639_v22 = vmax.f32 %v575_v14, 0.0  ;;  %v244_v23 = vadd.f32 %v1140_v6, %v173_v15  ;;  %v174_v24 = vmul.f32 %v798_v16, %v1127_v1  ;;  %v799_v26 = vunpack.c.h.bf16 %v1027_v0  ;;  %v1031_v15 = vld [vmem:[%s1865_s0 + $0x60] sm:$0xff]  }
  0x21   :  { %v576_v28 = vadd.f32 %v1165_v25, %v505_v17  ;;  %v506_v29 = vadd.f32 %v442_v11, %v243_v18  ;;  %v444_v30 = vmul.f32 %v926_v20, %v1135_v4  ;;  %v927_v31 = vunpack.c.h.bf16 %v1058_v8  ;;  %v1062_v20 = vld [vmem:[%s1868_s3 + $0x60] sm:$0xff]  }
  0x22   :  { %704 = vst.msk [vmem:[%s1871_s6 + $0x60] sm:$0xff] %vm691_vm0, %v639_v22  ;;  %v507_v32 = vadd.f32 %v443_v19, %v244_v23  ;;  %v245_v33 = vadd.f32 %v1140_v6, %v174_v24  ;;  %v175_v34 = vmul.f32 %v799_v26, %v1127_v1  ;;  %v802_v35 = vunpack.c.l.bf16 %v1028_v21 }
  0x23   :  { %v640_v36 = vmax.f32 %v576_v28, 0.0  ;;  %v577_v37 = vadd.f32 %v1165_v25, %v506_v29  ;;  %v445_v38 = vmul.f32 %v927_v31, %v1135_v4  ;;  %v930_v39 = vunpack.c.l.bf16 %v1059_v27 }
  0x24   :  { %v578_v40 = vadd.f32 %v1165_v25, %v507_v32  ;;  %v508_v41 = vadd.f32 %v444_v30, %v245_v33  ;;  %v246_v42 = vadd.f32 %v1140_v6, %v175_v34  ;;  %v176_v43 = vmul.f32 %v802_v35, %v1127_v1 }
  0x25   :  { %705 = vst.msk [vmem:[%s1871_s6 + $0x68] sm:$0xff] %vm691_vm0, %v640_v36  ;;  %v641_v46 = vmax.f32 %v577_v37, 0.0  ;;  %v446_v47 = vmul.f32 %v930_v39, %v1135_v4  ;;  %v803_v48 = vunpack.c.h.bf16 %v1028_v21  ;;  %v931_v49 = vunpack.c.h.bf16 %v1059_v27  ;;  %v1063_v39 = vld [vmem:[%s1868_s3 + $0x68] sm:$0xff]  }
  0x26   :  { %v642_v50 = vmax.f32 %v578_v40, 0.0  ;;  %v579_v51 = vadd.f32 %v1165_v25, %v508_v41  ;;  %v509_v52 = vadd.f32 %v445_v38, %v246_v42  ;;  %v247_v53 = vadd.f32 %v1140_v6, %v176_v43  ;;  %v1032_v38 = vld [vmem:[%s1865_s0 + $0x68] sm:$0xff]  }
  0x27   :  { %706 = vst.msk [vmem:[%s1871_s6 + $0x70] sm:$0xff] %vm691_vm0, %v641_v46  ;;  %v177_v54 = vmul.f32 %v803_v48, %v1127_v1  ;;  %v447_v55 = vmul.f32 %v931_v49, %v1135_v4  ;;  %v806_v56 = vunpack.c.l.bf16 %v1029_v44  ;;  %v934_v57 = vunpack.c.l.bf16 %v1060_v45 }
  0x28   :  { %707 = vst.msk [vmem:[%s1871_s6 + $0x78] sm:$0xff] %vm691_vm0, %v642_v50  ;;  %v643_v59 = vmax.f32 %v579_v51, 0.0  ;;  %v580_v60 = vadd.f32 %v1165_v25, %v509_v52  ;;  %v510_v61 = vadd.f32 %v446_v47, %v247_v53  ;;  %v807_v62 = vunpack.c.h.bf16 %v1029_v44  ;;  %v1033_v52 = vld [vmem:[%s1865_s0 + $0x70] sm:$0xff]  }
  0x29   :  { %v248_v0 = vadd.f32 %v1140_v6, %v177_v54  ;;  %v178_v2 = vmul.f32 %v806_v56, %v1127_v1  ;;  %v448_v3 = vmul.f32 %v934_v57, %v1135_v4  ;;  %v935_v5 = vunpack.c.h.bf16 %v1060_v45  ;;  %v1064_v57 = vld [vmem:[%s1868_s3 + $0x70] sm:$0xff]  }
  0x2a   :  { %708 = vst.msk [vmem:[%s1871_s6 + $0x80] sm:$0xff] %vm691_vm0, %v643_v59  ;;  %v644_v7 = vmax.f32 %v580_v60, 0.0  ;;  %v581_v8 = vadd.f32 %v1165_v25, %v510_v61  ;;  %v179_v9 = vmul.f32 %v807_v62, %v1127_v1  ;;  %v810_v10 = vunpack.c.l.bf16 %v1030_v58 }
  0x2b   :  { %v511_v11 = vadd.f32 %v447_v55, %v248_v0  ;;  %v249_v12 = vadd.f32 %v1140_v6, %v178_v2  ;;  %v449_v13 = vmul.f32 %v935_v5, %v1135_v4  ;;  %v938_v14 = vunpack.c.l.bf16 %v1061_v63 }
  0x2c   :  { %709 = vst.msk [vmem:[%s1871_s6 + $0x88] sm:$0xff] %vm691_vm0, %v644_v7  ;;  %v645_v16 = vmax.f32 %v581_v8, 0.0  ;;  %v250_v17 = vadd.f32 %v1140_v6, %v179_v9  ;;  %v180_v18 = vmul.f32 %v810_v10, %v1127_v1  ;;  %v811_v19 = vunpack.c.h.bf16 %v1030_v58  ;;  %v1034_v9 = vld [vmem:[%s1865_s0 + $0x78] sm:$0xff]  }
  0x2d   :  { %v582_v21 = vadd.f32 %v1165_v25, %v511_v11  ;;  %v512_v22 = vadd.f32 %v448_v3, %v249_v12  ;;  %v450_v23 = vmul.f32 %v938_v14, %v1135_v4  ;;  %v939_v24 = vunpack.c.h.bf16 %v1061_v63  ;;  %v1065_v14 = vld [vmem:[%s1868_s3 + $0x78] sm:$0xff]  }
  0x2e   :  { %710 = vst.msk [vmem:[%s1871_s6 + $0x90] sm:$0xff] %vm691_vm0, %v645_v16  ;;  %v513_v26 = vadd.f32 %v449_v13, %v250_v17  ;;  %v251_v27 = vadd.f32 %v1140_v6, %v180_v18  ;;  %v181_v28 = vmul.f32 %v811_v19, %v1127_v1  ;;  %v814_v29 = vunpack.c.l.bf16 %v1031_v15 }
  0x2f   :  { %v646_v30 = vmax.f32 %v582_v21, 0.0  ;;  %v583_v31 = vadd.f32 %v1165_v25, %v512_v22  ;;  %v451_v32 = vmul.f32 %v939_v24, %v1135_v4  ;;  %v942_v33 = vunpack.c.l.bf16 %v1062_v20 }
  0x30   :  { %v584_v34 = vadd.f32 %v1165_v25, %v513_v26  ;;  %v514_v35 = vadd.f32 %v450_v23, %v251_v27  ;;  %v252_v36 = vadd.f32 %v1140_v6, %v181_v28  ;;  %v182_v37 = vmul.f32 %v814_v29, %v1127_v1 }
  0x31   :  { %711 = vst.msk [vmem:[%s1871_s6 + $0x98] sm:$0xff] %vm691_vm0, %v646_v30  ;;  %v647_v40 = vmax.f32 %v583_v31, 0.0  ;;  %v452_v41 = vmul.f32 %v942_v33, %v1135_v4  ;;  %v815_v42 = vunpack.c.h.bf16 %v1031_v15  ;;  %v943_v43 = vunpack.c.h.bf16 %v1062_v20  ;;  %v1066_v33 = vld [vmem:[%s1868_s3 + $0x80] sm:$0xff]  }
  0x32   :  { %v648_v44 = vmax.f32 %v584_v34, 0.0  ;;  %v585_v45 = vadd.f32 %v1165_v25, %v514_v35  ;;  %v515_v46 = vadd.f32 %v451_v32, %v252_v36  ;;  %v253_v47 = vadd.f32 %v1140_v6, %v182_v37  ;;  %v1035_v32 = vld [vmem:[%s1865_s0 + $0x80] sm:$0xff]  }
  0x33   :  { %712 = vst.msk [vmem:[%s1871_s6 + $0xa0] sm:$0xff] %vm691_vm0, %v647_v40  ;;  %v183_v48 = vmul.f32 %v815_v42, %v1127_v1  ;;  %v453_v49 = vmul.f32 %v943_v43, %v1135_v4  ;;  %v818_v50 = vunpack.c.l.bf16 %v1032_v38  ;;  %v946_v51 = vunpack.c.l.bf16 %v1063_v39 }
  0x34   :  { %713 = vst.msk [vmem:[%s1871_s6 + $0xa8] sm:$0xff] %vm691_vm0, %v648_v44  ;;  %v649_v53 = vmax.f32 %v585_v45, 0.0  ;;  %v586_v54 = vadd.f32 %v1165_v25, %v515_v46  ;;  %v516_v55 = vadd.f32 %v452_v41, %v253_v47  ;;  %v819_v56 = vunpack.c.h.bf16 %v1032_v38  ;;  %v1036_v46 = vld [vmem:[%s1865_s0 + $0x88] sm:$0xff]  }
  0x35   :  { %v254_v58 = vadd.f32 %v1140_v6, %v183_v48  ;;  %v184_v59 = vmul.f32 %v818_v50, %v1127_v1  ;;  %v454_v60 = vmul.f32 %v946_v51, %v1135_v4  ;;  %v947_v61 = vunpack.c.h.bf16 %v1063_v39  ;;  %v1067_v51 = vld [vmem:[%s1868_s3 + $0x88] sm:$0xff]  }
  0x36   :  { %714 = vst.msk [vmem:[%s1871_s6 + $0xb0] sm:$0xff] %vm691_vm0, %v649_v53  ;;  %v650_v62 = vmax.f32 %v586_v54, 0.0  ;;  %v587_v63 = vadd.f32 %v1165_v25, %v516_v55  ;;  %v185_v0 = vmul.f32 %v819_v56, %v1127_v1  ;;  %v822_v2 = vunpack.c.l.bf16 %v1033_v52 }
  0x37   :  { %v517_v3 = vadd.f32 %v453_v49, %v254_v58  ;;  %v255_v5 = vadd.f32 %v1140_v6, %v184_v59  ;;  %v455_v7 = vmul.f32 %v947_v61, %v1135_v4  ;;  %v950_v8 = vunpack.c.l.bf16 %v1064_v57 }
  0x38   :  { %715 = vst.msk [vmem:[%s1871_s6 + $0xb8] sm:$0xff] %vm691_vm0, %v650_v62  ;;  %v651_v10 = vmax.f32 %v587_v63, 0.0  ;;  %v256_v11 = vadd.f32 %v1140_v6, %v185_v0  ;;  %v186_v12 = vmul.f32 %v822_v2, %v1127_v1  ;;  %v823_v13 = vunpack.c.h.bf16 %v1033_v52  ;;  %v1037_v0 = vld [vmem:[%s1865_s0 + $0x90] sm:$0xff]  }
  0x39   :  { %v588_v15 = vadd.f32 %v1165_v25, %v517_v3  ;;  %v518_v16 = vadd.f32 %v454_v60, %v255_v5  ;;  %v456_v17 = vmul.f32 %v950_v8, %v1135_v4  ;;  %v951_v18 = vunpack.c.h.bf16 %v1064_v57  ;;  %v1068_v8 = vld [vmem:[%s1868_s3 + $0x90] sm:$0xff]  }
  0x3a   :  { %716 = vst.msk [vmem:[%s1871_s6 + $0xc0] sm:$0xff] %vm691_vm0, %v651_v10  ;;  %v519_v19 = vadd.f32 %v455_v7, %v256_v11  ;;  %v257_v20 = vadd.f32 %v1140_v6, %v186_v12  ;;  %v187_v21 = vmul.f32 %v823_v13, %v1127_v1  ;;  %v826_v22 = vunpack.c.l.bf16 %v1034_v9 }
  0x3b   :  { %v652_v23 = vmax.f32 %v588_v15, 0.0  ;;  %v589_v24 = vadd.f32 %v1165_v25, %v518_v16  ;;  %v457_v26 = vmul.f32 %v951_v18, %v1135_v4  ;;  %v954_v27 = vunpack.c.l.bf16 %v1065_v14 }
  0x3c   :  { %v590_v28 = vadd.f32 %v1165_v25, %v519_v19  ;;  %v520_v29 = vadd.f32 %v456_v17, %v257_v20  ;;  %v258_v30 = vadd.f32 %v1140_v6, %v187_v21  ;;  %v188_v31 = vmul.f32 %v826_v22, %v1127_v1 }
  0x3d   :  { %717 = vst.msk [vmem:[%s1871_s6 + $0xc8] sm:$0xff] %vm691_vm0, %v652_v23  ;;  %v653_v34 = vmax.f32 %v589_v24, 0.0  ;;  %v458_v35 = vmul.f32 %v954_v27, %v1135_v4  ;;  %v827_v36 = vunpack.c.h.bf16 %v1034_v9  ;;  %v955_v37 = vunpack.c.h.bf16 %v1065_v14  ;;  %v1069_v27 = vld [vmem:[%s1868_s3 + $0x98] sm:$0xff]  }
  0x3e   :  { %v654_v38 = vmax.f32 %v590_v28, 0.0  ;;  %v591_v39 = vadd.f32 %v1165_v25, %v520_v29  ;;  %v521_v40 = vadd.f32 %v457_v26, %v258_v30  ;;  %v259_v41 = vadd.f32 %v1140_v6, %v188_v31  ;;  %v1038_v26 = vld [vmem:[%s1865_s0 + $0x98] sm:$0xff]  }
  0x3f   :  { %718 = vst.msk [vmem:[%s1871_s6 + $0xd0] sm:$0xff] %vm691_vm0, %v653_v34  ;;  %v189_v42 = vmul.f32 %v827_v36, %v1127_v1  ;;  %v459_v43 = vmul.f32 %v955_v37, %v1135_v4  ;;  %v830_v44 = vunpack.c.l.bf16 %v1035_v32  ;;  %v958_v45 = vunpack.c.l.bf16 %v1066_v33 }
  0x40   :  { %719 = vst.msk [vmem:[%s1871_s6 + $0xd8] sm:$0xff] %vm691_vm0, %v654_v38  ;;  %v655_v47 = vmax.f32 %v591_v39, 0.0  ;;  %v592_v48 = vadd.f32 %v1165_v25, %v521_v40  ;;  %v522_v49 = vadd.f32 %v458_v35, %v259_v41  ;;  %v831_v50 = vunpack.c.h.bf16 %v1035_v32  ;;  %v1039_v40 = vld [vmem:[%s1865_s0 + $0xa0] sm:$0xff]  }
  0x41   :  { %v260_v52 = vadd.f32 %v1140_v6, %v189_v42  ;;  %v190_v53 = vmul.f32 %v830_v44, %v1127_v1  ;;  %v460_v54 = vmul.f32 %v958_v45, %v1135_v4  ;;  %v959_v55 = vunpack.c.h.bf16 %v1066_v33  ;;  %v1070_v45 = vld [vmem:[%s1868_s3 + $0xa0] sm:$0xff]  }
  0x42   :  { %720 = vst.msk [vmem:[%s1871_s6 + $0xe0] sm:$0xff] %vm691_vm0, %v655_v47  ;;  %v656_v56 = vmax.f32 %v592_v48, 0.0  ;;  %v593_v57 = vadd.f32 %v1165_v25, %v522_v49  ;;  %v191_v58 = vmul.f32 %v831_v50, %v1127_v1  ;;  %v834_v59 = vunpack.c.l.bf16 %v1036_v46 }
  0x43   :  { %v523_v60 = vadd.f32 %v459_v43, %v260_v52  ;;  %v261_v61 = vadd.f32 %v1140_v6, %v190_v53  ;;  %v461_v62 = vmul.f32 %v959_v55, %v1135_v4  ;;  %v962_v63 = vunpack.c.l.bf16 %v1067_v51 }
  0x44   :  { %721 = vst.msk [vmem:[%s1871_s6 + $0xe8] sm:$0xff] %vm691_vm0, %v656_v56  ;;  %v657_v2 = vmax.f32 %v593_v57, 0.0  ;;  %v262_v3 = vadd.f32 %v1140_v6, %v191_v58  ;;  %v192_v5 = vmul.f32 %v834_v59, %v1127_v1  ;;  %v835_v7 = vunpack.c.h.bf16 %v1036_v46  ;;  %v1040_v58 = vld [vmem:[%s1865_s0 + $0xa8] sm:$0xff]  }
  0x45   :  { %v594_v9 = vadd.f32 %v1165_v25, %v523_v60  ;;  %v524_v10 = vadd.f32 %v460_v54, %v261_v61  ;;  %v462_v11 = vmul.f32 %v962_v63, %v1135_v4  ;;  %v963_v12 = vunpack.c.h.bf16 %v1067_v51  ;;  %v1071_v63 = vld [vmem:[%s1868_s3 + $0xa8] sm:$0xff]  }
  0x46   :  { %722 = vst.msk [vmem:[%s1871_s6 + $0xf0] sm:$0xff] %vm691_vm0, %v657_v2  ;;  %v525_v13 = vadd.f32 %v461_v62, %v262_v3  ;;  %v263_v14 = vadd.f32 %v1140_v6, %v192_v5  ;;  %v193_v15 = vmul.f32 %v835_v7, %v1127_v1  ;;  %v838_v16 = vunpack.c.l.bf16 %v1037_v0 }
  0x47   :  { %v658_v17 = vmax.f32 %v594_v9, 0.0  ;;  %v595_v18 = vadd.f32 %v1165_v25, %v524_v10  ;;  %v463_v19 = vmul.f32 %v963_v12, %v1135_v4  ;;  %v966_v20 = vunpack.c.l.bf16 %v1068_v8 }
  0x48   :  { %v596_v21 = vadd.f32 %v1165_v25, %v525_v13  ;;  %v526_v22 = vadd.f32 %v462_v11, %v263_v14  ;;  %v264_v23 = vadd.f32 %v1140_v6, %v193_v15  ;;  %v194_v24 = vmul.f32 %v838_v16, %v1127_v1 }
  0x49   :  { %723 = vst.msk [vmem:[%s1871_s6 + $0xf8] sm:$0xff] %vm691_vm0, %v658_v17  ;;  %v659_v28 = vmax.f32 %v595_v18, 0.0  ;;  %v464_v29 = vmul.f32 %v966_v20, %v1135_v4  ;;  %v839_v30 = vunpack.c.h.bf16 %v1037_v0  ;;  %v967_v31 = vunpack.c.h.bf16 %v1068_v8  ;;  %v1072_v20 = vld [vmem:[%s1868_s3 + $0xb0] sm:$0xff]  }
  0x4a   :  { %v660_v32 = vmax.f32 %v596_v21, 0.0  ;;  %v597_v33 = vadd.f32 %v1165_v25, %v526_v22  ;;  %v527_v34 = vadd.f32 %v463_v19, %v264_v23  ;;  %v265_v35 = vadd.f32 %v1140_v6, %v194_v24  ;;  %v1041_v19 = vld [vmem:[%s1865_s0 + $0xb0] sm:$0xff]  }
  0x4b   :  { %724 = vst.msk [vmem:[%s1871_s6 + $0x100] sm:$0xff] %vm691_vm0, %v659_v28  ;;  %v195_v36 = vmul.f32 %v839_v30, %v1127_v1  ;;  %v465_v37 = vmul.f32 %v967_v31, %v1135_v4  ;;  %v842_v38 = vunpack.c.l.bf16 %v1038_v26  ;;  %v970_v39 = vunpack.c.l.bf16 %v1069_v27 }
  0x4c   :  { %725 = vst.msk [vmem:[%s1871_s6 + $0x108] sm:$0xff] %vm691_vm0, %v660_v32  ;;  %v661_v41 = vmax.f32 %v597_v33, 0.0  ;;  %v598_v42 = vadd.f32 %v1165_v25, %v527_v34  ;;  %v528_v43 = vadd.f32 %v464_v29, %v265_v35  ;;  %v843_v44 = vunpack.c.h.bf16 %v1038_v26  ;;  %v1042_v34 = vld [vmem:[%s1865_s0 + $0xb8] sm:$0xff]  }
  0x4d   :  { %v266_v46 = vadd.f32 %v1140_v6, %v195_v36  ;;  %v196_v47 = vmul.f32 %v842_v38, %v1127_v1  ;;  %v466_v48 = vmul.f32 %v970_v39, %v1135_v4  ;;  %v971_v49 = vunpack.c.h.bf16 %v1069_v27  ;;  %v1073_v39 = vld [vmem:[%s1868_s3 + $0xb8] sm:$0xff]  }
  0x4e   :  { %726 = vst.msk [vmem:[%s1871_s6 + $0x110] sm:$0xff] %vm691_vm0, %v661_v41  ;;  %v662_v50 = vmax.f32 %v598_v42, 0.0  ;;  %v599_v51 = vadd.f32 %v1165_v25, %v528_v43  ;;  %v197_v52 = vmul.f32 %v843_v44, %v1127_v1  ;;  %v846_v53 = vunpack.c.l.bf16 %v1039_v40 }
  0x4f   :  { %v529_v54 = vadd.f32 %v465_v37, %v266_v46  ;;  %v267_v55 = vadd.f32 %v1140_v6, %v196_v47  ;;  %v467_v56 = vmul.f32 %v971_v49, %v1135_v4  ;;  %v974_v57 = vunpack.c.l.bf16 %v1070_v45 }
  0x50   :  { %727 = vst.msk [vmem:[%s1871_s6 + $0x118] sm:$0xff] %vm691_vm0, %v662_v50  ;;  %v663_v59 = vmax.f32 %v599_v51, 0.0  ;;  %v268_v60 = vadd.f32 %v1140_v6, %v197_v52  ;;  %v198_v61 = vmul.f32 %v846_v53, %v1127_v1  ;;  %v847_v62 = vunpack.c.h.bf16 %v1039_v40  ;;  %v1043_v52 = vld [vmem:[%s1865_s0 + $0xc0] sm:$0xff]  }
  0x51   :  { %v600_v0 = vadd.f32 %v1165_v25, %v529_v54  ;;  %v530_v2 = vadd.f32 %v466_v48, %v267_v55  ;;  %v468_v3 = vmul.f32 %v974_v57, %v1135_v4  ;;  %v975_v5 = vunpack.c.h.bf16 %v1070_v45  ;;  %v1074_v57 = vld [vmem:[%s1868_s3 + $0xc0] sm:$0xff]  }
  0x52   :  { %728 = vst.msk [vmem:[%s1871_s6 + $0x120] sm:$0xff] %vm691_vm0, %v663_v59  ;;  %v531_v7 = vadd.f32 %v467_v56, %v268_v60  ;;  %v269_v8 = vadd.f32 %v1140_v6, %v198_v61  ;;  %v199_v9 = vmul.f32 %v847_v62, %v1127_v1  ;;  %v850_v10 = vunpack.c.l.bf16 %v1040_v58 }
  0x53   :  { %v664_v11 = vmax.f32 %v600_v0, 0.0  ;;  %v601_v12 = vadd.f32 %v1165_v25, %v530_v2  ;;  %v469_v13 = vmul.f32 %v975_v5, %v1135_v4  ;;  %v978_v14 = vunpack.c.l.bf16 %v1071_v63 }
  0x54   :  { %v602_v15 = vadd.f32 %v1165_v25, %v531_v7  ;;  %v532_v16 = vadd.f32 %v468_v3, %v269_v8  ;;  %v270_v17 = vadd.f32 %v1140_v6, %v199_v9  ;;  %v200_v18 = vmul.f32 %v850_v10, %v1127_v1 }
  0x55   :  { %729 = vst.msk [vmem:[%s1871_s6 + $0x128] sm:$0xff] %vm691_vm0, %v664_v11  ;;  %v665_v21 = vmax.f32 %v601_v12, 0.0  ;;  %v470_v22 = vmul.f32 %v978_v14, %v1135_v4  ;;  %v851_v23 = vunpack.c.h.bf16 %v1040_v58  ;;  %v979_v24 = vunpack.c.h.bf16 %v1071_v63  ;;  %v1075_v14 = vld [vmem:[%s1868_s3 + $0xc8] sm:$0xff]  }
  0x56   :  { %v666_v26 = vmax.f32 %v602_v15, 0.0  ;;  %v603_v27 = vadd.f32 %v1165_v25, %v532_v16  ;;  %v533_v28 = vadd.f32 %v469_v13, %v270_v17  ;;  %v271_v29 = vadd.f32 %v1140_v6, %v200_v18  ;;  %v1044_v13 = vld [vmem:[%s1865_s0 + $0xc8] sm:$0xff]  }
  0x57   :  { %730 = vst.msk [vmem:[%s1871_s6 + $0x130] sm:$0xff] %vm691_vm0, %v665_v21  ;;  %v201_v30 = vmul.f32 %v851_v23, %v1127_v1  ;;  %v471_v31 = vmul.f32 %v979_v24, %v1135_v4  ;;  %v854_v32 = vunpack.c.l.bf16 %v1041_v19  ;;  %v982_v33 = vunpack.c.l.bf16 %v1072_v20 }
  0x58   :  { %731 = vst.msk [vmem:[%s1871_s6 + $0x138] sm:$0xff] %vm691_vm0, %v666_v26  ;;  %v667_v35 = vmax.f32 %v603_v27, 0.0  ;;  %v604_v36 = vadd.f32 %v1165_v25, %v533_v28  ;;  %v534_v37 = vadd.f32 %v470_v22, %v271_v29  ;;  %v855_v38 = vunpack.c.h.bf16 %v1041_v19  ;;  %v1045_v28 = vld [vmem:[%s1865_s0 + $0xd0] sm:$0xff]  }
  0x59   :  { %v272_v40 = vadd.f32 %v1140_v6, %v201_v30  ;;  %v202_v41 = vmul.f32 %v854_v32, %v1127_v1  ;;  %v472_v42 = vmul.f32 %v982_v33, %v1135_v4  ;;  %v983_v43 = vunpack.c.h.bf16 %v1072_v20  ;;  %v1076_v33 = vld [vmem:[%s1868_s3 + $0xd0] sm:$0xff]  }
  0x5a   :  { %732 = vst.msk [vmem:[%s1871_s6 + $0x140] sm:$0xff] %vm691_vm0, %v667_v35  ;;  %v668_v44 = vmax.f32 %v604_v36, 0.0  ;;  %v605_v45 = vadd.f32 %v1165_v25, %v534_v37  ;;  %v203_v46 = vmul.f32 %v855_v38, %v1127_v1  ;;  %v858_v47 = vunpack.c.l.bf16 %v1042_v34 }
  0x5b   :  { %v535_v48 = vadd.f32 %v471_v31, %v272_v40  ;;  %v273_v49 = vadd.f32 %v1140_v6, %v202_v41  ;;  %v473_v50 = vmul.f32 %v983_v43, %v1135_v4  ;;  %v986_v51 = vunpack.c.l.bf16 %v1073_v39 }
  0x5c   :  { %733 = vst.msk [vmem:[%s1871_s6 + $0x148] sm:$0xff] %vm691_vm0, %v668_v44  ;;  %v669_v53 = vmax.f32 %v605_v45, 0.0  ;;  %v274_v54 = vadd.f32 %v1140_v6, %v203_v46  ;;  %v204_v55 = vmul.f32 %v858_v47, %v1127_v1  ;;  %v859_v56 = vunpack.c.h.bf16 %v1042_v34  ;;  %v1046_v46 = vld [vmem:[%s1865_s0 + $0xd8] sm:$0xff]  }
  0x5d   :  { %v606_v58 = vadd.f32 %v1165_v25, %v535_v48  ;;  %v536_v59 = vadd.f32 %v472_v42, %v273_v49  ;;  %v474_v60 = vmul.f32 %v986_v51, %v1135_v4  ;;  %v987_v61 = vunpack.c.h.bf16 %v1073_v39 }
  0x5e   :  { %734 = vst.msk [vmem:[%s1871_s6 + $0x150] sm:$0xff] %vm691_vm0, %v669_v53  ;;  %v537_v62 = vadd.f32 %v473_v50, %v274_v54  ;;  %v275_v63 = vadd.f32 %v1140_v6, %v204_v55  ;;  %v205_v0 = vmul.f32 %v859_v56, %v1127_v1  ;;  %v862_v2 = vunpack.c.l.bf16 %v1043_v52  ;;  %v1077_v50 = vld [vmem:[%s1868_s3 + $0xd8] sm:$0xff]   ;;  %v1721_v53 = vld [vmem:[%s1869_s4] ss:$0 sm:$0xff] }
  0x5f   :  { %v670_v3 = vmax.f32 %v606_v58, 0.0  ;;  %v607_v5 = vadd.f32 %v1165_v25, %v536_v59  ;;  %v475_v7 = vmul.f32 %v987_v61, %v1135_v4  ;;  %v990_v8 = vunpack.c.l.bf16 %v1074_v57 }
  0x60   :  { %v608_v9 = vadd.f32 %v1165_v25, %v537_v62  ;;  %v538_v10 = vadd.f32 %v474_v60, %v275_v63  ;;  %v276_v11 = vadd.f32 %v1140_v6, %v205_v0  ;;  %v206_v12 = vmul.f32 %v862_v2, %v1127_v1 }
  0x61   :  { %735 = vst.msk [vmem:[%s1871_s6 + $0x158] sm:$0xff] %vm691_vm0, %v670_v3  ;;  %v671_v15 = vmax.f32 %v607_v5, 0.0  ;;  %v476_v16 = vmul.f32 %v990_v8, %v1135_v4  ;;  %v863_v17 = vunpack.c.h.bf16 %v1043_v52  ;;  %v991_v18 = vunpack.c.h.bf16 %v1074_v57  ;;  %v1078_v8 = vld [vmem:[%s1868_s3 + $0xe0] sm:$0xff]  }
  0x62   :  { %v672_v19 = vmax.f32 %v608_v9, 0.0  ;;  %v609_v20 = vadd.f32 %v1165_v25, %v538_v10  ;;  %v539_v21 = vadd.f32 %v475_v7, %v276_v11  ;;  %v277_v22 = vadd.f32 %v1140_v6, %v206_v12  ;;  %v1047_v7 = vld [vmem:[%s1865_s0 + $0xe0] sm:$0xff]  }
  0x63   :  { %736 = vst.msk [vmem:[%s1871_s6 + $0x160] sm:$0xff] %vm691_vm0, %v671_v15  ;;  %v207_v23 = vmul.f32 %v863_v17, %v1127_v1  ;;  %v477_v24 = vmul.f32 %v991_v18, %v1135_v4  ;;  %v866_v26 = vunpack.c.l.bf16 %v1044_v13  ;;  %v994_v27 = vunpack.c.l.bf16 %v1075_v14 }
  0x64   :  { %737 = vst.msk [vmem:[%s1871_s6 + $0x168] sm:$0xff] %vm691_vm0, %v672_v19  ;;  %v673_v29 = vmax.f32 %v609_v20, 0.0  ;;  %v610_v30 = vadd.f32 %v1165_v25, %v539_v21  ;;  %v540_v31 = vadd.f32 %v476_v16, %v277_v22  ;;  %v867_v32 = vunpack.c.h.bf16 %v1044_v13  ;;  %v1749_v13 = vld [vmem:[%s1870_s5] ss:$0 sm:$0xff]  ;;  %v1048_v21 = vld [vmem:[%s1865_s0 + $0xe8] sm:$0xff]  }
  0x65   :  { %v278_v34 = vadd.f32 %v1140_v6, %v207_v23  ;;  %v208_v35 = vmul.f32 %v866_v26, %v1127_v1  ;;  %v478_v36 = vmul.f32 %v994_v27, %v1135_v4  ;;  %v995_v37 = vunpack.c.h.bf16 %v1075_v14  ;;  %v1079_v27 = vld [vmem:[%s1868_s3 + $0xe8] sm:$0xff]  }
  0x66   :  { %738 = vst.msk [vmem:[%s1871_s6 + $0x170] sm:$0xff] %vm691_vm0, %v673_v29  ;;  %v674_v38 = vmax.f32 %v610_v30, 0.0  ;;  %v611_v39 = vadd.f32 %v1165_v25, %v540_v31  ;;  %v209_v40 = vmul.f32 %v867_v32, %v1127_v1  ;;  %v870_v41 = vunpack.c.l.bf16 %v1045_v28  ;;  %v1705_v1 = vld [vmem:[%s1867_s2] ss:$0 sm:$0xff] }
  0x67   :  { %v541_v42 = vadd.f32 %v477_v24, %v278_v34  ;;  %v279_v43 = vadd.f32 %v1140_v6, %v208_v35  ;;  %v479_v44 = vmul.f32 %v995_v37, %v1135_v4  ;;  %v998_v45 = vunpack.c.l.bf16 %v1076_v33  ;;  %v1711_v4 = vld [vmem:[%s1866_s1] ss:$0 sm:$0xff] }
  0x68   :  { %739 = vst.msk [vmem:[%s1871_s6 + $0x178] sm:$0xff] %vm691_vm0, %v674_v38  ;;  %v675_v47 = vmax.f32 %v611_v39, 0.0  ;;  %v280_v6 = vadd.f32 %v1705_v1, %v209_v40  ;;  %v210_v48 = vmul.f32 %v1711_v4, %v870_v41  ;;  %v871_v49 = vunpack.c.h.bf16 %v1045_v28  ;;  %v1049_v40 = vld [vmem:[%s1865_s0 + $0xf0] sm:$0xff]  }
  0x69   :  { %v612_v51 = vadd.f32 %v1165_v25, %v541_v42  ;;  %v542_v52 = vadd.f32 %v478_v36, %v279_v43  ;;  %v480_v54 = vmul.f32 %v1721_v53, %v998_v45  ;;  %v999_v55 = vunpack.c.h.bf16 %v1076_v33  ;;  %v1080_v45 = vld [vmem:[%s1868_s3 + $0xf0] sm:$0xff]  }
  0x6a   :  { %740 = vst.msk [vmem:[%s1871_s6 + $0x180] sm:$0xff] %vm691_vm0, %v675_v47  ;;  %v543_v56 = vadd.f32 %v479_v44, %v280_v6  ;;  %v281_v57 = vadd.f32 %v1705_v1, %v210_v48  ;;  %v211_v58 = vmul.f32 %v1711_v4, %v871_v49  ;;  %v874_v59 = vunpack.c.l.bf16 %v1046_v46 }
  0x6b   :  { %v676_v60 = vmax.f32 %v612_v51, 0.0  ;;  %v613_v61 = vadd.f32 %v1165_v25, %v542_v52  ;;  %v481_v62 = vmul.f32 %v1721_v53, %v999_v55  ;;  %v1002_v63 = vunpack.c.l.bf16 %v1077_v50 }
  0x6c   :  { %v614_v0 = vadd.f32 %v1165_v25, %v543_v56  ;;  %v544_v2 = vadd.f32 %v480_v54, %v281_v57  ;;  %v282_v3 = vadd.f32 %v1705_v1, %v211_v58  ;;  %v212_v5 = vmul.f32 %v1711_v4, %v874_v59 }
  0x6d   :  { %741 = vst.msk [vmem:[%s1871_s6 + $0x188] sm:$0xff] %vm691_vm0, %v676_v60  ;;  %v677_v9 = vmax.f32 %v613_v61, 0.0  ;;  %v482_v25 = vmul.f32 %v1721_v53, %v1002_v63  ;;  %v875_v10 = vunpack.c.h.bf16 %v1046_v46  ;;  %v1003_v11 = vunpack.c.h.bf16 %v1077_v50  ;;  %v1081_v63 = vld [vmem:[%s1868_s3 + $0xf8] sm:$0xff]  }
  0x6e   :  { %v678_v12 = vmax.f32 %v614_v0, 0.0  ;;  %v615_v14 = vadd.f32 %v1749_v13, %v544_v2  ;;  %v545_v15 = vadd.f32 %v481_v62, %v282_v3  ;;  %v283_v16 = vadd.f32 %v1705_v1, %v212_v5  ;;  %v1050_v62 = vld [vmem:[%s1865_s0 + $0xf8] sm:$0xff]  }
  0x6f   :  { %742 = vst.msk [vmem:[%s1871_s6 + $0x190] sm:$0xff] %vm691_vm0, %v677_v9  ;;  %v213_v17 = vmul.f32 %v1711_v4, %v875_v10  ;;  %v483_v18 = vmul.f32 %v1721_v53, %v1003_v11  ;;  %v878_v19 = vunpack.c.l.bf16 %v1047_v7  ;;  %v1006_v20 = vunpack.c.l.bf16 %v1078_v8 }
  0x70   :  { %743 = vst.msk [vmem:[%s1871_s6 + $0x198] sm:$0xff] %vm691_vm0, %v678_v12  ;;  %v679_v22 = vmax.f32 %v615_v14, 0.0  ;;  %v616_v23 = vadd.f32 %v1749_v13, %v545_v15  ;;  %v546_v24 = vadd.f32 %v482_v25, %v283_v16  ;;  %v879_v26 = vunpack.c.h.bf16 %v1047_v7 }
  0x71   :  { %v284_v28 = vadd.f32 %v1705_v1, %v213_v17  ;;  %v214_v29 = vmul.f32 %v1711_v4, %v878_v19  ;;  %v484_v30 = vmul.f32 %v1721_v53, %v1006_v20  ;;  %v1007_v31 = vunpack.c.h.bf16 %v1078_v8 }
  0x72   :  { %744 = vst.msk [vmem:[%s1871_s6 + $0x1a0] sm:$0xff] %vm691_vm0, %v679_v22  ;;  %v680_v32 = vmax.f32 %v616_v23, 0.0  ;;  %v617_v33 = vadd.f32 %v1749_v13, %v546_v24  ;;  %v215_v34 = vmul.f32 %v1711_v4, %v879_v26  ;;  %v882_v35 = vunpack.c.l.bf16 %v1048_v21 }
  0x73   :  { %v547_v36 = vadd.f32 %v483_v18, %v284_v28  ;;  %v285_v37 = vadd.f32 %v1705_v1, %v214_v29  ;;  %v485_v38 = vmul.f32 %v1721_v53, %v1007_v31  ;;  %v1010_v39 = vunpack.c.l.bf16 %v1079_v27 }
  0x74   :  { %745 = vst.msk [vmem:[%s1871_s6 + $0x1a8] sm:$0xff] %vm691_vm0, %v680_v32  ;;  %v681_v41 = vmax.f32 %v617_v33, 0.0  ;;  %v286_v42 = vadd.f32 %v1705_v1, %v215_v34  ;;  %v216_v43 = vmul.f32 %v1711_v4, %v882_v35  ;;  %v883_v44 = vunpack.c.h.bf16 %v1048_v21 }
  0x75   :  { %v618_v46 = vadd.f32 %v1749_v13, %v547_v36  ;;  %v548_v47 = vadd.f32 %v484_v30, %v285_v37  ;;  %v486_v6 = vmul.f32 %v1721_v53, %v1010_v39  ;;  %v1011_v48 = vunpack.c.h.bf16 %v1079_v27 }
  0x76   :  { %746 = vst.msk [vmem:[%s1871_s6 + $0x1b0] sm:$0xff] %vm691_vm0, %v681_v41  ;;  %v549_v49 = vadd.f32 %v485_v38, %v286_v42  ;;  %v287_v50 = vadd.f32 %v1705_v1, %v216_v43  ;;  %v217_v51 = vmul.f32 %v1711_v4, %v883_v44  ;;  %v886_v52 = vunpack.c.l.bf16 %v1049_v40 }
  0x77   :  { %v682_v54 = vmax.f32 %v618_v46, 0.0  ;;  %v619_v55 = vadd.f32 %v1749_v13, %v548_v47  ;;  %v487_v56 = vmul.f32 %v1721_v53, %v1011_v48  ;;  %v1014_v57 = vunpack.c.l.bf16 %v1080_v45 }
  0x78   :  { %v620_v58 = vadd.f32 %v1749_v13, %v549_v49  ;;  %v550_v59 = vadd.f32 %v486_v6, %v287_v50  ;;  %v288_v60 = vadd.f32 %v1705_v1, %v217_v51  ;;  %v218_v61 = vmul.f32 %v1711_v4, %v886_v52 }
  0x79   :  { %747 = vst.msk [vmem:[%s1871_s6 + $0x1b8] sm:$0xff] %vm691_vm0, %v682_v54  ;;  %v683_v0 = vmax.f32 %v619_v55, 0.0  ;;  %v488_v2 = vmul.f32 %v1721_v53, %v1014_v57  ;;  %v887_v3 = vunpack.c.h.bf16 %v1049_v40  ;;  %v1015_v5 = vunpack.c.h.bf16 %v1080_v45 }
  0x7a   :  { %v684_v7 = vmax.f32 %v620_v58, 0.0  ;;  %v621_v8 = vadd.f32 %v1749_v13, %v550_v59  ;;  %v551_v9 = vadd.f32 %v487_v56, %v288_v60  ;;  %v289_v25 = vadd.f32 %v1705_v1, %v218_v61 }
  0x7b   :  { %748 = vst.msk [vmem:[%s1871_s6 + $0x1c0] sm:$0xff] %vm691_vm0, %v683_v0  ;;  %v219_v10 = vmul.f32 %v1711_v4, %v887_v3  ;;  %v489_v11 = vmul.f32 %v1721_v53, %v1015_v5  ;;  %v890_v12 = vunpack.c.l.bf16 %v1050_v62  ;;  %v1018_v14 = vunpack.c.l.bf16 %v1081_v63 }
  0x7c   :  { %749 = vst.msk [vmem:[%s1871_s6 + $0x1c8] sm:$0xff] %vm691_vm0, %v684_v7  ;;  %v685_v15 = vmax.f32 %v621_v8, 0.0  ;;  %v622_v16 = vadd.f32 %v1749_v13, %v551_v9  ;;  %v552_v17 = vadd.f32 %v488_v2, %v289_v25  ;;  %v891_v18 = vunpack.c.h.bf16 %v1050_v62 }
  0x7d   :  { %v290_v19 = vadd.f32 %v1705_v1, %v219_v10  ;;  %v220_v20 = vmul.f32 %v1711_v4, %v890_v12  ;;  %v490_v21 = vmul.f32 %v1721_v53, %v1018_v14  ;;  %v1019_v22 = vunpack.c.h.bf16 %v1081_v63 }
  0x7e   :  { %750 = vst.msk [vmem:[%s1871_s6 + $0x1d0] sm:$0xff] %vm691_vm0, %v685_v15  ;;  %v686_v23 = vmax.f32 %v622_v16, 0.0  ;;  %v623_v24 = vadd.f32 %v1749_v13, %v552_v17  ;;  %v221_v26 = vmul.f32 %v1711_v4, %v891_v18 }
  0x7f   :  { %v553_v27 = vadd.f32 %v489_v11, %v290_v19  ;;  %v291_v28 = vadd.f32 %v1705_v1, %v220_v20  ;;  %v491_v29 = vmul.f32 %v1721_v53, %v1019_v22 }
  0x80   :  { %751 = vst.msk [vmem:[%s1871_s6 + $0x1d8] sm:$0xff] %vm691_vm0, %v686_v23  ;;  %v687_v30 = vmax.f32 %v623_v24, 0.0  ;;  %v292_v31 = vadd.f32 %v1705_v1, %v221_v26 }
  0x81   :  { %v624_v32 = vadd.f32 %v1749_v13, %v553_v27  ;;  %v554_v33 = vadd.f32 %v490_v21, %v291_v28 }
  0x82   :  { %752 = vst.msk [vmem:[%s1871_s6 + $0x1e0] sm:$0xff] %vm691_vm0, %v687_v30  ;;  %v555_v4 = vadd.f32 %v491_v29, %v292_v31 }
  0x83   :  { %v688_v34 = vmax.f32 %v624_v32, 0.0  ;;  %v625_v53 = vadd.f32 %v1749_v13, %v554_v33 }
  0x84   :  { %v626_v35 = vadd.f32 %v1749_v13, %v555_v4 }
  0x85   :  { %753 = vst.msk [vmem:[%s1871_s6 + $0x1e8] sm:$0xff] %vm691_vm0, %v688_v34  ;;  %v689_v1 = vmax.f32 %v625_v53, 0.0 }
  0x86   :  { %v690_v36 = vmax.f32 %v626_v35, 0.0 }
  0x87   :  { %754 = vst.msk [vmem:[%s1871_s6 + $0x1f0] sm:$0xff] %vm691_vm0, %v689_v1 }
  0x88   :  { %755 = vst.msk [vmem:[%s1871_s6 + $0x1f8] sm:$0xff] %vm691_vm0, %v690_v36 }

// kernel: bottleneck_forward.6
= control target key start
LH: loop header
LB: loop body
LE: loop exit
PB: predicated region body
PF: predicated region fallthrough
CT: control target
= control target key end

     0   :  { %s8134_s21 = smov 0   ;;  %s10314_s0 = inlined_call_operand.vmem [shape: bf16[2,288,4], index: 0, kind: input, shape index: {}]   ;;  %s10315_s1 = inlined_call_operand.vmem [shape: bf16[9,4,4], index: 1, kind: input, shape index: {}]   ;;  %s10316_s2 = inlined_call_operand.vmem [shape: f32[1,4], index: 2, kind: input, shape index: {}]   ;;  %s10317_s3 = inlined_call_operand.vmem [shape: f32[1,4], index: 3, kind: input, shape index: {}]   ;;  %s10318_s4 = inlined_call_operand.vmem [shape: f32[288,1], index: 4, kind: input, shape index: {}]   ;;  %s10319_s5 = inlined_call_operand.vmem [shape: bf16[2,256,4], index: 5, kind: output, shape index: {0}]   ;;  %s10320_s6 = inlined_call_operand.vmem [shape: f32[2,2,4], index: 6, kind: output, shape index: {1}]  }
   0x1 LB: > { %s5954_s22 = sadd.s32 4294967295, %s8094_s21   ;;  %p5958_p0 = scmp.ge.s32.totalorder %s8094_s21, 1  ;;  %s8094_s21 = sphi %s8134_s21, %s17_s21  }
   0x2   : > { %p215_p1 = scmp.lt.s32.totalorder %s8094_s21, 3 }
   0x4   : > { %p216_p2 = pnand %p5958_p0, %p215_p1 }
   0x5   : > { %v476_v0 = vld [vmem:[%s10318_s4 + $0x90] sm:$0xff] (!%p216_p2)  ;;  %v474_v1 = vld [vmem:[%s10318_s4 + $0x80] sm:$0xff] (!%p216_p2)  ;;  %vm710_vm0 = vcmask (!%p216_p2), 31744   ;;  %v8096_v2 = vmov (!%p216_p2), 0   ;;  %v8097_v3 = vmov (!%p216_p2), 0.0   ;;  %v477_v4 = vld [vmem:[%s10318_s4 + $0x98] sm:$0xff] (!%p216_p2) }
   0x6   : > { %219 = sbr.rel (%p216_p2) target bundleno = 1137 (0x471), region = 40  ;;  %8087 = vset.pattern.permute.xlu1 (!%p216_p2), %v8096_v2  ;;  %8086 = vset.pattern.permute.xlu0 (!%p216_p2), %v8096_v2  ;;  %711 = vst.msk [vmem:[#allocation2] sm:$0xff] (!%p216_p2), %vm710_vm0, %v8097_v3  ;;  %712 = vst.msk [vmem:[#allocation2 + $0x8] sm:$0xff] (!%p216_p2), %vm710_vm0, %v8097_v3  ;;  %v475_v5 = vld [vmem:[%s10318_s4 + $0x88] sm:$0xff] (!%p216_p2)  ;;  %v478_v7 = vld [vmem:[%s10318_s4 + $0xa0] sm:$0xff] (!%p216_p2)  ;;  %vm8098_vm1 = vmmov (!%p216_p2), 0  }
   0x7   : > { %586 = vperm.xlu1 (!%p216_p2), %8087, %v476_v0   ;;  %576 = vperm.xlu0 (!%p216_p2), %8086, %v474_v1   ;;  %713 = vst.msk [vmem:[#allocation2 + $0x10] sm:$0xff] (!%p216_p2), %vm710_vm0, %v8097_v3  ;;  %714 = vst.msk [vmem:[#allocation2 + $0x18] sm:$0xff] (!%p216_p2), %vm710_vm0, %v8097_v3  ;;  %v479_v6 = vld [vmem:[%s10318_s4 + $0xa8] sm:$0xff] (!%p216_p2)  ;;  %v480_v8 = vld [vmem:[%s10318_s4 + $0xb0] sm:$0xff] (!%p216_p2)  ;;  %vm932_vm2 = vcmask (!%p216_p2), 1041408   ;;  %vm715_vm3 = vcmask (!%p216_p2), 29696  }
   0x8   : > { %717 = vst.msk [vmem:[#allocation2 + $0x146] sm:$0xff] (!%p216_p2), %vm710_vm0, %v8097_v3  ;;  %718 = vst.msk [vmem:[#allocation2 + $0x14e] sm:$0xff] (!%p216_p2), %vm710_vm0, %v8097_v3  ;;  %6947 = vmatprep.subr.bf16.mxu0 (!%p216_p2), %v8097_v3  ;;  %8072 = vmatprep.subr.bf16.mxu1 (!%p216_p2), %v8097_v3  ;;  %v458_v9 = vld [vmem:[%s10318_s4] sm:$0xff] (!%p216_p2)  ;;  %v481_v12 = vld [vmem:[%s10318_s4 + $0xb8] sm:$0xff] (!%p216_p2)  ;;  %p249_p3 = scmp.lt.s32.totalorder (!%p216_p2), %s5954_s22, 1  ;;  %vm721_vm4 = vcmask (!%p216_p2), 27648  }
   0x9   : > { %719 = vst.msk [vmem:[#allocation2 + $0x156] sm:$0xff] (!%p216_p2), %vm710_vm0, %v8097_v3  ;;  %720 = vst.msk [vmem:[#allocation2 + $0x15e] sm:$0xff] (!%p216_p2), %vm710_vm0, %v8097_v3  ;;  %6949 = vmatprep.mubr.msk.f32.mxu0 (!%p216_p2), %vm8098_vm1, %v8097_v3  ;;  %7012 = vmatprep.mubr.msk.f32.mxu1 (!%p216_p2), %vm8098_vm1, %v8097_v3  ;;  %v759_v10 = vld [vmem:[%s10315_s1] sm:$0x3] (!%p216_p2)  ;;  %v459_v13 = vld [vmem:[%s10318_s4 + $0x8] sm:$0xff] (!%p216_p2)  ;;  %vm5764_vm5 = vcmask (!%p216_p2), 24576  }
   0xa   : > { %v934_v11 = vsel (!%p216_p2), %vm932_vm2, %v759_v10, 0  ;;  %v482_v15 = vld [vmem:[%s10318_s4 + $0xc0] sm:$0xff] (!%p216_p2)  ;;  %v460_v16 = vld [vmem:[%s10318_s4 + $0x10] sm:$0xff] (!%p216_p2)  ;;  %v483_v18 = vld [vmem:[%s10318_s4 + $0xc8] sm:$0xff] (!%p216_p2)  ;;  %716 = vst.msk [vmem:[#allocation2 + $0x20] sm:$0x3f] (!%p216_p2), %vm715_vm3, %v8097_v3 }
   0xb   : > { %591 = vperm.xlu1 (!%p216_p2), %8087, %v477_v4   ;;  %581 = vperm.xlu0 (!%p216_p2), %8086, %v475_v5   ;;  %v461_v19 = vld [vmem:[%s10318_s4 + $0x18] sm:$0xff] (!%p216_p2)  ;;  %v761_v21 = vld [vmem:[%s10315_s1 + $0x4] sm:$0x3] (!%p216_p2)  ;;  %v484_v23 = vld [vmem:[%s10318_s4 + $0xd0] sm:$0xff] (!%p216_p2)  ;;  %722 = vst.msk [vmem:[#allocation2 + $0x166] sm:$0xf] (!%p216_p2), %vm721_vm4, %v8097_v3 }
   0xc   : > { %6948 = vmatpush3.bf16.msra.mxu0 (!%p216_p2), %v934_v11  ;;  %8073 = vmatpush3.bf16.msra.mxu1 (!%p216_p2), %v934_v11  ;;  %v1949_v22 = vsel (!%p216_p2), %vm932_vm2, %v761_v21, 0  ;;  %v462_v24 = vld [vmem:[%s10318_s4 + $0x20] sm:$0xff] (!%p216_p2)  ;;  %v485_v26 = vld [vmem:[%s10318_s4 + $0xd8] sm:$0xff] (!%p216_p2)  ;;  %v463_v27 = vld [vmem:[%s10318_s4 + $0x28] sm:$0xff] (!%p216_p2) }
   0xd   : > { %v768_v14 = vld [vmem:[#allocation2] sm:$0xff]  ;;  %7072 = vmatprep.subr.bf16.mxu1 %v8097_v3  ;;  %7197 = vmatprep.subr.bf16.mxu0 %v8097_v3  ;;  %v769_v17 = vld [vmem:[#allocation2 + $0x8] sm:$0xff]  ;;  %v464_v29 = vld [vmem:[%s10318_s4 + $0x30] sm:$0xff]  ;;  %s10322_s22 = smov (!%p249_p3, %s5954_s22), 1 }
   0xe   : > { %v770_v20 = vld [vmem:[#allocation2 + $0x10] sm:$0xff]  ;;  %v771_v25 = vld [vmem:[#allocation2 + $0x18] sm:$0xff]  ;;  %v486_v28 = vld [vmem:[%s10318_s4 + $0xe0] sm:$0xff]  ;;  %s8074_s15 = smul.u32 144, %s10322_s22  ;;  %s6368_s9 = sshll.u32 %s10322_s22, 7 }
   0xf   : > { %601 = vperm.xlu1 %8087, %v479_v6   ;;  %596 = vperm.xlu0 %8086, %v478_v7   ;;  %v487_v30 = vld [vmem:[%s10318_s4 + $0xe8] sm:$0xff]  ;;  %v465_v31 = vld [vmem:[%s10318_s4 + $0x38] sm:$0xff]  ;;  %v488_v32 = vld [vmem:[%s10318_s4 + $0xf0] sm:$0xff]  ;;  %s10038_s12 = scalar_lea.vmem %s10319_s5, %s6368_s9  ;;  %s5962_s13 = sshll.u32 %s10322_s22, 1 }
  0x10   : > { %6950 = vmatmul.mubr.msk.f32.vlgmr.msra.gmra.mrb[0].mxu0 %vm710_vm0, %v768_v14  ;;  %v466_v33 = vld [vmem:[%s10318_s4 + $0x40] sm:$0xff]  ;;  %v489_v34 = vld [vmem:[%s10318_s4 + $0xf8] sm:$0xff]  ;;  %v467_v35 = vld [vmem:[%s10318_s4 + $0x48] sm:$0xff]  ;;  %s8288_s24 = scalar_lea.vmem %s10314_s0, %s8074_s15  ;;  %s262_s16 = scalar_lea.vmem %s10320_s6, %s5962_s13 }
  0x11   : > { %6952 = vmatprep.mubr.msk.f32.mxu0 %vm8098_vm1, %v8097_v3  ;;  %7198 = vmatpush3.bf16.msra.mxu0 %v1949_v22  ;;  %v490_v36 = vld [vmem:[%s10318_s4 + $0x100] sm:$0xff]  ;;  %v468_v37 = vld [vmem:[%s10318_s4 + $0x50] sm:$0xff]  ;;  %v491_v38 = vld [vmem:[%s10318_s4 + $0x108] sm:$0xff] }
  0x12   : > { %7447 = vmatprep.subr.bf16.mxu0 %v8097_v3  ;;  %v469_v39 = vld [vmem:[%s10318_s4 + $0x58] sm:$0xff]  ;;  %v8291_v40 = vld [vmem:[%s8288_s24 + $0x88] sm:$0xff]   ;;  %v8294_v41 = vld [vmem:[%s8288_s24 + $0x30] sm:$0xff]  }
  0x13   : > { %606 = vperm.xlu0 %8086, %v480_v8   ;;  %496 = vperm.xlu1 %8087, %v458_v9   ;;  %v6472_v42 = vunpack.c.h.bf16 %v8291_v40  ;;  %v6428_v43 = vunpack.c.h.bf16 %v8294_v41  ;;  %v492_v44 = vld [vmem:[%s10318_s4 + $0x110] sm:$0xff]  ;;  %v470_v45 = vld [vmem:[%s10318_s4 + $0x60] sm:$0xff]  ;;  %v6543_v50 = vld [vmem:[%s8288_s24 + $0x38] sm:$0xff]  }
  0x14   : > { %6953 = vmatmul.mubr.msk.f32.gmra.mrb[2].mxu0 %vm710_vm0, %v769_v17  ;;  %v8307_v46 = vld [vmem:[%s10316_s2] ss:$0 sm:$0xff]  ;;  %v6431_v53 = vunpack.c.l.bf16 %v6543_v50  ;;  %v6432_v54 = vunpack.c.h.bf16 %v6543_v50  ;;  %v493_v55 = vld [vmem:[%s10318_s4 + $0x118] sm:$0xff]  ;;  %v471_v56 = vld [vmem:[%s10318_s4 + $0x68] sm:$0xff] }
  0x15   : > { %6955 = vmatprep.mubr.msk.f32.mxu0 %vm8098_vm1, %v8097_v3  ;;  %v378_v47 = vmul.f32 %v6472_v42, %v8307_v46  ;;  %v356_v48 = vmul.f32 %v6428_v43, %v8307_v46  ;;  %v8314_v49 = vld [vmem:[%s10317_s3] ss:$0 sm:$0xff]  ;;  %v472_v61 = vld [vmem:[%s10318_s4 + $0x70] sm:$0xff]  ;;  %v473_v62 = vld [vmem:[%s10318_s4 + $0x78] sm:$0xff] }
  0x16   : > { %v357_v57 = vmul.f32 %v6431_v53, %v8307_v46  ;;  %v358_v58 = vmul.f32 %v6432_v54, %v8307_v46  ;;  %v6545_v63 = vld [vmem:[%s8288_s24 + $0x48] sm:$0xff]   ;;  %v6544_v0 = vld [vmem:[%s8288_s24 + $0x40] sm:$0xff]   ;;  %v6546_v8 = vld [vmem:[%s8288_s24 + $0x50] sm:$0xff]  }
  0x17   : > { %611 = vperm.xlu0 %8086, %v481_v12   ;;  %501 = vperm.xlu1 %8087, %v459_v13   ;;  %v8318_v51 = vadd.f32 %v8314_v49, %v378_v47  ;;  %v8321_v52 = vadd.f32 %v8314_v49, %v356_v48  ;;  %v6439_v1 = vunpack.c.l.bf16 %v6545_v63  ;;  %v6435_v2 = vunpack.c.l.bf16 %v6544_v0  ;;  %v6547_v13 = vld [vmem:[%s8288_s24 + $0x58] sm:$0xff]  }
  0x18   : > { %6956 = vmatmul.mubr.msk.f32.gmra.mrb[4].mxu0 %vm710_vm0, %v770_v20  ;;  %v8332_v59 = vadd.f32 %v8314_v49, %v357_v57  ;;  %v8335_v60 = vadd.f32 %v8314_v49, %v358_v58  ;;  %v6440_v4 = vunpack.c.h.bf16 %v6545_v63  ;;  %v6436_v5 = vunpack.c.h.bf16 %v6544_v0  ;;  %v760_v0 = vld [vmem:[%s10315_s1 + $0x2] sm:$0x3] }
  0x19   : > { %6958 = vmatprep.mubr.msk.f32.mxu0 %vm8098_vm1, %v8097_v3  ;;  %v361_v6 = vmul.f32 %v6439_v1, %v8307_v46  ;;  %v359_v7 = vmul.f32 %v6435_v2, %v8307_v46  ;;  %v6444_v11 = vunpack.c.h.bf16 %v6546_v8  ;;  %v6443_v12 = vunpack.c.l.bf16 %v6546_v8 }
  0x1a   : > { %v362_v9 = vmul.f32 %v6440_v4, %v8307_v46  ;;  %v360_v10 = vmul.f32 %v6436_v5, %v8307_v46 }
  0x1b   : > { %616 = vperm.xlu0 %8086, %v482_v15   ;;  %506 = vperm.xlu1 %8087, %v460_v16   ;;  %v404_v14 = vadd.f32 %v8314_v49, %v361_v6  ;;  %v402_v15 = vadd.f32 %v8314_v49, %v359_v7  ;;  %v6402_v16 = vld [vmem:[%s8288_s24] sm:$0xff]   ;;  %v364_v20 = vmul.f32 %v6444_v11, %v8307_v46  ;;  %v1421_v11 = vsel %vm932_vm2, %v760_v0, 0 }
  0x1c   : > { %6959 = vmatmul.mubr.msk.f32.gmra.mrb[6].mxu0 %vm710_vm0, %v771_v25  ;;  %v405_v17 = vadd.f32 %v8314_v49, %v362_v9  ;;  %v363_v21 = vmul.f32 %v6443_v12, %v8307_v46  ;;  %v6549_v9 = vld [vmem:[%s8288_s24 + $0x68] sm:$0xff]  }
  0x1d   : > { %6961 = vmatprep.mubr.msk.f32.mxu0 %vm8098_vm1, %v8097_v3  ;;  %v440_v22 = vmax.f32 %v404_v14, 0.0 }
  0x1e   : > { %v441_v25 = vmax.f32 %v405_v17, 0.0 }
  0x1f   : > { %621 = vperm.xlu0 %8086, %v483_v18   ;;  %511 = vperm.xlu1 %8087, %v461_v19   ;;  %v6447_v18 = vunpack.c.l.bf16 %v6547_v13  ;;  %v403_v19 = vadd.f32 %v8314_v49, %v360_v10  ;;  %v6538_v10 = vld [vmem:[%s8288_s24 + $0x10] sm:$0xff]  }
  0x23   : > { %626 = vperm.xlu0 %8086, %v484_v23   ;;  %516 = vperm.xlu1 %8087, %v462_v24   ;;  %v438_v23 = vmax.f32 %v402_v15, 0.0  ;;  %v6403_v24 = vunpack.c.l.bf16 %v6402_v16 }
  0x27   : > { %631 = vperm.xlu0 %8086, %v485_v26   ;;  %521 = vperm.xlu1 %8087, %v463_v27   ;;  %v365_v26 = vmul.f32 %v6447_v18, %v8307_v46 }
  0x2b   : > { %636 = vperm.xlu0 %8086, %v486_v28   ;;  %526 = vperm.xlu1 %8087, %v464_v29   ;;  %v439_v29 = vmax.f32 %v403_v19, 0.0  ;;  %v6455_v19 = vunpack.c.l.bf16 %v6549_v9 }
  0x2f   : > { %641 = vperm.xlu0 %8086, %v487_v30   ;;  %531 = vperm.xlu1 %8087, %v465_v31   ;;  %v407_v30 = vadd.f32 %v8314_v49, %v364_v20  ;;  %v406_v31 = vadd.f32 %v8314_v49, %v363_v21 }
  0x31   : > { %v442_v47 = vmax.f32 %v406_v31, 0.0  ;;  %v6456_v31 = vunpack.c.h.bf16 %v6549_v9 }
  0x33   : > { %646 = vperm.xlu0 %8086, %v488_v32   ;;  %536 = vperm.xlu1 %8087, %v466_v33   ;;  %v6448_v32 = vunpack.c.h.bf16 %v6547_v13  ;;  %v6548_v33 = vld [vmem:[%s8288_s24 + $0x60] sm:$0xff]  }
  0x34   : > { %v6451_v42 = vunpack.c.l.bf16 %v6548_v33  ;;  %v6452_v58 = vunpack.c.h.bf16 %v6548_v33  ;;  %v6550_v33 = vld [vmem:[%s8288_s24 + $0x70] sm:$0xff]  }
  0x35   : > { %v366_v48 = vmul.f32 %v6448_v32, %v8307_v46  ;;  %v6412_v32 = vunpack.c.h.bf16 %v6538_v10 }
  0x36   : > { %v367_v57 = vmul.f32 %v6451_v42, %v8307_v46  ;;  %v368_v13 = vmul.f32 %v6452_v58, %v8307_v46  ;;  %v6459_v42 = vunpack.c.l.bf16 %v6550_v33 }
  0x37   : > { %651 = vperm.xlu0 %8086, %v489_v34   ;;  %541 = vperm.xlu1 %8087, %v467_v35   ;;  %v409_v1 = vadd.f32 %v8314_v49, %v366_v48 }
  0x38   : > { %v410_v12 = vadd.f32 %v8314_v49, %v367_v57 }
  0x3b   : > { %656 = vperm.xlu0 %8086, %v490_v36   ;;  %546 = vperm.xlu1 %8087, %v468_v37   ;;  %v343_v36 = vmul.f32 %v6403_v24, %v8307_v46  ;;  %v6404_v37 = vunpack.c.h.bf16 %v6402_v16  ;;  %v445_v16 = vmax.f32 %v409_v1, 0.0 }
  0x3f   : > { %661 = vperm.xlu0 %8086, %v491_v38   ;;  %551 = vperm.xlu1 %8087, %v469_v39   ;;  %v6537_v38 = vld [vmem:[%s8288_s24 + $0x8] sm:$0xff]   ;;  %v408_v39 = vadd.f32 %v8314_v49, %v365_v26  ;;  %v411_v26 = vadd.f32 %v8314_v49, %v368_v13 }
  0x40   : > { %v6407_v50 = vunpack.c.l.bf16 %v6537_v38  ;;  %v6408_v4 = vunpack.c.h.bf16 %v6537_v38 }
  0x41   : > { %v444_v63 = vmax.f32 %v408_v39, 0.0 }
  0x42   : > { %v345_v2 = vmul.f32 %v6407_v50, %v8307_v46  ;;  %v346_v18 = vmul.f32 %v6408_v4, %v8307_v46  ;;  %v370_v50 = vmul.f32 %v6456_v31, %v8307_v46 }
  0x43   : > { %666 = vperm.xlu0 %8086, %v492_v44   ;;  %556 = vperm.xlu1 %8087, %v470_v45   ;;  %v443_v45 = vmax.f32 %v407_v30, 0.0 }
  0x44   : > { %v388_v17 = vadd.f32 %v8314_v49, %v345_v2  ;;  %v389_v30 = vadd.f32 %v8314_v49, %v346_v18  ;;  %v413_v2 = vadd.f32 %v8314_v49, %v370_v50 }
  0x46   : > { %v425_v48 = vmax.f32 %v389_v30, 0.0 }
  0x47   : > { %671 = vperm.xlu0 %8086, %v493_v55   ;;  %561 = vperm.xlu1 %8087, %v471_v56   ;;  %v386_v55 = vadd.f32 %v8314_v49, %v343_v36  ;;  %v344_v56 = vmul.f32 %v6404_v37, %v8307_v46  ;;  %v369_v37 = vmul.f32 %v6455_v19, %v8307_v46  ;;  %v449_v19 = vmax.f32 %v413_v2, 0.0 }
  0x49   : > { %v422_v7 = vmax.f32 %v386_v55, 0.0  ;;  %v387_v8 = vadd.f32 %v8314_v49, %v344_v56  ;;  %v412_v56 = vadd.f32 %v8314_v49, %v369_v37  ;;  %v6552_v37 = vld [vmem:[%s8288_s24 + $0x80] sm:$0xff]  }
  0x4a   : > { %v6467_v50 = vunpack.c.l.bf16 %v6552_v37 }
  0x4b   : > { %566 = vperm.xlu0 %8086, %v472_v61   ;;  %571 = vperm.xlu1 %8087, %v473_v62   ;;  %v448_v9 = vmax.f32 %v412_v56, 0.0 }
  0x86   : > { %v587_v27 = vpop.permute.xlu1 %586  ;;  %v577_v28 = vpop.permute.xlu0 %576 }
  0x87   : > { %v692_v34 = vmul.f32 %v587_v27, %v440_v22  ;;  %v690_v35 = vmul.f32 %v577_v28, %v438_v23  ;;  %v423_v22 = vmax.f32 %v387_v8, 0.0  ;;  %v6411_v23 = vunpack.c.l.bf16 %v6538_v10 }
  0x89   : > { %741 = vst.msk [vmem:[#allocation2 + $0xb6] sm:$0xff] %vm710_vm0, %v692_v34  ;;  %739 = vst.msk [vmem:[#allocation2 + $0xa6] sm:$0xff] %vm710_vm0, %v690_v35  ;;  %v6539_v34 = vld [vmem:[%s8288_s24 + $0x18] sm:$0xff]   ;;  %v347_v38 = vmul.f32 %v6411_v23, %v8307_v46 }
  0x8a   : > { %v592_v43 = vpop.permute.xlu1 %591  ;;  %v582_v44 = vpop.permute.xlu0 %581 }
  0x8b   : > { %v693_v53 = vmul.f32 %v592_v43, %v441_v25  ;;  %v691_v54 = vmul.f32 %v582_v44, %v439_v29  ;;  %v446_v25 = vmax.f32 %v410_v12, 0.0  ;;  %v424_v29 = vmax.f32 %v388_v17, 0.0 }
  0x8c   : > { %v6415_v43 = vunpack.c.l.bf16 %v6539_v34  ;;  %v390_v57 = vadd.f32 %v8314_v49, %v347_v38 }
  0x8d   : > { %742 = vst.msk [vmem:[#allocation2 + $0xbe] sm:$0xff] %vm710_vm0, %v693_v53  ;;  %740 = vst.msk [vmem:[#allocation2 + $0xae] sm:$0xff] %vm710_vm0, %v691_v54  ;;  %v348_v53 = vmul.f32 %v6412_v32, %v8307_v46 }
  0x8e   : > { %v602_v61 = vpop.permute.xlu1 %601  ;;  %v597_v62 = vpop.permute.xlu0 %596  ;;  %v426_v10 = vmax.f32 %v390_v57, 0.0 }
  0x8f   : > { %v695_v5 = vmul.f32 %v602_v61, %v443_v45  ;;  %v694_v6 = vmul.f32 %v597_v62, %v442_v47  ;;  %v447_v47 = vmax.f32 %v411_v26, 0.0  ;;  %v371_v62 = vmul.f32 %v6459_v42, %v8307_v46 }
  0x90   : > { %v391_v4 = vadd.f32 %v8314_v49, %v348_v53 }
  0x91   : > { %744 = vst.msk [vmem:[#allocation2 + $0xce] sm:$0xff] %vm710_vm0, %v695_v5  ;;  %743 = vst.msk [vmem:[#allocation2 + $0xc6] sm:$0xff] %vm710_vm0, %v694_v6  ;;  %v6460_v5 = vunpack.c.h.bf16 %v6550_v33  ;;  %v6416_v6 = vunpack.c.h.bf16 %v6539_v34 }
  0x92   : > { %v607_v14 = vpop.permute.xlu0 %606  ;;  %v497_v15 = vpop.permute.xlu1 %496 }
  0x93   : > { %v696_v20 = vmul.f32 %v607_v14, %v444_v63  ;;  %v674_v21 = vmul.f32 %v497_v15, %v422_v7  ;;  %v349_v63 = vmul.f32 %v6415_v43, %v8307_v46  ;;  %v6540_v14 = vld [vmem:[%s8288_s24 + $0x20] sm:$0xff]   ;;  %v414_v15 = vadd.f32 %v8314_v49, %v371_v62 }
  0x94   : > { %v789_v24 = vld [vmem:[#allocation2 + $0xa8] sm:$0xff]  ;;  %v790_v39 = vld [vmem:[#allocation2 + $0xb0] sm:$0xff]  ;;  %v791_v61 = vld [vmem:[#allocation2 + $0xb8] sm:$0xff]  ;;  %v6419_v26 = vunpack.c.l.bf16 %v6540_v14 }
  0x95   : > { %745 = vst.msk [vmem:[#allocation2 + $0xd6] sm:$0xff] %vm710_vm0, %v696_v20  ;;  %723 = vst.msk [vmem:[#allocation2 + $0x26] sm:$0xff] %vm710_vm0, %v674_v21  ;;  %7013 = vmatmul.mubr.msk.f32.vlgmr.msra.gmra.mrb[0].mxu1 %vm710_vm0, %v789_v24  ;;  %v427_v20 = vmax.f32 %v391_v4, 0.0  ;;  %v372_v21 = vmul.f32 %v6460_v5, %v8307_v46  ;;  %v375_v5 = vmul.f32 %v6467_v50, %v8307_v46 }
  0x96   : > { %7073 = vmatpush3.bf16.msra.mxu1 %v1421_v11  ;;  %v612_v27 = vpop.permute.xlu0 %611  ;;  %v502_v28 = vpop.permute.xlu1 %501  ;;  %7015 = vmatprep.mubr.msk.f32.mxu1 %vm8098_vm1, %v8097_v3  ;;  %v6551_v11 = vld [vmem:[%s8288_s24 + $0x78] sm:$0xff]   ;;  %v351_v43 = vmul.f32 %v6419_v26, %v8307_v46 }
  0x97   : > { %v697_v35 = vmul.f32 %v612_v27, %v445_v16  ;;  %v675_v36 = vmul.f32 %v502_v28, %v423_v22  ;;  %7322 = vmatprep.subr.bf16.mxu1 %v8097_v3  ;;  %v392_v16 = vadd.f32 %v8314_v49, %v349_v63  ;;  %v350_v22 = vmul.f32 %v6416_v6, %v8307_v46 }
  0x98   : > { %v792_v13 = vld [vmem:[#allocation2 + $0xc0] sm:$0xff]  ;;  %v793_v28 = vld [vmem:[#allocation2 + $0xc8] sm:$0xff]  ;;  %v6464_v30 = vunpack.c.h.bf16 %v6551_v11  ;;  %v415_v34 = vadd.f32 %v8314_v49, %v372_v21 }
  0x99   : > { %746 = vst.msk [vmem:[#allocation2 + $0xde] sm:$0xff] %vm710_vm0, %v697_v35  ;;  %724 = vst.msk [vmem:[#allocation2 + $0x2e] sm:$0xff] %vm710_vm0, %v675_v36  ;;  %7016 = vmatmul.mubr.msk.f32.gmra.mrb[2].mxu1 %vm710_vm0, %v790_v39  ;;  %v428_v33 = vmax.f32 %v392_v16, 0.0  ;;  %v393_v35 = vadd.f32 %v8314_v49, %v350_v22  ;;  %v6420_v36 = vunpack.c.h.bf16 %v6540_v14 }
  0x9a   : > { %v617_v44 = vpop.permute.xlu0 %616  ;;  %v507_v45 = vpop.permute.xlu1 %506  ;;  %7018 = vmatprep.mubr.msk.f32.mxu1 %vm8098_vm1, %v8097_v3 }
  0x9b   : > { %v698_v54 = vmul.f32 %v617_v44, %v446_v25  ;;  %v676_v55 = vmul.f32 %v507_v45, %v424_v29  ;;  %v6463_v25 = vunpack.c.l.bf16 %v6551_v11  ;;  %v450_v29 = vmax.f32 %v414_v15, 0.0  ;;  %v6541_v44 = vld [vmem:[%s8288_s24 + $0x28] sm:$0xff]  }
  0x9c   : > { %v772_v58 = vld [vmem:[#allocation2 + $0x20] sm:$0xff]  ;;  %v429_v56 = vmax.f32 %v393_v35, 0.0  ;;  %v352_v57 = vmul.f32 %v6420_v36, %v8307_v46  ;;  %v6424_v11 = vunpack.c.h.bf16 %v6541_v44 }
  0x9d   : > { %747 = vst.msk [vmem:[#allocation2 + $0xe6] sm:$0xff] %vm710_vm0, %v698_v54  ;;  %725 = vst.msk [vmem:[#allocation2 + $0x36] sm:$0xff] %vm710_vm0, %v676_v55  ;;  %6962 = vmatmul.mubr.msk.f32.gmra.mrb[8].mxu0 %vm710_vm0, %v772_v58  ;;  %7019 = vmatmul.mubr.msk.f32.gmra.mrb[4].mxu1 %vm710_vm0, %v791_v61  ;;  %v373_v42 = vmul.f32 %v6463_v25, %v8307_v46  ;;  %v451_v55 = vmax.f32 %v415_v34, 0.0  ;;  %v6423_v58 = vunpack.c.l.bf16 %v6541_v44 }
  0x9e   : > { %v622_v0 = vpop.permute.xlu0 %621  ;;  %v512_v1 = vpop.permute.xlu1 %511  ;;  %6964 = vmatprep.mubr.msk.f32.mxu0 %vm8098_vm1, %v8097_v3  ;;  %7021 = vmatprep.mubr.msk.f32.mxu1 %vm8098_vm1, %v8097_v3  ;;  %v354_v25 = vmul.f32 %v6424_v11, %v8307_v46 }
  0x9f   : > { %v699_v7 = vmul.f32 %v622_v0, %v447_v47  ;;  %v677_v8 = vmul.f32 %v512_v1, %v425_v48  ;;  %v794_v47 = vld [vmem:[#allocation2 + $0xd0] sm:$0xff]  ;;  %v374_v48 = vmul.f32 %v6464_v30, %v8307_v46  ;;  %v416_v63 = vadd.f32 %v8314_v49, %v373_v42 }
  0xa0   : > { %v773_v12 = vld [vmem:[#allocation2 + $0x28] sm:$0xff]  ;;  %v394_v0 = vadd.f32 %v8314_v49, %v351_v43  ;;  %v795_v2 = vld [vmem:[#allocation2 + $0xd8] sm:$0xff]  ;;  %v397_v35 = vadd.f32 %v8314_v49, %v354_v25 }
  0xa1   : > { %748 = vst.msk [vmem:[#allocation2 + $0xee] sm:$0xff] %vm710_vm0, %v699_v7  ;;  %726 = vst.msk [vmem:[#allocation2 + $0x3e] sm:$0xff] %vm710_vm0, %v677_v8  ;;  %6965 = vmatmul.mubr.msk.f32.gmra.mrb[10].mxu0 %vm710_vm0, %v773_v12  ;;  %7022 = vmatmul.mubr.msk.f32.gmra.mrb[6].mxu1 %vm710_vm0, %v792_v13  ;;  %v417_v4 = vadd.f32 %v8314_v49, %v374_v48  ;;  %v395_v8 = vadd.f32 %v8314_v49, %v352_v57  ;;  %v452_v14 = vmax.f32 %v416_v63, 0.0 }
  0xa2   : > { %v627_v17 = vpop.permute.xlu0 %626  ;;  %v517_v18 = vpop.permute.xlu1 %516  ;;  %6967 = vmatprep.mubr.msk.f32.mxu0 %vm8098_vm1, %v8097_v3  ;;  %7024 = vmatprep.mubr.msk.f32.mxu1 %vm8098_vm1, %v8097_v3  ;;  %v430_v15 = vmax.f32 %v394_v0, 0.0 }
  0xa3   : > { %v700_v23 = vmul.f32 %v627_v17, %v448_v9  ;;  %v678_v24 = vmul.f32 %v517_v18, %v426_v10  ;;  %v353_v9 = vmul.f32 %v6423_v58, %v8307_v46  ;;  %v6468_v10 = vunpack.c.h.bf16 %v6552_v37 }
  0xa4   : > { %v774_v27 = vld [vmem:[#allocation2 + $0x30] sm:$0xff]  ;;  %v796_v17 = vld [vmem:[#allocation2 + $0xe0] sm:$0xff]  ;;  %v453_v18 = vmax.f32 %v417_v4, 0.0  ;;  %v431_v22 = vmax.f32 %v395_v8, 0.0  ;;  %v435_v8 = vmax.f32 %v8321_v52, 0.0 }
  0xa5   : > { %749 = vst.msk [vmem:[#allocation2 + $0xf6] sm:$0xff] %vm710_vm0, %v700_v23  ;;  %727 = vst.msk [vmem:[#allocation2 + $0x46] sm:$0xff] %vm710_vm0, %v678_v24  ;;  %6968 = vmatmul.mubr.msk.f32.gmra.mrb[12].mxu0 %vm710_vm0, %v774_v27  ;;  %7025 = vmatmul.mubr.msk.f32.gmra.mrb[8].mxu1 %vm710_vm0, %v793_v28  ;;  %v396_v23 = vadd.f32 %v8314_v49, %v353_v9  ;;  %v376_v24 = vmul.f32 %v6468_v10, %v8307_v46  ;;  %v6471_v28 = vunpack.c.l.bf16 %v8291_v40 }
  0xa6   : > { %v632_v31 = vpop.permute.xlu0 %631  ;;  %v522_v32 = vpop.permute.xlu1 %521  ;;  %6970 = vmatprep.mubr.msk.f32.mxu0 %vm8098_vm1, %v8097_v3  ;;  %7027 = vmatprep.mubr.msk.f32.mxu1 %vm8098_vm1, %v8097_v3 }
  0xa7   : > { %v701_v38 = vmul.f32 %v632_v31, %v449_v19  ;;  %v679_v39 = vmul.f32 %v522_v32, %v427_v20  ;;  %v418_v19 = vadd.f32 %v8314_v49, %v375_v5  ;;  %v419_v34 = vadd.f32 %v8314_v49, %v376_v24 }
  0xa8   : > { %v775_v45 = vld [vmem:[#allocation2 + $0x38] sm:$0xff]  ;;  %v797_v31 = vld [vmem:[#allocation2 + $0xe8] sm:$0xff] }
  0xa9   : > { %750 = vst.msk [vmem:[#allocation2 + $0xfe] sm:$0xff] %vm710_vm0, %v701_v38  ;;  %728 = vst.msk [vmem:[#allocation2 + $0x4e] sm:$0xff] %vm710_vm0, %v679_v39  ;;  %6971 = vmatmul.mubr.msk.f32.gmra.mrb[14].mxu0 %vm710_vm0, %v775_v45  ;;  %7028 = vmatmul.mubr.msk.f32.gmra.mrb[10].mxu1 %vm710_vm0, %v794_v47  ;;  %v454_v40 = vmax.f32 %v418_v19, 0.0  ;;  %v377_v38 = vmul.f32 %v6471_v28, %v8307_v46  ;;  %v455_v47 = vmax.f32 %v419_v34, 0.0 }
  0xaa   : > { %v637_v53 = vpop.permute.xlu0 %636  ;;  %v527_v54 = vpop.permute.xlu1 %526  ;;  %6973 = vmatprep.mubr.msk.f32.mxu0 %vm8098_vm1, %v8097_v3  ;;  %7030 = vmatprep.mubr.msk.f32.mxu1 %vm8098_vm1, %v8097_v3 }
  0xab   : > { %v702_v61 = vmul.f32 %v637_v53, %v450_v29  ;;  %v680_v62 = vmul.f32 %v527_v54, %v428_v33  ;;  %v6427_v29 = vunpack.c.l.bf16 %v8294_v41  ;;  %v432_v41 = vmax.f32 %v396_v23, 0.0 }
  0xac   : > { %v776_v1 = vld [vmem:[#allocation2 + $0x40] sm:$0xff]  ;;  %v798_v43 = vld [vmem:[#allocation2 + $0xf0] sm:$0xff]  ;;  %v420_v53 = vadd.f32 %v8314_v49, %v377_v38 }
  0xad   : > { %751 = vst.msk [vmem:[#allocation2 + $0x106] sm:$0xff] %vm710_vm0, %v702_v61  ;;  %729 = vst.msk [vmem:[#allocation2 + $0x56] sm:$0xff] %vm710_vm0, %v680_v62  ;;  %6974 = vmatmul.mubr.msk.f32.gmra.mrb[16].mxu0 %vm710_vm0, %v776_v1  ;;  %7031 = vmatmul.mubr.msk.f32.gmra.mrb[12].mxu1 %vm710_vm0, %v795_v2  ;;  %v355_v39 = vmul.f32 %v6427_v29, %v8307_v46  ;;  %v433_v46 = vmax.f32 %v397_v35, 0.0  ;;  %v763_v29 = vld [vmem:[%s10315_s1 + $0x8] sm:$0x3]  ;;  %v8608_v38 = vld [vmem:[#allocation2 + $0x1a] sm:$0xff] }
  0xae   : > { %v642_v6 = vpop.permute.xlu0 %641  ;;  %v532_v7 = vpop.permute.xlu1 %531  ;;  %6976 = vmatprep.mubr.msk.f32.mxu0 %vm8098_vm1, %v8097_v3  ;;  %7033 = vmatprep.mubr.msk.f32.mxu1 %vm8098_vm1, %v8097_v3  ;;  %v456_v62 = vmax.f32 %v420_v53, 0.0  ;;  %v1257_v35 = vld [vmem:[#allocation2 + $0x9] sm:$0xff] }
  0xaf   : > { %v703_v12 = vmul.f32 %v642_v6, %v451_v55  ;;  %v681_v13 = vmul.f32 %v532_v7, %v429_v56  ;;  %v398_v54 = vadd.f32 %v8314_v49, %v355_v39  ;;  %v457_v7 = vmax.f32 %v8318_v51, 0.0 }
  0xb0   : > { %v777_v16 = vld [vmem:[#allocation2 + $0x48] sm:$0xff]  ;;  %v799_v56 = vld [vmem:[#allocation2 + $0xf8] sm:$0xff] }
  0xb1   : > { %752 = vst.msk [vmem:[#allocation2 + $0x10e] sm:$0xff] %vm710_vm0, %v703_v12  ;;  %730 = vst.msk [vmem:[#allocation2 + $0x5e] sm:$0xff] %vm710_vm0, %v681_v13  ;;  %6977 = vmatmul.mubr.msk.f32.gmra.mrb[18].mxu0 %vm710_vm0, %v777_v16  ;;  %7034 = vmatmul.mubr.msk.f32.gmra.mrb[14].mxu1 %vm710_vm0, %v796_v17  ;;  %v434_v63 = vmax.f32 %v398_v54, 0.0  ;;  %v436_v13 = vmax.f32 %v8332_v59, 0.0 }
  0xb2   : > { %v647_v20 = vpop.permute.xlu0 %646  ;;  %v537_v21 = vpop.permute.xlu1 %536  ;;  %6979 = vmatprep.mubr.msk.f32.mxu0 %vm8098_vm1, %v8097_v3  ;;  %7036 = vmatprep.mubr.msk.f32.mxu1 %vm8098_vm1, %v8097_v3 }
  0xb3   : > { %v704_v26 = vmul.f32 %v647_v20, %v452_v14  ;;  %v682_v27 = vmul.f32 %v537_v21, %v430_v15  ;;  %v437_v14 = vmax.f32 %v8335_v60, 0.0 }
  0xb4   : > { %v778_v30 = vld [vmem:[#allocation2 + $0x50] sm:$0xff]  ;;  %v800_v1 = vld [vmem:[#allocation2 + $0x100] sm:$0xff] }
  0xb5   : > { %753 = vst.msk [vmem:[#allocation2 + $0x116] sm:$0xff] %vm710_vm0, %v704_v26  ;;  %731 = vst.msk [vmem:[#allocation2 + $0x66] sm:$0xff] %vm710_vm0, %v682_v27  ;;  %6980 = vmatmul.mubr.msk.f32.gmra.mrb[20].mxu0 %vm710_vm0, %v778_v30  ;;  %7037 = vmatmul.mubr.msk.f32.gmra.mrb[16].mxu1 %vm710_vm0, %v797_v31  ;;  %v1784_v30 = vld [vmem:[#allocation2 + $0x2] sm:$0xff] }
  0xb6   : > { %v652_v32 = vpop.permute.xlu0 %651  ;;  %v542_v33 = vpop.permute.xlu1 %541  ;;  %6982 = vmatprep.mubr.msk.f32.mxu0 %vm8098_vm1, %v8097_v3  ;;  %7039 = vmatprep.mubr.msk.f32.mxu1 %vm8098_vm1, %v8097_v3 }
  0xb7   : > { %v705_v36 = vmul.f32 %v652_v32, %v453_v18  ;;  %v683_v37 = vmul.f32 %v542_v33, %v431_v22  ;;  %v762_v32 = vld [vmem:[%s10315_s1 + $0x6] sm:$0x3]  ;;  %v3005_v33 = vsel %vm932_vm2, %v763_v29, 0  ;;  %v8812_v29 = vld [vmem:[#allocation2 + $0xca] sm:$0xff] }
  0xb8   : > { %v779_v42 = vld [vmem:[#allocation2 + $0x58] sm:$0xff]  ;;  %v801_v10 = vld [vmem:[#allocation2 + $0x108] sm:$0xff]  ;;  %v2477_v34 = vsel %vm932_vm2, %v762_v32, 0 }
  0xb9   : > { %754 = vst.msk [vmem:[#allocation2 + $0x11e] sm:$0xff] %vm710_vm0, %v705_v36  ;;  %732 = vst.msk [vmem:[#allocation2 + $0x6e] sm:$0xff] %vm710_vm0, %v683_v37  ;;  %6983 = vmatmul.mubr.msk.f32.gmra.mrb[22].mxu0 %vm710_vm0, %v779_v42  ;;  %7040 = vmatmul.mubr.msk.f32.gmra.mrb[18].mxu1 %vm710_vm0, %v798_v43  ;;  %v8596_v36 = vld [vmem:[#allocation2 + $0x12] sm:$0xff] }
  0xba   : > { %v657_v44 = vpop.permute.xlu0 %656  ;;  %v547_v45 = vpop.permute.xlu1 %546  ;;  %6985 = vmatprep.mubr.msk.f32.mxu0 %vm8098_vm1, %v8097_v3  ;;  %7042 = vmatprep.mubr.msk.f32.mxu1 %vm8098_vm1, %v8097_v3  ;;  %v1258_v37 = vld [vmem:[#allocation2 + $0x11] sm:$0xff]  ;;  %v1259_v43 = vld [vmem:[#allocation2 + $0x19] sm:$0xff] }
  0xbb   : > { %v706_v48 = vmul.f32 %v657_v44, %v454_v40  ;;  %v684_v50 = vmul.f32 %v547_v45, %v432_v41  ;;  %v1256_v40 = vld [vmem:[#allocation2 + $0x1] sm:$0xff]  ;;  %v1785_v41 = vld [vmem:[#allocation2 + $0xa] sm:$0xff] }
  0xbc   : > { %v780_v55 = vld [vmem:[#allocation2 + $0x60] sm:$0xff]  ;;  %v802_v16 = vld [vmem:[#allocation2 + $0x110] sm:$0xff] }
  0xbd   : > { %755 = vst.msk [vmem:[#allocation2 + $0x126] sm:$0xff] %vm710_vm0, %v706_v48  ;;  %733 = vst.msk [vmem:[#allocation2 + $0x76] sm:$0xff] %vm710_vm0, %v684_v50  ;;  %6986 = vmatmul.mubr.msk.f32.gmra.mrb[24].mxu0 %vm710_vm0, %v780_v55  ;;  %7043 = vmatmul.mubr.msk.f32.gmra.mrb[20].mxu1 %vm710_vm0, %v799_v56  ;;  %v8618_v45 = vld [vmem:[#allocation2 + $0x22] sm:$0xff]  ;;  %v8628_v50 = vld [vmem:[#allocation2 + $0x2a] sm:$0xff] }
  0xbe   : > { %v662_v57 = vpop.permute.xlu0 %661  ;;  %v552_v58 = vpop.permute.xlu1 %551  ;;  %6988 = vmatprep.mubr.msk.f32.mxu0 %vm8098_vm1, %v8097_v3  ;;  %7045 = vmatprep.mubr.msk.f32.mxu1 %vm8098_vm1, %v8097_v3  ;;  %v1260_v48 = vld [vmem:[#allocation2 + $0x21] sm:$0xff]  ;;  %v1261_v55 = vld [vmem:[#allocation2 + $0x29] sm:$0xff]  ;;  %v8638_v56 = vld [vmem:[#allocation2 + $0x32] sm:$0xff] }
  0xbf   : > { %v707_v61 = vmul.f32 %v662_v57, %v455_v47  ;;  %v685_v49 = vmul.f32 %v552_v58, %v433_v46  ;;  %v1262_v58 = vld [vmem:[#allocation2 + $0x31] sm:$0xff] }
  0xc0   : > { %v781_v0 = vld [vmem:[#allocation2 + $0x68] sm:$0xff]  ;;  %v803_v20 = vld [vmem:[#allocation2 + $0x118] sm:$0xff] }
  0xc1   : > { %756 = vst.msk [vmem:[#allocation2 + $0x12e] sm:$0xff] %vm710_vm0, %v707_v61  ;;  %734 = vst.msk [vmem:[#allocation2 + $0x7e] sm:$0xff] %vm710_vm0, %v685_v49  ;;  %6989 = vmatmul.mubr.msk.f32.gmra.mrb[26].mxu0 %vm710_vm0, %v781_v0  ;;  %7046 = vmatmul.mubr.msk.f32.gmra.mrb[22].mxu1 %vm710_vm0, %v800_v1  ;;  %v8648_v61 = vld [vmem:[#allocation2 + $0x3a] sm:$0xff]  ;;  %v8666_v0 = vld [vmem:[#allocation2 + $0x4a] sm:$0xff] }
  0xc2   : > { %v667_v2 = vpop.permute.xlu0 %666  ;;  %v557_v4 = vpop.permute.xlu1 %556  ;;  %6991 = vmatprep.mubr.msk.f32.mxu0 %vm8098_vm1, %v8097_v3  ;;  %7048 = vmatprep.mubr.msk.f32.mxu1 %vm8098_vm1, %v8097_v3  ;;  %v1263_v49 = vld [vmem:[#allocation2 + $0x39] sm:$0xff]  ;;  %v1265_v1 = vld [vmem:[#allocation2 + $0x49] sm:$0xff]  ;;  %v1282_v32 = vld [vmem:[#allocation2 + $0xd1] sm:$0xff] }
  0xc3   : > { %v708_v5 = vmul.f32 %v667_v2, %v456_v62  ;;  %v686_v6 = vmul.f32 %v557_v4, %v434_v63  ;;  %v8657_v62 = vld [vmem:[#allocation2 + $0x42] sm:$0xff]  ;;  %v8675_v2 = vld [vmem:[#allocation2 + $0x52] sm:$0xff] }
  0xc4   : > { %v782_v9 = vld [vmem:[#allocation2 + $0x70] sm:$0xff]  ;;  %v804_v22 = vld [vmem:[#allocation2 + $0x120] sm:$0xff] }
  0xc5   : > { %757 = vst.msk [vmem:[#allocation2 + $0x136] sm:$0xff] %vm710_vm0, %v708_v5  ;;  %735 = vst.msk [vmem:[#allocation2 + $0x86] sm:$0xff] %vm710_vm0, %v686_v6  ;;  %6992 = vmatmul.mubr.msk.f32.gmra.mrb[28].mxu0 %vm710_vm0, %v782_v9  ;;  %7049 = vmatmul.mubr.msk.f32.gmra.mrb[24].mxu1 %vm710_vm0, %v801_v10  ;;  %v1264_v63 = vld [vmem:[#allocation2 + $0x41] sm:$0xff]  ;;  %v1266_v4 = vld [vmem:[#allocation2 + $0x51] sm:$0xff] }
  0xc6   : > { %v672_v11 = vpop.permute.xlu0 %671  ;;  %v562_v12 = vpop.permute.xlu1 %561  ;;  %6994 = vmatprep.mubr.msk.f32.mxu0 %vm8098_vm1, %v8097_v3  ;;  %7051 = vmatprep.mubr.msk.f32.mxu1 %vm8098_vm1, %v8097_v3  ;;  %v8684_v5 = vld [vmem:[#allocation2 + $0x5a] sm:$0xff]  ;;  %v8702_v9 = vld [vmem:[#allocation2 + $0x6a] sm:$0xff] }
  0xc7   : > { %v709_v51 = vmul.f32 %v672_v11, %v457_v7  ;;  %v687_v52 = vmul.f32 %v562_v12, %v435_v8  ;;  %v1267_v6 = vld [vmem:[#allocation2 + $0x59] sm:$0xff]  ;;  %v8693_v7 = vld [vmem:[#allocation2 + $0x62] sm:$0xff]  ;;  %v1270_v12 = vld [vmem:[#allocation2 + $0x71] sm:$0xff] }
  0xc8   : > { %v783_v15 = vld [vmem:[#allocation2 + $0x78] sm:$0xff]  ;;  %v805_v24 = vld [vmem:[#allocation2 + $0x128] sm:$0xff] }
  0xc9   : > { %758 = vst.msk [vmem:[#allocation2 + $0x13e] sm:$0xff] %vm710_vm0, %v709_v51  ;;  %736 = vst.msk [vmem:[#allocation2 + $0x8e] sm:$0xff] %vm710_vm0, %v687_v52  ;;  %6995 = vmatmul.mubr.msk.f32.gmra.mrb[30].mxu0 %vm710_vm0, %v783_v15  ;;  %7052 = vmatmul.mubr.msk.f32.gmra.mrb[26].mxu1 %vm710_vm0, %v802_v16  ;;  %v1268_v8 = vld [vmem:[#allocation2 + $0x61] sm:$0xff]  ;;  %v1269_v10 = vld [vmem:[#allocation2 + $0x69] sm:$0xff] }
  0xca   : > { %v567_v17 = vpop.permute.xlu0 %566  ;;  %v572_v18 = vpop.permute.xlu1 %571  ;;  %6997 = vmatprep.mubr.msk.f32.mxu0 %vm8098_vm1, %v8097_v3  ;;  %7054 = vmatprep.mubr.msk.f32.mxu1 %vm8098_vm1, %v8097_v3  ;;  %v8711_v11 = vld [vmem:[#allocation2 + $0x72] sm:$0xff]  ;;  %v8720_v51 = vld [vmem:[#allocation2 + $0x7a] sm:$0xff] }
  0xcb   : > { %v688_v59 = vmul.f32 %v567_v17, %v436_v13  ;;  %v689_v60 = vmul.f32 %v572_v18, %v437_v14  ;;  %v1271_v52 = vld [vmem:[#allocation2 + $0x79] sm:$0xff] }
  0xcc   : > { %v784_v19 = vld [vmem:[#allocation2 + $0x80] sm:$0xff]  ;;  %v806_v26 = vld [vmem:[#allocation2 + $0x130] sm:$0xff] }
  0xcd   : > { %737 = vst.msk [vmem:[#allocation2 + $0x96] sm:$0xff] %vm710_vm0, %v688_v59  ;;  %738 = vst.msk [vmem:[#allocation2 + $0x9e] sm:$0xff] %vm710_vm0, %v689_v60  ;;  %6998 = vmatmul.mubr.msk.f32.gmra.mrb[32].mxu0 %vm710_vm0, %v784_v19  ;;  %7055 = vmatmul.mubr.msk.f32.gmra.mrb[28].mxu1 %vm710_vm0, %v803_v20  ;;  %v8729_v13 = vld [vmem:[#allocation2 + $0x82] sm:$0xff] }
  0xce   : > { %7000 = vmatprep.mubr.msk.f32.mxu0 %vm8098_vm1, %v8097_v3  ;;  %7057 = vmatprep.mubr.msk.f32.mxu1 %vm8098_vm1, %v8097_v3  ;;  %v1272_v14 = vld [vmem:[#allocation2 + $0x81] sm:$0xff] }
  0xd0   : > { %v785_v21 = vld [vmem:[#allocation2 + $0x88] sm:$0xff]  ;;  %v807_v28 = vld [vmem:[#allocation2 + $0x138] sm:$0xff]  ;;  %v808_v31 = vld [vmem:[#allocation2 + $0x140] sm:$0xf] }
  0xd1   : > { %7001 = vmatmul.mubr.msk.f32.gmra.mrb[34].mxu0 %vm710_vm0, %v785_v21  ;;  %7058 = vmatmul.mubr.msk.f32.gmra.mrb[30].mxu1 %vm710_vm0, %v804_v22  ;;  %v8738_v15 = vld [vmem:[#allocation2 + $0x8a] sm:$0xff] }
  0xd2   : > { %7003 = vmatprep.mubr.msk.f32.mxu0 %vm8098_vm1, %v8097_v3  ;;  %7060 = vmatprep.mubr.msk.f32.mxu1 %vm8098_vm1, %v8097_v3  ;;  %v1273_v16 = vld [vmem:[#allocation2 + $0x89] sm:$0xff] }
  0xd3   : > { %v8776_v21 = vld [vmem:[#allocation2 + $0xaa] sm:$0xff] }
  0xd4   : > { %v786_v23 = vld [vmem:[#allocation2 + $0x90] sm:$0xff]  ;;  %v787_v25 = vld [vmem:[#allocation2 + $0x98] sm:$0xff]  ;;  %v788_v27 = vld [vmem:[#allocation2 + $0xa0] sm:$0xff] }
  0xd5   : > { %7004 = vmatmul.mubr.msk.f32.gmra.mrb[36].mxu0 %vm710_vm0, %v786_v23  ;;  %7061 = vmatmul.mubr.msk.f32.gmra.mrb[32].mxu1 %vm710_vm0, %v805_v24  ;;  %v8747_v17 = vld [vmem:[#allocation2 + $0x92] sm:$0xff]  ;;  %v8756_v59 = vld [vmem:[#allocation2 + $0x9a] sm:$0xff]  ;;  %v8765_v19 = vld [vmem:[#allocation2 + $0xa2] sm:$0xff] }
  0xd6   : > { %7006 = vmatprep.mubr.msk.f32.mxu0 %vm8098_vm1, %v8097_v3  ;;  %7063 = vmatprep.mubr.msk.f32.mxu1 %vm8098_vm1, %v8097_v3  ;;  %v1274_v18 = vld [vmem:[#allocation2 + $0x91] sm:$0xff]  ;;  %v1275_v60 = vld [vmem:[#allocation2 + $0x99] sm:$0xff]  ;;  %v1276_v20 = vld [vmem:[#allocation2 + $0xa1] sm:$0xff] }
  0xd7   : > { %v1277_v22 = vld [vmem:[#allocation2 + $0xa9] sm:$0xff]  ;;  %v8785_v23 = vld [vmem:[#allocation2 + $0xb2] sm:$0xff] }
  0xd8   : > { %v1278_v24 = vld [vmem:[#allocation2 + $0xb1] sm:$0xff] }
  0xd9   : > { %7007 = vmatmul.mubr.msk.f32.gmra.mrb[38].mxu0 %vm710_vm0, %v787_v25  ;;  %7064 = vmatmul.mubr.msk.f32.gmra.mrb[34].mxu1 %vm710_vm0, %v806_v26  ;;  %v8794_v25 = vld [vmem:[#allocation2 + $0xba] sm:$0xff] }
  0xda   : > { %7009 = vmatprep.mubr.msk.f32.mxu0 %vm8098_vm1, %v8097_v3  ;;  %7066 = vmatprep.mubr.msk.f32.mxu1 %vm8098_vm1, %v8097_v3  ;;  %v1279_v26 = vld [vmem:[#allocation2 + $0xb9] sm:$0xff] }
  0xdd   : > { %7010 = vmatmul.mubr.msk.f32.gmra.mrb[40].mxu0 %vm710_vm0, %v788_v27  ;;  %7067 = vmatmul.mubr.msk.f32.gmra.mrb[36].mxu1 %vm710_vm0, %v807_v28  ;;  %v8803_v27 = vld [vmem:[#allocation2 + $0xc2] sm:$0xff] }
  0xde   : > { %7069 = vmatprep.mubr.msk.f32.mxu1 %vm8098_vm1, %v8097_v3  ;;  %7199 = vmatprep.mubr.msk.f32.mxu0 %vm8098_vm1, %v8097_v3  ;;  %v1280_v28 = vld [vmem:[#allocation2 + $0xc1] sm:$0xff] }
  0xe1   : > { %7070 = vmatmul.mubr.msk.f32.gmra.mrb[38].mxu1 %vm710_vm0, %v808_v31  ;;  %7200 = vmatmul.mubr.msk.f32.vlgmr.msra.gmra.mrb[42].mxu0 %vm710_vm0, %v1784_v30  ;;  %v1281_v30 = vld [vmem:[#allocation2 + $0xc9] sm:$0xff]  ;;  %v8821_v31 = vld [vmem:[#allocation2 + $0xd2] sm:$0xff] }
  0xe2   : > { %7074 = vmatprep.mubr.msk.f32.mxu1 %vm8098_vm1, %v8097_v3  ;;  %7202 = vmatprep.mubr.msk.f32.mxu0 %vm8098_vm1, %v8097_v3 }
  0xe3   : > { %7448 = vmatpush3.bf16.msra.mxu0 %v3005_v33  ;;  %v970_v39 = vpop.f32.mrb[0].mxu0  ;;  %v8830_v33 = vld [vmem:[#allocation2 + $0xda] sm:$0xff] }
  0xe4   : > { %7697 = vmatprep.subr.bf16.mxu0 %v8097_v3  ;;  %1174 = vst.msk [vmem:[#allocation3] sm:$0xff] %vm710_vm0, %v970_v39  ;;  %v6951_v42 = vpop.f32.mrb[1].mxu0  ;;  %v8857_v39 = vld [vmem:[#allocation2 + $0xf2] sm:$0xff] }
  0xe5   : > { %7075 = vmatmul.mubr.msk.f32.vlgmr.msra.gmra.mrb[40].mxu1 %vm710_vm0, %v1256_v40  ;;  %7203 = vmatmul.mubr.msk.f32.gmra.mrb[44].mxu0 %vm710_vm0, %v1785_v41  ;;  %v1283_v40 = vld [vmem:[#allocation2 + $0xd9] sm:$0xff]  ;;  %v8839_v41 = vld [vmem:[#allocation2 + $0xe2] sm:$0xff]  ;;  %v1286_v42 = vld [vmem:[#allocation2 + $0xf1] sm:$0xff] }
  0xe6   : > { %7323 = vmatpush3.bf16.msra.mxu1 %v2477_v34  ;;  %7077 = vmatprep.mubr.msk.f32.mxu1 %vm8098_vm1, %v8097_v3  ;;  %v1284_v34 = vld [vmem:[#allocation2 + $0xe1] sm:$0xff] }
  0xe7   : > { %7205 = vmatprep.mubr.msk.f32.mxu0 %vm8098_vm1, %v8097_v3  ;;  %7572 = vmatprep.subr.bf16.mxu1 %v8097_v3  ;;  %v975_v44 = vpop.f32.mrb[2].mxu0 }
  0xe8   : > { %1175 = vst.msk [vmem:[#allocation3 + $0x8] sm:$0xff] %vm710_vm0, %v975_v44  ;;  %v6954_v47 = vpop.f32.mrb[3].mxu0  ;;  %v1287_v44 = vld [vmem:[#allocation2 + $0xf9] sm:$0xff] }
  0xe9   : > { %7078 = vmatmul.mubr.msk.f32.gmra.mrb[42].mxu1 %vm710_vm0, %v1257_v35  ;;  %7206 = vmatmul.mubr.msk.f32.gmra.mrb[46].mxu0 %vm710_vm0, %v8596_v36  ;;  %v8848_v35 = vld [vmem:[#allocation2 + $0xea] sm:$0xff]  ;;  %v1816_v47 = vld [vmem:[#allocation2 + $0x102] sm:$0xff] }
  0xea   : > { %7080 = vmatprep.mubr.msk.f32.mxu1 %vm8098_vm1, %v8097_v3  ;;  %7208 = vmatprep.mubr.msk.f32.mxu0 %vm8098_vm1, %v8097_v3 }
  0xeb   : > { %v980_v46 = vpop.f32.mrb[4].mxu0 }
  0xec   : > { %1176 = vst.msk [vmem:[#allocation3 + $0x10] sm:$0xff] %vm710_vm0, %v980_v46  ;;  %v6957_v53 = vpop.f32.mrb[5].mxu0  ;;  %v1288_v46 = vld [vmem:[#allocation2 + $0x101] sm:$0xff] }
  0xed   : > { %7081 = vmatmul.mubr.msk.f32.gmra.mrb[44].mxu1 %vm710_vm0, %v1258_v37  ;;  %7209 = vmatmul.mubr.msk.f32.gmra.mrb[48].mxu0 %vm710_vm0, %v8608_v38  ;;  %v1285_v37 = vld [vmem:[#allocation2 + $0xe9] sm:$0xff] }
  0xee   : > { %7083 = vmatprep.mubr.msk.f32.mxu1 %vm8098_vm1, %v8097_v3  ;;  %7211 = vmatprep.mubr.msk.f32.mxu0 %vm8098_vm1, %v8097_v3 }
  0xef   : > { %v985_v54 = vpop.f32.mrb[6].mxu0 }
  0xf0   : > { %1177 = vst.msk [vmem:[#allocation3 + $0x18] sm:$0xff] %vm710_vm0, %v985_v54  ;;  %v6960_v57 = vpop.f32.mrb[7].mxu0  ;;  %v1289_v54 = vld [vmem:[#allocation2 + $0x109] sm:$0xff] }
  0xf1   : > { %7084 = vmatmul.mubr.msk.f32.gmra.mrb[46].mxu1 %vm710_vm0, %v1259_v43  ;;  %7212 = vmatmul.mubr.msk.f32.gmra.mrb[50].mxu0 %vm710_vm0, %v8618_v45  ;;  %v8866_v43 = vld [vmem:[#allocation2 + $0xfa] sm:$0xff] }
  0xf2   : > { %7086 = vmatprep.mubr.msk.f32.mxu1 %vm8098_vm1, %v8097_v3  ;;  %7214 = vmatprep.mubr.msk.f32.mxu0 %vm8098_vm1, %v8097_v3 }
  0xf5   : > { %7087 = vmatmul.mubr.msk.f32.gmra.mrb[48].mxu1 %vm710_vm0, %v1260_v48  ;;  %7215 = vmatmul.mubr.msk.f32.gmra.mrb[52].mxu0 %vm710_vm0, %v8628_v50  ;;  %v1817_v48 = vld [vmem:[#allocation2 + $0x10a] sm:$0xff] }
  0xf6   : > { %7089 = vmatprep.mubr.msk.f32.mxu1 %vm8098_vm1, %v8097_v3  ;;  %7217 = vmatprep.mubr.msk.f32.mxu0 %vm8098_vm1, %v8097_v3 }
  0xf9   : > { %7090 = vmatmul.mubr.msk.f32.gmra.mrb[50].mxu1 %vm710_vm0, %v1261_v55  ;;  %7218 = vmatmul.mubr.msk.f32.gmra.mrb[54].mxu0 %vm710_vm0, %v8638_v56  ;;  %v1818_v55 = vld [vmem:[#allocation2 + $0x112] sm:$0xff] }
  0xfa   : > { %7092 = vmatprep.mubr.msk.f32.mxu1 %vm8098_vm1, %v8097_v3  ;;  %7220 = vmatprep.mubr.msk.f32.mxu0 %vm8098_vm1, %v8097_v3 }
  0xfd   : > { %7093 = vmatmul.mubr.msk.f32.gmra.mrb[52].mxu1 %vm710_vm0, %v1262_v58  ;;  %7221 = vmatmul.mubr.msk.f32.gmra.mrb[56].mxu0 %vm710_vm0, %v8648_v61 }
  0xfe   : > { %7095 = vmatprep.mubr.msk.f32.mxu1 %vm8098_vm1, %v8097_v3  ;;  %7223 = vmatprep.mubr.msk.f32.mxu0 %vm8098_vm1, %v8097_v3 }
 0x101   : > { %7096 = vmatmul.mubr.msk.f32.gmra.mrb[54].mxu1 %vm710_vm0, %v1263_v49  ;;  %7224 = vmatmul.mubr.msk.f32.gmra.mrb[58].mxu0 %vm710_vm0, %v8657_v62  ;;  %v1290_v49 = vld [vmem:[#allocation2 + $0x111] sm:$0xff] }
 0x102   : > { %7098 = vmatprep.mubr.msk.f32.mxu1 %vm8098_vm1, %v8097_v3  ;;  %7226 = vmatprep.mubr.msk.f32.mxu0 %vm8098_vm1, %v8097_v3 }
 0x105   : > { %7099 = vmatmul.mubr.msk.f32.gmra.mrb[56].mxu1 %vm710_vm0, %v1264_v63  ;;  %7227 = vmatmul.mubr.msk.f32.gmra.mrb[60].mxu0 %vm710_vm0, %v8666_v0  ;;  %v1819_v63 = vld [vmem:[#allocation2 + $0x11a] sm:$0xff] }
 0x106   : > { %7101 = vmatprep.mubr.msk.f32.mxu1 %vm8098_vm1, %v8097_v3  ;;  %7229 = vmatprep.mubr.msk.f32.mxu0 %vm8098_vm1, %v8097_v3 }
 0x109   : > { %7102 = vmatmul.mubr.msk.f32.gmra.mrb[58].mxu1 %vm710_vm0, %v1265_v1  ;;  %7230 = vmatmul.mubr.msk.f32.gmra.mrb[62].mxu0 %vm710_vm0, %v8675_v2 }
 0x10a   : > { %7104 = vmatprep.mubr.msk.f32.mxu1 %vm8098_vm1, %v8097_v3  ;;  %7232 = vmatprep.mubr.msk.f32.mxu0 %vm8098_vm1, %v8097_v3 }
 0x10d   : > { %7105 = vmatmul.mubr.msk.f32.gmra.mrb[60].mxu1 %vm710_vm0, %v1266_v4  ;;  %7233 = vmatmul.mubr.msk.f32.gmra.mrb[64].mxu0 %vm710_vm0, %v8684_v5 }
 0x10e   : > { %7107 = vmatprep.mubr.msk.f32.mxu1 %vm8098_vm1, %v8097_v3  ;;  %7235 = vmatprep.mubr.msk.f32.mxu0 %vm8098_vm1, %v8097_v3 }
 0x111   : > { %7108 = vmatmul.mubr.msk.f32.gmra.mrb[62].mxu1 %vm710_vm0, %v1267_v6  ;;  %7236 = vmatmul.mubr.msk.f32.gmra.mrb[66].mxu0 %vm710_vm0, %v8693_v7 }
 0x112   : > { %7110 = vmatprep.mubr.msk.f32.mxu1 %vm8098_vm1, %v8097_v3  ;;  %7238 = vmatprep.mubr.msk.f32.mxu0 %vm8098_vm1, %v8097_v3 }
 0x115   : > { %7111 = vmatmul.mubr.msk.f32.gmra.mrb[64].mxu1 %vm710_vm0, %v1268_v8  ;;  %7239 = vmatmul.mubr.msk.f32.gmra.mrb[68].mxu0 %vm710_vm0, %v8702_v9  ;;  %v1291_v8 = vld [vmem:[#allocation2 + $0x119] sm:$0xff] }
 0x116   : > { %7113 = vmatprep.mubr.msk.f32.mxu1 %vm8098_vm1, %v8097_v3  ;;  %7241 = vmatprep.mubr.msk.f32.mxu0 %vm8098_vm1, %v8097_v3 }
 0x119   : > { %7114 = vmatmul.mubr.msk.f32.gmra.mrb[66].mxu1 %vm710_vm0, %v1269_v10  ;;  %7242 = vmatmul.mubr.msk.f32.gmra.mrb[70].mxu0 %vm710_vm0, %v8711_v11  ;;  %v1820_v10 = vld [vmem:[#allocation2 + $0x122] sm:$0xff] }
 0x11a   : > { %7116 = vmatprep.mubr.msk.f32.mxu1 %vm8098_vm1, %v8097_v3  ;;  %7244 = vmatprep.mubr.msk.f32.mxu0 %vm8098_vm1, %v8097_v3 }
 0x11d   : > { %7117 = vmatmul.mubr.msk.f32.gmra.mrb[68].mxu1 %vm710_vm0, %v1270_v12  ;;  %7245 = vmatmul.mubr.msk.f32.gmra.mrb[72].mxu0 %vm710_vm0, %v8720_v51 }
 0x11e   : > { %7119 = vmatprep.mubr.msk.f32.mxu1 %vm8098_vm1, %v8097_v3  ;;  %7247 = vmatprep.mubr.msk.f32.mxu0 %vm8098_vm1, %v8097_v3 }
 0x121   : > { %7120 = vmatmul.mubr.msk.f32.gmra.mrb[70].mxu1 %vm710_vm0, %v1271_v52  ;;  %7248 = vmatmul.mubr.msk.f32.gmra.mrb[74].mxu0 %vm710_vm0, %v8729_v13 }
 0x122   : > { %7122 = vmatprep.mubr.msk.f32.mxu1 %vm8098_vm1, %v8097_v3  ;;  %7250 = vmatprep.mubr.msk.f32.mxu0 %vm8098_vm1, %v8097_v3 }
 0x125   : > { %7123 = vmatmul.mubr.msk.f32.gmra.mrb[72].mxu1 %vm710_vm0, %v1272_v14  ;;  %7251 = vmatmul.mubr.msk.f32.gmra.mrb[76].mxu0 %vm710_vm0, %v8738_v15 }
 0x126   : > { %7125 = vmatprep.mubr.msk.f32.mxu1 %vm8098_vm1, %v8097_v3  ;;  %7253 = vmatprep.mubr.msk.f32.mxu0 %vm8098_vm1, %v8097_v3 }
 0x129   : > { %7126 = vmatmul.mubr.msk.f32.gmra.mrb[74].mxu1 %vm710_vm0, %v1273_v16  ;;  %7254 = vmatmul.mubr.msk.f32.gmra.mrb[78].mxu0 %vm710_vm0, %v8747_v17 }
 0x12a   : > { %7128 = vmatprep.mubr.msk.f32.mxu1 %vm8098_vm1, %v8097_v3  ;;  %7256 = vmatprep.mubr.msk.f32.mxu0 %vm8098_vm1, %v8097_v3 }
 0x12d   : > { %7129 = vmatmul.mubr.msk.f32.gmra.mrb[76].mxu1 %vm710_vm0, %v1274_v18  ;;  %7257 = vmatmul.mubr.msk.f32.gmra.mrb[80].mxu0 %vm710_vm0, %v8756_v59  ;;  %v1292_v18 = vld [vmem:[#allocation2 + $0x121] sm:$0xff] }
 0x12e   : > { %7131 = vmatprep.mubr.msk.f32.mxu1 %vm8098_vm1, %v8097_v3  ;;  %7259 = vmatprep.mubr.msk.f32.mxu0 %vm8098_vm1, %v8097_v3 }
 0x131   : > { %7132 = vmatmul.mubr.msk.f32.gmra.mrb[78].mxu1 %vm710_vm0, %v1275_v60  ;;  %7260 = vmatmul.mubr.msk.f32.gmra.mrb[82].mxu0 %vm710_vm0, %v8765_v19  ;;  %v1821_v60 = vld [vmem:[#allocation2 + $0x12a] sm:$0xff] }
 0x132   : > { %7134 = vmatprep.mubr.msk.f32.mxu1 %vm8098_vm1, %v8097_v3  ;;  %7262 = vmatprep.mubr.msk.f32.mxu0 %vm8098_vm1, %v8097_v3 }
 0x135   : > { %7135 = vmatmul.mubr.msk.f32.gmra.mrb[80].mxu1 %vm710_vm0, %v1276_v20  ;;  %7263 = vmatmul.mubr.msk.f32.gmra.mrb[84].mxu0 %vm710_vm0, %v8776_v21 }
 0x136   : > { %7137 = vmatprep.mubr.msk.f32.mxu1 %vm8098_vm1, %v8097_v3  ;;  %7265 = vmatprep.mubr.msk.f32.mxu0 %vm8098_vm1, %v8097_v3 }
 0x139   : > { %7138 = vmatmul.mubr.msk.f32.gmra.mrb[82].mxu1 %vm710_vm0, %v1277_v22  ;;  %7266 = vmatmul.mubr.msk.f32.gmra.mrb[86].mxu0 %vm710_vm0, %v8785_v23 }
 0x13a   : > { %7140 = vmatprep.mubr.msk.f32.mxu1 %vm8098_vm1, %v8097_v3  ;;  %7268 = vmatprep.mubr.msk.f32.mxu0 %vm8098_vm1, %v8097_v3 }
 0x13d   : > { %7141 = vmatmul.mubr.msk.f32.gmra.mrb[84].mxu1 %vm710_vm0, %v1278_v24  ;;  %7269 = vmatmul.mubr.msk.f32.gmra.mrb[88].mxu0 %vm710_vm0, %v8794_v25 }
 0x13e   : > { %7143 = vmatprep.mubr.msk.f32.mxu1 %vm8098_vm1, %v8097_v3  ;;  %7271 = vmatprep.mubr.msk.f32.mxu0 %vm8098_vm1, %v8097_v3 }
 0x141   : > { %7144 = vmatmul.mubr.msk.f32.gmra.mrb[86].mxu1 %vm710_vm0, %v1279_v26  ;;  %7272 = vmatmul.mubr.msk.f32.gmra.mrb[90].mxu0 %vm710_vm0, %v8803_v27 }
 0x142   : > { %7146 = vmatprep.mubr.msk.f32.mxu1 %vm8098_vm1, %v8097_v3  ;;  %7274 = vmatprep.mubr.msk.f32.mxu0 %vm8098_vm1, %v8097_v3 }
 0x145   : > { %7147 = vmatmul.mubr.msk.f32.gmra.mrb[88].mxu1 %vm710_vm0, %v1280_v28  ;;  %7275 = vmatmul.mubr.msk.f32.gmra.mrb[92].mxu0 %vm710_vm0, %v8812_v29  ;;  %v1293_v28 = vld [vmem:[#allocation2 + $0x129] sm:$0xff] }
 0x146   : > { %7149 = vmatprep.mubr.msk.f32.mxu1 %vm8098_vm1, %v8097_v3  ;;  %7277 = vmatprep.mubr.msk.f32.mxu0 %vm8098_vm1, %v8097_v3 }
 0x149   : > { %7150 = vmatmul.mubr.msk.f32.gmra.mrb[90].mxu1 %vm710_vm0, %v1281_v30  ;;  %7278 = vmatmul.mubr.msk.f32.gmra.mrb[94].mxu0 %vm710_vm0, %v8821_v31  ;;  %v1822_v30 = vld [vmem:[#allocation2 + $0x132] sm:$0xff] }
 0x14a   : > { %7152 = vmatprep.mubr.msk.f32.mxu1 %vm8098_vm1, %v8097_v3  ;;  %7280 = vmatprep.mubr.msk.f32.mxu0 %vm8098_vm1, %v8097_v3 }
 0x14d   : > { %7153 = vmatmul.mubr.msk.f32.gmra.mrb[92].mxu1 %vm710_vm0, %v1282_v32  ;;  %7281 = vmatmul.mubr.msk.f32.gmra.mrb[96].mxu0 %vm710_vm0, %v8830_v33 }
 0x14e   : > { %7155 = vmatprep.mubr.msk.f32.mxu1 %vm8098_vm1, %v8097_v3  ;;  %7283 = vmatprep.mubr.msk.f32.mxu0 %vm8098_vm1, %v8097_v3 }
 0x151   : > { %7156 = vmatmul.mubr.msk.f32.gmra.mrb[94].mxu1 %vm710_vm0, %v1283_v40  ;;  %7284 = vmatmul.mubr.msk.f32.gmra.mrb[98].mxu0 %vm710_vm0, %v8839_v41 }
 0x152   : > { %7158 = vmatprep.mubr.msk.f32.mxu1 %vm8098_vm1, %v8097_v3  ;;  %7286 = vmatprep.mubr.msk.f32.mxu0 %vm8098_vm1, %v8097_v3 }
 0x155   : > { %7159 = vmatmul.mubr.msk.f32.gmra.mrb[96].mxu1 %vm710_vm0, %v1284_v34  ;;  %7287 = vmatmul.mubr.msk.f32.gmra.mrb[100].mxu0 %vm710_vm0, %v8848_v35 }
 0x156   : > { %7161 = vmatprep.mubr.msk.f32.mxu1 %vm8098_vm1, %v8097_v3  ;;  %7289 = vmatprep.mubr.msk.f32.mxu0 %vm8098_vm1, %v8097_v3 }
 0x159   : > { %7162 = vmatmul.mubr.msk.f32.gmra.mrb[98].mxu1 %vm710_vm0, %v1285_v37  ;;  %7290 = vmatmul.mubr.msk.f32.gmra.mrb[102].mxu0 %vm710_vm0, %v8857_v39 }
 0x15a   : > { %7164 = vmatprep.mubr.msk.f32.mxu1 %vm8098_vm1, %v8097_v3  ;;  %7292 = vmatprep.mubr.msk.f32.mxu0 %vm8098_vm1, %v8097_v3 }
 0x15d   : > { %7165 = vmatmul.mubr.msk.f32.gmra.mrb[100].mxu1 %vm710_vm0, %v1286_v42  ;;  %7293 = vmatmul.mubr.msk.f32.gmra.mrb[104].mxu0 %vm710_vm0, %v8866_v43  ;;  %v1294_v42 = vld [vmem:[#allocation2 + $0x131] sm:$0xff] }
 0x15e   : > { %7167 = vmatprep.mubr.msk.f32.mxu1 %vm8098_vm1, %v8097_v3  ;;  %7295 = vmatprep.mubr.msk.f32.mxu0 %vm8098_vm1, %v8097_v3 }
 0x161   : > { %7168 = vmatmul.mubr.msk.f32.gmra.mrb[102].mxu1 %vm710_vm0, %v1287_v44  ;;  %7296 = vmatmul.mubr.msk.f32.gmra.mrb[106].mxu0 %vm710_vm0, %v1816_v47  ;;  %v1823_v44 = vld [vmem:[#allocation2 + $0x13a] sm:$0xff] }
 0x162   : > { %7170 = vmatprep.mubr.msk.f32.mxu1 %vm8098_vm1, %v8097_v3  ;;  %7298 = vmatprep.mubr.msk.f32.mxu0 %vm8098_vm1, %v8097_v3 }
 0x165   : > { %7171 = vmatmul.mubr.msk.f32.gmra.mrb[104].mxu1 %vm710_vm0, %v1288_v46  ;;  %7299 = vmatmul.mubr.msk.f32.gmra.mrb[108].mxu0 %vm710_vm0, %v1817_v48 }
 0x166   : > { %7173 = vmatprep.mubr.msk.f32.mxu1 %vm8098_vm1, %v8097_v3  ;;  %7301 = vmatprep.mubr.msk.f32.mxu0 %vm8098_vm1, %v8097_v3 }
 0x168   : > { %v1075_v53 = vpop.f32.mrb[0].mxu1 }
 0x169   : > { %1195 = vst.msk [vmem:[#allocation3 + $0xa8] sm:$0xff] %vm710_vm0, %v1075_v53  ;;  %v7014_v57 = vpop.f32.mrb[1].mxu1  ;;  %7174 = vmatmul.mubr.msk.f32.gmra.mrb[106].mxu1 %vm710_vm0, %v1289_v54  ;;  %7302 = vmatmul.mubr.msk.f32.gmra.mrb[110].mxu0 %vm710_vm0, %v1818_v55  ;;  %v1295_v54 = vld [vmem:[#allocation2 + $0x139] sm:$0xff]  ;;  %v1824_v55 = vld [vmem:[#allocation2 + $0x142] sm:$0xf] }
 0x16a   : > { %7176 = vmatprep.mubr.msk.f32.mxu1 %vm8098_vm1, %v8097_v3  ;;  %7304 = vmatprep.mubr.msk.f32.mxu0 %vm8098_vm1, %v8097_v3 }
 0x16c   : > { %v1080_v58 = vpop.f32.mrb[2].mxu1 }
 0x16d   : > { %1196 = vst.msk [vmem:[#allocation3 + $0xb0] sm:$0xff] %vm710_vm0, %v1080_v58  ;;  %v7017_v1 = vpop.f32.mrb[3].mxu1  ;;  %7177 = vmatmul.mubr.msk.f32.gmra.mrb[108].mxu1 %vm710_vm0, %v1290_v49  ;;  %7305 = vmatmul.mubr.msk.f32.gmra.mrb[112].mxu0 %vm710_vm0, %v1819_v63  ;;  %v765_v49 = vld [vmem:[%s10315_s1 + $0xc] sm:$0x3]  ;;  %v2840_v63 = vld [vmem:[#allocation2 + $0x13] sm:$0xff] }
 0x16e   : > { %7179 = vmatprep.mubr.msk.f32.mxu1 %vm8098_vm1, %v8097_v3  ;;  %7307 = vmatprep.mubr.msk.f32.mxu0 %vm8098_vm1, %v8097_v3  ;;  %v1296_v1 = vld [vmem:[#allocation2 + $0x141] sm:$0xf] }
 0x170   : > { %v990_v4 = vpop.f32.mrb[8].mxu0  ;;  %v1085_v6 = vpop.f32.mrb[4].mxu1 }
 0x171   : > { %1178 = vst.msk [vmem:[#allocation3 + $0x20] sm:$0xff] %vm710_vm0, %v990_v4  ;;  %1197 = vst.msk [vmem:[#allocation3 + $0xb8] sm:$0xff] %vm710_vm0, %v1085_v6  ;;  %v6963_v12 = vpop.f32.mrb[9].mxu0  ;;  %v7020_v52 = vpop.f32.mrb[5].mxu1  ;;  %7180 = vmatmul.mubr.msk.f32.gmra.mrb[110].mxu1 %vm710_vm0, %v1291_v8  ;;  %7308 = vmatmul.mubr.msk.f32.gmra.mrb[114].mxu0 %vm710_vm0, %v1820_v10  ;;  %v764_v8 = vld [vmem:[%s10315_s1 + $0xa] sm:$0x3] }
 0x172   : > { %7182 = vmatprep.mubr.msk.f32.mxu1 %vm8098_vm1, %v8097_v3  ;;  %7310 = vmatprep.mubr.msk.f32.mxu0 %vm8098_vm1, %v8097_v3  ;;  %v4061_v10 = vsel %vm932_vm2, %v765_v49, 0  ;;  %v2846_v49 = vld [vmem:[#allocation2 + $0x43] sm:$0xff] }
 0x174   : > { %v995_v14 = vpop.f32.mrb[10].mxu0  ;;  %v1090_v16 = vpop.f32.mrb[6].mxu1 }
 0x175   : > { %1179 = vst.msk [vmem:[#allocation3 + $0x28] sm:$0xff] %vm710_vm0, %v995_v14  ;;  %1198 = vst.msk [vmem:[#allocation3 + $0xc0] sm:$0xff] %vm710_vm0, %v1090_v16  ;;  %v6966_v20 = vpop.f32.mrb[11].mxu0  ;;  %v7023_v22 = vpop.f32.mrb[7].mxu1  ;;  %7183 = vmatmul.mubr.msk.f32.gmra.mrb[112].mxu1 %vm710_vm0, %v1292_v18  ;;  %7311 = vmatmul.mubr.msk.f32.gmra.mrb[116].mxu0 %vm710_vm0, %v1821_v60  ;;  %v2841_v14 = vld [vmem:[#allocation2 + $0x1b] sm:$0xff]  ;;  %v3533_v16 = vsel %vm932_vm2, %v764_v8, 0 }
 0x176   : > { %7185 = vmatprep.mubr.msk.f32.mxu1 %vm8098_vm1, %v8097_v3  ;;  %7313 = vmatprep.mubr.msk.f32.mxu0 %vm8098_vm1, %v8097_v3 }
 0x178   : > { %v1000_v24 = vpop.f32.mrb[12].mxu0  ;;  %v1095_v26 = vpop.f32.mrb[8].mxu1 }
 0x179   : > { %1180 = vst.msk [vmem:[#allocation3 + $0x30] sm:$0xff] %vm710_vm0, %v1000_v24  ;;  %1199 = vst.msk [vmem:[#allocation3 + $0xc8] sm:$0xff] %vm710_vm0, %v1095_v26  ;;  %v6969_v32 = vpop.f32.mrb[13].mxu0  ;;  %v7026_v40 = vpop.f32.mrb[9].mxu1  ;;  %7186 = vmatmul.mubr.msk.f32.gmra.mrb[114].mxu1 %vm710_vm0, %v1293_v28  ;;  %7314 = vmatmul.mubr.msk.f32.gmra.mrb[118].mxu0 %vm710_vm0, %v1822_v30  ;;  %v2842_v28 = vld [vmem:[#allocation2 + $0x23] sm:$0xff] }
 0x17a   : > { %7188 = vmatprep.mubr.msk.f32.mxu1 %vm8098_vm1, %v8097_v3  ;;  %7316 = vmatprep.mubr.msk.f32.mxu0 %vm8098_vm1, %v8097_v3 }
 0x17c   : > { %v1005_v34 = vpop.f32.mrb[14].mxu0  ;;  %v1100_v37 = vpop.f32.mrb[10].mxu1 }
 0x17d   : > { %1181 = vst.msk [vmem:[#allocation3 + $0x38] sm:$0xff] %vm710_vm0, %v1005_v34  ;;  %1200 = vst.msk [vmem:[#allocation3 + $0xd0] sm:$0xff] %vm710_vm0, %v1100_v37  ;;  %v6972_v47 = vpop.f32.mrb[15].mxu0  ;;  %v7029_v46 = vpop.f32.mrb[11].mxu1  ;;  %7189 = vmatmul.mubr.msk.f32.gmra.mrb[116].mxu1 %vm710_vm0, %v1294_v42  ;;  %7317 = vmatmul.mubr.msk.f32.gmra.mrb[120].mxu0 %vm710_vm0, %v1823_v44  ;;  %v2843_v34 = vld [vmem:[#allocation2 + $0x2b] sm:$0xff] }
 0x17e   : > { %7191 = vmatprep.mubr.msk.f32.mxu1 %vm8098_vm1, %v8097_v3  ;;  %7319 = vmatprep.mubr.msk.f32.mxu0 %vm8098_vm1, %v8097_v3  ;;  %v2844_v47 = vld [vmem:[#allocation2 + $0x33] sm:$0xff] }
 0x180   : > { %v1010_v48 = vpop.f32.mrb[16].mxu0  ;;  %v1105_v53 = vpop.f32.mrb[12].mxu1 }
 0x181   : > { %1182 = vst.msk [vmem:[#allocation3 + $0x40] sm:$0xff] %vm710_vm0, %v1010_v48  ;;  %1201 = vst.msk [vmem:[#allocation3 + $0xd8] sm:$0xff] %vm710_vm0, %v1105_v53  ;;  %v6975_v57 = vpop.f32.mrb[17].mxu0  ;;  %v7032_v58 = vpop.f32.mrb[13].mxu1  ;;  %7192 = vmatmul.mubr.msk.f32.gmra.mrb[118].mxu1 %vm710_vm0, %v1295_v54  ;;  %7320 = vmatmul.mubr.msk.f32.gmra.mrb[122].mxu0 %vm710_vm0, %v1824_v55  ;;  %v2845_v54 = vld [vmem:[#allocation2 + $0x3b] sm:$0xff] }
 0x182   : > { %7194 = vmatprep.mubr.msk.f32.mxu1 %vm8098_vm1, %v8097_v3  ;;  %7449 = vmatprep.mubr.msk.f32.mxu0 %vm8098_vm1, %v8097_v3 }
 0x184   : > { %v1015_v4 = vpop.f32.mrb[18].mxu0  ;;  %v1110_v6 = vpop.f32.mrb[14].mxu1 }
 0x185   : > { %1183 = vst.msk [vmem:[#allocation3 + $0x48] sm:$0xff] %vm710_vm0, %v1015_v4  ;;  %1202 = vst.msk [vmem:[#allocation3 + $0xe0] sm:$0xff] %vm710_vm0, %v1110_v6  ;;  %v6978_v12 = vpop.f32.mrb[19].mxu0  ;;  %v7035_v52 = vpop.f32.mrb[15].mxu1  ;;  %7195 = vmatmul.mubr.msk.f32.gmra.mrb[120].mxu1 %vm710_vm0, %v1296_v1  ;;  %7450 = vmatmul.mubr.msk.f32.vlgmr.msra.gmra.mrb[124].mxu0 %vm710_vm0, %v2840_v63  ;;  %v2847_v6 = vld [vmem:[#allocation2 + $0x4b] sm:$0xff] }
 0x186   : > { %7324 = vmatprep.mubr.msk.f32.mxu1 %vm8098_vm1, %v8097_v3  ;;  %7452 = vmatprep.mubr.msk.f32.mxu0 %vm8098_vm1, %v8097_v3  ;;  %v2848_v52 = vld [vmem:[#allocation2 + $0x53] sm:$0xff] }
 0x187   : > { %7698 = vmatpush3.bf16.msra.mxu0 %v4061_v10 }
 0x188   : > { %v1020_v18 = vpop.f32.mrb[20].mxu0  ;;  %v1115_v60 = vpop.f32.mrb[16].mxu1  ;;  %7947 = vmatprep.subr.bf16.mxu0 %v8097_v3 }
 0x189   : > { %1184 = vst.msk [vmem:[#allocation3 + $0x50] sm:$0xff] %vm710_vm0, %v1020_v18  ;;  %1203 = vst.msk [vmem:[#allocation3 + $0xe8] sm:$0xff] %vm710_vm0, %v1115_v60  ;;  %v6981_v20 = vpop.f32.mrb[21].mxu0  ;;  %v7038_v22 = vpop.f32.mrb[17].mxu1  ;;  %7325 = vmatmul.mubr.msk.f32.vlgmr.msra.gmra.mrb[122].mxu1 %vm710_vm0, %v8596_v36  ;;  %7453 = vmatmul.mubr.msk.f32.gmra.mrb[126].mxu0 %vm710_vm0, %v2841_v14  ;;  %v2849_v60 = vld [vmem:[#allocation2 + $0x5b] sm:$0xff] }
 0x18a   : > { %7573 = vmatpush3.bf16.msra.mxu1 %v3533_v16  ;;  %7327 = vmatprep.mubr.msk.f32.mxu1 %vm8098_vm1, %v8097_v3 }
 0x18b   : > { %7455 = vmatprep.mubr.msk.f32.mxu0 %vm8098_vm1, %v8097_v3  ;;  %7822 = vmatprep.subr.bf16.mxu1 %v8097_v3 }
 0x18c   : > { %v1025_v24 = vpop.f32.mrb[22].mxu0  ;;  %v1120_v26 = vpop.f32.mrb[18].mxu1 }
 0x18d   : > { %1185 = vst.msk [vmem:[#allocation3 + $0x58] sm:$0xff] %vm710_vm0, %v1025_v24  ;;  %1204 = vst.msk [vmem:[#allocation3 + $0xf0] sm:$0xff] %vm710_vm0, %v1120_v26  ;;  %v6984_v30 = vpop.f32.mrb[23].mxu0  ;;  %v7041_v36 = vpop.f32.mrb[19].mxu1  ;;  %7328 = vmatmul.mubr.msk.f32.gmra.mrb[124].mxu1 %vm710_vm0, %v8608_v38  ;;  %7456 = vmatmul.mubr.msk.f32.gmra.mrb[128].mxu0 %vm710_vm0, %v2842_v28  ;;  %v2850_v26 = vld [vmem:[#allocation2 + $0x63] sm:$0xff] }
 0x18e   : > { %7330 = vmatprep.mubr.msk.f32.mxu1 %vm8098_vm1, %v8097_v3  ;;  %7458 = vmatprep.mubr.msk.f32.mxu0 %vm8098_vm1, %v8097_v3 }
 0x190   : > { %v1030_v32 = vpop.f32.mrb[24].mxu0  ;;  %v1125_v40 = vpop.f32.mrb[20].mxu1 }
 0x191   : > { %1186 = vst.msk [vmem:[#allocation3 + $0x60] sm:$0xff] %vm710_vm0, %v1030_v32  ;;  %1205 = vst.msk [vmem:[#allocation3 + $0xf8] sm:$0xff] %vm710_vm0, %v1125_v40  ;;  %v6987_v37 = vpop.f32.mrb[25].mxu0  ;;  %v7044_v42 = vpop.f32.mrb[21].mxu1  ;;  %7331 = vmatmul.mubr.msk.f32.gmra.mrb[126].mxu1 %vm710_vm0, %v8618_v45  ;;  %7459 = vmatmul.mubr.msk.f32.gmra.mrb[130].mxu0 %vm710_vm0, %v2843_v34  ;;  %v2851_v32 = vld [vmem:[#allocation2 + $0x6b] sm:$0xff] }
 0x192   : > { %7333 = vmatprep.mubr.msk.f32.mxu1 %vm8098_vm1, %v8097_v3  ;;  %7461 = vmatprep.mubr.msk.f32.mxu0 %vm8098_vm1, %v8097_v3  ;;  %v2852_v37 = vld [vmem:[#allocation2 + $0x73] sm:$0xff] }
 0x194   : > { %v1035_v38 = vpop.f32.mrb[26].mxu0  ;;  %v1130_v44 = vpop.f32.mrb[22].mxu1 }
 0x195   : > { %1187 = vst.msk [vmem:[#allocation3 + $0x68] sm:$0xff] %vm710_vm0, %v1035_v38  ;;  %1206 = vst.msk [vmem:[#allocation3 + $0x100] sm:$0xff] %vm710_vm0, %v1130_v44  ;;  %v6990_v46 = vpop.f32.mrb[27].mxu0  ;;  %v7047_v48 = vpop.f32.mrb[23].mxu1  ;;  %7334 = vmatmul.mubr.msk.f32.gmra.mrb[128].mxu1 %vm710_vm0, %v8628_v50  ;;  %7462 = vmatmul.mubr.msk.f32.gmra.mrb[132].mxu0 %vm710_vm0, %v2844_v47  ;;  %v1215_v44 = vld [vmem:[#allocation3] sm:$0xff] }
 0x196   : > { %7336 = vmatprep.mubr.msk.f32.mxu1 %vm8098_vm1, %v8097_v3  ;;  %7464 = vmatprep.mubr.msk.f32.mxu0 %vm8098_vm1, %v8097_v3  ;;  %v2853_v46 = vld [vmem:[#allocation2 + $0x7b] sm:$0xff] }
 0x198   : > { %v1040_v45 = vpop.f32.mrb[28].mxu0  ;;  %v1135_v53 = vpop.f32.mrb[24].mxu1 }
 0x199   : > { %1188 = vst.msk [vmem:[#allocation3 + $0x70] sm:$0xff] %vm710_vm0, %v1040_v45  ;;  %1207 = vst.msk [vmem:[#allocation3 + $0x108] sm:$0xff] %vm710_vm0, %v1135_v53  ;;  %v6993_v55 = vpop.f32.mrb[29].mxu0  ;;  %v7050_v57 = vpop.f32.mrb[25].mxu1  ;;  %7337 = vmatmul.mubr.msk.f32.gmra.mrb[130].mxu1 %vm710_vm0, %v8638_v56  ;;  %7465 = vmatmul.mubr.msk.f32.gmra.mrb[134].mxu0 %vm710_vm0, %v2845_v54  ;;  %v1216_v54 = vld [vmem:[#allocation3 + $0x8] sm:$0xff] }
 0x19a   : > { %7339 = vmatprep.mubr.msk.f32.mxu1 %vm8098_vm1, %v8097_v3  ;;  %7467 = vmatprep.mubr.msk.f32.mxu0 %vm8098_vm1, %v8097_v3  ;;  %v2854_v57 = vld [vmem:[#allocation2 + $0x83] sm:$0xff] }
 0x19c   : > { %v1045_v50 = vpop.f32.mrb[30].mxu0  ;;  %v1140_v58 = vpop.f32.mrb[26].mxu1 }
 0x19d   : > { %1189 = vst.msk [vmem:[#allocation3 + $0x78] sm:$0xff] %vm710_vm0, %v1045_v50  ;;  %1208 = vst.msk [vmem:[#allocation3 + $0x110] sm:$0xff] %vm710_vm0, %v1140_v58  ;;  %v6996_v63 = vpop.f32.mrb[31].mxu0  ;;  %v7053_v1 = vpop.f32.mrb[27].mxu1  ;;  %7340 = vmatmul.mubr.msk.f32.gmra.mrb[132].mxu1 %vm710_vm0, %v8648_v61  ;;  %7468 = vmatmul.mubr.msk.f32.gmra.mrb[136].mxu0 %vm710_vm0, %v2846_v49 }
 0x19e   : > { %7342 = vmatprep.mubr.msk.f32.mxu1 %vm8098_vm1, %v8097_v3  ;;  %7470 = vmatprep.mubr.msk.f32.mxu0 %vm8098_vm1, %v8097_v3  ;;  %v1217_v63 = vld [vmem:[#allocation3 + $0x10] sm:$0xff] }
 0x1a0   : > { %v1050_v56 = vpop.f32.mrb[32].mxu0  ;;  %v1145_v4 = vpop.f32.mrb[28].mxu1 }
 0x1a1   : > { %1190 = vst.msk [vmem:[#allocation3 + $0x80] sm:$0xff] %vm710_vm0, %v1050_v56  ;;  %1209 = vst.msk [vmem:[#allocation3 + $0x118] sm:$0xff] %vm710_vm0, %v1145_v4  ;;  %v6999_v8 = vpop.f32.mrb[33].mxu0  ;;  %v7056_v10 = vpop.f32.mrb[29].mxu1  ;;  %7343 = vmatmul.mubr.msk.f32.gmra.mrb[134].mxu1 %vm710_vm0, %v8657_v62  ;;  %7471 = vmatmul.mubr.msk.f32.gmra.mrb[138].mxu0 %vm710_vm0, %v2847_v6  ;;  %v2855_v56 = vld [vmem:[#allocation2 + $0x8b] sm:$0xff] }
 0x1a2   : > { %7345 = vmatprep.mubr.msk.f32.mxu1 %vm8098_vm1, %v8097_v3  ;;  %7473 = vmatprep.mubr.msk.f32.mxu0 %vm8098_vm1, %v8097_v3 }
 0x1a4   : > { %v1055_v61 = vpop.f32.mrb[34].mxu0  ;;  %v1150_v12 = vpop.f32.mrb[30].mxu1 }
 0x1a5   : > { %1191 = vst.msk [vmem:[#allocation3 + $0x88] sm:$0xff] %vm710_vm0, %v1055_v61  ;;  %1210 = vst.msk [vmem:[#allocation3 + $0x120] sm:$0xff] %vm710_vm0, %v1150_v12  ;;  %v7002_v14 = vpop.f32.mrb[35].mxu0  ;;  %v7059_v16 = vpop.f32.mrb[31].mxu1  ;;  %7346 = vmatmul.mubr.msk.f32.gmra.mrb[136].mxu1 %vm710_vm0, %v8666_v0  ;;  %7474 = vmatmul.mubr.msk.f32.gmra.mrb[140].mxu0 %vm710_vm0, %v2848_v52  ;;  %v1218_v12 = vld [vmem:[#allocation3 + $0x18] sm:$0xff] }
 0x1a6   : > { %7348 = vmatprep.mubr.msk.f32.mxu1 %vm8098_vm1, %v8097_v3  ;;  %7476 = vmatprep.mubr.msk.f32.mxu0 %vm8098_vm1, %v8097_v3  ;;  %v2856_v16 = vld [vmem:[#allocation2 + $0x93] sm:$0xff] }
 0x1a8   : > { %v1060_v62 = vpop.f32.mrb[36].mxu0  ;;  %v1155_v18 = vpop.f32.mrb[32].mxu1 }
 0x1a9   : > { %1192 = vst.msk [vmem:[#allocation3 + $0x90] sm:$0xff] %vm710_vm0, %v1060_v62  ;;  %1211 = vst.msk [vmem:[#allocation3 + $0x128] sm:$0xff] %vm710_vm0, %v1155_v18  ;;  %v7005_v20 = vpop.f32.mrb[37].mxu0  ;;  %v7062_v22 = vpop.f32.mrb[33].mxu1  ;;  %7349 = vmatmul.mubr.msk.f32.gmra.mrb[138].mxu1 %vm710_vm0, %v8675_v2  ;;  %7477 = vmatmul.mubr.msk.f32.gmra.mrb[142].mxu0 %vm710_vm0, %v2849_v60 }
 0x1aa   : > { %7351 = vmatprep.mubr.msk.f32.mxu1 %vm8098_vm1, %v8097_v3  ;;  %7479 = vmatprep.mubr.msk.f32.mxu0 %vm8098_vm1, %v8097_v3  ;;  %v1219_v22 = vld [vmem:[#allocation3 + $0x20] sm:$0xff] }
 0x1ac   : > { %v1065_v0 = vpop.f32.mrb[38].mxu0  ;;  %v1160_v24 = vpop.f32.mrb[34].mxu1 }
 0x1ad   : > { %1193 = vst.msk [vmem:[#allocation3 + $0x98] sm:$0xff] %vm710_vm0, %v1065_v0  ;;  %1212 = vst.msk [vmem:[#allocation3 + $0x130] sm:$0xff] %vm710_vm0, %v1160_v24  ;;  %v7008_v28 = vpop.f32.mrb[39].mxu0  ;;  %v7065_v30 = vpop.f32.mrb[35].mxu1  ;;  %7352 = vmatmul.mubr.msk.f32.gmra.mrb[140].mxu1 %vm710_vm0, %v8684_v5  ;;  %7480 = vmatmul.mubr.msk.f32.gmra.mrb[144].mxu0 %vm710_vm0, %v2850_v26  ;;  %v2857_v26 = vld [vmem:[#allocation2 + $0x9b] sm:$0xff] }
 0x1ae   : > { %7354 = vmatprep.mubr.msk.f32.mxu1 %vm8098_vm1, %v8097_v3  ;;  %7482 = vmatprep.mubr.msk.f32.mxu0 %vm8098_vm1, %v8097_v3 }
 0x1b0   : > { %v1070_v2 = vpop.f32.mrb[40].mxu0  ;;  %v1165_v36 = vpop.f32.mrb[36].mxu1 }
 0x1b1   : > { %1194 = vst.msk [vmem:[#allocation3 + $0xa0] sm:$0xff] %vm710_vm0, %v1070_v2  ;;  %1213 = vst.msk [vmem:[#allocation3 + $0x138] sm:$0xff] %vm710_vm0, %v1165_v36  ;;  %v7011_v40 = vpop.f32.mrb[41].mxu0  ;;  %v7068_v34 = vpop.f32.mrb[37].mxu1  ;;  %7355 = vmatmul.mubr.msk.f32.gmra.mrb[142].mxu1 %vm710_vm0, %v8693_v7  ;;  %7483 = vmatmul.mubr.msk.f32.gmra.mrb[146].mxu0 %vm710_vm0, %v2851_v32  ;;  %v1220_v32 = vld [vmem:[#allocation3 + $0x28] sm:$0xff] }
 0x1b2   : > { %7357 = vmatprep.mubr.msk.f32.mxu1 %vm8098_vm1, %v8097_v3  ;;  %7485 = vmatprep.mubr.msk.f32.mxu0 %vm8098_vm1, %v8097_v3 }
 0x1b4   : > { %v1170_v5 = vpop.f32.mrb[38].mxu1  ;;  %v1985_v42 = vpop.f32.mrb[42].mxu0 }
 0x1b5   : > { %1214 = vst.msk [vmem:[#allocation3 + $0x140] sm:$0xf] %vm721_vm4, %v1170_v5  ;;  %v7071_v38 = vpop.f32.mrb[39].mxu1  ;;  %7358 = vmatmul.mubr.msk.f32.gmra.mrb[144].mxu1 %vm710_vm0, %v8702_v9  ;;  %7486 = vmatmul.mubr.msk.f32.gmra.mrb[148].mxu0 %vm710_vm0, %v2852_v37  ;;  %v7201_v7 = vpop.f32.mrb[43].mxu0  ;;  %v2858_v5 = vld [vmem:[#allocation2 + $0xa3] sm:$0xff] }
 0x1b6   : > { %7360 = vmatprep.mubr.msk.f32.mxu1 %vm8098_vm1, %v8097_v3  ;;  %7488 = vmatprep.mubr.msk.f32.mxu0 %vm8098_vm1, %v8097_v3 }
 0x1b8   : > { %v1457_v47 = vpop.f32.mrb[40].mxu1  ;;  %v1990_v48 = vpop.f32.mrb[44].mxu0 }
 0x1b9   : > { %v1661_v45 = vadd.f32 %v1457_v47, %v1215_v44  ;;  %v7076_v53 = vpop.f32.mrb[41].mxu1  ;;  %7361 = vmatmul.mubr.msk.f32.gmra.mrb[146].mxu1 %vm710_vm0, %v8711_v11  ;;  %7489 = vmatmul.mubr.msk.f32.gmra.mrb[150].mxu0 %vm710_vm0, %v2853_v46  ;;  %v7204_v9 = vpop.f32.mrb[45].mxu0  ;;  %v1221_v44 = vld [vmem:[#allocation3 + $0x30] sm:$0xff] }
 0x1ba   : > { %7363 = vmatprep.mubr.msk.f32.mxu1 %vm8098_vm1, %v8097_v3  ;;  %7491 = vmatprep.mubr.msk.f32.mxu0 %vm8098_vm1, %v8097_v3 }
 0x1bb   : > { %1702 = vst.msk [vmem:[#allocation3] sm:$0xff] %vm710_vm0, %v1661_v45 }
 0x1bc   : > { %v1462_v55 = vpop.f32.mrb[42].mxu1  ;;  %v1995_v50 = vpop.f32.mrb[46].mxu0 }
 0x1bd   : > { %v1662_v58 = vadd.f32 %v1462_v55, %v1216_v54  ;;  %v7079_v49 = vpop.f32.mrb[43].mxu1  ;;  %7364 = vmatmul.mubr.msk.f32.gmra.mrb[148].mxu1 %vm710_vm0, %v8720_v51  ;;  %7492 = vmatmul.mubr.msk.f32.gmra.mrb[152].mxu0 %vm710_vm0, %v2854_v57  ;;  %v7207_v11 = vpop.f32.mrb[47].mxu0  ;;  %v1222_v55 = vld [vmem:[#allocation3 + $0x38] sm:$0xff] }
 0x1be   : > { %7366 = vmatprep.mubr.msk.f32.mxu1 %vm8098_vm1, %v8097_v3  ;;  %7494 = vmatprep.mubr.msk.f32.mxu0 %vm8098_vm1, %v8097_v3 }
 0x1bf   : > { %1703 = vst.msk [vmem:[#allocation3 + $0x8] sm:$0xff] %vm710_vm0, %v1662_v58  ;;  %v2860_v58 = vld [vmem:[#allocation2 + $0xb3] sm:$0xff] }
 0x1c0   : > { %v1467_v1 = vpop.f32.mrb[44].mxu1  ;;  %v2000_v4 = vpop.f32.mrb[48].mxu0 }
 0x1c1   : > { %v1663_v6 = vadd.f32 %v1467_v1, %v1217_v63  ;;  %v7082_v8 = vpop.f32.mrb[45].mxu1  ;;  %7367 = vmatmul.mubr.msk.f32.gmra.mrb[150].mxu1 %vm710_vm0, %v8729_v13  ;;  %7495 = vmatmul.mubr.msk.f32.gmra.mrb[154].mxu0 %vm710_vm0, %v2855_v56  ;;  %v7210_v51 = vpop.f32.mrb[49].mxu0  ;;  %v1223_v56 = vld [vmem:[#allocation3 + $0x40] sm:$0xff] }
 0x1c2   : > { %v1743_v10 = vld [vmem:[#allocation3] sm:$0xff]  ;;  %7369 = vmatprep.mubr.msk.f32.mxu1 %vm8098_vm1, %v8097_v3  ;;  %7497 = vmatprep.mubr.msk.f32.mxu0 %vm8098_vm1, %v8097_v3  ;;  %v2861_v8 = vld [vmem:[#allocation2 + $0xbb] sm:$0xff] }
 0x1c3   : > { %v2189_v61 = vadd.f32 %v1985_v42, %v1743_v10  ;;  %1704 = vst.msk [vmem:[#allocation3 + $0x10] sm:$0xff] %vm710_vm0, %v1663_v6 }
 0x1c4   : > { %v1472_v52 = vpop.f32.mrb[46].mxu1  ;;  %v2005_v14 = vpop.f32.mrb[50].mxu0 }
 0x1c5   : > { %2230 = vst.msk [vmem:[#allocation3] sm:$0xff] %vm710_vm0, %v2189_v61  ;;  %v1664_v13 = vadd.f32 %v1472_v52, %v1218_v12  ;;  %v7085_v62 = vpop.f32.mrb[47].mxu1  ;;  %v7213_v18 = vpop.f32.mrb[51].mxu0  ;;  %7370 = vmatmul.mubr.msk.f32.gmra.mrb[152].mxu1 %vm710_vm0, %v8738_v15  ;;  %7498 = vmatmul.mubr.msk.f32.gmra.mrb[156].mxu0 %vm710_vm0, %v2856_v16  ;;  %v1224_v52 = vld [vmem:[#allocation3 + $0x48] sm:$0xff] }
 0x1c6   : > { %v1744_v60 = vld [vmem:[#allocation3 + $0x8] sm:$0xff]  ;;  %7372 = vmatprep.mubr.msk.f32.mxu1 %vm8098_vm1, %v8097_v3  ;;  %7500 = vmatprep.mubr.msk.f32.mxu0 %vm8098_vm1, %v8097_v3 }
 0x1c7   : > { %v2190_v20 = vadd.f32 %v1990_v48, %v1744_v60  ;;  %1705 = vst.msk [vmem:[#allocation3 + $0x18] sm:$0xff] %vm710_vm0, %v1664_v13  ;;  %v2859_v48 = vld [vmem:[#allocation2 + $0xab] sm:$0xff]  ;;  %v2862_v13 = vld [vmem:[#allocation2 + $0xc3] sm:$0xff] }
 0x1c8   : > { %v1477_v0 = vpop.f32.mrb[48].mxu1  ;;  %v2010_v24 = vpop.f32.mrb[52].mxu0 }
 0x1c9   : > { %2231 = vst.msk [vmem:[#allocation3 + $0x8] sm:$0xff] %vm710_vm0, %v2190_v20  ;;  %v1665_v28 = vadd.f32 %v1477_v0, %v1219_v22  ;;  %v7088_v15 = vpop.f32.mrb[49].mxu1  ;;  %v7216_v30 = vpop.f32.mrb[53].mxu0  ;;  %7373 = vmatmul.mubr.msk.f32.gmra.mrb[154].mxu1 %vm710_vm0, %v8747_v17  ;;  %7501 = vmatmul.mubr.msk.f32.gmra.mrb[158].mxu0 %vm710_vm0, %v2857_v26  ;;  %v1225_v22 = vld [vmem:[#allocation3 + $0x50] sm:$0xff]  ;;  %v2863_v26 = vld [vmem:[#allocation2 + $0xcb] sm:$0xff] }
 0x1ca   : > { %v1745_v2 = vld [vmem:[#allocation3 + $0x10] sm:$0xff]  ;;  %7375 = vmatprep.mubr.msk.f32.mxu1 %vm8098_vm1, %v8097_v3  ;;  %7503 = vmatprep.mubr.msk.f32.mxu0 %vm8098_vm1, %v8097_v3 }
 0x1cb   : > { %v2191_v36 = vadd.f32 %v1995_v50, %v1745_v2  ;;  %1706 = vst.msk [vmem:[#allocation3 + $0x20] sm:$0xff] %vm710_vm0, %v1665_v28 }
 0x1cc   : > { %v1482_v40 = vpop.f32.mrb[50].mxu1  ;;  %v2015_v34 = vpop.f32.mrb[54].mxu0 }
 0x1cd   : > { %2232 = vst.msk [vmem:[#allocation3 + $0x10] sm:$0xff] %vm710_vm0, %v2191_v36  ;;  %v1666_v37 = vadd.f32 %v1482_v40, %v1220_v32  ;;  %v7091_v17 = vpop.f32.mrb[51].mxu1  ;;  %v7219_v42 = vpop.f32.mrb[55].mxu0  ;;  %7376 = vmatmul.mubr.msk.f32.gmra.mrb[156].mxu1 %vm710_vm0, %v8756_v59  ;;  %7504 = vmatmul.mubr.msk.f32.gmra.mrb[160].mxu0 %vm710_vm0, %v2858_v5  ;;  %v1226_v36 = vld [vmem:[#allocation3 + $0x58] sm:$0xff] }
 0x1ce   : > { %7378 = vmatprep.mubr.msk.f32.mxu1 %vm8098_vm1, %v8097_v3  ;;  %7506 = vmatprep.mubr.msk.f32.mxu0 %vm8098_vm1, %v8097_v3  ;;  %v1746_v38 = vld [vmem:[#allocation3 + $0x18] sm:$0xff] }
 0x1cf   : > { %1707 = vst.msk [vmem:[#allocation3 + $0x28] sm:$0xff] %vm710_vm0, %v1666_v37  ;;  %v2192_v7 = vadd.f32 %v2000_v4, %v1746_v38  ;;  %v1227_v38 = vld [vmem:[#allocation3 + $0x60] sm:$0xff] }
 0x1d0   : > { %v1487_v47 = vpop.f32.mrb[52].mxu1  ;;  %v2020_v46 = vpop.f32.mrb[56].mxu0 }
 0x1d1   : > { %v1667_v45 = vadd.f32 %v1487_v47, %v1221_v44  ;;  %v7094_v53 = vpop.f32.mrb[53].mxu1  ;;  %v7222_v9 = vpop.f32.mrb[57].mxu0  ;;  %7379 = vmatmul.mubr.msk.f32.gmra.mrb[158].mxu1 %vm710_vm0, %v8765_v19  ;;  %7507 = vmatmul.mubr.msk.f32.gmra.mrb[162].mxu0 %vm710_vm0, %v2859_v48  ;;  %2233 = vst.msk [vmem:[#allocation3 + $0x18] sm:$0xff] %vm710_vm0, %v2192_v7  ;;  %v2865_v47 = vld [vmem:[#allocation2 + $0xdb] sm:$0xff] }
 0x1d2   : > { %7381 = vmatprep.mubr.msk.f32.mxu1 %vm8098_vm1, %v8097_v3  ;;  %7509 = vmatprep.mubr.msk.f32.mxu0 %vm8098_vm1, %v8097_v3  ;;  %v1747_v59 = vld [vmem:[#allocation3 + $0x20] sm:$0xff]  ;;  %v1228_v9 = vld [vmem:[#allocation3 + $0x68] sm:$0xff] }
 0x1d3   : > { %1708 = vst.msk [vmem:[#allocation3 + $0x30] sm:$0xff] %vm710_vm0, %v1667_v45  ;;  %v2193_v54 = vadd.f32 %v2005_v14, %v1747_v59 }
 0x1d4   : > { %v1492_v57 = vpop.f32.mrb[54].mxu1  ;;  %v2025_v50 = vpop.f32.mrb[58].mxu0 }
 0x1d5   : > { %v1668_v49 = vadd.f32 %v1492_v57, %v1222_v55  ;;  %v7097_v19 = vpop.f32.mrb[55].mxu1  ;;  %v7225_v11 = vpop.f32.mrb[59].mxu0  ;;  %7382 = vmatmul.mubr.msk.f32.gmra.mrb[160].mxu1 %vm710_vm0, %v8776_v21  ;;  %7510 = vmatmul.mubr.msk.f32.gmra.mrb[164].mxu0 %vm710_vm0, %v2860_v58  ;;  %2234 = vst.msk [vmem:[#allocation3 + $0x20] sm:$0xff] %vm710_vm0, %v2193_v54  ;;  %v2866_v55 = vld [vmem:[#allocation2 + $0xe3] sm:$0xff] }
 0x1d6   : > { %7384 = vmatprep.mubr.msk.f32.mxu1 %vm8098_vm1, %v8097_v3  ;;  %7512 = vmatprep.mubr.msk.f32.mxu0 %vm8098_vm1, %v8097_v3  ;;  %v1748_v63 = vld [vmem:[#allocation3 + $0x28] sm:$0xff]  ;;  %v1229_v19 = vld [vmem:[#allocation3 + $0x70] sm:$0xff] }
 0x1d7   : > { %1709 = vst.msk [vmem:[#allocation3 + $0x38] sm:$0xff] %vm710_vm0, %v1668_v49  ;;  %v2194_v1 = vadd.f32 %v2010_v24, %v1748_v63 }
 0x1d8   : > { %v1497_v4 = vpop.f32.mrb[56].mxu1  ;;  %v2030_v6 = vpop.f32.mrb[60].mxu0 }
 0x1d9   : > { %v1669_v51 = vadd.f32 %v1497_v4, %v1223_v56  ;;  %v7100_v21 = vpop.f32.mrb[57].mxu1  ;;  %v7228_v10 = vpop.f32.mrb[61].mxu0  ;;  %7385 = vmatmul.mubr.msk.f32.gmra.mrb[162].mxu1 %vm710_vm0, %v8785_v23  ;;  %7513 = vmatmul.mubr.msk.f32.gmra.mrb[166].mxu0 %vm710_vm0, %v2861_v8  ;;  %2235 = vst.msk [vmem:[#allocation3 + $0x28] sm:$0xff] %vm710_vm0, %v2194_v1  ;;  %v2867_v1 = vld [vmem:[#allocation2 + $0xeb] sm:$0xff] }
 0x1da   : > { %7387 = vmatprep.mubr.msk.f32.mxu1 %vm8098_vm1, %v8097_v3  ;;  %7515 = vmatprep.mubr.msk.f32.mxu0 %vm8098_vm1, %v8097_v3  ;;  %v1749_v61 = vld [vmem:[#allocation3 + $0x30] sm:$0xff] }
 0x1db   : > { %1710 = vst.msk [vmem:[#allocation3 + $0x40] sm:$0xff] %vm710_vm0, %v1669_v51  ;;  %v2195_v12 = vadd.f32 %v2015_v34, %v1749_v61  ;;  %v2864_v34 = vld [vmem:[#allocation2 + $0xd3] sm:$0xff]  ;;  %v1230_v51 = vld [vmem:[#allocation3 + $0x78] sm:$0xff] }
 0x1dc   : > { %v1502_v14 = vpop.f32.mrb[58].mxu1  ;;  %v2035_v16 = vpop.f32.mrb[62].mxu0  ;;  %v2868_v61 = vld [vmem:[#allocation2 + $0xf3] sm:$0xff] }
 0x1dd   : > { %v1670_v62 = vadd.f32 %v1502_v14, %v1224_v52  ;;  %v7103_v23 = vpop.f32.mrb[59].mxu1  ;;  %v7231_v18 = vpop.f32.mrb[63].mxu0  ;;  %7388 = vmatmul.mubr.msk.f32.gmra.mrb[164].mxu1 %vm710_vm0, %v8794_v25  ;;  %7516 = vmatmul.mubr.msk.f32.gmra.mrb[168].mxu0 %vm710_vm0, %v2862_v13  ;;  %2236 = vst.msk [vmem:[#allocation3 + $0x30] sm:$0xff] %vm710_vm0, %v2195_v12  ;;  %v1231_v13 = vld [vmem:[#allocation3 + $0x80] sm:$0xff] }
 0x1de   : > { %7390 = vmatprep.mubr.msk.f32.mxu1 %vm8098_vm1, %v8097_v3  ;;  %7518 = vmatprep.mubr.msk.f32.mxu0 %vm8098_vm1, %v8097_v3  ;;  %v1750_v60 = vld [vmem:[#allocation3 + $0x38] sm:$0xff]  ;;  %v2869_v18 = vld [vmem:[#allocation2 + $0xfb] sm:$0xff] }
 0x1df   : > { %1711 = vst.msk [vmem:[#allocation3 + $0x48] sm:$0xff] %vm710_vm0, %v1670_v62  ;;  %v2196_v20 = vadd.f32 %v2020_v46, %v1750_v60 }
 0x1e0   : > { %v1507_v0 = vpop.f32.mrb[60].mxu1  ;;  %v2040_v24 = vpop.f32.mrb[64].mxu0 }
 0x1e1   : > { %v1671_v28 = vadd.f32 %v1507_v0, %v1225_v22  ;;  %v7106_v25 = vpop.f32.mrb[61].mxu1  ;;  %v7234_v15 = vpop.f32.mrb[65].mxu0  ;;  %7391 = vmatmul.mubr.msk.f32.gmra.mrb[166].mxu1 %vm710_vm0, %v8803_v27  ;;  %7519 = vmatmul.mubr.msk.f32.gmra.mrb[170].mxu0 %vm710_vm0, %v2863_v26  ;;  %2237 = vst.msk [vmem:[#allocation3 + $0x38] sm:$0xff] %vm710_vm0, %v2196_v20 }
 0x1e2   : > { %7393 = vmatprep.mubr.msk.f32.mxu1 %vm8098_vm1, %v8097_v3  ;;  %7521 = vmatprep.mubr.msk.f32.mxu0 %vm8098_vm1, %v8097_v3  ;;  %v1751_v30 = vld [vmem:[#allocation3 + $0x40] sm:$0xff]  ;;  %v2870_v25 = vld [vmem:[#allocation2 + $0x103] sm:$0xff] }
 0x1e3   : > { %1712 = vst.msk [vmem:[#allocation3 + $0x50] sm:$0xff] %vm710_vm0, %v1671_v28  ;;  %v2197_v2 = vadd.f32 %v2025_v50, %v1751_v30 }
 0x1e4   : > { %v1512_v32 = vpop.f32.mrb[62].mxu1  ;;  %v2045_v40 = vpop.f32.mrb[66].mxu0 }
 0x1e5   : > { %v1672_v5 = vadd.f32 %v1512_v32, %v1226_v36  ;;  %v7109_v27 = vpop.f32.mrb[63].mxu1  ;;  %v7237_v37 = vpop.f32.mrb[67].mxu0  ;;  %7394 = vmatmul.mubr.msk.f32.gmra.mrb[168].mxu1 %vm710_vm0, %v8812_v29  ;;  %7522 = vmatmul.mubr.msk.f32.gmra.mrb[172].mxu0 %vm710_vm0, %v2864_v34  ;;  %2238 = vst.msk [vmem:[#allocation3 + $0x40] sm:$0xff] %vm710_vm0, %v2197_v2  ;;  %v1233_v32 = vld [vmem:[#allocation3 + $0x90] sm:$0xff] }
 0x1e6   : > { %7396 = vmatprep.mubr.msk.f32.mxu1 %vm8098_vm1, %v8097_v3  ;;  %7524 = vmatprep.mubr.msk.f32.mxu0 %vm8098_vm1, %v8097_v3  ;;  %v1752_v17 = vld [vmem:[#allocation3 + $0x48] sm:$0xff]  ;;  %v2871_v27 = vld [vmem:[#allocation2 + $0x10b] sm:$0xff] }
 0x1e7   : > { %1713 = vst.msk [vmem:[#allocation3 + $0x58] sm:$0xff] %vm710_vm0, %v1672_v5  ;;  %v2198_v42 = vadd.f32 %v2030_v6, %v1752_v17  ;;  %v2342_v5 = vld [vmem:[#allocation2 + $0x102] sm:$0xff] }
 0x1e8   : > { %v1517_v7 = vpop.f32.mrb[64].mxu1  ;;  %v2050_v44 = vpop.f32.mrb[68].mxu0 }
 0x1e9   : > { %v1673_v46 = vadd.f32 %v1517_v7, %v1227_v38  ;;  %v7112_v29 = vpop.f32.mrb[65].mxu1  ;;  %v7240_v48 = vpop.f32.mrb[69].mxu0  ;;  %7397 = vmatmul.mubr.msk.f32.gmra.mrb[170].mxu1 %vm710_vm0, %v8821_v31  ;;  %7525 = vmatmul.mubr.msk.f32.gmra.mrb[174].mxu0 %vm710_vm0, %v2865_v47  ;;  %2239 = vst.msk [vmem:[#allocation3 + $0x48] sm:$0xff] %vm710_vm0, %v2198_v42  ;;  %v1234_v7 = vld [vmem:[#allocation3 + $0x98] sm:$0xff] }
 0x1ea   : > { %7399 = vmatprep.mubr.msk.f32.mxu1 %vm8098_vm1, %v8097_v3  ;;  %7527 = vmatprep.mubr.msk.f32.mxu0 %vm8098_vm1, %v8097_v3  ;;  %v1753_v45 = vld [vmem:[#allocation3 + $0x50] sm:$0xff]  ;;  %v2872_v29 = vld [vmem:[#allocation2 + $0x113] sm:$0xff] }
 0x1eb   : > { %1714 = vst.msk [vmem:[#allocation3 + $0x60] sm:$0xff] %vm710_vm0, %v1673_v46  ;;  %v2199_v53 = vadd.f32 %v2035_v16, %v1753_v45  ;;  %v2343_v46 = vld [vmem:[#allocation2 + $0x10a] sm:$0xff] }
 0x1ec   : > { %v1522_v59 = vpop.f32.mrb[66].mxu1  ;;  %v2055_v54 = vpop.f32.mrb[70].mxu0 }
 0x1ed   : > { %v1674_v57 = vadd.f32 %v1522_v59, %v1228_v9  ;;  %v7115_v31 = vpop.f32.mrb[67].mxu1  ;;  %v7243_v50 = vpop.f32.mrb[71].mxu0  ;;  %7400 = vmatmul.mubr.msk.f32.gmra.mrb[172].mxu1 %vm710_vm0, %v8830_v33  ;;  %7528 = vmatmul.mubr.msk.f32.gmra.mrb[176].mxu0 %vm710_vm0, %v2866_v55  ;;  %2240 = vst.msk [vmem:[#allocation3 + $0x50] sm:$0xff] %vm710_vm0, %v2199_v53 }
 0x1ee   : > { %7402 = vmatprep.mubr.msk.f32.mxu1 %vm8098_vm1, %v8097_v3  ;;  %7530 = vmatprep.mubr.msk.f32.mxu0 %vm8098_vm1, %v8097_v3  ;;  %v1754_v58 = vld [vmem:[#allocation3 + $0x58] sm:$0xff]  ;;  %v2344_v31 = vld [vmem:[#allocation2 + $0x112] sm:$0xff]  ;;  %v2873_v50 = vld [vmem:[#allocation2 + $0x11b] sm:$0xff] }
 0x1ef   : > { %1715 = vst.msk [vmem:[#allocation3 + $0x68] sm:$0xff] %vm710_vm0, %v1674_v57  ;;  %v2200_v49 = vadd.f32 %v2040_v24, %v1754_v58  ;;  %v1232_v24 = vld [vmem:[#allocation3 + $0x88] sm:$0xff] }
 0x1f0   : > { %v1527_v11 = vpop.f32.mrb[68].mxu1  ;;  %v2060_v63 = vpop.f32.mrb[72].mxu0 }
 0x1f1   : > { %v1675_v56 = vadd.f32 %v1527_v11, %v1229_v19  ;;  %v7118_v33 = vpop.f32.mrb[69].mxu1  ;;  %v7246_v4 = vpop.f32.mrb[73].mxu0  ;;  %7403 = vmatmul.mubr.msk.f32.gmra.mrb[174].mxu1 %vm710_vm0, %v8839_v41  ;;  %7531 = vmatmul.mubr.msk.f32.gmra.mrb[178].mxu0 %vm710_vm0, %v2867_v1  ;;  %2241 = vst.msk [vmem:[#allocation3 + $0x58] sm:$0xff] %vm710_vm0, %v2200_v49  ;;  %v1236_v1 = vld [vmem:[#allocation3 + $0xa8] sm:$0xff] }
 0x1f2   : > { %7405 = vmatprep.mubr.msk.f32.mxu1 %vm8098_vm1, %v8097_v3  ;;  %7533 = vmatprep.mubr.msk.f32.mxu0 %vm8098_vm1, %v8097_v3  ;;  %v1755_v6 = vld [vmem:[#allocation3 + $0x60] sm:$0xff]  ;;  %v2345_v4 = vld [vmem:[#allocation2 + $0x11a] sm:$0xff] }
 0x1f3   : > { %1716 = vst.msk [vmem:[#allocation3 + $0x70] sm:$0xff] %vm710_vm0, %v1675_v56  ;;  %v2201_v8 = vadd.f32 %v2045_v40, %v1755_v6  ;;  %v2874_v6 = vld [vmem:[#allocation2 + $0x123] sm:$0xff] }
 0x1f4   : > { %v1532_v21 = vpop.f32.mrb[70].mxu1  ;;  %v2065_v10 = vpop.f32.mrb[74].mxu0 }
 0x1f5   : > { %v1676_v12 = vadd.f32 %v1532_v21, %v1230_v51  ;;  %v7121_v41 = vpop.f32.mrb[71].mxu1  ;;  %v7249_v52 = vpop.f32.mrb[75].mxu0  ;;  %7406 = vmatmul.mubr.msk.f32.gmra.mrb[176].mxu1 %vm710_vm0, %v8848_v35  ;;  %7534 = vmatmul.mubr.msk.f32.gmra.mrb[180].mxu0 %vm710_vm0, %v2868_v61  ;;  %2242 = vst.msk [vmem:[#allocation3 + $0x60] sm:$0xff] %vm710_vm0, %v2201_v8 }
 0x1f6   : > { %7408 = vmatprep.mubr.msk.f32.mxu1 %vm8098_vm1, %v8097_v3  ;;  %7536 = vmatprep.mubr.msk.f32.mxu0 %vm8098_vm1, %v8097_v3  ;;  %v1756_v14 = vld [vmem:[#allocation3 + $0x68] sm:$0xff] }
 0x1f7   : > { %1717 = vst.msk [vmem:[#allocation3 + $0x78] sm:$0xff] %vm710_vm0, %v1676_v12  ;;  %v2202_v16 = vadd.f32 %v2050_v44, %v1756_v14  ;;  %v1237_v12 = vld [vmem:[#allocation3 + $0xb0] sm:$0xff] }
 0x1f8   : > { %v1537_v62 = vpop.f32.mrb[72].mxu1  ;;  %v2070_v23 = vpop.f32.mrb[76].mxu0  ;;  %v2346_v14 = vld [vmem:[#allocation2 + $0x122] sm:$0xff] }
 0x1f9   : > { %v1677_v60 = vadd.f32 %v1537_v62, %v1231_v13  ;;  %v7124_v35 = vpop.f32.mrb[73].mxu1  ;;  %v7252_v20 = vpop.f32.mrb[77].mxu0  ;;  %7409 = vmatmul.mubr.msk.f32.gmra.mrb[178].mxu1 %vm710_vm0, %v8857_v39  ;;  %7537 = vmatmul.mubr.msk.f32.gmra.mrb[182].mxu0 %vm710_vm0, %v2869_v18  ;;  %2243 = vst.msk [vmem:[#allocation3 + $0x68] sm:$0xff] %vm710_vm0, %v2202_v16  ;;  %v2875_v16 = vld [vmem:[#allocation2 + $0x12b] sm:$0xff] }
 0x1fa   : > { %7411 = vmatprep.mubr.msk.f32.mxu1 %vm8098_vm1, %v8097_v3  ;;  %7539 = vmatprep.mubr.msk.f32.mxu0 %vm8098_vm1, %v8097_v3  ;;  %v1757_v22 = vld [vmem:[#allocation3 + $0x70] sm:$0xff]  ;;  %v1238_v35 = vld [vmem:[#allocation3 + $0xb8] sm:$0xff] }
 0x1fb   : > { %1718 = vst.msk [vmem:[#allocation3 + $0x80] sm:$0xff] %vm710_vm0, %v1677_v60  ;;  %v2203_v0 = vadd.f32 %v2055_v54, %v1757_v22  ;;  %v1235_v54 = vld [vmem:[#allocation3 + $0xa0] sm:$0xff] }
 0x1fc   : > { %v1542_v26 = vpop.f32.mrb[74].mxu1  ;;  %v2075_v28 = vpop.f32.mrb[78].mxu0 }
 0x1fd   : > { %v1678_v15 = vadd.f32 %v1542_v26, %v1232_v24  ;;  %v7127_v39 = vpop.f32.mrb[75].mxu1  ;;  %v7255_v30 = vpop.f32.mrb[79].mxu0  ;;  %7412 = vmatmul.mubr.msk.f32.gmra.mrb[180].mxu1 %vm710_vm0, %v8866_v43  ;;  %7540 = vmatmul.mubr.msk.f32.gmra.mrb[184].mxu0 %vm710_vm0, %v2870_v25  ;;  %2244 = vst.msk [vmem:[#allocation3 + $0x70] sm:$0xff] %vm710_vm0, %v2203_v0  ;;  %v2347_v0 = vld [vmem:[#allocation2 + $0x12a] sm:$0xff]  ;;  %v2876_v24 = vld [vmem:[#allocation2 + $0x133] sm:$0xff] }
 0x1fe   : > { %7414 = vmatprep.mubr.msk.f32.mxu1 %vm8098_vm1, %v8097_v3  ;;  %7542 = vmatprep.mubr.msk.f32.mxu0 %vm8098_vm1, %v8097_v3  ;;  %v1758_v2 = vld [vmem:[#allocation3 + $0x78] sm:$0xff]  ;;  %v1239_v30 = vld [vmem:[#allocation3 + $0xc0] sm:$0xff] }
 0x1ff   : > { %1719 = vst.msk [vmem:[#allocation3 + $0x88] sm:$0xff] %vm710_vm0, %v1678_v15  ;;  %v2204_v36 = vadd.f32 %v2060_v63, %v1758_v2 }
 0x200   : > { %v1547_v40 = vpop.f32.mrb[76].mxu1  ;;  %v2080_v34 = vpop.f32.mrb[80].mxu0 }
 0x201   : > { %v1679_v43 = vadd.f32 %v1547_v40, %v1233_v32  ;;  %v7130_v37 = vpop.f32.mrb[77].mxu1  ;;  %v7258_v17 = vpop.f32.mrb[81].mxu0  ;;  %7415 = vmatmul.mubr.msk.f32.gmra.mrb[182].mxu1 %vm710_vm0, %v2342_v5  ;;  %7543 = vmatmul.mubr.msk.f32.gmra.mrb[186].mxu0 %vm710_vm0, %v2871_v27  ;;  %2245 = vst.msk [vmem:[#allocation3 + $0x78] sm:$0xff] %vm710_vm0, %v2204_v36  ;;  %v2348_v32 = vld [vmem:[#allocation2 + $0x132] sm:$0xff]  ;;  %v2877_v40 = vld [vmem:[#allocation2 + $0x13b] sm:$0xff] }
 0x202   : > { %7417 = vmatprep.mubr.msk.f32.mxu1 %vm8098_vm1, %v8097_v3  ;;  %7545 = vmatprep.mubr.msk.f32.mxu0 %vm8098_vm1, %v8097_v3  ;;  %v1759_v42 = vld [vmem:[#allocation3 + $0x80] sm:$0xff]  ;;  %v1240_v17 = vld [vmem:[#allocation3 + $0xc8] sm:$0xff] }
 0x203   : > { %1720 = vst.msk [vmem:[#allocation3 + $0x90] sm:$0xff] %vm710_vm0, %v1679_v43  ;;  %v2205_v38 = vadd.f32 %v2065_v10, %v1759_v42 }
 0x204   : > { %v1552_v44 = vpop.f32.mrb[78].mxu1  ;;  %v2085_v47 = vpop.f32.mrb[82].mxu0 }
 0x205   : > { %v1680_v48 = vadd.f32 %v1552_v44, %v1234_v7  ;;  %v7133_v45 = vpop.f32.mrb[79].mxu1  ;;  %v7261_v53 = vpop.f32.mrb[83].mxu0  ;;  %7418 = vmatmul.mubr.msk.f32.gmra.mrb[184].mxu1 %vm710_vm0, %v2343_v46  ;;  %7546 = vmatmul.mubr.msk.f32.gmra.mrb[188].mxu0 %vm710_vm0, %v2872_v29  ;;  %2246 = vst.msk [vmem:[#allocation3 + $0x80] sm:$0xff] %vm710_vm0, %v2205_v38  ;;  %v2349_v7 = vld [vmem:[#allocation2 + $0x13a] sm:$0xff]  ;;  %v2878_v44 = vld [vmem:[#allocation2 + $0x143] sm:$0xff] }
 0x206   : > { %7420 = vmatprep.mubr.msk.f32.mxu1 %vm8098_vm1, %v8097_v3  ;;  %7548 = vmatprep.mubr.msk.f32.mxu0 %vm8098_vm1, %v8097_v3  ;;  %v1760_v9 = vld [vmem:[#allocation3 + $0x88] sm:$0xff] }
 0x207   : > { %1721 = vst.msk [vmem:[#allocation3 + $0x98] sm:$0xff] %vm710_vm0, %v1680_v48  ;;  %v2206_v59 = vadd.f32 %v2070_v23, %v1760_v9  ;;  %v2879_v48 = vld [vmem:[#allocation2 + $0x14b] sm:$0xff]  ;;  %v1241_v9 = vld [vmem:[#allocation3 + $0xd0] sm:$0xff] }
 0x208   : > { %v1557_v55 = vpop.f32.mrb[80].mxu1  ;;  %v2090_v57 = vpop.f32.mrb[84].mxu0 }
 0x209   : > { %v1681_v58 = vadd.f32 %v1557_v55, %v1235_v54  ;;  %v7136_v49 = vpop.f32.mrb[81].mxu1  ;;  %v7264_v19 = vpop.f32.mrb[85].mxu0  ;;  %7421 = vmatmul.mubr.msk.f32.gmra.mrb[186].mxu1 %vm710_vm0, %v2344_v31  ;;  %7549 = vmatmul.mubr.msk.f32.gmra.mrb[190].mxu0 %vm710_vm0, %v2873_v50  ;;  %2247 = vst.msk [vmem:[#allocation3 + $0x88] sm:$0xff] %vm710_vm0, %v2206_v59  ;;  %v2350_v55 = vld [vmem:[#allocation2 + $0x142] sm:$0xff] }
 0x20a   : > { %7423 = vmatprep.mubr.msk.f32.mxu1 %vm8098_vm1, %v8097_v3  ;;  %7551 = vmatprep.mubr.msk.f32.mxu0 %vm8098_vm1, %v8097_v3  ;;  %v1761_v11 = vld [vmem:[#allocation3 + $0x90] sm:$0xff]  ;;  %v2880_v49 = vld [vmem:[#allocation2 + $0x153] sm:$0xf] }
 0x20b   : > { %1722 = vst.msk [vmem:[#allocation3 + $0xa0] sm:$0xff] %vm710_vm0, %v1681_v58  ;;  %v2207_v63 = vadd.f32 %v2075_v28, %v1761_v11  ;;  %v2351_v58 = vld [vmem:[#allocation2 + $0x14a] sm:$0xff] }
 0x20c   : > { %v1562_v56 = vpop.f32.mrb[82].mxu1  ;;  %v2095_v33 = vpop.f32.mrb[86].mxu0 }
 0x20d   : > { %v1682_v8 = vadd.f32 %v1562_v56, %v1236_v1  ;;  %v7139_v51 = vpop.f32.mrb[83].mxu1  ;;  %v7267_v21 = vpop.f32.mrb[87].mxu0  ;;  %7424 = vmatmul.mubr.msk.f32.gmra.mrb[188].mxu1 %vm710_vm0, %v2345_v4  ;;  %7552 = vmatmul.mubr.msk.f32.gmra.mrb[192].mxu0 %vm710_vm0, %v2874_v6  ;;  %2248 = vst.msk [vmem:[#allocation3 + $0x90] sm:$0xff] %vm710_vm0, %v2207_v63  ;;  %v1242_v63 = vld [vmem:[#allocation3 + $0xd8] sm:$0xff] }
 0x20e   : > { %7426 = vmatprep.mubr.msk.f32.mxu1 %vm8098_vm1, %v8097_v3  ;;  %7554 = vmatprep.mubr.msk.f32.mxu0 %vm8098_vm1, %v8097_v3  ;;  %v1762_v10 = vld [vmem:[#allocation3 + $0x98] sm:$0xff]  ;;  %v2352_v51 = vld [vmem:[#allocation2 + $0x152] sm:$0xf] }
 0x20f   : > { %1723 = vst.msk [vmem:[#allocation3 + $0xa8] sm:$0xff] %vm710_vm0, %v1682_v8  ;;  %v2208_v61 = vadd.f32 %v2080_v34, %v1762_v10  ;;  %v767_v8 = vld [vmem:[%s10315_s1 + $0x10] sm:$0x3]  ;;  %v3896_v10 = vld [vmem:[#allocation2 + $0x24] sm:$0xff] }
 0x210   : > { %v1567_v41 = vpop.f32.mrb[84].mxu1  ;;  %v2100_v52 = vpop.f32.mrb[88].mxu0 }
 0x211   : > { %v1683_v13 = vadd.f32 %v1567_v41, %v1237_v12  ;;  %v7142_v62 = vpop.f32.mrb[85].mxu1  ;;  %v7270_v23 = vpop.f32.mrb[89].mxu0  ;;  %7427 = vmatmul.mubr.msk.f32.gmra.mrb[190].mxu1 %vm710_vm0, %v2346_v14  ;;  %7555 = vmatmul.mubr.msk.f32.gmra.mrb[194].mxu0 %vm710_vm0, %v2875_v16  ;;  %2249 = vst.msk [vmem:[#allocation3 + $0x98] sm:$0xff] %vm710_vm0, %v2208_v61  ;;  %v1243_v12 = vld [vmem:[#allocation3 + $0xe0] sm:$0xff]  ;;  %v766_v14 = vld [vmem:[%s10315_s1 + $0xe] sm:$0x3] }
 0x212   : > { %7429 = vmatprep.mubr.msk.f32.mxu1 %vm8098_vm1, %v8097_v3  ;;  %7557 = vmatprep.mubr.msk.f32.mxu0 %vm8098_vm1, %v8097_v3  ;;  %v1763_v18 = vld [vmem:[#allocation3 + $0xa0] sm:$0xff]  ;;  %v5117_v16 = vsel %vm932_vm2, %v767_v8, 0  ;;  %v1249_v8 = vld [vmem:[#allocation3 + $0x110] sm:$0xff] }
 0x213   : > { %1724 = vst.msk [vmem:[#allocation3 + $0xb0] sm:$0xff] %vm710_vm0, %v1683_v13  ;;  %v2209_v60 = vadd.f32 %v2085_v47, %v1763_v18  ;;  %v3368_v18 = vld [vmem:[#allocation2 + $0x14] sm:$0xff] }
 0x214   : > { %v1572_v20 = vpop.f32.mrb[86].mxu1  ;;  %v9265_v22 = vpop.f32.mrb[90].mxu0 }
 0x215   : > { %v1684_v26 = vadd.f32 %v1572_v20, %v1238_v35  ;;  %v7145_v28 = vpop.f32.mrb[87].mxu1  ;;  %v7273_v25 = vpop.f32.mrb[91].mxu0  ;;  %7430 = vmatmul.mubr.msk.f32.gmra.mrb[192].mxu1 %vm710_vm0, %v2347_v0  ;;  %7558 = vmatmul.mubr.msk.f32.gmra.mrb[196].mxu0 %vm710_vm0, %v2876_v24  ;;  %2250 = vst.msk [vmem:[#allocation3 + $0xa0] sm:$0xff] %vm710_vm0, %v2209_v60  ;;  %v4589_v35 = vsel %vm932_vm2, %v766_v14, 0 }
 0x216   : > { %7432 = vmatprep.mubr.msk.f32.mxu1 %vm8098_vm1, %v8097_v3  ;;  %7560 = vmatprep.mubr.msk.f32.mxu0 %vm8098_vm1, %v8097_v3  ;;  %v1764_v15 = vld [vmem:[#allocation3 + $0xa8] sm:$0xff] }
 0x217   : > { %1725 = vst.msk [vmem:[#allocation3 + $0xb8] sm:$0xff] %vm710_vm0, %v1684_v26  ;;  %v2210_v39 = vadd.f32 %v2090_v57, %v1764_v15  ;;  %v3897_v26 = vld [vmem:[#allocation2 + $0x2c] sm:$0xff] }
 0x218   : > { %v1577_v2 = vpop.f32.mrb[88].mxu1  ;;  %v9275_v36 = vpop.f32.mrb[92].mxu0 }
 0x219   : > { %v1685_v34 = vadd.f32 %v1577_v2, %v1239_v30  ;;  %v7148_v5 = vpop.f32.mrb[89].mxu1  ;;  %v7276_v27 = vpop.f32.mrb[93].mxu0  ;;  %7433 = vmatmul.mubr.msk.f32.gmra.mrb[194].mxu1 %vm710_vm0, %v2348_v32  ;;  %7561 = vmatmul.mubr.msk.f32.gmra.mrb[198].mxu0 %vm710_vm0, %v2877_v40  ;;  %2251 = vst.msk [vmem:[#allocation3 + $0xa8] sm:$0xff] %vm710_vm0, %v2210_v39  ;;  %v3369_v39 = vld [vmem:[#allocation2 + $0x1c] sm:$0xff] }
 0x21a   : > { %7435 = vmatprep.mubr.msk.f32.mxu1 %vm8098_vm1, %v8097_v3  ;;  %7563 = vmatprep.mubr.msk.f32.mxu0 %vm8098_vm1, %v8097_v3  ;;  %v1765_v43 = vld [vmem:[#allocation3 + $0xb0] sm:$0xff] }
 0x21b   : > { %1726 = vst.msk [vmem:[#allocation3 + $0xc0] sm:$0xff] %vm710_vm0, %v1685_v34  ;;  %v2211_v37 = vadd.f32 %v2095_v33, %v1765_v43  ;;  %v3898_v34 = vld [vmem:[#allocation2 + $0x34] sm:$0xff] }
 0x21c   : > { %v1582_v42 = vpop.f32.mrb[90].mxu1  ;;  %v9285_v38 = vpop.f32.mrb[94].mxu0 }
 0x21d   : > { %v1686_v47 = vadd.f32 %v1582_v42, %v1240_v17  ;;  %v7151_v46 = vpop.f32.mrb[91].mxu1  ;;  %v7279_v29 = vpop.f32.mrb[95].mxu0  ;;  %7436 = vmatmul.mubr.msk.f32.gmra.mrb[196].mxu1 %vm710_vm0, %v2349_v7  ;;  %7564 = vmatmul.mubr.msk.f32.gmra.mrb[200].mxu0 %vm710_vm0, %v2878_v44  ;;  %2252 = vst.msk [vmem:[#allocation3 + $0xb0] sm:$0xff] %vm710_vm0, %v2211_v37  ;;  %v1246_v42 = vld [vmem:[#allocation3 + $0xf8] sm:$0xff]  ;;  %v3899_v44 = vld [vmem:[#allocation2 + $0x3c] sm:$0xff] }
 0x21e   : > { %7438 = vmatprep.mubr.msk.f32.mxu1 %vm8098_vm1, %v8097_v3  ;;  %7566 = vmatprep.mubr.msk.f32.mxu0 %vm8098_vm1, %v8097_v3  ;;  %v1766_v45 = vld [vmem:[#allocation3 + $0xb8] sm:$0xff] }
 0x21f   : > { %1727 = vst.msk [vmem:[#allocation3 + $0xc8] sm:$0xff] %vm710_vm0, %v1686_v47  ;;  %v2212_v53 = vadd.f32 %v2100_v52, %v1766_v45 }
 0x220   : > { %v1587_v59 = vpop.f32.mrb[92].mxu1  ;;  %v9295_v54 = vpop.f32.mrb[96].mxu0 }
 0x221   : > { %v1687_v57 = vadd.f32 %v1587_v59, %v1241_v9  ;;  %v7154_v31 = vpop.f32.mrb[93].mxu1  ;;  %v7282_v50 = vpop.f32.mrb[97].mxu0  ;;  %7439 = vmatmul.mubr.msk.f32.gmra.mrb[198].mxu1 %vm710_vm0, %v2350_v55  ;;  %7567 = vmatmul.mubr.msk.f32.gmra.mrb[202].mxu0 %vm710_vm0, %v2879_v48  ;;  %2253 = vst.msk [vmem:[#allocation3 + $0xb8] sm:$0xff] %vm710_vm0, %v2212_v53  ;;  %v1247_v53 = vld [vmem:[#allocation3 + $0x100] sm:$0xff] }
 0x222   : > { %7441 = vmatprep.mubr.msk.f32.mxu1 %vm8098_vm1, %v8097_v3  ;;  %7569 = vmatprep.mubr.msk.f32.mxu0 %vm8098_vm1, %v8097_v3  ;;  %v1767_v19 = vld [vmem:[#allocation3 + $0xc0] sm:$0xff] }
 0x223   : > { %1728 = vst.msk [vmem:[#allocation3 + $0xd0] sm:$0xff] %vm710_vm0, %v1687_v57  ;;  %v2213_v11 = vadd.f32 %v9265_v22, %v1767_v19  ;;  %v1244_v22 = vld [vmem:[#allocation3 + $0xe8] sm:$0xff] }
 0x224   : > { %v1592_v1 = vpop.f32.mrb[94].mxu1  ;;  %v9306_v56 = vpop.f32.mrb[98].mxu0 }
 0x225   : > { %v1688_v33 = vadd.f32 %v1592_v1, %v1242_v63  ;;  %v7157_v4 = vpop.f32.mrb[95].mxu1  ;;  %v7285_v6 = vpop.f32.mrb[99].mxu0  ;;  %7442 = vmatmul.mubr.msk.f32.gmra.mrb[200].mxu1 %vm710_vm0, %v2351_v58  ;;  %7570 = vmatmul.mubr.msk.f32.gmra.mrb[204].mxu0 %vm710_vm0, %v2880_v49  ;;  %2254 = vst.msk [vmem:[#allocation3 + $0xc0] sm:$0xff] %vm710_vm0, %v2213_v11  ;;  %v1248_v49 = vld [vmem:[#allocation3 + $0x108] sm:$0xff]  ;;  %v3901_v63 = vld [vmem:[#allocation2 + $0x4c] sm:$0xff] }
 0x226   : > { %7444 = vmatprep.mubr.msk.f32.mxu1 %vm8098_vm1, %v8097_v3  ;;  %7699 = vmatprep.mubr.msk.f32.mxu0 %vm8098_vm1, %v8097_v3  ;;  %v1768_v21 = vld [vmem:[#allocation3 + $0xc8] sm:$0xff] }
 0x227   : > { %1729 = vst.msk [vmem:[#allocation3 + $0xd8] sm:$0xff] %vm710_vm0, %v1688_v33  ;;  %v2214_v61 = vadd.f32 %v9275_v36, %v1768_v21  ;;  %v1245_v36 = vld [vmem:[#allocation3 + $0xf0] sm:$0xff] }
 0x228   : > { %v1597_v41 = vpop.f32.mrb[96].mxu1  ;;  %v9320_v52 = vpop.f32.mrb[100].mxu0 }
 0x229   : > { %v1689_v13 = vadd.f32 %v1597_v41, %v1243_v12  ;;  %v7160_v62 = vpop.f32.mrb[97].mxu1  ;;  %v7288_v23 = vpop.f32.mrb[101].mxu0  ;;  %7445 = vmatmul.mubr.msk.f32.gmra.mrb[202].mxu1 %vm710_vm0, %v2352_v51  ;;  %7700 = vmatmul.mubr.msk.f32.vlgmr.msra.gmra.mrb[206].mxu0 %vm710_vm0, %v3896_v10  ;;  %2255 = vst.msk [vmem:[#allocation3 + $0xc8] sm:$0xff] %vm710_vm0, %v2214_v61 }
 0x22a   : > { %7574 = vmatprep.mubr.msk.f32.mxu1 %vm8098_vm1, %v8097_v3  ;;  %7702 = vmatprep.mubr.msk.f32.mxu0 %vm8098_vm1, %v8097_v3  ;;  %v1769_v60 = vld [vmem:[#allocation3 + $0xd0] sm:$0xff] }
 0x22b   : > { %1730 = vst.msk [vmem:[#allocation3 + $0xe0] sm:$0xff] %vm710_vm0, %v1689_v13  ;;  %7948 = vmatpush3.bf16.msra.mxu0 %v5117_v16  ;;  %v2215_v20 = vadd.f32 %v9285_v38, %v1769_v60  ;;  %v1250_v16 = vld [vmem:[#allocation3 + $0x118] sm:$0xff]  ;;  %v3903_v23 = vld [vmem:[#allocation2 + $0x5c] sm:$0xff] }
 0x22c   : > { %v1602_v0 = vpop.f32.mrb[98].mxu1  ;;  %v2135_v24 = vpop.f32.mrb[102].mxu0 }
 0x22d   : > { %v1690_v28 = vadd.f32 %v1602_v0, %v1244_v22  ;;  %v7163_v25 = vpop.f32.mrb[99].mxu1  ;;  %v7291_v15 = vpop.f32.mrb[103].mxu0  ;;  %7575 = vmatmul.mubr.msk.f32.vlgmr.msra.gmra.mrb[204].mxu1 %vm710_vm0, %v3368_v18  ;;  %7703 = vmatmul.mubr.msk.f32.gmra.mrb[208].mxu0 %vm710_vm0, %v3897_v26  ;;  %2256 = vst.msk [vmem:[#allocation3 + $0xd0] sm:$0xff] %vm710_vm0, %v2215_v20  ;;  %v1251_v0 = vld [vmem:[#allocation3 + $0x120] sm:$0xff] }
 0x22e   : > { %7823 = vmatpush3.bf16.msra.mxu1 %v4589_v35  ;;  %7577 = vmatprep.mubr.msk.f32.mxu1 %vm8098_vm1, %v8097_v3  ;;  %v1770_v30 = vld [vmem:[#allocation3 + $0xd8] sm:$0xff] }
 0x22f   : > { %1731 = vst.msk [vmem:[#allocation3 + $0xe8] sm:$0xff] %vm710_vm0, %v1690_v28  ;;  %7705 = vmatprep.mubr.msk.f32.mxu0 %vm8098_vm1, %v8097_v3  ;;  %v2216_v2 = vadd.f32 %v9295_v54, %v1770_v30  ;;  %v3900_v54 = vld [vmem:[#allocation2 + $0x44] sm:$0xff] }
 0x230   : > { %v1607_v32 = vpop.f32.mrb[100].mxu1  ;;  %v2140_v40 = vpop.f32.mrb[104].mxu0  ;;  %v3904_v28 = vld [vmem:[#allocation2 + $0x64] sm:$0xff] }
 0x231   : > { %v1691_v5 = vadd.f32 %v1607_v32, %v1245_v36  ;;  %v7166_v27 = vpop.f32.mrb[101].mxu1  ;;  %v7294_v43 = vpop.f32.mrb[105].mxu0  ;;  %7578 = vmatmul.mubr.msk.f32.gmra.mrb[206].mxu1 %vm710_vm0, %v3369_v39  ;;  %7706 = vmatmul.mubr.msk.f32.gmra.mrb[210].mxu0 %vm710_vm0, %v3898_v34  ;;  %2257 = vst.msk [vmem:[#allocation3 + $0xd8] sm:$0xff] %vm710_vm0, %v2216_v2  ;;  %v1252_v36 = vld [vmem:[#allocation3 + $0x128] sm:$0xff] }
 0x232   : > { %7580 = vmatprep.mubr.msk.f32.mxu1 %vm8098_vm1, %v8097_v3  ;;  %7708 = vmatprep.mubr.msk.f32.mxu0 %vm8098_vm1, %v8097_v3  ;;  %v1771_v37 = vld [vmem:[#allocation3 + $0xe0] sm:$0xff] }
 0x233   : > { %1732 = vst.msk [vmem:[#allocation3 + $0xf0] sm:$0xff] %vm710_vm0, %v1691_v5  ;;  %v2217_v17 = vadd.f32 %v9306_v56, %v1771_v37 }
 0x234   : > { %v1612_v38 = vpop.f32.mrb[102].mxu1  ;;  %v2145_v7 = vpop.f32.mrb[106].mxu0 }
 0x235   : > { %v1692_v47 = vadd.f32 %v1612_v38, %v1246_v42  ;;  %v7169_v46 = vpop.f32.mrb[103].mxu1  ;;  %v7297_v29 = vpop.f32.mrb[107].mxu0  ;;  %7581 = vmatmul.mubr.msk.f32.gmra.mrb[208].mxu1 %vm710_vm0, %v3896_v10  ;;  %7709 = vmatmul.mubr.msk.f32.gmra.mrb[212].mxu0 %vm710_vm0, %v3899_v44  ;;  %2258 = vst.msk [vmem:[#allocation3 + $0xe0] sm:$0xff] %vm710_vm0, %v2217_v17  ;;  %v3902_v10 = vld [vmem:[#allocation2 + $0x54] sm:$0xff]  ;;  %v1253_v42 = vld [vmem:[#allocation3 + $0x130] sm:$0xff] }
 0x236   : > { %7583 = vmatprep.mubr.msk.f32.mxu1 %vm8098_vm1, %v8097_v3  ;;  %7711 = vmatprep.mubr.msk.f32.mxu0 %vm8098_vm1, %v8097_v3  ;;  %v1772_v48 = vld [vmem:[#allocation3 + $0xe8] sm:$0xff] }
 0x237   : > { %1733 = vst.msk [vmem:[#allocation3 + $0xf8] sm:$0xff] %vm710_vm0, %v1692_v47  ;;  %v2218_v45 = vadd.f32 %v9320_v52, %v1772_v48 }
 0x238   : > { %v1617_v9 = vpop.f32.mrb[104].mxu1  ;;  %v2150_v59 = vpop.f32.mrb[108].mxu0 }
 0x239   : > { %v1693_v55 = vadd.f32 %v1617_v9, %v1247_v53  ;;  %v7172_v57 = vpop.f32.mrb[105].mxu1  ;;  %v7300_v31 = vpop.f32.mrb[109].mxu0  ;;  %7584 = vmatmul.mubr.msk.f32.gmra.mrb[210].mxu1 %vm710_vm0, %v3897_v26  ;;  %7712 = vmatmul.mubr.msk.f32.gmra.mrb[214].mxu0 %vm710_vm0, %v3900_v54  ;;  %2259 = vst.msk [vmem:[#allocation3 + $0xe8] sm:$0xff] %vm710_vm0, %v2218_v45  ;;  %v1254_v53 = vld [vmem:[#allocation3 + $0x138] sm:$0xff] }
 0x23a   : > { %7586 = vmatprep.mubr.msk.f32.mxu1 %vm8098_vm1, %v8097_v3  ;;  %7714 = vmatprep.mubr.msk.f32.mxu0 %vm8098_vm1, %v8097_v3  ;;  %v1773_v50 = vld [vmem:[#allocation3 + $0xf0] sm:$0xff] }
 0x23b   : > { %1734 = vst.msk [vmem:[#allocation3 + $0x100] sm:$0xff] %vm710_vm0, %v1693_v55  ;;  %v2219_v58 = vadd.f32 %v2135_v24, %v1773_v50 }
 0x23c   : > { %v1622_v19 = vpop.f32.mrb[106].mxu1  ;;  %v2155_v11 = vpop.f32.mrb[110].mxu0 }
 0x23d   : > { %v1694_v1 = vadd.f32 %v1622_v19, %v1248_v49  ;;  %v7175_v56 = vpop.f32.mrb[107].mxu1  ;;  %v7303_v33 = vpop.f32.mrb[111].mxu0  ;;  %7587 = vmatmul.mubr.msk.f32.gmra.mrb[212].mxu1 %vm710_vm0, %v3898_v34  ;;  %7715 = vmatmul.mubr.msk.f32.gmra.mrb[216].mxu0 %vm710_vm0, %v3901_v63  ;;  %2260 = vst.msk [vmem:[#allocation3 + $0xf0] sm:$0xff] %vm710_vm0, %v2219_v58  ;;  %v3905_v34 = vld [vmem:[#allocation2 + $0x6c] sm:$0xff] }
 0x23e   : > { %7589 = vmatprep.mubr.msk.f32.mxu1 %vm8098_vm1, %v8097_v3  ;;  %7717 = vmatprep.mubr.msk.f32.mxu0 %vm8098_vm1, %v8097_v3  ;;  %v1774_v4 = vld [vmem:[#allocation3 + $0xf8] sm:$0xff]  ;;  %v1255_v49 = vld [vmem:[#allocation3 + $0x140] sm:$0xf] }
 0x23f   : > { %1735 = vst.msk [vmem:[#allocation3 + $0x108] sm:$0xff] %vm710_vm0, %v1694_v1  ;;  %v2220_v6 = vadd.f32 %v2140_v40, %v1774_v4 }
 0x240   : > { %v1627_v51 = vpop.f32.mrb[108].mxu1  ;;  %v2160_v21 = vpop.f32.mrb[112].mxu0 }
 0x241   : > { %v1695_v61 = vadd.f32 %v1627_v51, %v1249_v8  ;;  %v7178_v12 = vpop.f32.mrb[109].mxu1  ;;  %v7306_v41 = vpop.f32.mrb[113].mxu0  ;;  %7590 = vmatmul.mubr.msk.f32.gmra.mrb[214].mxu1 %vm710_vm0, %v3899_v44  ;;  %7718 = vmatmul.mubr.msk.f32.gmra.mrb[218].mxu0 %vm710_vm0, %v3902_v10  ;;  %2261 = vst.msk [vmem:[#allocation3 + $0xf8] sm:$0xff] %vm710_vm0, %v2220_v6  ;;  %v3906_v44 = vld [vmem:[#allocation2 + $0x74] sm:$0xff] }
 0x242   : > { %7592 = vmatprep.mubr.msk.f32.mxu1 %vm8098_vm1, %v8097_v3  ;;  %7720 = vmatprep.mubr.msk.f32.mxu0 %vm8098_vm1, %v8097_v3  ;;  %v1775_v52 = vld [vmem:[#allocation3 + $0x100] sm:$0xff] }
 0x243   : > { %1736 = vst.msk [vmem:[#allocation3 + $0x110] sm:$0xff] %vm710_vm0, %v1695_v61  ;;  %v2221_v14 = vadd.f32 %v2145_v7, %v1775_v52  ;;  %v2271_v8 = vld [vmem:[#allocation3] sm:$0xff] }
 0x244   : > { %v1632_v13 = vpop.f32.mrb[110].mxu1  ;;  %v2165_v62 = vpop.f32.mrb[114].mxu0 }
 0x245   : > { %v1696_v18 = vadd.f32 %v1632_v13, %v1250_v16  ;;  %v7181_v60 = vpop.f32.mrb[111].mxu1  ;;  %v7309_v35 = vpop.f32.mrb[115].mxu0  ;;  %7593 = vmatmul.mubr.msk.f32.gmra.mrb[216].mxu1 %vm710_vm0, %v3900_v54  ;;  %7721 = vmatmul.mubr.msk.f32.gmra.mrb[220].mxu0 %vm710_vm0, %v3903_v23  ;;  %2262 = vst.msk [vmem:[#allocation3 + $0x100] sm:$0xff] %vm710_vm0, %v2221_v14  ;;  %v3907_v54 = vld [vmem:[#allocation2 + $0x7c] sm:$0xff] }
 0x246   : > { %7595 = vmatprep.mubr.msk.f32.mxu1 %vm8098_vm1, %v8097_v3  ;;  %7723 = vmatprep.mubr.msk.f32.mxu0 %vm8098_vm1, %v8097_v3  ;;  %v1776_v20 = vld [vmem:[#allocation3 + $0x108] sm:$0xff] }
 0x247   : > { %1737 = vst.msk [vmem:[#allocation3 + $0x118] sm:$0xff] %vm710_vm0, %v1696_v18  ;;  %v2222_v22 = vadd.f32 %v2150_v59, %v1776_v20  ;;  %v2272_v16 = vld [vmem:[#allocation3 + $0x8] sm:$0xff] }
 0x248   : > { %v1637_v24 = vpop.f32.mrb[112].mxu1  ;;  %v2170_v26 = vpop.f32.mrb[116].mxu0 }
 0x249   : > { %v1697_v25 = vadd.f32 %v1637_v24, %v1251_v0  ;;  %v7184_v15 = vpop.f32.mrb[113].mxu1  ;;  %v7312_v39 = vpop.f32.mrb[117].mxu0  ;;  %7596 = vmatmul.mubr.msk.f32.gmra.mrb[218].mxu1 %vm710_vm0, %v3901_v63  ;;  %7724 = vmatmul.mubr.msk.f32.gmra.mrb[222].mxu0 %vm710_vm0, %v3904_v28  ;;  %2263 = vst.msk [vmem:[#allocation3 + $0x108] sm:$0xff] %vm710_vm0, %v2222_v22  ;;  %v2273_v0 = vld [vmem:[#allocation3 + $0x10] sm:$0xff] }
 0x24a   : > { %7598 = vmatprep.mubr.msk.f32.mxu1 %vm8098_vm1, %v8097_v3  ;;  %7726 = vmatprep.mubr.msk.f32.mxu0 %vm8098_vm1, %v8097_v3  ;;  %v1777_v30 = vld [vmem:[#allocation3 + $0x110] sm:$0xff] }
 0x24b   : > { %1738 = vst.msk [vmem:[#allocation3 + $0x120] sm:$0xff] %vm710_vm0, %v1697_v25  ;;  %v2223_v2 = vadd.f32 %v2155_v11, %v1777_v30  ;;  %v3908_v11 = vld [vmem:[#allocation2 + $0x84] sm:$0xff] }
 0x24c   : > { %v1642_v32 = vpop.f32.mrb[114].mxu1  ;;  %v2175_v40 = vpop.f32.mrb[118].mxu0 }
 0x24d   : > { %v1698_v5 = vadd.f32 %v1642_v32, %v1252_v36  ;;  %v7187_v27 = vpop.f32.mrb[115].mxu1  ;;  %v7315_v43 = vpop.f32.mrb[119].mxu0  ;;  %7599 = vmatmul.mubr.msk.f32.gmra.mrb[220].mxu1 %vm710_vm0, %v3902_v10  ;;  %7727 = vmatmul.mubr.msk.f32.gmra.mrb[224].mxu0 %vm710_vm0, %v3905_v34  ;;  %2264 = vst.msk [vmem:[#allocation3 + $0x110] sm:$0xff] %vm710_vm0, %v2223_v2  ;;  %v2274_v36 = vld [vmem:[#allocation3 + $0x18] sm:$0xff] }
 0x24e   : > { %7601 = vmatprep.mubr.msk.f32.mxu1 %vm8098_vm1, %v8097_v3  ;;  %7729 = vmatprep.mubr.msk.f32.mxu0 %vm8098_vm1, %v8097_v3  ;;  %v1778_v37 = vld [vmem:[#allocation3 + $0x118] sm:$0xff] }
 0x24f   : > { %1739 = vst.msk [vmem:[#allocation3 + $0x128] sm:$0xff] %vm710_vm0, %v1698_v5  ;;  %v2224_v17 = vadd.f32 %v2160_v21, %v1778_v37  ;;  %v3909_v21 = vld [vmem:[#allocation2 + $0x8c] sm:$0xff] }
 0x250   : > { %v1647_v38 = vpop.f32.mrb[116].mxu1  ;;  %v2180_v7 = vpop.f32.mrb[120].mxu0 }
 0x251   : > { %v1699_v47 = vadd.f32 %v1647_v38, %v1253_v42  ;;  %v7190_v46 = vpop.f32.mrb[117].mxu1  ;;  %v7318_v29 = vpop.f32.mrb[121].mxu0  ;;  %7602 = vmatmul.mubr.msk.f32.gmra.mrb[222].mxu1 %vm710_vm0, %v3903_v23  ;;  %7730 = vmatmul.mubr.msk.f32.gmra.mrb[226].mxu0 %vm710_vm0, %v3906_v44  ;;  %2265 = vst.msk [vmem:[#allocation3 + $0x118] sm:$0xff] %vm710_vm0, %v2224_v17  ;;  %v3910_v23 = vld [vmem:[#allocation2 + $0x94] sm:$0xff] }
 0x252   : > { %7604 = vmatprep.mubr.msk.f32.mxu1 %vm8098_vm1, %v8097_v3  ;;  %7732 = vmatprep.mubr.msk.f32.mxu0 %vm8098_vm1, %v8097_v3  ;;  %v1779_v48 = vld [vmem:[#allocation3 + $0x120] sm:$0xff] }
 0x253   : > { %1740 = vst.msk [vmem:[#allocation3 + $0x130] sm:$0xff] %vm710_vm0, %v1699_v47  ;;  %v2225_v45 = vadd.f32 %v2165_v62, %v1779_v48  ;;  %v2275_v42 = vld [vmem:[#allocation3 + $0x20] sm:$0xff] }
 0x254   : > { %v1652_v9 = vpop.f32.mrb[118].mxu1  ;;  %v2185_v59 = vpop.f32.mrb[122].mxu0 }
 0x255   : > { %v1700_v55 = vadd.f32 %v1652_v9, %v1254_v53  ;;  %v7193_v57 = vpop.f32.mrb[119].mxu1  ;;  %v7321_v31 = vpop.f32.mrb[123].mxu0  ;;  %7605 = vmatmul.mubr.msk.f32.gmra.mrb[224].mxu1 %vm710_vm0, %v3904_v28  ;;  %7733 = vmatmul.mubr.msk.f32.gmra.mrb[228].mxu0 %vm710_vm0, %v3907_v54  ;;  %2266 = vst.msk [vmem:[#allocation3 + $0x120] sm:$0xff] %vm710_vm0, %v2225_v45  ;;  %v3911_v28 = vld [vmem:[#allocation2 + $0x9c] sm:$0xff] }
 0x256   : > { %7607 = vmatprep.mubr.msk.f32.mxu1 %vm8098_vm1, %v8097_v3  ;;  %7735 = vmatprep.mubr.msk.f32.mxu0 %vm8098_vm1, %v8097_v3  ;;  %v1780_v50 = vld [vmem:[#allocation3 + $0x128] sm:$0xff] }
 0x257   : > { %1741 = vst.msk [vmem:[#allocation3 + $0x138] sm:$0xff] %vm710_vm0, %v1700_v55  ;;  %v2226_v58 = vadd.f32 %v2170_v26, %v1780_v50  ;;  %v2276_v53 = vld [vmem:[#allocation3 + $0x28] sm:$0xff] }
 0x258   : > { %v1657_v19 = vpop.f32.mrb[120].mxu1  ;;  %v3041_v63 = vpop.f32.mrb[124].mxu0 }
 0x259   : > { %v1701_v1 = vadd.f32 %v1657_v19, %v1255_v49  ;;  %v7196_v56 = vpop.f32.mrb[121].mxu1  ;;  %7608 = vmatmul.mubr.msk.f32.gmra.mrb[226].mxu1 %vm710_vm0, %v3905_v34  ;;  %7736 = vmatmul.mubr.msk.f32.gmra.mrb[230].mxu0 %vm710_vm0, %v3908_v11  ;;  %v7451_v33 = vpop.f32.mrb[125].mxu0  ;;  %2267 = vst.msk [vmem:[#allocation3 + $0x128] sm:$0xff] %vm710_vm0, %v2226_v58  ;;  %v3912_v34 = vld [vmem:[#allocation2 + $0xa4] sm:$0xff] }
 0x25a   : > { %7610 = vmatprep.mubr.msk.f32.mxu1 %vm8098_vm1, %v8097_v3  ;;  %7738 = vmatprep.mubr.msk.f32.mxu0 %vm8098_vm1, %v8097_v3  ;;  %v1781_v4 = vld [vmem:[#allocation3 + $0x130] sm:$0xff] }
 0x25b   : > { %1742 = vst.msk [vmem:[#allocation3 + $0x140] sm:$0xf] %vm721_vm4, %v1701_v1  ;;  %v2227_v6 = vadd.f32 %v2175_v40, %v1781_v4  ;;  %v2277_v49 = vld [vmem:[#allocation3 + $0x30] sm:$0xff] }
 0x25c   : > { %v2513_v51 = vpop.f32.mrb[122].mxu1  ;;  %v3046_v10 = vpop.f32.mrb[126].mxu0 }
 0x25d   : > { %v2717_v61 = vadd.f32 %v2513_v51, %v2271_v8  ;;  %v7326_v12 = vpop.f32.mrb[123].mxu1  ;;  %7611 = vmatmul.mubr.msk.f32.gmra.mrb[228].mxu1 %vm710_vm0, %v3906_v44  ;;  %7739 = vmatmul.mubr.msk.f32.gmra.mrb[232].mxu0 %vm710_vm0, %v3909_v21  ;;  %v7454_v41 = vpop.f32.mrb[127].mxu0  ;;  %2268 = vst.msk [vmem:[#allocation3 + $0x130] sm:$0xff] %vm710_vm0, %v2227_v6  ;;  %v3913_v44 = vld [vmem:[#allocation2 + $0xac] sm:$0xff] }
 0x25e   : > { %7613 = vmatprep.mubr.msk.f32.mxu1 %vm8098_vm1, %v8097_v3  ;;  %7741 = vmatprep.mubr.msk.f32.mxu0 %vm8098_vm1, %v8097_v3  ;;  %v1782_v52 = vld [vmem:[#allocation3 + $0x138] sm:$0xff] }
 0x25f   : > { %2758 = vst.msk [vmem:[#allocation3] sm:$0xff] %vm710_vm0, %v2717_v61  ;;  %v2228_v14 = vadd.f32 %v2180_v7, %v1782_v52  ;;  %v2278_v8 = vld [vmem:[#allocation3 + $0x38] sm:$0xff] }
 0x260   : > { %v2518_v13 = vpop.f32.mrb[124].mxu1  ;;  %v3051_v62 = vpop.f32.mrb[128].mxu0 }
 0x261   : > { %v2718_v18 = vadd.f32 %v2518_v13, %v2272_v16  ;;  %v7329_v60 = vpop.f32.mrb[125].mxu1  ;;  %v7457_v35 = vpop.f32.mrb[129].mxu0  ;;  %7614 = vmatmul.mubr.msk.f32.gmra.mrb[230].mxu1 %vm710_vm0, %v3907_v54  ;;  %7742 = vmatmul.mubr.msk.f32.gmra.mrb[234].mxu0 %vm710_vm0, %v3910_v23  ;;  %2269 = vst.msk [vmem:[#allocation3 + $0x138] sm:$0xff] %vm710_vm0, %v2228_v14  ;;  %v3914_v54 = vld [vmem:[#allocation2 + $0xb4] sm:$0xff] }
 0x262   : > { %v1783_v20 = vld [vmem:[#allocation3 + $0x140] sm:$0xf]  ;;  %7616 = vmatprep.mubr.msk.f32.mxu1 %vm8098_vm1, %v8097_v3  ;;  %7744 = vmatprep.mubr.msk.f32.mxu0 %vm8098_vm1, %v8097_v3 }
 0x263   : > { %v2229_v22 = vadd.f32 %v2185_v59, %v1783_v20  ;;  %2759 = vst.msk [vmem:[#allocation3 + $0x8] sm:$0xff] %vm710_vm0, %v2718_v18  ;;  %v2279_v16 = vld [vmem:[#allocation3 + $0x40] sm:$0xff] }
 0x264   : > { %v2523_v24 = vpop.f32.mrb[126].mxu1  ;;  %v3056_v26 = vpop.f32.mrb[130].mxu0 }
 0x265   : > { %2270 = vst.msk [vmem:[#allocation3 + $0x140] sm:$0xf] %vm721_vm4, %v2229_v22  ;;  %v2719_v25 = vadd.f32 %v2523_v24, %v2273_v0  ;;  %v7332_v15 = vpop.f32.mrb[127].mxu1  ;;  %v7460_v39 = vpop.f32.mrb[131].mxu0  ;;  %7617 = vmatmul.mubr.msk.f32.gmra.mrb[232].mxu1 %vm710_vm0, %v3908_v11  ;;  %7745 = vmatmul.mubr.msk.f32.gmra.mrb[236].mxu0 %vm710_vm0, %v3911_v28  ;;  %v2280_v0 = vld [vmem:[#allocation3 + $0x48] sm:$0xff] }
 0x266   : > { %v2799_v30 = vld [vmem:[#allocation3] sm:$0xff]  ;;  %7619 = vmatprep.mubr.msk.f32.mxu1 %vm8098_vm1, %v8097_v3  ;;  %7747 = vmatprep.mubr.msk.f32.mxu0 %vm8098_vm1, %v8097_v3 }
 0x267   : > { %v3245_v2 = vadd.f32 %v3041_v63, %v2799_v30  ;;  %2760 = vst.msk [vmem:[#allocation3 + $0x10] sm:$0xff] %vm710_vm0, %v2719_v25  ;;  %v3915_v63 = vld [vmem:[#allocation2 + $0xbc] sm:$0xff] }
 0x268   : > { %v2528_v32 = vpop.f32.mrb[128].mxu1  ;;  %v3061_v40 = vpop.f32.mrb[132].mxu0 }
 0x269   : > { %3286 = vst.msk [vmem:[#allocation3] sm:$0xff] %vm710_vm0, %v3245_v2  ;;  %v2720_v5 = vadd.f32 %v2528_v32, %v2274_v36  ;;  %v7335_v27 = vpop.f32.mrb[129].mxu1  ;;  %v7463_v43 = vpop.f32.mrb[133].mxu0  ;;  %7620 = vmatmul.mubr.msk.f32.gmra.mrb[234].mxu1 %vm710_vm0, %v3909_v21  ;;  %7748 = vmatmul.mubr.msk.f32.gmra.mrb[238].mxu0 %vm710_vm0, %v3912_v34  ;;  %v2281_v36 = vld [vmem:[#allocation3 + $0x50] sm:$0xff] }
 0x26a   : > { %7622 = vmatprep.mubr.msk.f32.mxu1 %vm8098_vm1, %v8097_v3  ;;  %7750 = vmatprep.mubr.msk.f32.mxu0 %vm8098_vm1, %v8097_v3  ;;  %v2800_v37 = vld [vmem:[#allocation3 + $0x8] sm:$0xff] }
 0x26b   : > { %2761 = vst.msk [vmem:[#allocation3 + $0x18] sm:$0xff] %vm710_vm0, %v2720_v5  ;;  %v3246_v17 = vadd.f32 %v3046_v10, %v2800_v37  ;;  %v3916_v10 = vld [vmem:[#allocation2 + $0xc4] sm:$0xff] }
 0x26c   : > { %v2533_v38 = vpop.f32.mrb[130].mxu1  ;;  %v3066_v7 = vpop.f32.mrb[134].mxu0 }
 0x26d   : > { %v2721_v47 = vadd.f32 %v2533_v38, %v2275_v42  ;;  %v7338_v46 = vpop.f32.mrb[131].mxu1  ;;  %v7466_v29 = vpop.f32.mrb[135].mxu0  ;;  %7623 = vmatmul.mubr.msk.f32.gmra.mrb[236].mxu1 %vm710_vm0, %v3910_v23  ;;  %7751 = vmatmul.mubr.msk.f32.gmra.mrb[240].mxu0 %vm710_vm0, %v3913_v44  ;;  %3287 = vst.msk [vmem:[#allocation3 + $0x8] sm:$0xff] %vm710_vm0, %v3246_v17  ;;  %v3917_v23 = vld [vmem:[#allocation2 + $0xcc] sm:$0xff] }
 0x26e   : > { %7625 = vmatprep.mubr.msk.f32.mxu1 %vm8098_vm1, %v8097_v3  ;;  %7753 = vmatprep.mubr.msk.f32.mxu0 %vm8098_vm1, %v8097_v3  ;;  %v2801_v48 = vld [vmem:[#allocation3 + $0x10] sm:$0xff]  ;;  %v2282_v42 = vld [vmem:[#allocation3 + $0x58] sm:$0xff] }
 0x26f   : > { %2762 = vst.msk [vmem:[#allocation3 + $0x20] sm:$0xff] %vm710_vm0, %v2721_v47  ;;  %v3247_v45 = vadd.f32 %v3051_v62, %v2801_v48 }
 0x270   : > { %v2538_v9 = vpop.f32.mrb[132].mxu1  ;;  %v3071_v59 = vpop.f32.mrb[136].mxu0 }
 0x271   : > { %v2722_v55 = vadd.f32 %v2538_v9, %v2276_v53  ;;  %v7341_v57 = vpop.f32.mrb[133].mxu1  ;;  %v7469_v31 = vpop.f32.mrb[137].mxu0  ;;  %7626 = vmatmul.mubr.msk.f32.gmra.mrb[238].mxu1 %vm710_vm0, %v3911_v28  ;;  %7754 = vmatmul.mubr.msk.f32.gmra.mrb[242].mxu0 %vm710_vm0, %v3914_v54  ;;  %3288 = vst.msk [vmem:[#allocation3 + $0x10] sm:$0xff] %vm710_vm0, %v3247_v45  ;;  %v3918_v28 = vld [vmem:[#allocation2 + $0xd4] sm:$0xff] }
 0x272   : > { %7628 = vmatprep.mubr.msk.f32.mxu1 %vm8098_vm1, %v8097_v3  ;;  %7756 = vmatprep.mubr.msk.f32.mxu0 %vm8098_vm1, %v8097_v3  ;;  %v2802_v50 = vld [vmem:[#allocation3 + $0x18] sm:$0xff]  ;;  %v2283_v53 = vld [vmem:[#allocation3 + $0x60] sm:$0xff] }
 0x273   : > { %2763 = vst.msk [vmem:[#allocation3 + $0x28] sm:$0xff] %vm710_vm0, %v2722_v55  ;;  %v3248_v58 = vadd.f32 %v3056_v26, %v2802_v50 }
 0x274   : > { %v2543_v19 = vpop.f32.mrb[134].mxu1  ;;  %v3076_v11 = vpop.f32.mrb[138].mxu0 }
 0x275   : > { %v2723_v1 = vadd.f32 %v2543_v19, %v2277_v49  ;;  %v7344_v56 = vpop.f32.mrb[135].mxu1  ;;  %v7472_v33 = vpop.f32.mrb[139].mxu0  ;;  %7629 = vmatmul.mubr.msk.f32.gmra.mrb[240].mxu1 %vm710_vm0, %v3912_v34  ;;  %7757 = vmatmul.mubr.msk.f32.gmra.mrb[244].mxu0 %vm710_vm0, %v3915_v63  ;;  %3289 = vst.msk [vmem:[#allocation3 + $0x18] sm:$0xff] %vm710_vm0, %v3248_v58  ;;  %v3919_v34 = vld [vmem:[#allocation2 + $0xdc] sm:$0xff] }
 0x276   : > { %7631 = vmatprep.mubr.msk.f32.mxu1 %vm8098_vm1, %v8097_v3  ;;  %7759 = vmatprep.mubr.msk.f32.mxu0 %vm8098_vm1, %v8097_v3  ;;  %v2803_v4 = vld [vmem:[#allocation3 + $0x20] sm:$0xff]  ;;  %v2284_v49 = vld [vmem:[#allocation3 + $0x68] sm:$0xff] }
 0x277   : > { %2764 = vst.msk [vmem:[#allocation3 + $0x30] sm:$0xff] %vm710_vm0, %v2723_v1  ;;  %v3249_v6 = vadd.f32 %v3061_v40, %v2803_v4 }
 0x278   : > { %v2548_v51 = vpop.f32.mrb[136].mxu1  ;;  %v3081_v21 = vpop.f32.mrb[140].mxu0 }
 0x279   : > { %v2724_v61 = vadd.f32 %v2548_v51, %v2278_v8  ;;  %v7347_v12 = vpop.f32.mrb[137].mxu1  ;;  %v7475_v41 = vpop.f32.mrb[141].mxu0  ;;  %7632 = vmatmul.mubr.msk.f32.gmra.mrb[242].mxu1 %vm710_vm0, %v3913_v44  ;;  %7760 = vmatmul.mubr.msk.f32.gmra.mrb[246].mxu0 %vm710_vm0, %v3916_v10  ;;  %3290 = vst.msk [vmem:[#allocation3 + $0x20] sm:$0xff] %vm710_vm0, %v3249_v6  ;;  %v3920_v44 = vld [vmem:[#allocation2 + $0xe4] sm:$0xff] }
 0x27a   : > { %7634 = vmatprep.mubr.msk.f32.mxu1 %vm8098_vm1, %v8097_v3  ;;  %7762 = vmatprep.mubr.msk.f32.mxu0 %vm8098_vm1, %v8097_v3  ;;  %v2804_v52 = vld [vmem:[#allocation3 + $0x28] sm:$0xff]  ;;  %v2285_v8 = vld [vmem:[#allocation3 + $0x70] sm:$0xff] }
 0x27b   : > { %2765 = vst.msk [vmem:[#allocation3 + $0x38] sm:$0xff] %vm710_vm0, %v2724_v61  ;;  %v3250_v14 = vadd.f32 %v3066_v7, %v2804_v52 }
 0x27c   : > { %v2553_v13 = vpop.f32.mrb[138].mxu1  ;;  %v3086_v62 = vpop.f32.mrb[142].mxu0 }
 0x27d   : > { %v2725_v18 = vadd.f32 %v2553_v13, %v2279_v16  ;;  %v7350_v60 = vpop.f32.mrb[139].mxu1  ;;  %v7478_v35 = vpop.f32.mrb[143].mxu0  ;;  %7635 = vmatmul.mubr.msk.f32.gmra.mrb[244].mxu1 %vm710_vm0, %v3914_v54  ;;  %7763 = vmatmul.mubr.msk.f32.gmra.mrb[248].mxu0 %vm710_vm0, %v3917_v23  ;;  %3291 = vst.msk [vmem:[#allocation3 + $0x28] sm:$0xff] %vm710_vm0, %v3250_v14  ;;  %v3921_v54 = vld [vmem:[#allocation2 + $0xec] sm:$0xff] }
 0x27e   : > { %7637 = vmatprep.mubr.msk.f32.mxu1 %vm8098_vm1, %v8097_v3  ;;  %7765 = vmatprep.mubr.msk.f32.mxu0 %vm8098_vm1, %v8097_v3  ;;  %v2805_v20 = vld [vmem:[#allocation3 + $0x30] sm:$0xff]  ;;  %v2286_v16 = vld [vmem:[#allocation3 + $0x78] sm:$0xff] }
 0x27f   : > { %2766 = vst.msk [vmem:[#allocation3 + $0x40] sm:$0xff] %vm710_vm0, %v2725_v18  ;;  %v3251_v22 = vadd.f32 %v3071_v59, %v2805_v20 }
 0x280   : > { %v2558_v24 = vpop.f32.mrb[140].mxu1  ;;  %v3091_v26 = vpop.f32.mrb[144].mxu0 }
 0x281   : > { %v2726_v25 = vadd.f32 %v2558_v24, %v2280_v0  ;;  %v7353_v15 = vpop.f32.mrb[141].mxu1  ;;  %v7481_v39 = vpop.f32.mrb[145].mxu0  ;;  %7638 = vmatmul.mubr.msk.f32.gmra.mrb[246].mxu1 %vm710_vm0, %v3915_v63  ;;  %7766 = vmatmul.mubr.msk.f32.gmra.mrb[250].mxu0 %vm710_vm0, %v3918_v28  ;;  %3292 = vst.msk [vmem:[#allocation3 + $0x30] sm:$0xff] %vm710_vm0, %v3251_v22  ;;  %v3922_v63 = vld [vmem:[#allocation2 + $0xf4] sm:$0xff] }
 0x282   : > { %7640 = vmatprep.mubr.msk.f32.mxu1 %vm8098_vm1, %v8097_v3  ;;  %7768 = vmatprep.mubr.msk.f32.mxu0 %vm8098_vm1, %v8097_v3  ;;  %v2806_v30 = vld [vmem:[#allocation3 + $0x38] sm:$0xff]  ;;  %v2287_v0 = vld [vmem:[#allocation3 + $0x80] sm:$0xff] }
 0x283   : > { %2767 = vst.msk [vmem:[#allocation3 + $0x48] sm:$0xff] %vm710_vm0, %v2726_v25  ;;  %v3252_v2 = vadd.f32 %v3076_v11, %v2806_v30 }
 0x284   : > { %v2563_v32 = vpop.f32.mrb[142].mxu1  ;;  %v3096_v40 = vpop.f32.mrb[146].mxu0 }
 0x285   : > { %v2727_v5 = vadd.f32 %v2563_v32, %v2281_v36  ;;  %v7356_v27 = vpop.f32.mrb[143].mxu1  ;;  %v7484_v43 = vpop.f32.mrb[147].mxu0  ;;  %7641 = vmatmul.mubr.msk.f32.gmra.mrb[248].mxu1 %vm710_vm0, %v3916_v10  ;;  %7769 = vmatmul.mubr.msk.f32.gmra.mrb[252].mxu0 %vm710_vm0, %v3919_v34  ;;  %3293 = vst.msk [vmem:[#allocation3 + $0x38] sm:$0xff] %vm710_vm0, %v3252_v2  ;;  %v3923_v10 = vld [vmem:[#allocation2 + $0xfc] sm:$0xff] }
 0x286   : > { %7643 = vmatprep.mubr.msk.f32.mxu1 %vm8098_vm1, %v8097_v3  ;;  %7771 = vmatprep.mubr.msk.f32.mxu0 %vm8098_vm1, %v8097_v3  ;;  %v2807_v37 = vld [vmem:[#allocation3 + $0x40] sm:$0xff]  ;;  %v2288_v36 = vld [vmem:[#allocation3 + $0x88] sm:$0xff] }
 0x287   : > { %2768 = vst.msk [vmem:[#allocation3 + $0x50] sm:$0xff] %vm710_vm0, %v2727_v5  ;;  %v3253_v17 = vadd.f32 %v3081_v21, %v2807_v37 }
 0x288   : > { %v2568_v38 = vpop.f32.mrb[144].mxu1  ;;  %v3101_v7 = vpop.f32.mrb[148].mxu0 }
 0x289   : > { %v2728_v47 = vadd.f32 %v2568_v38, %v2282_v42  ;;  %v7359_v46 = vpop.f32.mrb[145].mxu1  ;;  %v7487_v29 = vpop.f32.mrb[149].mxu0  ;;  %7644 = vmatmul.mubr.msk.f32.gmra.mrb[250].mxu1 %vm710_vm0, %v3917_v23  ;;  %7772 = vmatmul.mubr.msk.f32.gmra.mrb[254].mxu0 %vm710_vm0, %v3920_v44  ;;  %3294 = vst.msk [vmem:[#allocation3 + $0x40] sm:$0xff] %vm710_vm0, %v3253_v17  ;;  %v3924_v23 = vld [vmem:[#allocation2 + $0x104] sm:$0xff] }
 0x28a   : > { %7646 = vmatprep.mubr.msk.f32.mxu1 %vm8098_vm1, %v8097_v3  ;;  %7774 = vmatprep.mubr.msk.f32.mxu0 %vm8098_vm1, %v8097_v3  ;;  %v2808_v48 = vld [vmem:[#allocation3 + $0x48] sm:$0xff]  ;;  %v2289_v42 = vld [vmem:[#allocation3 + $0x90] sm:$0xff] }
 0x28b   : > { %2769 = vst.msk [vmem:[#allocation3 + $0x58] sm:$0xff] %vm710_vm0, %v2728_v47  ;;  %v3254_v45 = vadd.f32 %v3086_v62, %v2808_v48 }
 0x28c   : > { %v2573_v9 = vpop.f32.mrb[146].mxu1  ;;  %v3106_v59 = vpop.f32.mrb[150].mxu0 }
 0x28d   : > { %v2729_v55 = vadd.f32 %v2573_v9, %v2283_v53  ;;  %v7362_v57 = vpop.f32.mrb[147].mxu1  ;;  %v7490_v31 = vpop.f32.mrb[151].mxu0  ;;  %7647 = vmatmul.mubr.msk.f32.gmra.mrb[252].mxu1 %vm710_vm0, %v3918_v28  ;;  %7775 = vmatmul.mubr.msk.f32.gmra.mrb[0].mxu0 %vm710_vm0, %v3921_v54  ;;  %3295 = vst.msk [vmem:[#allocation3 + $0x48] sm:$0xff] %vm710_vm0, %v3254_v45  ;;  %v3925_v28 = vld [vmem:[#allocation2 + $0x10c] sm:$0xff] }
 0x28e   : > { %7649 = vmatprep.mubr.msk.f32.mxu1 %vm8098_vm1, %v8097_v3  ;;  %7777 = vmatprep.mubr.msk.f32.mxu0 %vm8098_vm1, %v8097_v3  ;;  %v2809_v50 = vld [vmem:[#allocation3 + $0x50] sm:$0xff]  ;;  %v2290_v53 = vld [vmem:[#allocation3 + $0x98] sm:$0xff] }
 0x28f   : > { %2770 = vst.msk [vmem:[#allocation3 + $0x60] sm:$0xff] %vm710_vm0, %v2729_v55  ;;  %v3255_v58 = vadd.f32 %v3091_v26, %v2809_v50 }
 0x290   : > { %v2578_v19 = vpop.f32.mrb[148].mxu1  ;;  %v3111_v11 = vpop.f32.mrb[152].mxu0 }
 0x291   : > { %v2730_v1 = vadd.f32 %v2578_v19, %v2284_v49  ;;  %v7365_v56 = vpop.f32.mrb[149].mxu1  ;;  %v7493_v33 = vpop.f32.mrb[153].mxu0  ;;  %7650 = vmatmul.mubr.msk.f32.gmra.mrb[254].mxu1 %vm710_vm0, %v3919_v34  ;;  %7778 = vmatmul.mubr.msk.f32.gmra.mrb[2].mxu0 %vm710_vm0, %v3922_v63  ;;  %3296 = vst.msk [vmem:[#allocation3 + $0x50] sm:$0xff] %vm710_vm0, %v3255_v58  ;;  %v3926_v34 = vld [vmem:[#allocation2 + $0x114] sm:$0xff] }
 0x292   : > { %7652 = vmatprep.mubr.msk.f32.mxu1 %vm8098_vm1, %v8097_v3  ;;  %7780 = vmatprep.mubr.msk.f32.mxu0 %vm8098_vm1, %v8097_v3  ;;  %v2810_v4 = vld [vmem:[#allocation3 + $0x58] sm:$0xff]  ;;  %v2291_v49 = vld [vmem:[#allocation3 + $0xa0] sm:$0xff] }
 0x293   : > { %2771 = vst.msk [vmem:[#allocation3 + $0x68] sm:$0xff] %vm710_vm0, %v2730_v1  ;;  %v3256_v6 = vadd.f32 %v3096_v40, %v2810_v4 }
 0x294   : > { %v2583_v51 = vpop.f32.mrb[150].mxu1  ;;  %v3116_v21 = vpop.f32.mrb[154].mxu0 }
 0x295   : > { %v2731_v61 = vadd.f32 %v2583_v51, %v2285_v8  ;;  %v7368_v12 = vpop.f32.mrb[151].mxu1  ;;  %v7496_v41 = vpop.f32.mrb[155].mxu0  ;;  %7653 = vmatmul.mubr.msk.f32.gmra.mrb[0].mxu1 %vm710_vm0, %v3920_v44  ;;  %7781 = vmatmul.mubr.msk.f32.gmra.mrb[4].mxu0 %vm710_vm0, %v3923_v10  ;;  %3297 = vst.msk [vmem:[#allocation3 + $0x58] sm:$0xff] %vm710_vm0, %v3256_v6  ;;  %v3927_v44 = vld [vmem:[#allocation2 + $0x11c] sm:$0xff] }
 0x296   : > { %7655 = vmatprep.mubr.msk.f32.mxu1 %vm8098_vm1, %v8097_v3  ;;  %7783 = vmatprep.mubr.msk.f32.mxu0 %vm8098_vm1, %v8097_v3  ;;  %v2811_v52 = vld [vmem:[#allocation3 + $0x60] sm:$0xff]  ;;  %v2292_v8 = vld [vmem:[#allocation3 + $0xa8] sm:$0xff] }
 0x297   : > { %2772 = vst.msk [vmem:[#allocation3 + $0x70] sm:$0xff] %vm710_vm0, %v2731_v61  ;;  %v3257_v14 = vadd.f32 %v3101_v7, %v2811_v52 }
 0x298   : > { %v2588_v13 = vpop.f32.mrb[152].mxu1  ;;  %v3121_v62 = vpop.f32.mrb[156].mxu0 }
 0x299   : > { %v2732_v18 = vadd.f32 %v2588_v13, %v2286_v16  ;;  %v7371_v60 = vpop.f32.mrb[153].mxu1  ;;  %v7499_v35 = vpop.f32.mrb[157].mxu0  ;;  %7656 = vmatmul.mubr.msk.f32.gmra.mrb[2].mxu1 %vm710_vm0, %v3921_v54  ;;  %7784 = vmatmul.mubr.msk.f32.gmra.mrb[6].mxu0 %vm710_vm0, %v3924_v23  ;;  %3298 = vst.msk [vmem:[#allocation3 + $0x60] sm:$0xff] %vm710_vm0, %v3257_v14  ;;  %v3928_v54 = vld [vmem:[#allocation2 + $0x124] sm:$0xff] }
 0x29a   : > { %7658 = vmatprep.mubr.msk.f32.mxu1 %vm8098_vm1, %v8097_v3  ;;  %7786 = vmatprep.mubr.msk.f32.mxu0 %vm8098_vm1, %v8097_v3  ;;  %v2812_v20 = vld [vmem:[#allocation3 + $0x68] sm:$0xff]  ;;  %v2293_v16 = vld [vmem:[#allocation3 + $0xb0] sm:$0xff] }
 0x29b   : > { %2773 = vst.msk [vmem:[#allocation3 + $0x78] sm:$0xff] %vm710_vm0, %v2732_v18  ;;  %v3258_v22 = vadd.f32 %v3106_v59, %v2812_v20 }
 0x29c   : > { %v2593_v24 = vpop.f32.mrb[154].mxu1  ;;  %v3126_v26 = vpop.f32.mrb[158].mxu0 }
 0x29d   : > { %v2733_v25 = vadd.f32 %v2593_v24, %v2287_v0  ;;  %v7374_v15 = vpop.f32.mrb[155].mxu1  ;;  %v7502_v39 = vpop.f32.mrb[159].mxu0  ;;  %7659 = vmatmul.mubr.msk.f32.gmra.mrb[4].mxu1 %vm710_vm0, %v3922_v63  ;;  %7787 = vmatmul.mubr.msk.f32.gmra.mrb[8].mxu0 %vm710_vm0, %v3925_v28  ;;  %3299 = vst.msk [vmem:[#allocation3 + $0x68] sm:$0xff] %vm710_vm0, %v3258_v22  ;;  %v3929_v63 = vld [vmem:[#allocation2 + $0x12c] sm:$0xff] }
 0x29e   : > { %7661 = vmatprep.mubr.msk.f32.mxu1 %vm8098_vm1, %v8097_v3  ;;  %7789 = vmatprep.mubr.msk.f32.mxu0 %vm8098_vm1, %v8097_v3  ;;  %v2813_v30 = vld [vmem:[#allocation3 + $0x70] sm:$0xff]  ;;  %v2294_v0 = vld [vmem:[#allocation3 + $0xb8] sm:$0xff] }
 0x29f   : > { %2774 = vst.msk [vmem:[#allocation3 + $0x80] sm:$0xff] %vm710_vm0, %v2733_v25  ;;  %v3259_v2 = vadd.f32 %v3111_v11, %v2813_v30  ;;  %v3933_v30 = vld [vmem:[#allocation2 + $0x14c] sm:$0xff] }
 0x2a0   : > { %v2598_v32 = vpop.f32.mrb[156].mxu1  ;;  %v3131_v40 = vpop.f32.mrb[160].mxu0 }
 0x2a1   : > { %v2734_v5 = vadd.f32 %v2598_v32, %v2288_v36  ;;  %v7377_v27 = vpop.f32.mrb[157].mxu1  ;;  %v7505_v43 = vpop.f32.mrb[161].mxu0  ;;  %7662 = vmatmul.mubr.msk.f32.gmra.mrb[6].mxu1 %vm710_vm0, %v3923_v10  ;;  %7790 = vmatmul.mubr.msk.f32.gmra.mrb[10].mxu0 %vm710_vm0, %v3926_v34  ;;  %3300 = vst.msk [vmem:[#allocation3 + $0x70] sm:$0xff] %vm710_vm0, %v3259_v2  ;;  %v3930_v10 = vld [vmem:[#allocation2 + $0x134] sm:$0xff] }
 0x2a2   : > { %7664 = vmatprep.mubr.msk.f32.mxu1 %vm8098_vm1, %v8097_v3  ;;  %7792 = vmatprep.mubr.msk.f32.mxu0 %vm8098_vm1, %v8097_v3  ;;  %v2814_v37 = vld [vmem:[#allocation3 + $0x78] sm:$0xff]  ;;  %v2295_v32 = vld [vmem:[#allocation3 + $0xc0] sm:$0xff] }
 0x2a3   : > { %2775 = vst.msk [vmem:[#allocation3 + $0x88] sm:$0xff] %vm710_vm0, %v2734_v5  ;;  %v3260_v17 = vadd.f32 %v3116_v21, %v2814_v37  ;;  %v3934_v37 = vld [vmem:[#allocation2 + $0x154] sm:$0xff] }
 0x2a4   : > { %v2603_v38 = vpop.f32.mrb[158].mxu1  ;;  %v3136_v7 = vpop.f32.mrb[162].mxu0 }
 0x2a5   : > { %v2735_v47 = vadd.f32 %v2603_v38, %v2289_v42  ;;  %v7380_v46 = vpop.f32.mrb[159].mxu1  ;;  %v7508_v29 = vpop.f32.mrb[163].mxu0  ;;  %7665 = vmatmul.mubr.msk.f32.gmra.mrb[8].mxu1 %vm710_vm0, %v3924_v23  ;;  %7793 = vmatmul.mubr.msk.f32.gmra.mrb[12].mxu0 %vm710_vm0, %v3927_v44  ;;  %3301 = vst.msk [vmem:[#allocation3 + $0x78] sm:$0xff] %vm710_vm0, %v3260_v17  ;;  %v3931_v23 = vld [vmem:[#allocation2 + $0x13c] sm:$0xff] }
 0x2a6   : > { %7667 = vmatprep.mubr.msk.f32.mxu1 %vm8098_vm1, %v8097_v3  ;;  %7795 = vmatprep.mubr.msk.f32.mxu0 %vm8098_vm1, %v8097_v3  ;;  %v2815_v48 = vld [vmem:[#allocation3 + $0x80] sm:$0xff]  ;;  %v2296_v38 = vld [vmem:[#allocation3 + $0xc8] sm:$0xff] }
 0x2a7   : > { %2776 = vst.msk [vmem:[#allocation3 + $0x90] sm:$0xff] %vm710_vm0, %v2735_v47  ;;  %v3261_v45 = vadd.f32 %v3121_v62, %v2815_v48  ;;  %v3935_v48 = vld [vmem:[#allocation2 + $0x15c] sm:$0xff] }
 0x2a8   : > { %v2608_v9 = vpop.f32.mrb[160].mxu1  ;;  %v3141_v59 = vpop.f32.mrb[164].mxu0 }
 0x2a9   : > { %v2736_v55 = vadd.f32 %v2608_v9, %v2290_v53  ;;  %v7383_v57 = vpop.f32.mrb[161].mxu1  ;;  %v7511_v31 = vpop.f32.mrb[165].mxu0  ;;  %7668 = vmatmul.mubr.msk.f32.gmra.mrb[10].mxu1 %vm710_vm0, %v3925_v28  ;;  %7796 = vmatmul.mubr.msk.f32.gmra.mrb[14].mxu0 %vm710_vm0, %v3928_v54  ;;  %3302 = vst.msk [vmem:[#allocation3 + $0x80] sm:$0xff] %vm710_vm0, %v3261_v45  ;;  %v3932_v28 = vld [vmem:[#allocation2 + $0x144] sm:$0xff] }
 0x2aa   : > { %7670 = vmatprep.mubr.msk.f32.mxu1 %vm8098_vm1, %v8097_v3  ;;  %7798 = vmatprep.mubr.msk.f32.mxu0 %vm8098_vm1, %v8097_v3  ;;  %v2816_v50 = vld [vmem:[#allocation3 + $0x88] sm:$0xff]  ;;  %v2297_v9 = vld [vmem:[#allocation3 + $0xd0] sm:$0xff] }
 0x2ab   : > { %2777 = vst.msk [vmem:[#allocation3 + $0x98] sm:$0xff] %vm710_vm0, %v2736_v55  ;;  %v3262_v58 = vadd.f32 %v3126_v26, %v2816_v50  ;;  %v3936_v50 = vld [vmem:[#allocation2 + $0x164] sm:$0xf] }
 0x2ac   : > { %v2613_v19 = vpop.f32.mrb[162].mxu1  ;;  %v3146_v11 = vpop.f32.mrb[166].mxu0 }
 0x2ad   : > { %v2737_v1 = vadd.f32 %v2613_v19, %v2291_v49  ;;  %v7386_v56 = vpop.f32.mrb[163].mxu1  ;;  %v7514_v33 = vpop.f32.mrb[167].mxu0  ;;  %7671 = vmatmul.mubr.msk.f32.gmra.mrb[12].mxu1 %vm710_vm0, %v3926_v34  ;;  %7799 = vmatmul.mubr.msk.f32.gmra.mrb[16].mxu0 %vm710_vm0, %v3929_v63  ;;  %3303 = vst.msk [vmem:[#allocation3 + $0x88] sm:$0xff] %vm710_vm0, %v3262_v58  ;;  %v2298_v19 = vld [vmem:[#allocation3 + $0xd8] sm:$0xff] }
 0x2ae   : > { %7673 = vmatprep.mubr.msk.f32.mxu1 %vm8098_vm1, %v8097_v3  ;;  %7801 = vmatprep.mubr.msk.f32.mxu0 %vm8098_vm1, %v8097_v3  ;;  %v2817_v4 = vld [vmem:[#allocation3 + $0x90] sm:$0xff] }
 0x2af   : > { %2778 = vst.msk [vmem:[#allocation3 + $0xa0] sm:$0xff] %vm710_vm0, %v2737_v1  ;;  %v3263_v6 = vadd.f32 %v3131_v40, %v2817_v4  ;;  %v3408_v4 = vld [vmem:[#allocation2 + $0x154] sm:$0xf] }
 0x2b0   : > { %v2618_v51 = vpop.f32.mrb[164].mxu1  ;;  %v3151_v21 = vpop.f32.mrb[168].mxu0 }
 0x2b1   : > { %v2738_v61 = vadd.f32 %v2618_v51, %v2292_v8  ;;  %v7389_v12 = vpop.f32.mrb[165].mxu1  ;;  %v7517_v41 = vpop.f32.mrb[169].mxu0  ;;  %7674 = vmatmul.mubr.msk.f32.gmra.mrb[14].mxu1 %vm710_vm0, %v3927_v44  ;;  %7802 = vmatmul.mubr.msk.f32.gmra.mrb[18].mxu0 %vm710_vm0, %v3930_v10  ;;  %3304 = vst.msk [vmem:[#allocation3 + $0x90] sm:$0xff] %vm710_vm0, %v3263_v6  ;;  %v2299_v51 = vld [vmem:[#allocation3 + $0xe0] sm:$0xff] }
 0x2b2   : > { %7676 = vmatprep.mubr.msk.f32.mxu1 %vm8098_vm1, %v8097_v3  ;;  %7804 = vmatprep.mubr.msk.f32.mxu0 %vm8098_vm1, %v8097_v3  ;;  %v2818_v52 = vld [vmem:[#allocation3 + $0x98] sm:$0xff] }
 0x2b3   : > { %2779 = vst.msk [vmem:[#allocation3 + $0xa8] sm:$0xff] %vm710_vm0, %v2738_v61  ;;  %v3264_v14 = vadd.f32 %v3136_v7, %v2818_v52  ;;  %v4952_v61 = vld [vmem:[#allocation2 + $0x26] sm:$0xff] }
 0x2b4   : > { %v2623_v13 = vpop.f32.mrb[166].mxu1  ;;  %v3156_v62 = vpop.f32.mrb[170].mxu0 }
 0x2b5   : > { %v2739_v18 = vadd.f32 %v2623_v13, %v2293_v16  ;;  %v7392_v60 = vpop.f32.mrb[167].mxu1  ;;  %v7520_v35 = vpop.f32.mrb[171].mxu0  ;;  %7677 = vmatmul.mubr.msk.f32.gmra.mrb[16].mxu1 %vm710_vm0, %v3928_v54  ;;  %7805 = vmatmul.mubr.msk.f32.gmra.mrb[20].mxu0 %vm710_vm0, %v3931_v23  ;;  %3305 = vst.msk [vmem:[#allocation3 + $0x98] sm:$0xff] %vm710_vm0, %v3264_v14  ;;  %v2300_v13 = vld [vmem:[#allocation3 + $0xe8] sm:$0xff] }
 0x2b6   : > { %7679 = vmatprep.mubr.msk.f32.mxu1 %vm8098_vm1, %v8097_v3  ;;  %7807 = vmatprep.mubr.msk.f32.mxu0 %vm8098_vm1, %v8097_v3  ;;  %v2819_v20 = vld [vmem:[#allocation3 + $0xa0] sm:$0xff] }
 0x2b7   : > { %2780 = vst.msk [vmem:[#allocation3 + $0xb0] sm:$0xff] %vm710_vm0, %v2739_v18  ;;  %v3265_v22 = vadd.f32 %v3141_v59, %v2819_v20  ;;  %v4424_v18 = vld [vmem:[#allocation2 + $0x25] sm:$0xff]  ;;  %v4953_v60 = vld [vmem:[#allocation2 + $0x2e] sm:$0xff] }
 0x2b8   : > { %v2628_v24 = vpop.f32.mrb[168].mxu1  ;;  %v3161_v26 = vpop.f32.mrb[172].mxu0 }
 0x2b9   : > { %v2740_v25 = vadd.f32 %v2628_v24, %v2294_v0  ;;  %v7395_v15 = vpop.f32.mrb[169].mxu1  ;;  %v7523_v39 = vpop.f32.mrb[173].mxu0  ;;  %7680 = vmatmul.mubr.msk.f32.gmra.mrb[18].mxu1 %vm710_vm0, %v3929_v63  ;;  %7808 = vmatmul.mubr.msk.f32.gmra.mrb[22].mxu0 %vm710_vm0, %v3932_v28  ;;  %3306 = vst.msk [vmem:[#allocation3 + $0xa0] sm:$0xff] %vm710_vm0, %v3265_v22 }
 0x2ba   : > { %7682 = vmatprep.mubr.msk.f32.mxu1 %vm8098_vm1, %v8097_v3  ;;  %7810 = vmatprep.mubr.msk.f32.mxu0 %vm8098_vm1, %v8097_v3  ;;  %v2820_v2 = vld [vmem:[#allocation3 + $0xa8] sm:$0xff]  ;;  %v4425_v15 = vld [vmem:[#allocation2 + $0x2d] sm:$0xff] }
 0x2bb   : > { %2781 = vst.msk [vmem:[#allocation3 + $0xb8] sm:$0xff] %vm710_vm0, %v2740_v25  ;;  %v3266_v36 = vadd.f32 %v3146_v11, %v2820_v2  ;;  %v4954_v39 = vld [vmem:[#allocation2 + $0x36] sm:$0xff] }
 0x2bc   : > { %v2633_v40 = vpop.f32.mrb[170].mxu1  ;;  %v3166_v34 = vpop.f32.mrb[174].mxu0 }
 0x2bd   : > { %v2741_v5 = vadd.f32 %v2633_v40, %v2295_v32  ;;  %v7398_v27 = vpop.f32.mrb[171].mxu1  ;;  %v7526_v43 = vpop.f32.mrb[175].mxu0  ;;  %7683 = vmatmul.mubr.msk.f32.gmra.mrb[20].mxu1 %vm710_vm0, %v3930_v10  ;;  %7811 = vmatmul.mubr.msk.f32.gmra.mrb[24].mxu0 %vm710_vm0, %v3933_v30  ;;  %3307 = vst.msk [vmem:[#allocation3 + $0xa8] sm:$0xff] %vm710_vm0, %v3266_v36 }
 0x2be   : > { %7685 = vmatprep.mubr.msk.f32.mxu1 %vm8098_vm1, %v8097_v3  ;;  %7813 = vmatprep.mubr.msk.f32.mxu0 %vm8098_vm1, %v8097_v3  ;;  %v2821_v17 = vld [vmem:[#allocation3 + $0xb0] sm:$0xff]  ;;  %v4426_v43 = vld [vmem:[#allocation2 + $0x35] sm:$0xff] }
 0x2bf   : > { %2782 = vst.msk [vmem:[#allocation3 + $0xc0] sm:$0xff] %vm710_vm0, %v2741_v5  ;;  %v3267_v42 = vadd.f32 %v3151_v21, %v2821_v17 }
 0x2c0   : > { %v2638_v7 = vpop.f32.mrb[172].mxu1  ;;  %v3171_v44 = vpop.f32.mrb[176].mxu0 }
 0x2c1   : > { %v2742_v47 = vadd.f32 %v2638_v7, %v2296_v38  ;;  %v7401_v46 = vpop.f32.mrb[173].mxu1  ;;  %v7529_v29 = vpop.f32.mrb[177].mxu0  ;;  %7686 = vmatmul.mubr.msk.f32.gmra.mrb[22].mxu1 %vm710_vm0, %v3931_v23  ;;  %7814 = vmatmul.mubr.msk.f32.gmra.mrb[26].mxu0 %vm710_vm0, %v3934_v37  ;;  %3308 = vst.msk [vmem:[#allocation3 + $0xb0] sm:$0xff] %vm710_vm0, %v3267_v42  ;;  %v4955_v37 = vld [vmem:[#allocation2 + $0x3e] sm:$0xff] }
 0x2c2   : > { %7688 = vmatprep.mubr.msk.f32.mxu1 %vm8098_vm1, %v8097_v3  ;;  %7816 = vmatprep.mubr.msk.f32.mxu0 %vm8098_vm1, %v8097_v3  ;;  %v2822_v45 = vld [vmem:[#allocation3 + $0xb8] sm:$0xff] }
 0x2c3   : > { %2783 = vst.msk [vmem:[#allocation3 + $0xc8] sm:$0xff] %vm710_vm0, %v2742_v47  ;;  %v3268_v53 = vadd.f32 %v3156_v62, %v2822_v45  ;;  %v2303_v47 = vld [vmem:[#allocation3 + $0x100] sm:$0xff]  ;;  %v4956_v45 = vld [vmem:[#allocation2 + $0x46] sm:$0xff] }
 0x2c4   : > { %v2643_v59 = vpop.f32.mrb[174].mxu1  ;;  %v3176_v54 = vpop.f32.mrb[178].mxu0 }
 0x2c5   : > { %v2743_v55 = vadd.f32 %v2643_v59, %v2297_v9  ;;  %v7404_v57 = vpop.f32.mrb[175].mxu1  ;;  %v7532_v31 = vpop.f32.mrb[179].mxu0  ;;  %7689 = vmatmul.mubr.msk.f32.gmra.mrb[24].mxu1 %vm710_vm0, %v3932_v28  ;;  %7817 = vmatmul.mubr.msk.f32.gmra.mrb[28].mxu0 %vm710_vm0, %v3935_v48  ;;  %3309 = vst.msk [vmem:[#allocation3 + $0xb8] sm:$0xff] %vm710_vm0, %v3268_v53  ;;  %v4427_v48 = vld [vmem:[#allocation2 + $0x3d] sm:$0xff] }
 0x2c6   : > { %7691 = vmatprep.mubr.msk.f32.mxu1 %vm8098_vm1, %v8097_v3  ;;  %7819 = vmatprep.mubr.msk.f32.mxu0 %vm8098_vm1, %v8097_v3  ;;  %v2823_v58 = vld [vmem:[#allocation3 + $0xc0] sm:$0xff]  ;;  %v2304_v57 = vld [vmem:[#allocation3 + $0x108] sm:$0xff] }
 0x2c7   : > { %2784 = vst.msk [vmem:[#allocation3 + $0xd0] sm:$0xff] %vm710_vm0, %v2743_v55  ;;  %v3269_v49 = vadd.f32 %v3161_v26, %v2823_v58  ;;  %v2301_v26 = vld [vmem:[#allocation3 + $0xf0] sm:$0xff] }
 0x2c8   : > { %v2648_v11 = vpop.f32.mrb[176].mxu1  ;;  %v3181_v63 = vpop.f32.mrb[180].mxu0  ;;  %v4428_v58 = vld [vmem:[#allocation2 + $0x45] sm:$0xff] }
 0x2c9   : > { %v2744_v1 = vadd.f32 %v2648_v11, %v2298_v19  ;;  %v7407_v56 = vpop.f32.mrb[177].mxu1  ;;  %v7535_v33 = vpop.f32.mrb[181].mxu0  ;;  %7692 = vmatmul.mubr.msk.f32.gmra.mrb[26].mxu1 %vm710_vm0, %v3933_v30  ;;  %7820 = vmatmul.mubr.msk.f32.gmra.mrb[30].mxu0 %vm710_vm0, %v3936_v50  ;;  %3310 = vst.msk [vmem:[#allocation3 + $0xc0] sm:$0xff] %vm710_vm0, %v3269_v49  ;;  %v4957_v49 = vld [vmem:[#allocation2 + $0x4e] sm:$0xff] }
 0x2ca   : > { %7694 = vmatprep.mubr.msk.f32.mxu1 %vm8098_vm1, %v8097_v3  ;;  %7949 = vmatprep.mubr.msk.f32.mxu0 %vm8098_vm1, %v8097_v3  ;;  %v2824_v6 = vld [vmem:[#allocation3 + $0xc8] sm:$0xff]  ;;  %v2305_v33 = vld [vmem:[#allocation3 + $0x110] sm:$0xff] }
 0x2cb   : > { %2785 = vst.msk [vmem:[#allocation3 + $0xd8] sm:$0xff] %vm710_vm0, %v2744_v1  ;;  %v3270_v8 = vadd.f32 %v3166_v34, %v2824_v6  ;;  %v2302_v34 = vld [vmem:[#allocation3 + $0xf8] sm:$0xff] }
 0x2cc   : > { %v2653_v21 = vpop.f32.mrb[178].mxu1  ;;  %v3186_v10 = vpop.f32.mrb[182].mxu0 }
 0x2cd   : > { %v2745_v12 = vadd.f32 %v2653_v21, %v2299_v51  ;;  %v7410_v41 = vpop.f32.mrb[179].mxu1  ;;  %v7538_v52 = vpop.f32.mrb[183].mxu0  ;;  %7695 = vmatmul.mubr.msk.f32.gmra.mrb[28].mxu1 %vm710_vm0, %v3408_v4  ;;  %7950 = vmatmul.mubr.msk.f32.vlgmr.msra.gmra.mrb[32].mxu0 %vm710_vm0, %v4952_v61  ;;  %3311 = vst.msk [vmem:[#allocation3 + $0xc8] sm:$0xff] %vm710_vm0, %v3270_v8  ;;  %v4429_v8 = vld [vmem:[#allocation2 + $0x4d] sm:$0xff]  ;;  %v4958_v51 = vld [vmem:[#allocation2 + $0x56] sm:$0xff] }
 0x2ce   : > { %7824 = vmatprep.mubr.msk.f32.mxu1 %vm8098_vm1, %v8097_v3  ;;  %7952 = vmatprep.mubr.msk.f32.mxu0 %vm8098_vm1, %v8097_v3  ;;  %v2825_v14 = vld [vmem:[#allocation3 + $0xd0] sm:$0xff]  ;;  %v2306_v52 = vld [vmem:[#allocation3 + $0x118] sm:$0xff] }
 0x2cf   : > { %2786 = vst.msk [vmem:[#allocation3 + $0xe0] sm:$0xff] %vm710_vm0, %v2745_v12  ;;  %v3271_v16 = vadd.f32 %v3171_v44, %v2825_v14 }
 0x2d0   : > { %v2658_v62 = vpop.f32.mrb[180].mxu1  ;;  %v3191_v23 = vpop.f32.mrb[184].mxu0 }
 0x2d1   : > { %v2746_v35 = vadd.f32 %v2658_v62, %v2300_v13  ;;  %v7413_v20 = vpop.f32.mrb[181].mxu1  ;;  %v7541_v22 = vpop.f32.mrb[185].mxu0  ;;  %7825 = vmatmul.mubr.msk.f32.vlgmr.msra.gmra.mrb[30].mxu1 %vm710_vm0, %v4424_v18  ;;  %7953 = vmatmul.mubr.msk.f32.gmra.mrb[34].mxu0 %vm710_vm0, %v4953_v60  ;;  %3312 = vst.msk [vmem:[#allocation3 + $0xd0] sm:$0xff] %vm710_vm0, %v3271_v16  ;;  %v4430_v13 = vld [vmem:[#allocation2 + $0x55] sm:$0xff]  ;;  %v4959_v62 = vld [vmem:[#allocation2 + $0x5e] sm:$0xff] }
 0x2d2   : > { %7827 = vmatprep.mubr.msk.f32.mxu1 %vm8098_vm1, %v8097_v3  ;;  %7955 = vmatprep.mubr.msk.f32.mxu0 %vm8098_vm1, %v8097_v3  ;;  %v2826_v0 = vld [vmem:[#allocation3 + $0xd8] sm:$0xff]  ;;  %v2307_v22 = vld [vmem:[#allocation3 + $0x120] sm:$0xff] }
 0x2d3   : > { %2787 = vst.msk [vmem:[#allocation3 + $0xe8] sm:$0xff] %vm710_vm0, %v2746_v35  ;;  %v3272_v24 = vadd.f32 %v3176_v54, %v2826_v0 }
 0x2d4   : > { %v2663_v28 = vpop.f32.mrb[182].mxu1  ;;  %v3196_v25 = vpop.f32.mrb[186].mxu0 }
 0x2d5   : > { %v2747_v30 = vadd.f32 %v2663_v28, %v2301_v26  ;;  %v7416_v2 = vpop.f32.mrb[183].mxu1  ;;  %v7544_v36 = vpop.f32.mrb[187].mxu0  ;;  %7828 = vmatmul.mubr.msk.f32.gmra.mrb[32].mxu1 %vm710_vm0, %v4425_v15  ;;  %7956 = vmatmul.mubr.msk.f32.gmra.mrb[36].mxu0 %vm710_vm0, %v4954_v39  ;;  %3313 = vst.msk [vmem:[#allocation3 + $0xd8] sm:$0xff] %vm710_vm0, %v3272_v24  ;;  %v4431_v26 = vld [vmem:[#allocation2 + $0x5d] sm:$0xff]  ;;  %v4960_v28 = vld [vmem:[#allocation2 + $0x66] sm:$0xff] }
 0x2d6   : > { %7830 = vmatprep.mubr.msk.f32.mxu1 %vm8098_vm1, %v8097_v3  ;;  %7958 = vmatprep.mubr.msk.f32.mxu0 %vm8098_vm1, %v8097_v3  ;;  %v2827_v32 = vld [vmem:[#allocation3 + $0xe0] sm:$0xff]  ;;  %v2308_v36 = vld [vmem:[#allocation3 + $0x128] sm:$0xff] }
 0x2d7   : > { %2788 = vst.msk [vmem:[#allocation3 + $0xf0] sm:$0xff] %vm710_vm0, %v2747_v30  ;;  %v3273_v40 = vadd.f32 %v3181_v63, %v2827_v32 }
 0x2d8   : > { %v2668_v5 = vpop.f32.mrb[184].mxu1  ;;  %v3201_v27 = vpop.f32.mrb[188].mxu0 }
 0x2d9   : > { %v2748_v17 = vadd.f32 %v2668_v5, %v2302_v34  ;;  %v7419_v42 = vpop.f32.mrb[185].mxu1  ;;  %v7547_v38 = vpop.f32.mrb[189].mxu0  ;;  %7831 = vmatmul.mubr.msk.f32.gmra.mrb[34].mxu1 %vm710_vm0, %v4426_v43  ;;  %7959 = vmatmul.mubr.msk.f32.gmra.mrb[38].mxu0 %vm710_vm0, %v4955_v37  ;;  %3314 = vst.msk [vmem:[#allocation3 + $0xe0] sm:$0xff] %vm710_vm0, %v3273_v40  ;;  %v4432_v34 = vld [vmem:[#allocation2 + $0x65] sm:$0xff]  ;;  %v4961_v5 = vld [vmem:[#allocation2 + $0x6e] sm:$0xff] }
 0x2da   : > { %7833 = vmatprep.mubr.msk.f32.mxu1 %vm8098_vm1, %v8097_v3  ;;  %7961 = vmatprep.mubr.msk.f32.mxu0 %vm8098_vm1, %v8097_v3  ;;  %v2828_v7 = vld [vmem:[#allocation3 + $0xe8] sm:$0xff]  ;;  %v2309_v38 = vld [vmem:[#allocation3 + $0x130] sm:$0xff] }
 0x2db   : > { %2789 = vst.msk [vmem:[#allocation3 + $0xf8] sm:$0xff] %vm710_vm0, %v2748_v17  ;;  %v3274_v44 = vadd.f32 %v3186_v10, %v2828_v7 }
 0x2dc   : > { %v2673_v46 = vpop.f32.mrb[186].mxu1  ;;  %v3206_v29 = vpop.f32.mrb[190].mxu0 }
 0x2dd   : > { %v2749_v53 = vadd.f32 %v2673_v46, %v2303_v47  ;;  %v7422_v9 = vpop.f32.mrb[187].mxu1  ;;  %v7550_v59 = vpop.f32.mrb[191].mxu0  ;;  %7834 = vmatmul.mubr.msk.f32.gmra.mrb[36].mxu1 %vm710_vm0, %v4427_v48  ;;  %7962 = vmatmul.mubr.msk.f32.gmra.mrb[40].mxu0 %vm710_vm0, %v4956_v45  ;;  %3315 = vst.msk [vmem:[#allocation3 + $0xe8] sm:$0xff] %vm710_vm0, %v3274_v44  ;;  %v4433_v44 = vld [vmem:[#allocation2 + $0x6d] sm:$0xff]  ;;  %v4962_v47 = vld [vmem:[#allocation2 + $0x76] sm:$0xff] }
 0x2de   : > { %7836 = vmatprep.mubr.msk.f32.mxu1 %vm8098_vm1, %v8097_v3  ;;  %7964 = vmatprep.mubr.msk.f32.mxu0 %vm8098_vm1, %v8097_v3  ;;  %v2829_v54 = vld [vmem:[#allocation3 + $0xf0] sm:$0xff]  ;;  %v2310_v59 = vld [vmem:[#allocation3 + $0x138] sm:$0xff] }
 0x2df   : > { %2790 = vst.msk [vmem:[#allocation3 + $0x100] sm:$0xff] %vm710_vm0, %v2749_v53  ;;  %v3275_v55 = vadd.f32 %v3191_v23, %v2829_v54 }
 0x2e0   : > { %v2678_v31 = vpop.f32.mrb[188].mxu1  ;;  %v3211_v50 = vpop.f32.mrb[192].mxu0 }
 0x2e1   : > { %v2750_v19 = vadd.f32 %v2678_v31, %v2304_v57  ;;  %v7425_v11 = vpop.f32.mrb[189].mxu1  ;;  %v7553_v63 = vpop.f32.mrb[193].mxu0  ;;  %7837 = vmatmul.mubr.msk.f32.gmra.mrb[38].mxu1 %vm710_vm0, %v4428_v58  ;;  %7965 = vmatmul.mubr.msk.f32.gmra.mrb[42].mxu0 %vm710_vm0, %v4957_v49  ;;  %3316 = vst.msk [vmem:[#allocation3 + $0xf0] sm:$0xff] %vm710_vm0, %v3275_v55  ;;  %v4434_v55 = vld [vmem:[#allocation2 + $0x75] sm:$0xff]  ;;  %v4963_v57 = vld [vmem:[#allocation2 + $0x7e] sm:$0xff] }
 0x2e2   : > { %7839 = vmatprep.mubr.msk.f32.mxu1 %vm8098_vm1, %v8097_v3  ;;  %7967 = vmatprep.mubr.msk.f32.mxu0 %vm8098_vm1, %v8097_v3  ;;  %v2830_v1 = vld [vmem:[#allocation3 + $0xf8] sm:$0xff]  ;;  %v2311_v63 = vld [vmem:[#allocation3 + $0x140] sm:$0xf] }
 0x2e3   : > { %2791 = vst.msk [vmem:[#allocation3 + $0x108] sm:$0xff] %vm710_vm0, %v2750_v19  ;;  %v3276_v56 = vadd.f32 %v3196_v25, %v2830_v1 }
 0x2e4   : > { %v2683_v4 = vpop.f32.mrb[190].mxu1  ;;  %v3216_v6 = vpop.f32.mrb[194].mxu0 }
 0x2e5   : > { %v2751_v21 = vadd.f32 %v2683_v4, %v2305_v33  ;;  %v7428_v10 = vpop.f32.mrb[191].mxu1  ;;  %v7556_v61 = vpop.f32.mrb[195].mxu0  ;;  %7840 = vmatmul.mubr.msk.f32.gmra.mrb[40].mxu1 %vm710_vm0, %v4429_v8  ;;  %7968 = vmatmul.mubr.msk.f32.gmra.mrb[44].mxu0 %vm710_vm0, %v4958_v51  ;;  %3317 = vst.msk [vmem:[#allocation3 + $0xf8] sm:$0xff] %vm710_vm0, %v3276_v56  ;;  %v4435_v33 = vld [vmem:[#allocation2 + $0x7d] sm:$0xff]  ;;  %v4964_v4 = vld [vmem:[#allocation2 + $0x86] sm:$0xff] }
 0x2e6   : > { %7842 = vmatprep.mubr.msk.f32.mxu1 %vm8098_vm1, %v8097_v3  ;;  %7970 = vmatprep.mubr.msk.f32.mxu0 %vm8098_vm1, %v8097_v3  ;;  %v2831_v12 = vld [vmem:[#allocation3 + $0x100] sm:$0xff] }
 0x2e7   : > { %2792 = vst.msk [vmem:[#allocation3 + $0x110] sm:$0xff] %vm710_vm0, %v2751_v21  ;;  %v3277_v41 = vadd.f32 %v3201_v27, %v2831_v12  ;;  %v3327_v61 = vld [vmem:[#allocation3] sm:$0xff] }
 0x2e8   : > { %v2688_v14 = vpop.f32.mrb[192].mxu1  ;;  %v3221_v16 = vpop.f32.mrb[196].mxu0 }
 0x2e9   : > { %v2752_v23 = vadd.f32 %v2688_v14, %v2306_v52  ;;  %v7431_v18 = vpop.f32.mrb[193].mxu1  ;;  %v7559_v60 = vpop.f32.mrb[197].mxu0  ;;  %7843 = vmatmul.mubr.msk.f32.gmra.mrb[42].mxu1 %vm710_vm0, %v4430_v13  ;;  %7971 = vmatmul.mubr.msk.f32.gmra.mrb[46].mxu0 %vm710_vm0, %v4959_v62  ;;  %3318 = vst.msk [vmem:[#allocation3 + $0x100] sm:$0xff] %vm710_vm0, %v3277_v41  ;;  %v4436_v52 = vld [vmem:[#allocation2 + $0x85] sm:$0xff]  ;;  %v4965_v14 = vld [vmem:[#allocation2 + $0x8e] sm:$0xff] }
 0x2ea   : > { %7845 = vmatprep.mubr.msk.f32.mxu1 %vm8098_vm1, %v8097_v3  ;;  %7973 = vmatprep.mubr.msk.f32.mxu0 %vm8098_vm1, %v8097_v3  ;;  %v2832_v35 = vld [vmem:[#allocation3 + $0x108] sm:$0xff] }
 0x2eb   : > { %2793 = vst.msk [vmem:[#allocation3 + $0x118] sm:$0xff] %vm710_vm0, %v2752_v23  ;;  %v3278_v20 = vadd.f32 %v3206_v29, %v2832_v35  ;;  %v3328_v60 = vld [vmem:[#allocation3 + $0x8] sm:$0xff] }
 0x2ec   : > { %v2693_v0 = vpop.f32.mrb[194].mxu1  ;;  %v3226_v24 = vpop.f32.mrb[198].mxu0 }
 0x2ed   : > { %v2753_v25 = vadd.f32 %v2693_v0, %v2307_v22  ;;  %v7434_v15 = vpop.f32.mrb[195].mxu1  ;;  %v7562_v39 = vpop.f32.mrb[199].mxu0  ;;  %7846 = vmatmul.mubr.msk.f32.gmra.mrb[44].mxu1 %vm710_vm0, %v4431_v26  ;;  %7974 = vmatmul.mubr.msk.f32.gmra.mrb[48].mxu0 %vm710_vm0, %v4960_v28  ;;  %3319 = vst.msk [vmem:[#allocation3 + $0x108] sm:$0xff] %vm710_vm0, %v3278_v20  ;;  %v4437_v22 = vld [vmem:[#allocation2 + $0x8d] sm:$0xff]  ;;  %v4966_v0 = vld [vmem:[#allocation2 + $0x96] sm:$0xff] }
 0x2ee   : > { %7848 = vmatprep.mubr.msk.f32.mxu1 %vm8098_vm1, %v8097_v3  ;;  %7976 = vmatprep.mubr.msk.f32.mxu0 %vm8098_vm1, %v8097_v3  ;;  %v2833_v30 = vld [vmem:[#allocation3 + $0x110] sm:$0xff] }
 0x2ef   : > { %2794 = vst.msk [vmem:[#allocation3 + $0x120] sm:$0xff] %vm710_vm0, %v2753_v25  ;;  %v3279_v2 = vadd.f32 %v3211_v50, %v2833_v30  ;;  %v3329_v39 = vld [vmem:[#allocation3 + $0x10] sm:$0xff] }
 0x2f0   : > { %v2698_v32 = vpop.f32.mrb[196].mxu1  ;;  %v3231_v40 = vpop.f32.mrb[200].mxu0 }
 0x2f1   : > { %v2754_v27 = vadd.f32 %v2698_v32, %v2308_v36  ;;  %v7437_v43 = vpop.f32.mrb[197].mxu1  ;;  %v7565_v37 = vpop.f32.mrb[201].mxu0  ;;  %7849 = vmatmul.mubr.msk.f32.gmra.mrb[46].mxu1 %vm710_vm0, %v4432_v34  ;;  %7977 = vmatmul.mubr.msk.f32.gmra.mrb[50].mxu0 %vm710_vm0, %v4961_v5  ;;  %3320 = vst.msk [vmem:[#allocation3 + $0x110] sm:$0xff] %vm710_vm0, %v3279_v2  ;;  %v4438_v36 = vld [vmem:[#allocation2 + $0x95] sm:$0xff]  ;;  %v4967_v32 = vld [vmem:[#allocation2 + $0x9e] sm:$0xff] }
 0x2f2   : > { %7851 = vmatprep.mubr.msk.f32.mxu1 %vm8098_vm1, %v8097_v3  ;;  %7979 = vmatprep.mubr.msk.f32.mxu0 %vm8098_vm1, %v8097_v3  ;;  %v2834_v17 = vld [vmem:[#allocation3 + $0x118] sm:$0xff] }
 0x2f3   : > { %2795 = vst.msk [vmem:[#allocation3 + $0x128] sm:$0xff] %vm710_vm0, %v2754_v27  ;;  %v3280_v42 = vadd.f32 %v3216_v6, %v2834_v17  ;;  %v3330_v37 = vld [vmem:[#allocation3 + $0x18] sm:$0xff] }
 0x2f4   : > { %v2703_v7 = vpop.f32.mrb[198].mxu1  ;;  %v3236_v46 = vpop.f32.mrb[202].mxu0 }
 0x2f5   : > { %v2755_v29 = vadd.f32 %v2703_v7, %v2309_v38  ;;  %v7440_v48 = vpop.f32.mrb[199].mxu1  ;;  %7852 = vmatmul.mubr.msk.f32.gmra.mrb[48].mxu1 %vm710_vm0, %v4433_v44  ;;  %7980 = vmatmul.mubr.msk.f32.gmra.mrb[52].mxu0 %vm710_vm0, %v4962_v47  ;;  %v7568_v45 = vpop.f32.mrb[203].mxu0  ;;  %3321 = vst.msk [vmem:[#allocation3 + $0x118] sm:$0xff] %vm710_vm0, %v3280_v42  ;;  %v4439_v38 = vld [vmem:[#allocation2 + $0x9d] sm:$0xff]  ;;  %v4968_v7 = vld [vmem:[#allocation2 + $0xa6] sm:$0xff] }
 0x2f6   : > { %7854 = vmatprep.mubr.msk.f32.mxu1 %vm8098_vm1, %v8097_v3  ;;  %7982 = vmatprep.mubr.msk.f32.mxu0 %vm8098_vm1, %v8097_v3  ;;  %v2835_v53 = vld [vmem:[#allocation3 + $0x120] sm:$0xff] }
 0x2f7   : > { %2796 = vst.msk [vmem:[#allocation3 + $0x130] sm:$0xff] %vm710_vm0, %v2755_v29  ;;  %v3281_v9 = vadd.f32 %v3221_v16, %v2835_v53  ;;  %v3331_v45 = vld [vmem:[#allocation3 + $0x20] sm:$0xff] }
 0x2f8   : > { %v2708_v54 = vpop.f32.mrb[200].mxu1  ;;  %v3241_v31 = vpop.f32.mrb[204].mxu0 }
 0x2f9   : > { %v2756_v50 = vadd.f32 %v2708_v54, %v2310_v59  ;;  %v7443_v58 = vpop.f32.mrb[201].mxu1  ;;  %7855 = vmatmul.mubr.msk.f32.gmra.mrb[50].mxu1 %vm710_vm0, %v4434_v55  ;;  %7983 = vmatmul.mubr.msk.f32.gmra.mrb[54].mxu0 %vm710_vm0, %v4963_v57  ;;  %v7571_v49 = vpop.f32.mrb[205].mxu0  ;;  %3322 = vst.msk [vmem:[#allocation3 + $0x120] sm:$0xff] %vm710_vm0, %v3281_v9  ;;  %v4440_v59 = vld [vmem:[#allocation2 + $0xa5] sm:$0xff]  ;;  %v4969_v54 = vld [vmem:[#allocation2 + $0xae] sm:$0xff] }
 0x2fa   : > { %7857 = vmatprep.mubr.msk.f32.mxu1 %vm8098_vm1, %v8097_v3  ;;  %7985 = vmatprep.mubr.msk.f32.mxu0 %vm8098_vm1, %v8097_v3  ;;  %v2836_v19 = vld [vmem:[#allocation3 + $0x128] sm:$0xff] }
 0x2fb   : > { %2797 = vst.msk [vmem:[#allocation3 + $0x138] sm:$0xff] %vm710_vm0, %v2756_v50  ;;  %v3282_v11 = vadd.f32 %v3226_v24, %v2836_v19  ;;  %v3332_v49 = vld [vmem:[#allocation3 + $0x28] sm:$0xff] }
 0x2fc   : > { %v2713_v1 = vpop.f32.mrb[202].mxu1  ;;  %v4097_v56 = vpop.f32.mrb[206].mxu0 }
 0x2fd   : > { %v2757_v6 = vadd.f32 %v2713_v1, %v2311_v63  ;;  %v7446_v8 = vpop.f32.mrb[203].mxu1  ;;  %v7701_v51 = vpop.f32.mrb[207].mxu0  ;;  %7858 = vmatmul.mubr.msk.f32.gmra.mrb[52].mxu1 %vm710_vm0, %v4435_v33  ;;  %7986 = vmatmul.mubr.msk.f32.gmra.mrb[56].mxu0 %vm710_vm0, %v4964_v4  ;;  %3323 = vst.msk [vmem:[#allocation3 + $0x128] sm:$0xff] %vm710_vm0, %v3282_v11  ;;  %v4441_v63 = vld [vmem:[#allocation2 + $0xad] sm:$0xff]  ;;  %v4970_v1 = vld [vmem:[#allocation2 + $0xb6] sm:$0xff] }
 0x2fe   : > { %7860 = vmatprep.mubr.msk.f32.mxu1 %vm8098_vm1, %v8097_v3  ;;  %7988 = vmatprep.mubr.msk.f32.mxu0 %vm8098_vm1, %v8097_v3  ;;  %v2837_v21 = vld [vmem:[#allocation3 + $0x130] sm:$0xff] }
 0x2ff   : > { %2798 = vst.msk [vmem:[#allocation3 + $0x140] sm:$0xf] %vm721_vm4, %v2757_v6  ;;  %v3283_v10 = vadd.f32 %v3231_v40, %v2837_v21  ;;  %v3333_v51 = vld [vmem:[#allocation3 + $0x30] sm:$0xff] }
 0x300   : > { %v3569_v12 = vpop.f32.mrb[204].mxu1  ;;  %v4102_v41 = vpop.f32.mrb[208].mxu0 }
 0x301   : > { %v3773_v16 = vadd.f32 %v3569_v12, %v3327_v61  ;;  %v7576_v13 = vpop.f32.mrb[205].mxu1  ;;  %v7704_v62 = vpop.f32.mrb[209].mxu0  ;;  %7861 = vmatmul.mubr.msk.f32.gmra.mrb[54].mxu1 %vm710_vm0, %v4436_v52  ;;  %7989 = vmatmul.mubr.msk.f32.gmra.mrb[58].mxu0 %vm710_vm0, %v4965_v14  ;;  %3324 = vst.msk [vmem:[#allocation3 + $0x130] sm:$0xff] %vm710_vm0, %v3283_v10  ;;  %v4442_v61 = vld [vmem:[#allocation2 + $0xb5] sm:$0xff]  ;;  %v4971_v12 = vld [vmem:[#allocation2 + $0xbe] sm:$0xff] }
 0x302   : > { %v2838_v23 = vld [vmem:[#allocation3 + $0x138] sm:$0xff]  ;;  %7863 = vmatprep.mubr.msk.f32.mxu1 %vm8098_vm1, %v8097_v3  ;;  %7991 = vmatprep.mubr.msk.f32.mxu0 %vm8098_vm1, %v8097_v3 }
 0x303   : > { %v3284_v18 = vadd.f32 %v3236_v46, %v2838_v23  ;;  %3814 = vst.msk [vmem:[#allocation3] sm:$0xff] %vm710_vm0, %v3773_v16  ;;  %v3334_v62 = vld [vmem:[#allocation3 + $0x38] sm:$0xff] }
 0x304   : > { %v3574_v35 = vpop.f32.mrb[206].mxu1  ;;  %v4107_v20 = vpop.f32.mrb[210].mxu0 }
 0x305   : > { %3325 = vst.msk [vmem:[#allocation3 + $0x138] sm:$0xff] %vm710_vm0, %v3284_v18  ;;  %v3774_v24 = vadd.f32 %v3574_v35, %v3328_v60  ;;  %v7579_v26 = vpop.f32.mrb[207].mxu1  ;;  %v7707_v28 = vpop.f32.mrb[211].mxu0  ;;  %7864 = vmatmul.mubr.msk.f32.gmra.mrb[56].mxu1 %vm710_vm0, %v4437_v22  ;;  %7992 = vmatmul.mubr.msk.f32.gmra.mrb[60].mxu0 %vm710_vm0, %v4966_v0  ;;  %v4443_v60 = vld [vmem:[#allocation2 + $0xbd] sm:$0xff]  ;;  %v4972_v35 = vld [vmem:[#allocation2 + $0xc6] sm:$0xff] }
 0x306   : > { %v2839_v25 = vld [vmem:[#allocation3 + $0x140] sm:$0xf]  ;;  %7866 = vmatprep.mubr.msk.f32.mxu1 %vm8098_vm1, %v8097_v3  ;;  %7994 = vmatprep.mubr.msk.f32.mxu0 %vm8098_vm1, %v8097_v3 }
 0x307   : > { %v3285_v15 = vadd.f32 %v3241_v31, %v2839_v25  ;;  %3815 = vst.msk [vmem:[#allocation3 + $0x8] sm:$0xff] %vm710_vm0, %v3774_v24  ;;  %v3335_v28 = vld [vmem:[#allocation3 + $0x40] sm:$0xff] }
 0x308   : > { %v3579_v30 = vpop.f32.mrb[208].mxu1  ;;  %v4112_v2 = vpop.f32.mrb[212].mxu0 }
 0x309   : > { %3326 = vst.msk [vmem:[#allocation3 + $0x140] sm:$0xf] %vm721_vm4, %v3285_v15  ;;  %v3775_v40 = vadd.f32 %v3579_v30, %v3329_v39  ;;  %v7582_v34 = vpop.f32.mrb[209].mxu1  ;;  %v7710_v5 = vpop.f32.mrb[213].mxu0  ;;  %7867 = vmatmul.mubr.msk.f32.gmra.mrb[58].mxu1 %vm710_vm0, %v4438_v36  ;;  %7995 = vmatmul.mubr.msk.f32.gmra.mrb[62].mxu0 %vm710_vm0, %v4967_v32  ;;  %v4444_v39 = vld [vmem:[#allocation2 + $0xc5] sm:$0xff]  ;;  %v4973_v30 = vld [vmem:[#allocation2 + $0xce] sm:$0xff] }
 0x30a   : > { %7869 = vmatprep.mubr.msk.f32.mxu1 %vm8098_vm1, %v8097_v3  ;;  %7997 = vmatprep.mubr.msk.f32.mxu0 %vm8098_vm1, %v8097_v3  ;;  %v3855_v27 = vld [vmem:[#allocation3] sm:$0xff]  ;;  %v3336_v5 = vld [vmem:[#allocation3 + $0x48] sm:$0xff] }
 0x30b   : > { %3816 = vst.msk [vmem:[#allocation3 + $0x10] sm:$0xff] %vm710_vm0, %v3775_v40  ;;  %v4301_v43 = vadd.f32 %v4097_v56, %v3855_v27 }
 0x30c   : > { %v3584_v17 = vpop.f32.mrb[210].mxu1  ;;  %v4117_v42 = vpop.f32.mrb[214].mxu0 }
 0x30d   : > { %v3776_v44 = vadd.f32 %v3584_v17, %v3330_v37  ;;  %v7585_v47 = vpop.f32.mrb[211].mxu1  ;;  %v7713_v46 = vpop.f32.mrb[215].mxu0  ;;  %7870 = vmatmul.mubr.msk.f32.gmra.mrb[60].mxu1 %vm710_vm0, %v4439_v38  ;;  %7998 = vmatmul.mubr.msk.f32.gmra.mrb[64].mxu0 %vm710_vm0, %v4968_v7  ;;  %4342 = vst.msk [vmem:[#allocation3] sm:$0xff] %vm710_vm0, %v4301_v43  ;;  %v4445_v37 = vld [vmem:[#allocation2 + $0xcd] sm:$0xff]  ;;  %v4974_v17 = vld [vmem:[#allocation2 + $0xd6] sm:$0xff] }
 0x30e   : > { %7872 = vmatprep.mubr.msk.f32.mxu1 %vm8098_vm1, %v8097_v3  ;;  %8000 = vmatprep.mubr.msk.f32.mxu0 %vm8098_vm1, %v8097_v3  ;;  %v3856_v29 = vld [vmem:[#allocation3 + $0x8] sm:$0xff]  ;;  %v3337_v46 = vld [vmem:[#allocation3 + $0x50] sm:$0xff] }
 0x30f   : > { %3817 = vst.msk [vmem:[#allocation3 + $0x18] sm:$0xff] %vm710_vm0, %v3776_v44  ;;  %v4302_v48 = vadd.f32 %v4102_v41, %v3856_v29 }
 0x310   : > { %v3589_v53 = vpop.f32.mrb[212].mxu1  ;;  %v4122_v9 = vpop.f32.mrb[216].mxu0 }
 0x311   : > { %v3777_v55 = vadd.f32 %v3589_v53, %v3331_v45  ;;  %v7588_v57 = vpop.f32.mrb[213].mxu1  ;;  %v7716_v31 = vpop.f32.mrb[217].mxu0  ;;  %7873 = vmatmul.mubr.msk.f32.gmra.mrb[62].mxu1 %vm710_vm0, %v4440_v59  ;;  %8001 = vmatmul.mubr.msk.f32.gmra.mrb[66].mxu0 %vm710_vm0, %v4969_v54  ;;  %4343 = vst.msk [vmem:[#allocation3 + $0x8] sm:$0xff] %vm710_vm0, %v4302_v48  ;;  %v4446_v45 = vld [vmem:[#allocation2 + $0xd5] sm:$0xff]  ;;  %v4975_v53 = vld [vmem:[#allocation2 + $0xde] sm:$0xff] }
 0x312   : > { %7875 = vmatprep.mubr.msk.f32.mxu1 %vm8098_vm1, %v8097_v3  ;;  %8003 = vmatprep.mubr.msk.f32.mxu0 %vm8098_vm1, %v8097_v3  ;;  %v3857_v50 = vld [vmem:[#allocation3 + $0x10] sm:$0xff]  ;;  %v3338_v31 = vld [vmem:[#allocation3 + $0x58] sm:$0xff] }
 0x313   : > { %3818 = vst.msk [vmem:[#allocation3 + $0x20] sm:$0xff] %vm710_vm0, %v3777_v55  ;;  %v4303_v58 = vadd.f32 %v4107_v20, %v3857_v50 }
 0x314   : > { %v3594_v19 = vpop.f32.mrb[214].mxu1  ;;  %v4127_v11 = vpop.f32.mrb[218].mxu0 }
 0x315   : > { %v3778_v56 = vadd.f32 %v3594_v19, %v3332_v49  ;;  %v7591_v33 = vpop.f32.mrb[215].mxu1  ;;  %v7719_v4 = vpop.f32.mrb[219].mxu0  ;;  %7876 = vmatmul.mubr.msk.f32.gmra.mrb[64].mxu1 %vm710_vm0, %v4441_v63  ;;  %8004 = vmatmul.mubr.msk.f32.gmra.mrb[68].mxu0 %vm710_vm0, %v4970_v1  ;;  %4344 = vst.msk [vmem:[#allocation3 + $0x10] sm:$0xff] %vm710_vm0, %v4303_v58  ;;  %v4447_v49 = vld [vmem:[#allocation2 + $0xdd] sm:$0xff]  ;;  %v4976_v19 = vld [vmem:[#allocation2 + $0xe6] sm:$0xff] }
 0x316   : > { %7878 = vmatprep.mubr.msk.f32.mxu1 %vm8098_vm1, %v8097_v3  ;;  %8006 = vmatprep.mubr.msk.f32.mxu0 %vm8098_vm1, %v8097_v3  ;;  %v3858_v6 = vld [vmem:[#allocation3 + $0x18] sm:$0xff]  ;;  %v3339_v4 = vld [vmem:[#allocation3 + $0x60] sm:$0xff] }
 0x317   : > { %3819 = vst.msk [vmem:[#allocation3 + $0x28] sm:$0xff] %vm710_vm0, %v3778_v56  ;;  %v4304_v8 = vadd.f32 %v4112_v2, %v3858_v6 }
 0x318   : > { %v3599_v21 = vpop.f32.mrb[216].mxu1  ;;  %v4132_v10 = vpop.f32.mrb[220].mxu0 }
 0x319   : > { %v3779_v41 = vadd.f32 %v3599_v21, %v3333_v51  ;;  %v7594_v52 = vpop.f32.mrb[217].mxu1  ;;  %v7722_v14 = vpop.f32.mrb[221].mxu0  ;;  %7879 = vmatmul.mubr.msk.f32.gmra.mrb[66].mxu1 %vm710_vm0, %v4442_v61  ;;  %8007 = vmatmul.mubr.msk.f32.gmra.mrb[70].mxu0 %vm710_vm0, %v4971_v12  ;;  %4345 = vst.msk [vmem:[#allocation3 + $0x18] sm:$0xff] %vm710_vm0, %v4304_v8  ;;  %v4448_v51 = vld [vmem:[#allocation2 + $0xe5] sm:$0xff]  ;;  %v4977_v21 = vld [vmem:[#allocation2 + $0xee] sm:$0xff] }
 0x31a   : > { %7881 = vmatprep.mubr.msk.f32.mxu1 %vm8098_vm1, %v8097_v3  ;;  %8009 = vmatprep.mubr.msk.f32.mxu0 %vm8098_vm1, %v8097_v3  ;;  %v3859_v16 = vld [vmem:[#allocation3 + $0x20] sm:$0xff]  ;;  %v3340_v14 = vld [vmem:[#allocation3 + $0x68] sm:$0xff] }
 0x31b   : > { %3820 = vst.msk [vmem:[#allocation3 + $0x30] sm:$0xff] %vm710_vm0, %v3779_v41  ;;  %v4305_v13 = vadd.f32 %v4117_v42, %v3859_v16 }
 0x31c   : > { %v3604_v23 = vpop.f32.mrb[218].mxu1  ;;  %v4137_v18 = vpop.f32.mrb[222].mxu0 }
 0x31d   : > { %v3780_v20 = vadd.f32 %v3604_v23, %v3334_v62  ;;  %v7597_v22 = vpop.f32.mrb[219].mxu1  ;;  %v7725_v0 = vpop.f32.mrb[223].mxu0  ;;  %7882 = vmatmul.mubr.msk.f32.gmra.mrb[68].mxu1 %vm710_vm0, %v4443_v60  ;;  %8010 = vmatmul.mubr.msk.f32.gmra.mrb[72].mxu0 %vm710_vm0, %v4972_v35  ;;  %4346 = vst.msk [vmem:[#allocation3 + $0x20] sm:$0xff] %vm710_vm0, %v4305_v13  ;;  %v4449_v62 = vld [vmem:[#allocation2 + $0xed] sm:$0xff]  ;;  %v4978_v23 = vld [vmem:[#allocation2 + $0xf6] sm:$0xff] }
 0x31e   : > { %7884 = vmatprep.mubr.msk.f32.mxu1 %vm8098_vm1, %v8097_v3  ;;  %8012 = vmatprep.mubr.msk.f32.mxu0 %vm8098_vm1, %v8097_v3  ;;  %v3860_v24 = vld [vmem:[#allocation3 + $0x28] sm:$0xff]  ;;  %v3341_v0 = vld [vmem:[#allocation3 + $0x70] sm:$0xff] }
 0x31f   : > { %3821 = vst.msk [vmem:[#allocation3 + $0x38] sm:$0xff] %vm710_vm0, %v3780_v20  ;;  %v4306_v26 = vadd.f32 %v4122_v9, %v3860_v24 }
 0x320   : > { %v3609_v25 = vpop.f32.mrb[220].mxu1  ;;  %v4142_v15 = vpop.f32.mrb[224].mxu0 }
 0x321   : > { %v3781_v2 = vadd.f32 %v3609_v25, %v3335_v28  ;;  %v7600_v36 = vpop.f32.mrb[221].mxu1  ;;  %v7728_v32 = vpop.f32.mrb[225].mxu0  ;;  %7885 = vmatmul.mubr.msk.f32.gmra.mrb[70].mxu1 %vm710_vm0, %v4444_v39  ;;  %8013 = vmatmul.mubr.msk.f32.gmra.mrb[74].mxu0 %vm710_vm0, %v4973_v30  ;;  %4347 = vst.msk [vmem:[#allocation3 + $0x28] sm:$0xff] %vm710_vm0, %v4306_v26  ;;  %v4450_v28 = vld [vmem:[#allocation2 + $0xf5] sm:$0xff]  ;;  %v4979_v25 = vld [vmem:[#allocation2 + $0xfe] sm:$0xff] }
 0x322   : > { %7887 = vmatprep.mubr.msk.f32.mxu1 %vm8098_vm1, %v8097_v3  ;;  %8015 = vmatprep.mubr.msk.f32.mxu0 %vm8098_vm1, %v8097_v3  ;;  %v3861_v40 = vld [vmem:[#allocation3 + $0x30] sm:$0xff]  ;;  %v3342_v32 = vld [vmem:[#allocation3 + $0x78] sm:$0xff] }
 0x323   : > { %3822 = vst.msk [vmem:[#allocation3 + $0x40] sm:$0xff] %vm710_vm0, %v3781_v2  ;;  %v4307_v34 = vadd.f32 %v4127_v11, %v3861_v40 }
 0x324   : > { %v3614_v27 = vpop.f32.mrb[222].mxu1  ;;  %v4147_v43 = vpop.f32.mrb[226].mxu0 }
 0x325   : > { %v3782_v42 = vadd.f32 %v3614_v27, %v3336_v5  ;;  %v7603_v38 = vpop.f32.mrb[223].mxu1  ;;  %v7731_v7 = vpop.f32.mrb[227].mxu0  ;;  %7888 = vmatmul.mubr.msk.f32.gmra.mrb[72].mxu1 %vm710_vm0, %v4445_v37  ;;  %8016 = vmatmul.mubr.msk.f32.gmra.mrb[76].mxu0 %vm710_vm0, %v4974_v17  ;;  %4348 = vst.msk [vmem:[#allocation3 + $0x30] sm:$0xff] %vm710_vm0, %v4307_v34  ;;  %v4451_v5 = vld [vmem:[#allocation2 + $0xfd] sm:$0xff]  ;;  %v4980_v27 = vld [vmem:[#allocation2 + $0x106] sm:$0xff] }
 0x326   : > { %7890 = vmatprep.mubr.msk.f32.mxu1 %vm8098_vm1, %v8097_v3  ;;  %8018 = vmatprep.mubr.msk.f32.mxu0 %vm8098_vm1, %v8097_v3  ;;  %v3862_v44 = vld [vmem:[#allocation3 + $0x38] sm:$0xff]  ;;  %v3343_v7 = vld [vmem:[#allocation3 + $0x80] sm:$0xff] }
 0x327   : > { %3823 = vst.msk [vmem:[#allocation3 + $0x48] sm:$0xff] %vm710_vm0, %v3782_v42  ;;  %v4308_v47 = vadd.f32 %v4132_v10, %v3862_v44 }
 0x328   : > { %v3619_v29 = vpop.f32.mrb[224].mxu1  ;;  %v4152_v48 = vpop.f32.mrb[228].mxu0 }
 0x329   : > { %v3783_v9 = vadd.f32 %v3619_v29, %v3337_v46  ;;  %v7606_v59 = vpop.f32.mrb[225].mxu1  ;;  %v7734_v54 = vpop.f32.mrb[229].mxu0  ;;  %7891 = vmatmul.mubr.msk.f32.gmra.mrb[74].mxu1 %vm710_vm0, %v4446_v45  ;;  %8019 = vmatmul.mubr.msk.f32.gmra.mrb[78].mxu0 %vm710_vm0, %v4975_v53  ;;  %4349 = vst.msk [vmem:[#allocation3 + $0x38] sm:$0xff] %vm710_vm0, %v4308_v47  ;;  %v4452_v46 = vld [vmem:[#allocation2 + $0x105] sm:$0xff]  ;;  %v4981_v29 = vld [vmem:[#allocation2 + $0x10e] sm:$0xff] }
 0x32a   : > { %7893 = vmatprep.mubr.msk.f32.mxu1 %vm8098_vm1, %v8097_v3  ;;  %8021 = vmatprep.mubr.msk.f32.mxu0 %vm8098_vm1, %v8097_v3  ;;  %v3863_v55 = vld [vmem:[#allocation3 + $0x40] sm:$0xff]  ;;  %v3344_v54 = vld [vmem:[#allocation3 + $0x88] sm:$0xff] }
 0x32b   : > { %3824 = vst.msk [vmem:[#allocation3 + $0x50] sm:$0xff] %vm710_vm0, %v3783_v9  ;;  %v4309_v57 = vadd.f32 %v4137_v18, %v3863_v55 }
 0x32c   : > { %v3624_v50 = vpop.f32.mrb[226].mxu1  ;;  %v4157_v58 = vpop.f32.mrb[230].mxu0 }
 0x32d   : > { %v3784_v11 = vadd.f32 %v3624_v50, %v3338_v31  ;;  %v7609_v63 = vpop.f32.mrb[227].mxu1  ;;  %v7737_v1 = vpop.f32.mrb[231].mxu0  ;;  %7894 = vmatmul.mubr.msk.f32.gmra.mrb[76].mxu1 %vm710_vm0, %v4447_v49  ;;  %8022 = vmatmul.mubr.msk.f32.gmra.mrb[80].mxu0 %vm710_vm0, %v4976_v19  ;;  %4350 = vst.msk [vmem:[#allocation3 + $0x40] sm:$0xff] %vm710_vm0, %v4309_v57  ;;  %v4453_v31 = vld [vmem:[#allocation2 + $0x10d] sm:$0xff]  ;;  %v4982_v50 = vld [vmem:[#allocation2 + $0x116] sm:$0xff] }
 0x32e   : > { %7896 = vmatprep.mubr.msk.f32.mxu1 %vm8098_vm1, %v8097_v3  ;;  %8024 = vmatprep.mubr.msk.f32.mxu0 %vm8098_vm1, %v8097_v3  ;;  %v3864_v56 = vld [vmem:[#allocation3 + $0x48] sm:$0xff]  ;;  %v3345_v1 = vld [vmem:[#allocation3 + $0x90] sm:$0xff] }
 0x32f   : > { %3825 = vst.msk [vmem:[#allocation3 + $0x58] sm:$0xff] %vm710_vm0, %v3784_v11  ;;  %v4310_v33 = vadd.f32 %v4142_v15, %v3864_v56 }
 0x330   : > { %v3629_v6 = vpop.f32.mrb[228].mxu1  ;;  %v4162_v8 = vpop.f32.mrb[232].mxu0 }
 0x331   : > { %v3785_v10 = vadd.f32 %v3629_v6, %v3339_v4  ;;  %v7612_v61 = vpop.f32.mrb[229].mxu1  ;;  %v7740_v12 = vpop.f32.mrb[233].mxu0  ;;  %7897 = vmatmul.mubr.msk.f32.gmra.mrb[78].mxu1 %vm710_vm0, %v4448_v51  ;;  %8025 = vmatmul.mubr.msk.f32.gmra.mrb[82].mxu0 %vm710_vm0, %v4977_v21  ;;  %4351 = vst.msk [vmem:[#allocation3 + $0x48] sm:$0xff] %vm710_vm0, %v4310_v33  ;;  %v4454_v4 = vld [vmem:[#allocation2 + $0x115] sm:$0xff]  ;;  %v4983_v6 = vld [vmem:[#allocation2 + $0x11e] sm:$0xff] }
 0x332   : > { %7899 = vmatprep.mubr.msk.f32.mxu1 %vm8098_vm1, %v8097_v3  ;;  %8027 = vmatprep.mubr.msk.f32.mxu0 %vm8098_vm1, %v8097_v3  ;;  %v3865_v41 = vld [vmem:[#allocation3 + $0x50] sm:$0xff]  ;;  %v3346_v12 = vld [vmem:[#allocation3 + $0x98] sm:$0xff] }
 0x333   : > { %3826 = vst.msk [vmem:[#allocation3 + $0x60] sm:$0xff] %vm710_vm0, %v3785_v10  ;;  %v4311_v52 = vadd.f32 %v4147_v43, %v3865_v41 }
 0x334   : > { %v3634_v16 = vpop.f32.mrb[230].mxu1  ;;  %v4167_v13 = vpop.f32.mrb[234].mxu0 }
 0x335   : > { %v3786_v18 = vadd.f32 %v3634_v16, %v3340_v14  ;;  %v7615_v60 = vpop.f32.mrb[231].mxu1  ;;  %v7743_v35 = vpop.f32.mrb[235].mxu0  ;;  %7900 = vmatmul.mubr.msk.f32.gmra.mrb[80].mxu1 %vm710_vm0, %v4449_v62  ;;  %8028 = vmatmul.mubr.msk.f32.gmra.mrb[84].mxu0 %vm710_vm0, %v4978_v23  ;;  %4352 = vst.msk [vmem:[#allocation3 + $0x50] sm:$0xff] %vm710_vm0, %v4311_v52  ;;  %v4455_v14 = vld [vmem:[#allocation2 + $0x11d] sm:$0xff]  ;;  %v4984_v16 = vld [vmem:[#allocation2 + $0x126] sm:$0xff] }
 0x336   : > { %7902 = vmatprep.mubr.msk.f32.mxu1 %vm8098_vm1, %v8097_v3  ;;  %8030 = vmatprep.mubr.msk.f32.mxu0 %vm8098_vm1, %v8097_v3  ;;  %v3866_v20 = vld [vmem:[#allocation3 + $0x58] sm:$0xff]  ;;  %v3347_v35 = vld [vmem:[#allocation3 + $0xa0] sm:$0xff] }
 0x337   : > { %3827 = vst.msk [vmem:[#allocation3 + $0x68] sm:$0xff] %vm710_vm0, %v3786_v18  ;;  %v4312_v22 = vadd.f32 %v4152_v48, %v3866_v20 }
 0x338   : > { %v3639_v24 = vpop.f32.mrb[232].mxu1  ;;  %v4172_v26 = vpop.f32.mrb[236].mxu0 }
 0x339   : > { %v3787_v15 = vadd.f32 %v3639_v24, %v3341_v0  ;;  %v7618_v39 = vpop.f32.mrb[233].mxu1  ;;  %v7746_v30 = vpop.f32.mrb[237].mxu0  ;;  %7903 = vmatmul.mubr.msk.f32.gmra.mrb[82].mxu1 %vm710_vm0, %v4450_v28  ;;  %8031 = vmatmul.mubr.msk.f32.gmra.mrb[86].mxu0 %vm710_vm0, %v4979_v25  ;;  %4353 = vst.msk [vmem:[#allocation3 + $0x58] sm:$0xff] %vm710_vm0, %v4312_v22  ;;  %v4456_v0 = vld [vmem:[#allocation2 + $0x125] sm:$0xff]  ;;  %v4985_v24 = vld [vmem:[#allocation2 + $0x12e] sm:$0xff] }
 0x33a   : > { %7905 = vmatprep.mubr.msk.f32.mxu1 %vm8098_vm1, %v8097_v3  ;;  %8033 = vmatprep.mubr.msk.f32.mxu0 %vm8098_vm1, %v8097_v3  ;;  %v3867_v2 = vld [vmem:[#allocation3 + $0x60] sm:$0xff]  ;;  %v3348_v30 = vld [vmem:[#allocation3 + $0xa8] sm:$0xff] }
 0x33b   : > { %3828 = vst.msk [vmem:[#allocation3 + $0x70] sm:$0xff] %vm710_vm0, %v3787_v15  ;;  %v4313_v36 = vadd.f32 %v4157_v58, %v3867_v2 }
 0x33c   : > { %v3644_v40 = vpop.f32.mrb[234].mxu1  ;;  %v4177_v34 = vpop.f32.mrb[238].mxu0 }
 0x33d   : > { %v3788_v43 = vadd.f32 %v3644_v40, %v3342_v32  ;;  %v7621_v37 = vpop.f32.mrb[235].mxu1  ;;  %v7749_v17 = vpop.f32.mrb[239].mxu0  ;;  %7906 = vmatmul.mubr.msk.f32.gmra.mrb[84].mxu1 %vm710_vm0, %v4451_v5  ;;  %8034 = vmatmul.mubr.msk.f32.gmra.mrb[88].mxu0 %vm710_vm0, %v4980_v27  ;;  %4354 = vst.msk [vmem:[#allocation3 + $0x60] sm:$0xff] %vm710_vm0, %v4313_v36  ;;  %v4457_v32 = vld [vmem:[#allocation2 + $0x12d] sm:$0xff]  ;;  %v4986_v40 = vld [vmem:[#allocation2 + $0x136] sm:$0xff] }
 0x33e   : > { %7908 = vmatprep.mubr.msk.f32.mxu1 %vm8098_vm1, %v8097_v3  ;;  %8036 = vmatprep.mubr.msk.f32.mxu0 %vm8098_vm1, %v8097_v3  ;;  %v3868_v42 = vld [vmem:[#allocation3 + $0x68] sm:$0xff]  ;;  %v3349_v17 = vld [vmem:[#allocation3 + $0xb0] sm:$0xff] }
 0x33f   : > { %3829 = vst.msk [vmem:[#allocation3 + $0x78] sm:$0xff] %vm710_vm0, %v3788_v43  ;;  %v4314_v38 = vadd.f32 %v4162_v8, %v3868_v42 }
 0x340   : > { %v3649_v44 = vpop.f32.mrb[236].mxu1  ;;  %v4182_v47 = vpop.f32.mrb[240].mxu0 }
 0x341   : > { %v3789_v48 = vadd.f32 %v3649_v44, %v3343_v7  ;;  %v7624_v45 = vpop.f32.mrb[237].mxu1  ;;  %v7752_v53 = vpop.f32.mrb[241].mxu0  ;;  %7909 = vmatmul.mubr.msk.f32.gmra.mrb[86].mxu1 %vm710_vm0, %v4452_v46  ;;  %8037 = vmatmul.mubr.msk.f32.gmra.mrb[90].mxu0 %vm710_vm0, %v4981_v29  ;;  %4355 = vst.msk [vmem:[#allocation3 + $0x68] sm:$0xff] %vm710_vm0, %v4314_v38  ;;  %v4458_v7 = vld [vmem:[#allocation2 + $0x135] sm:$0xff]  ;;  %v4987_v44 = vld [vmem:[#allocation2 + $0x13e] sm:$0xff] }
 0x342   : > { %7911 = vmatprep.mubr.msk.f32.mxu1 %vm8098_vm1, %v8097_v3  ;;  %8039 = vmatprep.mubr.msk.f32.mxu0 %vm8098_vm1, %v8097_v3  ;;  %v3869_v9 = vld [vmem:[#allocation3 + $0x70] sm:$0xff] }
 0x343   : > { %3830 = vst.msk [vmem:[#allocation3 + $0x80] sm:$0xff] %vm710_vm0, %v3789_v48  ;;  %v4315_v59 = vadd.f32 %v4167_v13, %v3869_v9  ;;  %v4988_v48 = vld [vmem:[#allocation2 + $0x146] sm:$0xff] }
 0x344   : > { %v3654_v55 = vpop.f32.mrb[238].mxu1  ;;  %v4187_v57 = vpop.f32.mrb[242].mxu0  ;;  %v3350_v9 = vld [vmem:[#allocation3 + $0xb8] sm:$0xff] }
 0x345   : > { %v3790_v58 = vadd.f32 %v3654_v55, %v3344_v54  ;;  %v7627_v49 = vpop.f32.mrb[239].mxu1  ;;  %v7755_v19 = vpop.f32.mrb[243].mxu0  ;;  %7912 = vmatmul.mubr.msk.f32.gmra.mrb[88].mxu1 %vm710_vm0, %v4453_v31  ;;  %8040 = vmatmul.mubr.msk.f32.gmra.mrb[92].mxu0 %vm710_vm0, %v4982_v50  ;;  %4356 = vst.msk [vmem:[#allocation3 + $0x70] sm:$0xff] %vm710_vm0, %v4315_v59  ;;  %v4459_v55 = vld [vmem:[#allocation2 + $0x13d] sm:$0xff] }
 0x346   : > { %7914 = vmatprep.mubr.msk.f32.mxu1 %vm8098_vm1, %v8097_v3  ;;  %8042 = vmatprep.mubr.msk.f32.mxu0 %vm8098_vm1, %v8097_v3  ;;  %v3870_v11 = vld [vmem:[#allocation3 + $0x78] sm:$0xff] }
 0x347   : > { %3831 = vst.msk [vmem:[#allocation3 + $0x88] sm:$0xff] %vm710_vm0, %v3790_v58  ;;  %v4316_v63 = vadd.f32 %v4172_v26, %v3870_v11  ;;  %v4989_v58 = vld [vmem:[#allocation2 + $0x14e] sm:$0xff] }
 0x348   : > { %v3659_v56 = vpop.f32.mrb[240].mxu1  ;;  %v4192_v33 = vpop.f32.mrb[244].mxu0  ;;  %v3351_v11 = vld [vmem:[#allocation3 + $0xc0] sm:$0xff] }
 0x349   : > { %v3791_v8 = vadd.f32 %v3659_v56, %v3345_v1  ;;  %v7630_v51 = vpop.f32.mrb[241].mxu1  ;;  %v7758_v21 = vpop.f32.mrb[245].mxu0  ;;  %7915 = vmatmul.mubr.msk.f32.gmra.mrb[90].mxu1 %vm710_vm0, %v4454_v4  ;;  %8043 = vmatmul.mubr.msk.f32.gmra.mrb[94].mxu0 %vm710_vm0, %v4983_v6  ;;  %4357 = vst.msk [vmem:[#allocation3 + $0x78] sm:$0xff] %vm710_vm0, %v4316_v63  ;;  %v4460_v56 = vld [vmem:[#allocation2 + $0x145] sm:$0xff] }
 0x34a   : > { %7917 = vmatprep.mubr.msk.f32.mxu1 %vm8098_vm1, %v8097_v3  ;;  %8045 = vmatprep.mubr.msk.f32.mxu0 %vm8098_vm1, %v8097_v3  ;;  %v3871_v10 = vld [vmem:[#allocation3 + $0x80] sm:$0xff] }
 0x34b   : > { %3832 = vst.msk [vmem:[#allocation3 + $0x90] sm:$0xff] %vm710_vm0, %v3791_v8  ;;  %v4317_v61 = vadd.f32 %v4177_v34, %v3871_v10  ;;  %v4461_v8 = vld [vmem:[#allocation2 + $0x14d] sm:$0xff]  ;;  %v4990_v51 = vld [vmem:[#allocation2 + $0x156] sm:$0xff] }
 0x34c   : > { %v3664_v41 = vpop.f32.mrb[242].mxu1  ;;  %v4197_v52 = vpop.f32.mrb[246].mxu0 }
 0x34d   : > { %v3792_v13 = vadd.f32 %v3664_v41, %v3346_v12  ;;  %v7633_v62 = vpop.f32.mrb[243].mxu1  ;;  %v7761_v23 = vpop.f32.mrb[247].mxu0  ;;  %7918 = vmatmul.mubr.msk.f32.gmra.mrb[92].mxu1 %vm710_vm0, %v4455_v14  ;;  %8046 = vmatmul.mubr.msk.f32.gmra.mrb[96].mxu0 %vm710_vm0, %v4984_v16  ;;  %4358 = vst.msk [vmem:[#allocation3 + $0x80] sm:$0xff] %vm710_vm0, %v4317_v61  ;;  %v3352_v61 = vld [vmem:[#allocation3 + $0xc8] sm:$0xff] }
 0x34e   : > { %7920 = vmatprep.mubr.msk.f32.mxu1 %vm8098_vm1, %v8097_v3  ;;  %8048 = vmatprep.mubr.msk.f32.mxu0 %vm8098_vm1, %v8097_v3  ;;  %v3872_v18 = vld [vmem:[#allocation3 + $0x88] sm:$0xff] }
 0x34f   : > { %3833 = vst.msk [vmem:[#allocation3 + $0x98] sm:$0xff] %vm710_vm0, %v3792_v13  ;;  %v4318_v60 = vadd.f32 %v4182_v47, %v3872_v18  ;;  %v4462_v13 = vld [vmem:[#allocation2 + $0x155] sm:$0xff]  ;;  %v4991_v62 = vld [vmem:[#allocation2 + $0x15e] sm:$0xff] }
 0x350   : > { %v3669_v20 = vpop.f32.mrb[244].mxu1  ;;  %v4202_v22 = vpop.f32.mrb[248].mxu0 }
 0x351   : > { %v3793_v26 = vadd.f32 %v3669_v20, %v3347_v35  ;;  %v7636_v28 = vpop.f32.mrb[245].mxu1  ;;  %v7764_v25 = vpop.f32.mrb[249].mxu0  ;;  %7921 = vmatmul.mubr.msk.f32.gmra.mrb[94].mxu1 %vm710_vm0, %v4456_v0  ;;  %8049 = vmatmul.mubr.msk.f32.gmra.mrb[98].mxu0 %vm710_vm0, %v4985_v24  ;;  %4359 = vst.msk [vmem:[#allocation3 + $0x88] sm:$0xff] %vm710_vm0, %v4318_v60  ;;  %v3353_v60 = vld [vmem:[#allocation3 + $0xd0] sm:$0xff] }
 0x352   : > { %7923 = vmatprep.mubr.msk.f32.mxu1 %vm8098_vm1, %v8097_v3  ;;  %8051 = vmatprep.mubr.msk.f32.mxu0 %vm8098_vm1, %v8097_v3  ;;  %v3873_v15 = vld [vmem:[#allocation3 + $0x90] sm:$0xff] }
 0x353   : > { %3834 = vst.msk [vmem:[#allocation3 + $0xa0] sm:$0xff] %vm710_vm0, %v3793_v26  ;;  %v4319_v39 = vadd.f32 %v4187_v57, %v3873_v15  ;;  %v4463_v26 = vld [vmem:[#allocation2 + $0x15d] sm:$0xff]  ;;  %v4992_v28 = vld [vmem:[#allocation2 + $0x166] sm:$0xf] }
 0x354   : > { %v3674_v2 = vpop.f32.mrb[246].mxu1  ;;  %v9931_v36 = vpop.f32.mrb[250].mxu0 }
 0x355   : > { %v3794_v34 = vadd.f32 %v3674_v2, %v3348_v30  ;;  %v7639_v5 = vpop.f32.mrb[247].mxu1  ;;  %v7767_v27 = vpop.f32.mrb[251].mxu0  ;;  %7924 = vmatmul.mubr.msk.f32.gmra.mrb[96].mxu1 %vm710_vm0, %v4457_v32  ;;  %8052 = vmatmul.mubr.msk.f32.gmra.mrb[100].mxu0 %vm710_vm0, %v4986_v40  ;;  %4360 = vst.msk [vmem:[#allocation3 + $0x90] sm:$0xff] %vm710_vm0, %v4319_v39  ;;  %v3354_v39 = vld [vmem:[#allocation3 + $0xd8] sm:$0xff] }
 0x356   : > { %7926 = vmatprep.mubr.msk.f32.mxu1 %vm8098_vm1, %v8097_v3  ;;  %8054 = vmatprep.mubr.msk.f32.mxu0 %vm8098_vm1, %v8097_v3  ;;  %v3874_v43 = vld [vmem:[#allocation3 + $0x98] sm:$0xff] }
 0x357   : > { %3835 = vst.msk [vmem:[#allocation3 + $0xa8] sm:$0xff] %vm710_vm0, %v3794_v34  ;;  %v4320_v37 = vadd.f32 %v4192_v33, %v3874_v43  ;;  %v4464_v34 = vld [vmem:[#allocation2 + $0x165] sm:$0xf]  ;;  %v3355_v43 = vld [vmem:[#allocation3 + $0xe0] sm:$0xff] }
 0x358   : > { %v3679_v42 = vpop.f32.mrb[248].mxu1  ;;  %v9941_v38 = vpop.f32.mrb[252].mxu0 }
 0x359   : > { %v3795_v47 = vadd.f32 %v3679_v42, %v3349_v17  ;;  %v7642_v46 = vpop.f32.mrb[249].mxu1  ;;  %v7770_v29 = vpop.f32.mrb[253].mxu0  ;;  %7927 = vmatmul.mubr.msk.f32.gmra.mrb[98].mxu1 %vm710_vm0, %v4458_v7  ;;  %8055 = vmatmul.mubr.msk.f32.gmra.mrb[102].mxu0 %vm710_vm0, %v4987_v44  ;;  %4361 = vst.msk [vmem:[#allocation3 + $0x98] sm:$0xff] %vm710_vm0, %v4320_v37 }
 0x35a   : > { %7929 = vmatprep.mubr.msk.f32.mxu1 %vm8098_vm1, %v8097_v3  ;;  %8057 = vmatprep.mubr.msk.f32.mxu0 %vm8098_vm1, %v8097_v3  ;;  %v3875_v45 = vld [vmem:[#allocation3 + $0xa0] sm:$0xff] }
 0x35b   : > { %3836 = vst.msk [vmem:[#allocation3 + $0xb0] sm:$0xff] %vm710_vm0, %v3795_v47  ;;  %v4321_v53 = vadd.f32 %v4197_v52, %v3875_v45 }
 0x35c   : > { %v3684_v59 = vpop.f32.mrb[250].mxu1  ;;  %v4217_v54 = vpop.f32.mrb[254].mxu0 }
 0x35d   : > { %v3796_v57 = vadd.f32 %v3684_v59, %v3350_v9  ;;  %v7645_v31 = vpop.f32.mrb[251].mxu1  ;;  %v7773_v50 = vpop.f32.mrb[255].mxu0  ;;  %7930 = vmatmul.mubr.msk.f32.gmra.mrb[100].mxu1 %vm710_vm0, %v4459_v55  ;;  %8058 = vmatmul.mubr.msk.f32.gmra.mrb[104].mxu0 %vm710_vm0, %v4988_v48  ;;  %4362 = vst.msk [vmem:[#allocation3 + $0xa0] sm:$0xff] %vm710_vm0, %v4321_v53 }
 0x35e   : > { %7932 = vmatprep.mubr.msk.f32.mxu1 %vm8098_vm1, %v8097_v3  ;;  %8060 = vmatprep.mubr.msk.f32.mxu0 %vm8098_vm1, %v8097_v3  ;;  %v3876_v49 = vld [vmem:[#allocation3 + $0xa8] sm:$0xff] }
 0x35f   : > { %3837 = vst.msk [vmem:[#allocation3 + $0xb8] sm:$0xff] %vm710_vm0, %v3796_v57  ;;  %v4322_v19 = vadd.f32 %v4202_v22, %v3876_v49 }
 0x360   : > { %v3689_v63 = vpop.f32.mrb[252].mxu1  ;;  %v4222_v1 = vpop.f32.mrb[0].mxu0 }
 0x361   : > { %v3797_v33 = vadd.f32 %v3689_v63, %v3351_v11  ;;  %v7648_v4 = vpop.f32.mrb[253].mxu1  ;;  %v7776_v6 = vpop.f32.mrb[1].mxu0  ;;  %7933 = vmatmul.mubr.msk.f32.gmra.mrb[102].mxu1 %vm710_vm0, %v4460_v56  ;;  %8061 = vmatmul.mubr.msk.f32.gmra.mrb[106].mxu0 %vm710_vm0, %v4989_v58  ;;  %4363 = vst.msk [vmem:[#allocation3 + $0xa8] sm:$0xff] %vm710_vm0, %v4322_v19  ;;  %v3358_v11 = vld [vmem:[#allocation3 + $0xf8] sm:$0xff] }
 0x362   : > { %7935 = vmatprep.mubr.msk.f32.mxu1 %vm8098_vm1, %v8097_v3  ;;  %8063 = vmatprep.mubr.msk.f32.mxu0 %vm8098_vm1, %v8097_v3  ;;  %v3877_v21 = vld [vmem:[#allocation3 + $0xb0] sm:$0xff] }
 0x363   : > { %3838 = vst.msk [vmem:[#allocation3 + $0xc0] sm:$0xff] %vm710_vm0, %v3797_v33  ;;  %v4323_v10 = vadd.f32 %v9931_v36, %v3877_v21 }
 0x364   : > { %v3694_v12 = vpop.f32.mrb[254].mxu1  ;;  %v4227_v41 = vpop.f32.mrb[2].mxu0 }
 0x365   : > { %v3798_v52 = vadd.f32 %v3694_v12, %v3352_v61  ;;  %v7651_v14 = vpop.f32.mrb[255].mxu1  ;;  %v7779_v16 = vpop.f32.mrb[3].mxu0  ;;  %7936 = vmatmul.mubr.msk.f32.gmra.mrb[104].mxu1 %vm710_vm0, %v4461_v8  ;;  %8064 = vmatmul.mubr.msk.f32.gmra.mrb[108].mxu0 %vm710_vm0, %v4990_v51  ;;  %4364 = vst.msk [vmem:[#allocation3 + $0xb0] sm:$0xff] %vm710_vm0, %v4323_v10  ;;  %v3359_v51 = vld [vmem:[#allocation3 + $0x100] sm:$0xff] }
 0x366   : > { %7938 = vmatprep.mubr.msk.f32.mxu1 %vm8098_vm1, %v8097_v3  ;;  %8066 = vmatprep.mubr.msk.f32.mxu0 %vm8098_vm1, %v8097_v3  ;;  %v3878_v23 = vld [vmem:[#allocation3 + $0xb8] sm:$0xff]  ;;  %v3360_v16 = vld [vmem:[#allocation3 + $0x108] sm:$0xff] }
 0x367   : > { %3839 = vst.msk [vmem:[#allocation3 + $0xc8] sm:$0xff] %vm710_vm0, %v3798_v52  ;;  %v4324_v18 = vadd.f32 %v9941_v38, %v3878_v23 }
 0x368   : > { %v3699_v35 = vpop.f32.mrb[0].mxu1  ;;  %v4232_v20 = vpop.f32.mrb[4].mxu0 }
 0x369   : > { %v3799_v22 = vadd.f32 %v3699_v35, %v3353_v60  ;;  %v7654_v0 = vpop.f32.mrb[1].mxu1  ;;  %v7782_v24 = vpop.f32.mrb[5].mxu0  ;;  %7939 = vmatmul.mubr.msk.f32.gmra.mrb[106].mxu1 %vm710_vm0, %v4462_v13  ;;  %8067 = vmatmul.mubr.msk.f32.gmra.mrb[110].mxu0 %vm710_vm0, %v4991_v62  ;;  %4365 = vst.msk [vmem:[#allocation3 + $0xb8] sm:$0xff] %vm710_vm0, %v4324_v18 }
 0x36a   : > { %7941 = vmatprep.mubr.msk.f32.mxu1 %vm8098_vm1, %v8097_v3  ;;  %8069 = vmatprep.mubr.msk.f32.mxu0 %vm8098_vm1, %v8097_v3  ;;  %v3879_v25 = vld [vmem:[#allocation3 + $0xc0] sm:$0xff] }
 0x36b   : > { %3840 = vst.msk [vmem:[#allocation3 + $0xd0] sm:$0xff] %vm710_vm0, %v3799_v22  ;;  %v4325_v15 = vadd.f32 %v4217_v54, %v3879_v25  ;;  %v3357_v54 = vld [vmem:[#allocation3 + $0xf0] sm:$0xff] }
 0x36c   : > { %v3704_v30 = vpop.f32.mrb[2].mxu1  ;;  %v4237_v2 = vpop.f32.mrb[6].mxu0  ;;  %v3361_v22 = vld [vmem:[#allocation3 + $0x110] sm:$0xff] }
 0x36d   : > { %v3800_v36 = vadd.f32 %v3704_v30, %v3354_v39  ;;  %v7657_v32 = vpop.f32.mrb[3].mxu1  ;;  %v7785_v40 = vpop.f32.mrb[7].mxu0  ;;  %7942 = vmatmul.mubr.msk.f32.gmra.mrb[108].mxu1 %vm710_vm0, %v4463_v26  ;;  %8070 = vmatmul.mubr.msk.f32.gmra.mrb[112].mxu0 %vm710_vm0, %v4992_v28  ;;  %4366 = vst.msk [vmem:[#allocation3 + $0xc0] sm:$0xff] %vm710_vm0, %v4325_v15  ;;  %v3362_v30 = vld [vmem:[#allocation3 + $0x118] sm:$0xff] }
 0x36e   : > { %7944 = vmatprep.mubr.msk.f32.mxu1 %vm8098_vm1, %v8097_v3  ;;  %v3880_v5 = vld [vmem:[#allocation3 + $0xc8] sm:$0xff] }
 0x36f   : > { %3841 = vst.msk [vmem:[#allocation3 + $0xd8] sm:$0xff] %vm710_vm0, %v3800_v36  ;;  %v4326_v27 = vadd.f32 %v4222_v1, %v3880_v5  ;;  %v3356_v3 = vld [vmem:[#allocation3 + $0xe8] sm:$0xff] }
 0x370   : > { %v3709_v37 = vpop.f32.mrb[4].mxu1  ;;  %v4242_v17 = vpop.f32.mrb[8].mxu0 }
 0x371   : > { %v3801_v42 = vadd.f32 %v3709_v37, %v3355_v43  ;;  %v7660_v38 = vpop.f32.mrb[5].mxu1  ;;  %v7788_v7 = vpop.f32.mrb[9].mxu0  ;;  %7945 = vmatmul.mubr.msk.f32.gmra.mrb[110].mxu1 %vm710_vm0, %v4464_v34  ;;  %4367 = vst.msk [vmem:[#allocation3 + $0xc8] sm:$0xff] %vm710_vm0, %v4326_v27  ;;  %v3363_v43 = vld [vmem:[#allocation3 + $0x120] sm:$0xff] }
 0x372   : > { %v3881_v44 = vld [vmem:[#allocation3 + $0xd0] sm:$0xff] }
 0x373   : > { %3842 = vst.msk [vmem:[#allocation3 + $0xe0] sm:$0xff] %vm710_vm0, %v3801_v42  ;;  %v4327_v47 = vadd.f32 %v4227_v41, %v3881_v44 }
 0x374   : > { %v3714_v46 = vpop.f32.mrb[6].mxu1  ;;  %v4247_v29 = vpop.f32.mrb[10].mxu0 }
 0x375   : > { %v3802_v48 = vadd.f32 %v3714_v46, %v3356_v3  ;;  %v7663_v45 = vpop.f32.mrb[7].mxu1  ;;  %v7791_v53 = vpop.f32.mrb[11].mxu0  ;;  %4368 = vst.msk [vmem:[#allocation3 + $0xd0] sm:$0xff] %vm710_vm0, %v4327_v47  ;;  %v3364_v3 = vld [vmem:[#allocation3 + $0x128] sm:$0xff] }
 0x376   : > { %v3882_v9 = vld [vmem:[#allocation3 + $0xd8] sm:$0xff] }
 0x377   : > { %3843 = vst.msk [vmem:[#allocation3 + $0xe8] sm:$0xff] %vm710_vm0, %v3802_v48  ;;  %v4328_v59 = vadd.f32 %v4232_v20, %v3882_v9 }
 0x378   : > { %v3719_v55 = vpop.f32.mrb[8].mxu1  ;;  %v4252_v57 = vpop.f32.mrb[12].mxu0 }
 0x379   : > { %v3803_v31 = vadd.f32 %v3719_v55, %v3357_v54  ;;  %v7666_v50 = vpop.f32.mrb[9].mxu1  ;;  %v7794_v58 = vpop.f32.mrb[13].mxu0  ;;  %4369 = vst.msk [vmem:[#allocation3 + $0xd8] sm:$0xff] %vm710_vm0, %v4328_v59  ;;  %v3365_v54 = vld [vmem:[#allocation3 + $0x130] sm:$0xff] }
 0x37a   : > { %v3883_v49 = vld [vmem:[#allocation3 + $0xe0] sm:$0xff] }
 0x37b   : > { %3844 = vst.msk [vmem:[#allocation3 + $0xf0] sm:$0xff] %vm710_vm0, %v3803_v31  ;;  %v4329_v19 = vadd.f32 %v4237_v2, %v3883_v49 }
 0x37c   : > { %v3724_v63 = vpop.f32.mrb[10].mxu1  ;;  %v4257_v1 = vpop.f32.mrb[14].mxu0 }
 0x37d   : > { %v3804_v56 = vadd.f32 %v3724_v63, %v3358_v11  ;;  %v7669_v33 = vpop.f32.mrb[11].mxu1  ;;  %v7797_v4 = vpop.f32.mrb[15].mxu0  ;;  %4370 = vst.msk [vmem:[#allocation3 + $0xe0] sm:$0xff] %vm710_vm0, %v4329_v19  ;;  %v3366_v11 = vld [vmem:[#allocation3 + $0x138] sm:$0xff] }
 0x37e   : > { %v3884_v6 = vld [vmem:[#allocation3 + $0xe8] sm:$0xff] }
 0x37f   : > { %3845 = vst.msk [vmem:[#allocation3 + $0xf8] sm:$0xff] %vm710_vm0, %v3804_v56  ;;  %v4330_v8 = vadd.f32 %v4242_v17, %v3884_v6 }
 0x380   : > { %v3729_v21 = vpop.f32.mrb[12].mxu1  ;;  %v4262_v10 = vpop.f32.mrb[16].mxu0 }
 0x381   : > { %v3805_v61 = vadd.f32 %v3729_v21, %v3359_v51  ;;  %v7672_v12 = vpop.f32.mrb[13].mxu1  ;;  %v7800_v41 = vpop.f32.mrb[17].mxu0  ;;  %4371 = vst.msk [vmem:[#allocation3 + $0xe8] sm:$0xff] %vm710_vm0, %v4330_v8  ;;  %v3367_v51 = vld [vmem:[#allocation3 + $0x140] sm:$0xf] }
 0x382   : > { %v3885_v52 = vld [vmem:[#allocation3 + $0xf0] sm:$0xff] }
 0x383   : > { %3846 = vst.msk [vmem:[#allocation3 + $0x100] sm:$0xff] %vm710_vm0, %v3805_v61  ;;  %v4331_v14 = vadd.f32 %v4247_v29, %v3885_v52 }
 0x384   : > { %v3734_v13 = vpop.f32.mrb[14].mxu1  ;;  %v4267_v62 = vpop.f32.mrb[18].mxu0 }
 0x385   : > { %v3806_v23 = vadd.f32 %v3734_v13, %v3360_v16  ;;  %v7675_v18 = vpop.f32.mrb[15].mxu1  ;;  %v7803_v60 = vpop.f32.mrb[19].mxu0  ;;  %4372 = vst.msk [vmem:[#allocation3 + $0xf0] sm:$0xff] %vm710_vm0, %v4331_v14  ;;  %v4383_v16 = vld [vmem:[#allocation3] sm:$0xff] }
 0x386   : > { %v3886_v35 = vld [vmem:[#allocation3 + $0xf8] sm:$0xff] }
 0x387   : > { %3847 = vst.msk [vmem:[#allocation3 + $0x108] sm:$0xff] %vm710_vm0, %v3806_v23  ;;  %v4332_v20 = vadd.f32 %v4252_v57, %v3886_v35 }
 0x388   : > { %v3739_v0 = vpop.f32.mrb[16].mxu1  ;;  %v4272_v24 = vpop.f32.mrb[20].mxu0 }
 0x389   : > { %v3807_v26 = vadd.f32 %v3739_v0, %v3361_v22  ;;  %v7678_v28 = vpop.f32.mrb[17].mxu1  ;;  %v7806_v25 = vpop.f32.mrb[21].mxu0  ;;  %4373 = vst.msk [vmem:[#allocation3 + $0xf8] sm:$0xff] %vm710_vm0, %v4332_v20  ;;  %v4384_v22 = vld [vmem:[#allocation3 + $0x8] sm:$0xff] }
 0x38a   : > { %v3887_v15 = vld [vmem:[#allocation3 + $0x100] sm:$0xff] }
 0x38b   : > { %3848 = vst.msk [vmem:[#allocation3 + $0x110] sm:$0xff] %vm710_vm0, %v3807_v26  ;;  %v4333_v39 = vadd.f32 %v4257_v1, %v3887_v15 }
 0x38c   : > { %v3744_v2 = vpop.f32.mrb[18].mxu1  ;;  %v4277_v36 = vpop.f32.mrb[22].mxu0 }
 0x38d   : > { %v3808_v32 = vadd.f32 %v3744_v2, %v3362_v30  ;;  %v7681_v40 = vpop.f32.mrb[19].mxu1  ;;  %v7809_v34 = vpop.f32.mrb[23].mxu0  ;;  %4374 = vst.msk [vmem:[#allocation3 + $0x100] sm:$0xff] %vm710_vm0, %v4333_v39  ;;  %v4385_v30 = vld [vmem:[#allocation3 + $0x10] sm:$0xff] }
 0x38e   : > { %v3888_v5 = vld [vmem:[#allocation3 + $0x108] sm:$0xff] }
 0x38f   : > { %3849 = vst.msk [vmem:[#allocation3 + $0x118] sm:$0xff] %vm710_vm0, %v3808_v32  ;;  %v4334_v27 = vadd.f32 %v4262_v10, %v3888_v5 }
 0x390   : > { %v3749_v37 = vpop.f32.mrb[20].mxu1  ;;  %v4282_v17 = vpop.f32.mrb[24].mxu0 }
 0x391   : > { %v3809_v42 = vadd.f32 %v3749_v37, %v3363_v43  ;;  %v7684_v38 = vpop.f32.mrb[21].mxu1  ;;  %v7812_v7 = vpop.f32.mrb[25].mxu0  ;;  %4375 = vst.msk [vmem:[#allocation3 + $0x108] sm:$0xff] %vm710_vm0, %v4334_v27  ;;  %v4386_v43 = vld [vmem:[#allocation3 + $0x18] sm:$0xff] }
 0x392   : > { %v3889_v44 = vld [vmem:[#allocation3 + $0x110] sm:$0xff] }
 0x393   : > { %3850 = vst.msk [vmem:[#allocation3 + $0x120] sm:$0xff] %vm710_vm0, %v3809_v42  ;;  %v4335_v47 = vadd.f32 %v4267_v62, %v3889_v44 }
 0x394   : > { %v3754_v46 = vpop.f32.mrb[22].mxu1  ;;  %v4287_v29 = vpop.f32.mrb[26].mxu0 }
 0x395   : > { %v3810_v48 = vadd.f32 %v3754_v46, %v3364_v3  ;;  %v7687_v45 = vpop.f32.mrb[23].mxu1  ;;  %v7815_v53 = vpop.f32.mrb[27].mxu0  ;;  %4376 = vst.msk [vmem:[#allocation3 + $0x110] sm:$0xff] %vm710_vm0, %v4335_v47  ;;  %v4387_v3 = vld [vmem:[#allocation3 + $0x20] sm:$0xff] }
 0x396   : > { %v3890_v9 = vld [vmem:[#allocation3 + $0x118] sm:$0xff] }
 0x397   : > { %3851 = vst.msk [vmem:[#allocation3 + $0x128] sm:$0xff] %vm710_vm0, %v3810_v48  ;;  %v4336_v59 = vadd.f32 %v4272_v24, %v3890_v9 }
 0x398   : > { %v3759_v55 = vpop.f32.mrb[24].mxu1  ;;  %v4292_v57 = vpop.f32.mrb[28].mxu0 }
 0x399   : > { %v3811_v31 = vadd.f32 %v3759_v55, %v3365_v54  ;;  %v7690_v50 = vpop.f32.mrb[25].mxu1  ;;  %v7818_v58 = vpop.f32.mrb[29].mxu0  ;;  %4377 = vst.msk [vmem:[#allocation3 + $0x118] sm:$0xff] %vm710_vm0, %v4336_v59  ;;  %v4388_v54 = vld [vmem:[#allocation3 + $0x28] sm:$0xff] }
 0x39a   : > { %v3891_v49 = vld [vmem:[#allocation3 + $0x120] sm:$0xff] }
 0x39b   : > { %3852 = vst.msk [vmem:[#allocation3 + $0x130] sm:$0xff] %vm710_vm0, %v3811_v31  ;;  %v4337_v19 = vadd.f32 %v4277_v36, %v3891_v49 }
 0x39c   : > { %v3764_v63 = vpop.f32.mrb[26].mxu1  ;;  %v4297_v1 = vpop.f32.mrb[30].mxu0 }
 0x39d   : > { %v3812_v56 = vadd.f32 %v3764_v63, %v3366_v11  ;;  %v7693_v33 = vpop.f32.mrb[27].mxu1  ;;  %v7821_v4 = vpop.f32.mrb[31].mxu0  ;;  %4378 = vst.msk [vmem:[#allocation3 + $0x120] sm:$0xff] %vm710_vm0, %v4337_v19  ;;  %v4389_v11 = vld [vmem:[#allocation3 + $0x30] sm:$0xff] }
 0x39e   : > { %v3892_v6 = vld [vmem:[#allocation3 + $0x128] sm:$0xff] }
 0x39f   : > { %v4338_v8 = vadd.f32 %v4282_v17, %v3892_v6  ;;  %3853 = vst.msk [vmem:[#allocation3 + $0x138] sm:$0xff] %vm710_vm0, %v3812_v56 }
 0x3a0   : > { %v3769_v21 = vpop.f32.mrb[28].mxu1  ;;  %v5153_v10 = vpop.f32.mrb[32].mxu0 }
 0x3a1   : > { %4379 = vst.msk [vmem:[#allocation3 + $0x128] sm:$0xff] %vm710_vm0, %v4338_v8  ;;  %v3813_v61 = vadd.f32 %v3769_v21, %v3367_v51  ;;  %v7696_v12 = vpop.f32.mrb[29].mxu1  ;;  %v7951_v41 = vpop.f32.mrb[33].mxu0  ;;  %v4390_v51 = vld [vmem:[#allocation3 + $0x38] sm:$0xff] }
 0x3a2   : > { %v3893_v52 = vld [vmem:[#allocation3 + $0x130] sm:$0xff] }
 0x3a3   : > { %v4339_v14 = vadd.f32 %v4287_v29, %v3893_v52  ;;  %3854 = vst.msk [vmem:[#allocation3 + $0x140] sm:$0xf] %vm721_vm4, %v3813_v61 }
 0x3a4   : > { %v4625_v13 = vpop.f32.mrb[30].mxu1  ;;  %v5158_v62 = vpop.f32.mrb[34].mxu0 }
 0x3a5   : > { %4380 = vst.msk [vmem:[#allocation3 + $0x130] sm:$0xff] %vm710_vm0, %v4339_v14  ;;  %v4829_v23 = vadd.f32 %v4625_v13, %v4383_v16  ;;  %v7826_v18 = vpop.f32.mrb[31].mxu1  ;;  %v7954_v60 = vpop.f32.mrb[35].mxu0  ;;  %v4391_v13 = vld [vmem:[#allocation3 + $0x40] sm:$0xff] }
 0x3a6   : > { %v3894_v35 = vld [vmem:[#allocation3 + $0x138] sm:$0xff] }
 0x3a7   : > { %v4340_v20 = vadd.f32 %v4292_v57, %v3894_v35  ;;  %4870 = vst.msk [vmem:[#allocation3] sm:$0xff] %vm710_vm0, %v4829_v23 }
 0x3a8   : > { %v4630_v0 = vpop.f32.mrb[32].mxu1  ;;  %v5163_v24 = vpop.f32.mrb[36].mxu0 }
 0x3a9   : > { %4381 = vst.msk [vmem:[#allocation3 + $0x138] sm:$0xff] %vm710_vm0, %v4340_v20  ;;  %v4830_v26 = vadd.f32 %v4630_v0, %v4384_v22  ;;  %v7829_v28 = vpop.f32.mrb[33].mxu1  ;;  %v7957_v25 = vpop.f32.mrb[37].mxu0 }
 0x3aa   : > { %v3895_v15 = vld [vmem:[#allocation3 + $0x140] sm:$0xf] }
 0x3ab   : > { %v4341_v39 = vadd.f32 %v4297_v1, %v3895_v15  ;;  %4871 = vst.msk [vmem:[#allocation3 + $0x8] sm:$0xff] %vm710_vm0, %v4830_v26  ;;  %v4392_v26 = vld [vmem:[#allocation3 + $0x48] sm:$0xff] }
 0x3ac   : > { %v4635_v2 = vpop.f32.mrb[34].mxu1  ;;  %v5168_v36 = vpop.f32.mrb[38].mxu0 }
 0x3ad   : > { %4382 = vst.msk [vmem:[#allocation3 + $0x140] sm:$0xf] %vm721_vm4, %v4341_v39  ;;  %v4831_v32 = vadd.f32 %v4635_v2, %v4385_v30  ;;  %v7832_v40 = vpop.f32.mrb[35].mxu1  ;;  %v7960_v34 = vpop.f32.mrb[39].mxu0 }
 0x3ae   : > { %v4911_v5 = vld [vmem:[#allocation3] sm:$0xff]  ;;  %v4393_v34 = vld [vmem:[#allocation3 + $0x50] sm:$0xff] }
 0x3af   : > { %v5357_v27 = vadd.f32 %v5153_v10, %v4911_v5  ;;  %4872 = vst.msk [vmem:[#allocation3 + $0x10] sm:$0xff] %vm710_vm0, %v4831_v32 }
 0x3b0   : > { %v4640_v37 = vpop.f32.mrb[36].mxu1  ;;  %v5173_v17 = vpop.f32.mrb[40].mxu0 }
 0x3b1   : > { %5398 = vst.msk [vmem:[#allocation3] sm:$0xff] %vm710_vm0, %v5357_v27  ;;  %v4832_v42 = vadd.f32 %v4640_v37, %v4386_v43  ;;  %v7835_v38 = vpop.f32.mrb[37].mxu1  ;;  %v7963_v7 = vpop.f32.mrb[41].mxu0 }
 0x3b2   : > { %v4912_v44 = vld [vmem:[#allocation3 + $0x8] sm:$0xff] }
 0x3b3   : > { %v5358_v47 = vadd.f32 %v5158_v62, %v4912_v44  ;;  %4873 = vst.msk [vmem:[#allocation3 + $0x18] sm:$0xff] %vm710_vm0, %v4832_v42 }
 0x3b4   : > { %v4645_v46 = vpop.f32.mrb[38].mxu1  ;;  %v5178_v29 = vpop.f32.mrb[42].mxu0 }
 0x3b5   : > { %5399 = vst.msk [vmem:[#allocation3 + $0x8] sm:$0xff] %vm710_vm0, %v5358_v47  ;;  %v4833_v48 = vadd.f32 %v4645_v46, %v4387_v3  ;;  %v7838_v45 = vpop.f32.mrb[39].mxu1  ;;  %v7966_v53 = vpop.f32.mrb[43].mxu0  ;;  %v4394_v47 = vld [vmem:[#allocation3 + $0x58] sm:$0xff] }
 0x3b6   : > { %v4913_v9 = vld [vmem:[#allocation3 + $0x10] sm:$0xff] }
 0x3b7   : > { %v5359_v59 = vadd.f32 %v5163_v24, %v4913_v9  ;;  %4874 = vst.msk [vmem:[#allocation3 + $0x20] sm:$0xff] %vm710_vm0, %v4833_v48 }
 0x3b8   : > { %v4650_v55 = vpop.f32.mrb[40].mxu1  ;;  %v5183_v57 = vpop.f32.mrb[44].mxu0 }
 0x3b9   : > { %5400 = vst.msk [vmem:[#allocation3 + $0x10] sm:$0xff] %vm710_vm0, %v5359_v59  ;;  %v4834_v31 = vadd.f32 %v4650_v55, %v4388_v54  ;;  %v7841_v50 = vpop.f32.mrb[41].mxu1  ;;  %v7969_v58 = vpop.f32.mrb[45].mxu0 }
 0x3ba   : > { %v4914_v49 = vld [vmem:[#allocation3 + $0x18] sm:$0xff] }
 0x3bb   : > { %v5360_v19 = vadd.f32 %v5168_v36, %v4914_v49  ;;  %4875 = vst.msk [vmem:[#allocation3 + $0x28] sm:$0xff] %vm710_vm0, %v4834_v31  ;;  %v4395_v31 = vld [vmem:[#allocation3 + $0x60] sm:$0xff] }
 0x3bc   : > { %v4655_v63 = vpop.f32.mrb[42].mxu1  ;;  %v5188_v1 = vpop.f32.mrb[46].mxu0 }
 0x3bd   : > { %5401 = vst.msk [vmem:[#allocation3 + $0x18] sm:$0xff] %vm710_vm0, %v5360_v19  ;;  %v4835_v56 = vadd.f32 %v4655_v63, %v4389_v11  ;;  %v7844_v33 = vpop.f32.mrb[43].mxu1  ;;  %v7972_v4 = vpop.f32.mrb[47].mxu0 }
 0x3be   : > { %v4915_v6 = vld [vmem:[#allocation3 + $0x20] sm:$0xff] }
 0x3bf   : > { %v5361_v8 = vadd.f32 %v5173_v17, %v4915_v6  ;;  %4876 = vst.msk [vmem:[#allocation3 + $0x30] sm:$0xff] %vm710_vm0, %v4835_v56  ;;  %v4396_v56 = vld [vmem:[#allocation3 + $0x68] sm:$0xff] }
 0x3c0   : > { %v4660_v21 = vpop.f32.mrb[44].mxu1  ;;  %v5193_v10 = vpop.f32.mrb[48].mxu0 }
 0x3c1   : > { %5402 = vst.msk [vmem:[#allocation3 + $0x20] sm:$0xff] %vm710_vm0, %v5361_v8  ;;  %v4836_v61 = vadd.f32 %v4660_v21, %v4390_v51  ;;  %v7847_v12 = vpop.f32.mrb[45].mxu1  ;;  %v7975_v41 = vpop.f32.mrb[49].mxu0 }
 0x3c2   : > { %v4916_v52 = vld [vmem:[#allocation3 + $0x28] sm:$0xff] }
 0x3c3   : > { %v5362_v14 = vadd.f32 %v5178_v29, %v4916_v52  ;;  %4877 = vst.msk [vmem:[#allocation3 + $0x38] sm:$0xff] %vm710_vm0, %v4836_v61  ;;  %v4397_v52 = vld [vmem:[#allocation3 + $0x70] sm:$0xff] }
 0x3c4   : > { %v5439_v16 = vld [vmem:[#allocation3 + $0x13] sm:$0xff]  ;;  %v4665_v62 = vpop.f32.mrb[46].mxu1  ;;  %v5198_v23 = vpop.f32.mrb[50].mxu0 }
 0x3c5   : > { %v6369_v18 = vpack.c.bf16 %v5439_v16, %v5439_v16  ;;  %5403 = vst.msk [vmem:[#allocation3 + $0x28] sm:$0xff] %vm710_vm0, %v5362_v14  ;;  %v4837_v60 = vadd.f32 %v4665_v62, %v4391_v13  ;;  %v7850_v35 = vpop.f32.mrb[47].mxu1  ;;  %v7978_v20 = vpop.f32.mrb[51].mxu0 }
 0x3c6   : > { %v4917_v22 = vld [vmem:[#allocation3 + $0x30] sm:$0xff] }
 0x3c7   : > { %5449 = vst.msk [vmem:[%s10038_s12] sm:$0xf] %vm721_vm4, %v6369_v18  ;;  %v5363_v0 = vadd.f32 %v5183_v57, %v4917_v22 }
 0x3c8   : > { %4878 = vst.msk [vmem:[#allocation3 + $0x40] sm:$0xff] %vm710_vm0, %v4837_v60  ;;  %v5440_v24 = vld [vmem:[#allocation3 + $0x1b] sm:$0xff]  ;;  %v4670_v28 = vpop.f32.mrb[48].mxu1  ;;  %v5203_v25 = vpop.f32.mrb[52].mxu0 }
 0x3c9   : > { %v6370_v15 = vpack.c.bf16 %v5440_v24, %v5440_v24  ;;  %5404 = vst.msk [vmem:[#allocation3 + $0x30] sm:$0xff] %vm710_vm0, %v5363_v0  ;;  %v4838_v39 = vadd.f32 %v4670_v28, %v4392_v26  ;;  %v7853_v30 = vpop.f32.mrb[49].mxu1  ;;  %v7981_v2 = vpop.f32.mrb[53].mxu0  ;;  %v4398_v60 = vld [vmem:[#allocation3 + $0x78] sm:$0xff] }
 0x3ca   : > { %v4918_v36 = vld [vmem:[#allocation3 + $0x38] sm:$0xff]  ;;  %v4399_v2 = vld [vmem:[#allocation3 + $0x80] sm:$0xff] }
 0x3cb   : > { %5450 = vst.msk [vmem:[%s10038_s12 + $0x4] sm:$0xf] %vm721_vm4, %v6370_v15  ;;  %v5364_v32 = vadd.f32 %v5188_v1, %v4918_v36 }
 0x3cc   : > { %4879 = vst.msk [vmem:[#allocation3 + $0x48] sm:$0xff] %vm710_vm0, %v4838_v39  ;;  %v5451_v40 = vld [vmem:[#allocation3 + $0x25] sm:$0xff]  ;;  %v4675_v5 = vpop.f32.mrb[50].mxu1  ;;  %v5208_v27 = vpop.f32.mrb[54].mxu0 }
 0x3cd   : > { %v6371_v43 = vpack.c.bf16 %v5451_v40, %v5451_v40  ;;  %5405 = vst.msk [vmem:[#allocation3 + $0x38] sm:$0xff] %vm710_vm0, %v5364_v32  ;;  %v4839_v37 = vadd.f32 %v4675_v5, %v4393_v34  ;;  %v7856_v17 = vpop.f32.mrb[51].mxu1  ;;  %v7984_v42 = vpop.f32.mrb[55].mxu0 }
 0x3cf   : > { %v4919_v38 = vld [vmem:[#allocation3 + $0x40] sm:$0xff]  ;;  %5461 = vst.msk [vmem:[%s10038_s12 + $0x8] sm:$0xf] %vm721_vm4, %v6371_v43  ;;  %v4400_v43 = vld [vmem:[#allocation3 + $0x88] sm:$0xff] }
 0x3d0   : > { %v5365_v7 = vadd.f32 %v5193_v10, %v4919_v38  ;;  %4880 = vst.msk [vmem:[#allocation3 + $0x50] sm:$0xff] %vm710_vm0, %v4839_v37  ;;  %v5452_v44 = vld [vmem:[#allocation3 + $0x2d] sm:$0xff]  ;;  %v4680_v3 = vpop.f32.mrb[52].mxu1  ;;  %v5213_v46 = vpop.f32.mrb[56].mxu0 }
 0x3d1   : > { %v6372_v29 = vpack.c.bf16 %v5452_v44, %v5452_v44  ;;  %v4840_v48 = vadd.f32 %v4680_v3, %v4394_v47  ;;  %v7859_v45 = vpop.f32.mrb[53].mxu1  ;;  %v7987_v53 = vpop.f32.mrb[57].mxu0 }
 0x3d2   : > { %5406 = vst.msk [vmem:[#allocation3 + $0x40] sm:$0xff] %vm710_vm0, %v5365_v7 }
 0x3d3   : > { %v4920_v9 = vld [vmem:[#allocation3 + $0x48] sm:$0xff]  ;;  %5462 = vst.msk [vmem:[%s10038_s12 + $0xc] sm:$0xf] %vm721_vm4, %v6372_v29 }
 0x3d4   : > { %v5366_v59 = vadd.f32 %v5198_v23, %v4920_v9  ;;  %4881 = vst.msk [vmem:[#allocation3 + $0x58] sm:$0xff] %vm710_vm0, %v4840_v48  ;;  %v5463_v54 = vld [vmem:[#allocation3 + $0x37] sm:$0xff]  ;;  %v4685_v55 = vpop.f32.mrb[54].mxu1  ;;  %v5218_v57 = vpop.f32.mrb[58].mxu0 }
 0x3d5   : > { %v7862_v50 = vpop.f32.mrb[55].mxu1  ;;  %v7990_v58 = vpop.f32.mrb[59].mxu0  ;;  %v6373_v49 = vpack.c.bf16 %v5463_v54, %v5463_v54  ;;  %v4841_v11 = vadd.f32 %v4685_v55, %v4395_v31  ;;  %v4401_v48 = vld [vmem:[#allocation3 + $0x90] sm:$0xff] }
 0x3d6   : > { %5407 = vst.msk [vmem:[#allocation3 + $0x48] sm:$0xff] %vm710_vm0, %v5366_v59  ;;  %v4402_v50 = vld [vmem:[#allocation3 + $0x98] sm:$0xff] }
 0x3d7   : > { %v4921_v19 = vld [vmem:[#allocation3 + $0x50] sm:$0xff]  ;;  %5473 = vst.msk [vmem:[%s10038_s12 + $0x10] sm:$0xf] %vm721_vm4, %v6373_v49 }
 0x3d8   : > { %v5367_v63 = vadd.f32 %v5203_v25, %v4921_v19  ;;  %4882 = vst.msk [vmem:[#allocation3 + $0x60] sm:$0xff] %vm710_vm0, %v4841_v11  ;;  %v4690_v33 = vpop.f32.mrb[56].mxu1  ;;  %v5223_v4 = vpop.f32.mrb[60].mxu0 }
 0x3d9   : > { %v5464_v1 = vld [vmem:[#allocation3 + $0x3f] sm:$0xff]  ;;  %v4842_v8 = vadd.f32 %v4690_v33, %v4396_v56  ;;  %v7865_v51 = vpop.f32.mrb[57].mxu1  ;;  %v7993_v21 = vpop.f32.mrb[61].mxu0 }
 0x3da   : > { %v6374_v6 = vpack.c.bf16 %v5464_v1, %v5464_v1  ;;  %5408 = vst.msk [vmem:[#allocation3 + $0x50] sm:$0xff] %vm710_vm0, %v5367_v63 }
 0x3db   : > { %v4922_v10 = vld [vmem:[#allocation3 + $0x58] sm:$0xff]  ;;  %4883 = vst.msk [vmem:[#allocation3 + $0x68] sm:$0xff] %vm710_vm0, %v4842_v8  ;;  %v4403_v8 = vld [vmem:[#allocation3 + $0xa0] sm:$0xff] }
 0x3dc   : > { %5474 = vst.msk [vmem:[%s10038_s12 + $0x14] sm:$0xf] %vm721_vm4, %v6374_v6  ;;  %v5368_v61 = vadd.f32 %v5208_v27, %v4922_v10  ;;  %v4695_v12 = vpop.f32.mrb[58].mxu1  ;;  %v5228_v41 = vpop.f32.mrb[62].mxu0 }
 0x3dd   : > { %v7868_v14 = vpop.f32.mrb[59].mxu1  ;;  %v7996_v16 = vpop.f32.mrb[63].mxu0  ;;  %v4843_v13 = vadd.f32 %v4695_v12, %v4397_v52 }
 0x3de   : > { %5409 = vst.msk [vmem:[#allocation3 + $0x58] sm:$0xff] %vm710_vm0, %v5368_v61 }
 0x3df   : > { %v4923_v62 = vld [vmem:[#allocation3 + $0x60] sm:$0xff]  ;;  %4884 = vst.msk [vmem:[#allocation3 + $0x70] sm:$0xff] %vm710_vm0, %v4843_v13 }
 0x3e0   : > { %v5369_v18 = vadd.f32 %v5213_v46, %v4923_v62  ;;  %v4700_v35 = vpop.f32.mrb[60].mxu1  ;;  %v5233_v20 = vpop.f32.mrb[64].mxu0 }
 0x3e1   : > { %v5475_v23 = vld [vmem:[#allocation3 + $0x49] sm:$0xff]  ;;  %v4844_v0 = vadd.f32 %v4700_v35, %v4398_v60  ;;  %v7871_v24 = vpop.f32.mrb[61].mxu1  ;;  %v7999_v26 = vpop.f32.mrb[65].mxu0 }
 0x3e2   : > { %v6375_v22 = vpack.c.bf16 %v5475_v23, %v5475_v23  ;;  %5410 = vst.msk [vmem:[#allocation3 + $0x60] sm:$0xff] %vm710_vm0, %v5369_v18  ;;  %v4924_v28 = vld [vmem:[#allocation3 + $0x68] sm:$0xff] }
 0x3e3   : > { %v5370_v25 = vadd.f32 %v5218_v57, %v4924_v28  ;;  %4885 = vst.msk [vmem:[#allocation3 + $0x78] sm:$0xff] %vm710_vm0, %v4844_v0  ;;  %v4404_v23 = vld [vmem:[#allocation3 + $0xa8] sm:$0xff]  ;;  %v6474_v0 = vld [vmem:[%s10038_s12] sm:$0xff]  }
 0x3e4   : > { %5485 = vst.msk [vmem:[%s10038_s12 + $0x18] sm:$0xf] %vm721_vm4, %v6375_v22  ;;  %v4705_v39 = vpop.f32.mrb[62].mxu1  ;;  %v5238_v30 = vpop.f32.mrb[66].mxu0  ;;  %v4405_v28 = vld [vmem:[#allocation3 + $0xb0] sm:$0xff] }
 0x3e5   : > { %v5476_v15 = vld [vmem:[#allocation3 + $0x51] sm:$0xff]  ;;  %5411 = vst.msk [vmem:[#allocation3 + $0x68] sm:$0xff] %vm710_vm0, %v5370_v25  ;;  %v7874_v36 = vpop.f32.mrb[63].mxu1  ;;  %v8002_v32 = vpop.f32.mrb[67].mxu0  ;;  %v4845_v34 = vadd.f32 %v4705_v39, %v4399_v2 }
 0x3e6   : > { %v6376_v40 = vpack.c.bf16 %v5476_v15, %v5476_v15  ;;  %v4925_v5 = vld [vmem:[#allocation3 + $0x70] sm:$0xff]  ;;  %v6475_v32 = vunpack.c.l.bf16 %v6474_v0 }
 0x3e7   : > { %v5371_v27 = vadd.f32 %v5223_v4, %v4925_v5  ;;  %4886 = vst.msk [vmem:[#allocation3 + $0x80] sm:$0xff] %vm710_vm0, %v4845_v34  ;;  %v6554_v34 = vld [vmem:[%s10038_s12 + $0x8] sm:$0xff]  }
 0x3e8   : > { %5486 = vst.msk [vmem:[%s10038_s12 + $0x1c] sm:$0xf] %vm721_vm4, %v6376_v40  ;;  %v4710_v37 = vpop.f32.mrb[64].mxu1  ;;  %v5243_v17 = vpop.f32.mrb[68].mxu0  ;;  %v6476_v40 = vunpack.c.h.bf16 %v6474_v0  ;;  %v4409_v0 = vld [vmem:[#allocation3 + $0xd0] sm:$0xff] }
 0x3e9   : > { %v5487_v42 = vld [vmem:[#allocation3 + $0x5b] sm:$0xff]  ;;  %v4846_v38 = vadd.f32 %v4710_v37, %v4400_v43  ;;  %v7877_v7 = vpop.f32.mrb[65].mxu1  ;;  %v8005_v44 = vpop.f32.mrb[69].mxu0  ;;  %5412 = vst.msk [vmem:[#allocation3 + $0x70] sm:$0xff] %vm710_vm0, %v5371_v27 }
 0x3ea   : > { %v6377_v47 = vpack.c.bf16 %v5487_v42, %v5487_v42  ;;  %v4926_v3 = vld [vmem:[#allocation3 + $0x78] sm:$0xff]  ;;  %v5766_v44 = vmul.f32 %v6475_v32, %v6475_v32 }
 0x3eb   : > { %v5372_v46 = vadd.f32 %v5228_v41, %v4926_v3  ;;  %4887 = vst.msk [vmem:[#allocation3 + $0x88] sm:$0xff] %vm710_vm0, %v4846_v38  ;;  %v4406_v42 = vld [vmem:[#allocation3 + $0xb8] sm:$0xff] }
 0x3ec   : > { %5497 = vst.msk [vmem:[%s10038_s12 + $0x20] sm:$0xf] %vm721_vm4, %v6377_v47  ;;  %v5488_v29 = vld [vmem:[#allocation3 + $0x63] sm:$0xff]  ;;  %v4715_v45 = vpop.f32.mrb[66].mxu1  ;;  %v5248_v53 = vpop.f32.mrb[70].mxu0  ;;  %v5767_v47 = vmul.f32 %v6476_v40, %v6476_v40 }
 0x3ed   : > { %v6378_v9 = vpack.c.bf16 %v5488_v29, %v5488_v29  ;;  %5413 = vst.msk [vmem:[#allocation3 + $0x78] sm:$0xff] %vm710_vm0, %v5372_v46  ;;  %v4847_v59 = vadd.f32 %v4715_v45, %v4401_v48  ;;  %v7880_v54 = vpop.f32.mrb[67].mxu1  ;;  %v8008_v55 = vpop.f32.mrb[71].mxu0  ;;  %v5695_v29 = vsel %vm710_vm0, %v6475_v32, 0.0  ;;  %v6555_v48 = vld [vmem:[%s10038_s12 + $0x10] sm:$0xff]  }
 0x3ee   : > { %v4927_v57 = vld [vmem:[#allocation3 + $0x80] sm:$0xff]  ;;  %v5696_v55 = vsel %vm710_vm0, %v6476_v40, 0.0 }
 0x3ef   : > { %5498 = vst.msk [vmem:[%s10038_s12 + $0x24] sm:$0xf] %vm721_vm4, %v6378_v9  ;;  %v5373_v31 = vadd.f32 %v5233_v20, %v4927_v57  ;;  %v4407_v9 = vld [vmem:[#allocation3 + $0xc0] sm:$0xff] }
 0x3f0   : > { %4888 = vst.msk [vmem:[#allocation3 + $0x90] sm:$0xff] %vm710_vm0, %v4847_v59  ;;  %v4720_v58 = vpop.f32.mrb[68].mxu1  ;;  %v5253_v49 = vpop.f32.mrb[72].mxu0  ;;  %v5499_v19 = vld [vmem:[#allocation3 + $0x6d] sm:$0xff] }
 0x3f1   : > { %v4848_v11 = vadd.f32 %v4720_v58, %v4402_v50  ;;  %v7883_v63 = vpop.f32.mrb[69].mxu1  ;;  %v8011_v1 = vpop.f32.mrb[73].mxu0  ;;  %5414 = vst.msk [vmem:[#allocation3 + $0x80] sm:$0xff] %vm710_vm0, %v5373_v31  ;;  %v6379_v33 = vpack.c.bf16 %v5499_v19, %v5499_v19  ;;  %v5798_v19 = vsel %vm710_vm0, %v5766_v44, 0.0  ;;  %v4410_v44 = vld [vmem:[#allocation3 + $0xd8] sm:$0xff] }
 0x3f2   : > { %v4928_v56 = vld [vmem:[#allocation3 + $0x88] sm:$0xff]  ;;  %v6480_v1 = vunpack.c.h.bf16 %v6554_v34 }
 0x3f3   : > { %v5374_v4 = vadd.f32 %v5238_v30, %v4928_v56  ;;  %4889 = vst.msk [vmem:[#allocation3 + $0x98] sm:$0xff] %vm710_vm0, %v4848_v11  ;;  %v5799_v11 = vsel %vm710_vm0, %v5767_v47, 0.0 }
 0x3f4   : > { %v5500_v6 = vld [vmem:[#allocation3 + $0x75] sm:$0xff]  ;;  %v4725_v51 = vpop.f32.mrb[70].mxu1  ;;  %v5258_v21 = vpop.f32.mrb[74].mxu0  ;;  %5509 = vst.msk [vmem:[%s10038_s12 + $0x28] sm:$0xf] %vm721_vm4, %v6379_v33  ;;  %v6483_v33 = vunpack.c.l.bf16 %v6555_v48 }
 0x3f5   : > { %v6380_v10 = vpack.c.bf16 %v5500_v6, %v5500_v6  ;;  %5415 = vst.msk [vmem:[#allocation3 + $0x88] sm:$0xff] %vm710_vm0, %v5374_v4  ;;  %v4849_v61 = vadd.f32 %v4725_v51, %v4403_v8  ;;  %v7886_v12 = vpop.f32.mrb[71].mxu1  ;;  %v8014_v41 = vpop.f32.mrb[75].mxu0  ;;  %v5697_v6 = vadd.f32 %v5696_v55, %v5695_v29 }
 0x3f7   : > { %v4929_v52 = vld [vmem:[#allocation3 + $0x90] sm:$0xff]  ;;  %5510 = vst.msk [vmem:[%s10038_s12 + $0x2c] sm:$0xf] %vm721_vm4, %v6380_v10 }
 0x3f8   : > { %v5375_v14 = vadd.f32 %v5243_v17, %v4929_v52  ;;  %4890 = vst.msk [vmem:[#allocation3 + $0xa0] sm:$0xff] %vm710_vm0, %v4849_v61  ;;  %v4730_v16 = vpop.f32.mrb[72].mxu1  ;;  %v5263_v13 = vpop.f32.mrb[76].mxu0  ;;  %v5511_v62 = vld [vmem:[#allocation3 + $0x7f] sm:$0xff]  ;;  %v6479_v17 = vunpack.c.l.bf16 %v6554_v34  ;;  %v4408_v61 = vld [vmem:[#allocation3 + $0xc8] sm:$0xff]  ;;  %v5800_v52 = vadd.f32 %v5799_v11, %v5798_v19 }
 0x3f9   : > { %v7889_v18 = vpop.f32.mrb[73].mxu1  ;;  %v8017_v60 = vpop.f32.mrb[77].mxu0  ;;  %v6381_v35 = vpack.c.bf16 %v5511_v62, %v5511_v62  ;;  %v4850_v22 = vadd.f32 %v4730_v16, %v4404_v23  ;;  %v6556_v16 = vld [vmem:[%s10038_s12 + $0x18] sm:$0xff]   ;;  %v5769_v23 = vmul.f32 %v6480_v1, %v6480_v1  ;;  %v4411_v19 = vld [vmem:[#allocation3 + $0xe0] sm:$0xff] }
 0x3fa   : > { %5416 = vst.msk [vmem:[#allocation3 + $0x90] sm:$0xff] %vm710_vm0, %v5375_v14  ;;  %v4930_v20 = vld [vmem:[#allocation3 + $0x98] sm:$0xff]  ;;  %v5768_v57 = vmul.f32 %v6479_v17, %v6479_v17  ;;  %v5698_v56 = vsel %vm710_vm0, %v6479_v17, 0.0  ;;  %v5770_v18 = vmul.f32 %v6483_v33, %v6483_v33  ;;  %v6488_v55 = vunpack.c.h.bf16 %v6556_v16 }
 0x3fb   : > { %v5376_v24 = vadd.f32 %v5248_v53, %v4930_v20  ;;  %5521 = vst.msk [vmem:[%s10038_s12 + $0x30] sm:$0xf] %vm721_vm4, %v6381_v35  ;;  %v5699_v14 = vadd.f32 %v5698_v56, %v5697_v6  ;;  %v5700_v35 = vsel %vm710_vm0, %v6480_v1, 0.0 }
 0x3fc   : > { %v5512_v26 = vld [vmem:[#allocation3 + $0x87] sm:$0xff]  ;;  %4891 = vst.msk [vmem:[#allocation3 + $0xa8] sm:$0xff] %vm710_vm0, %v4850_v22  ;;  %v4735_v25 = vpop.f32.mrb[74].mxu1  ;;  %v10095_v15 = vpop.f32.mrb[78].mxu0  ;;  %v5801_v10 = vsel %vm710_vm0, %v5768_v57, 0.0 }
 0x3fd   : > { %v6382_v39 = vpack.c.bf16 %v5512_v26, %v5512_v26  ;;  %5417 = vst.msk [vmem:[#allocation3 + $0x98] sm:$0xff] %vm710_vm0, %v5376_v24  ;;  %v4851_v30 = vadd.f32 %v4735_v25, %v4405_v28  ;;  %v7892_v2 = vpop.f32.mrb[75].mxu1  ;;  %v8020_v36 = vpop.f32.mrb[79].mxu0  ;;  %v5802_v20 = vadd.f32 %v5801_v10, %v5800_v52  ;;  %v6484_v28 = vunpack.c.h.bf16 %v6555_v48 }
 0x3fe   : > { %v5702_v25 = vsel %vm710_vm0, %v6483_v33, 0.0  ;;  %v5701_v40 = vadd.f32 %v5700_v35, %v5699_v14 }
 0x3ff   : > { %v4931_v5 = vld [vmem:[#allocation3 + $0xa0] sm:$0xff]  ;;  %5522 = vst.msk [vmem:[%s10038_s12 + $0x34] sm:$0xf] %vm721_vm4, %v6382_v39  ;;  %v6487_v39 = vunpack.c.l.bf16 %v6556_v16  ;;  %v5708_v16 = vsel %vm710_vm0, %v6488_v55, 0.0 }
 0x400   : > { %v5377_v27 = vadd.f32 %v5253_v49, %v4931_v5  ;;  %4892 = vst.msk [vmem:[#allocation3 + $0xb0] sm:$0xff] %vm710_vm0, %v4851_v30  ;;  %v4740_v43 = vpop.f32.mrb[76].mxu1  ;;  %v10102_v37 = vpop.f32.mrb[80].mxu0  ;;  %v5803_v5 = vsel %vm710_vm0, %v5769_v23, 0.0 }
 0x401   : > { %v7895_v38 = vpop.f32.mrb[77].mxu1  ;;  %v8023_v7 = vpop.f32.mrb[81].mxu0  ;;  %v4852_v3 = vadd.f32 %v4740_v43, %v4406_v42  ;;  %v5804_v17 = vadd.f32 %v5803_v5, %v5802_v20  ;;  %v5703_v42 = vadd.f32 %v5702_v25, %v5701_v40  ;;  %v5772_v29 = vmul.f32 %v6487_v39, %v6487_v39 }
 0x402   : > { %5418 = vst.msk [vmem:[#allocation3 + $0xa0] sm:$0xff] %vm710_vm0, %v5377_v27  ;;  %v5805_v27 = vsel %vm710_vm0, %v5770_v18, 0.0  ;;  %v6557_v38 = vld [vmem:[%s10038_s12 + $0x20] sm:$0xff]   ;;  %v5706_v57 = vsel %vm710_vm0, %v6487_v39, 0.0  ;;  %v4412_v18 = vld [vmem:[#allocation3 + $0xe8] sm:$0xff] }
 0x403   : > { %v4932_v46 = vld [vmem:[#allocation3 + $0xa8] sm:$0xff]  ;;  %4893 = vst.msk [vmem:[#allocation3 + $0xb8] sm:$0xff] %vm710_vm0, %v4852_v3  ;;  %v5809_v56 = vsel %vm710_vm0, %v5772_v29, 0.0 }
 0x404   : > { %v5523_v45 = vld [vmem:[#allocation3 + $0x91] sm:$0xff]  ;;  %v5378_v53 = vadd.f32 %v5258_v21, %v4932_v46  ;;  %v4745_v59 = vpop.f32.mrb[78].mxu1  ;;  %v10108_v54 = vpop.f32.mrb[82].mxu0  ;;  %v5771_v46 = vmul.f32 %v6484_v28, %v6484_v28 }
 0x405   : > { %v6383_v31 = vpack.c.bf16 %v5523_v45, %v5523_v45  ;;  %v4853_v50 = vadd.f32 %v4745_v59, %v4407_v9  ;;  %v7898_v58 = vpop.f32.mrb[79].mxu1  ;;  %v8026_v49 = vpop.f32.mrb[83].mxu0  ;;  %v5806_v9 = vadd.f32 %v5805_v27, %v5804_v17  ;;  %v5704_v59 = vsel %vm710_vm0, %v6484_v28, 0.0 }
 0x406   : > { %5419 = vst.msk [vmem:[#allocation3 + $0xa8] sm:$0xff] %vm710_vm0, %v5378_v53  ;;  %v5705_v58 = vadd.f32 %v5704_v59, %v5703_v42  ;;  %v5807_v1 = vsel %vm710_vm0, %v5771_v46, 0.0  ;;  %v4413_v42 = vld [vmem:[#allocation3 + $0xf0] sm:$0xff] }
 0x407   : > { %v4933_v63 = vld [vmem:[#allocation3 + $0xb0] sm:$0xff]  ;;  %5533 = vst.msk [vmem:[%s10038_s12 + $0x38] sm:$0xf] %vm721_vm4, %v6383_v31  ;;  %v6491_v31 = vunpack.c.l.bf16 %v6557_v38 }
 0x408   : > { %v5379_v4 = vadd.f32 %v5263_v13, %v4933_v63  ;;  %4894 = vst.msk [vmem:[#allocation3 + $0xc0] sm:$0xff] %vm710_vm0, %v4853_v50  ;;  %v4750_v51 = vpop.f32.mrb[80].mxu1  ;;  %v10118_v21 = vpop.f32.mrb[84].mxu0  ;;  %v5707_v10 = vadd.f32 %v5706_v57, %v5705_v58 }
 0x409   : > { %v5524_v8 = vld [vmem:[#allocation3 + $0x99] sm:$0xff]  ;;  %v7901_v12 = vpop.f32.mrb[81].mxu1  ;;  %v8029_v41 = vpop.f32.mrb[85].mxu0  ;;  %v4854_v13 = vadd.f32 %v4750_v51, %v4408_v61  ;;  %v5808_v51 = vadd.f32 %v5807_v1, %v5806_v9  ;;  %v5710_v20 = vsel %vm710_vm0, %v6491_v31, 0.0 }
 0x40a   : > { %5420 = vst.msk [vmem:[#allocation3 + $0xb0] sm:$0xff] %vm710_vm0, %v5379_v4  ;;  %v6384_v62 = vpack.c.bf16 %v5524_v8, %v5524_v8  ;;  %v4934_v60 = vld [vmem:[#allocation3 + $0xb8] sm:$0xff]  ;;  %v5774_v41 = vmul.f32 %v6491_v31, %v6491_v31  ;;  %v5709_v25 = vadd.f32 %v5708_v16, %v5707_v10  ;;  %v4415_v16 = vld [vmem:[#allocation3 + $0x100] sm:$0xff] }
 0x40b   : > { %v5380_v22 = vadd.f32 %v10095_v15, %v4934_v60  ;;  %4895 = vst.msk [vmem:[#allocation3 + $0xc8] sm:$0xff] %vm710_vm0, %v4854_v13  ;;  %v6558_v61 = vld [vmem:[%s10038_s12 + $0x28] sm:$0xff]   ;;  %v6492_v13 = vunpack.c.h.bf16 %v6557_v38 }
 0x40c   : > { %5534 = vst.msk [vmem:[%s10038_s12 + $0x3c] sm:$0xf] %vm721_vm4, %v6384_v62  ;;  %v4755_v24 = vpop.f32.mrb[82].mxu1  ;;  %v10128_v26 = vpop.f32.mrb[86].mxu0  ;;  %v5810_v62 = vadd.f32 %v5809_v56, %v5808_v51  ;;  %v5711_v40 = vadd.f32 %v5710_v20, %v5709_v25  ;;  %v4416_v25 = vld [vmem:[#allocation3 + $0x108] sm:$0xff] }
 0x40d   : > { %v5535_v30 = vld [vmem:[#allocation3 + $0xa3] sm:$0xff]  ;;  %v4855_v2 = vadd.f32 %v4755_v24, %v4409_v0  ;;  %v7904_v36 = vpop.f32.mrb[83].mxu1  ;;  %v8032_v32 = vpop.f32.mrb[87].mxu0  ;;  %5421 = vst.msk [vmem:[#allocation3 + $0xb8] sm:$0xff] %vm710_vm0, %v5380_v22  ;;  %v6495_v22 = vunpack.c.l.bf16 %v6558_v61  ;;  %v5775_v27 = vmul.f32 %v6492_v13, %v6492_v13 }
 0x40e   : > { %v6385_v34 = vpack.c.bf16 %v5535_v30, %v5535_v30 }
 0x40f   : > { %v4935_v15 = vld [vmem:[#allocation3 + $0xc0] sm:$0xff]  ;;  %4896 = vst.msk [vmem:[#allocation3 + $0xd0] sm:$0xff] %vm710_vm0, %v4855_v2  ;;  %v5813_v2 = vsel %vm710_vm0, %v5774_v41, 0.0 }
 0x410   : > { %v5381_v43 = vadd.f32 %v10102_v37, %v4935_v15  ;;  %5545 = vst.msk [vmem:[%s10038_s12 + $0x40] sm:$0xf] %vm721_vm4, %v6385_v34  ;;  %v4760_v47 = vpop.f32.mrb[84].mxu1  ;;  %v10139_v3 = vpop.f32.mrb[88].mxu0  ;;  %v6559_v34 = vld [vmem:[%s10038_s12 + $0x30] sm:$0xff]  }
 0x411   : > { %v5536_v7 = vld [vmem:[#allocation3 + $0xab] sm:$0xff]  ;;  %v4856_v45 = vadd.f32 %v4760_v47, %v4410_v44  ;;  %v7907_v37 = vpop.f32.mrb[85].mxu1  ;;  %v8035_v53 = vpop.f32.mrb[89].mxu0  ;;  %v5712_v44 = vsel %vm710_vm0, %v6492_v13, 0.0  ;;  %v6500_v41 = vunpack.c.h.bf16 %v6559_v34 }
 0x412   : > { %v6386_v48 = vpack.c.bf16 %v5536_v7, %v5536_v7  ;;  %5422 = vst.msk [vmem:[#allocation3 + $0xc0] sm:$0xff] %vm710_vm0, %v5381_v43  ;;  %v4936_v50 = vld [vmem:[#allocation3 + $0xc8] sm:$0xff]  ;;  %v5776_v43 = vmul.f32 %v6495_v22, %v6495_v22  ;;  %v6499_v37 = vunpack.c.l.bf16 %v6559_v34  ;;  %v5713_v9 = vadd.f32 %v5712_v44, %v5711_v40 }
 0x413   : > { %4897 = vst.msk [vmem:[#allocation3 + $0xd8] sm:$0xff] %vm710_vm0, %v4856_v45  ;;  %v5382_v49 = vadd.f32 %v10108_v54, %v4936_v50  ;;  %v5773_v54 = vmul.f32 %v6488_v55, %v6488_v55  ;;  %v5714_v45 = vsel %vm710_vm0, %v6495_v22, 0.0  ;;  %v4414_v55 = vld [vmem:[#allocation3 + $0xf8] sm:$0xff]  ;;  %v5815_v50 = vsel %vm710_vm0, %v5775_v27, 0.0 }
 0x414   : > { %5546 = vst.msk [vmem:[%s10038_s12 + $0x44] sm:$0xf] %vm721_vm4, %v6386_v48  ;;  %v4765_v11 = vpop.f32.mrb[86].mxu1  ;;  %v10148_v63 = vpop.f32.mrb[90].mxu0  ;;  %v5547_v33 = vld [vmem:[#allocation3 + $0xb5] sm:$0xff]  ;;  %v6496_v48 = vunpack.c.h.bf16 %v6558_v61  ;;  %v5817_v58 = vsel %vm710_vm0, %v5776_v43, 0.0  ;;  %v5715_v56 = vadd.f32 %v5714_v45, %v5713_v9 }
 0x415   : > { %v4857_v4 = vadd.f32 %v4765_v11, %v4411_v19  ;;  %v7910_v6 = vpop.f32.mrb[87].mxu1  ;;  %v8038_v8 = vpop.f32.mrb[91].mxu0  ;;  %5423 = vst.msk [vmem:[#allocation3 + $0xc8] sm:$0xff] %vm710_vm0, %v5382_v49  ;;  %v6387_v52 = vpack.c.bf16 %v5547_v33, %v5547_v33  ;;  %v5811_v30 = vsel %vm710_vm0, %v5773_v54, 0.0  ;;  %v6560_v33 = vld [vmem:[%s10038_s12 + $0x38] sm:$0xff]   ;;  %v5720_v27 = vsel %vm710_vm0, %v6500_v41, 0.0 }
 0x416   : > { %v4937_v12 = vld [vmem:[#allocation3 + $0xd0] sm:$0xff]  ;;  %v5812_v32 = vadd.f32 %v5811_v30, %v5810_v62  ;;  %v5777_v6 = vmul.f32 %v6496_v48, %v6496_v48  ;;  %v5778_v8 = vmul.f32 %v6499_v37, %v6499_v37  ;;  %v5716_v54 = vsel %vm710_vm0, %v6496_v48, 0.0 }
 0x417   : > { %v5383_v14 = vadd.f32 %v10118_v21, %v4937_v12  ;;  %4898 = vst.msk [vmem:[#allocation3 + $0xe0] sm:$0xff] %vm710_vm0, %v4857_v4  ;;  %v4417_v45 = vld [vmem:[#allocation3 + $0x110] sm:$0xff] }
 0x418   : > { %v4770_v60 = vpop.f32.mrb[88].mxu1  ;;  %v10157_v35 = vpop.f32.mrb[92].mxu0  ;;  %5557 = vst.msk [vmem:[%s10038_s12 + $0x48] sm:$0xf] %vm721_vm4, %v6387_v52  ;;  %v5718_v52 = vsel %vm710_vm0, %v6499_v37, 0.0 }
 0x419   : > { %v5548_v23 = vld [vmem:[#allocation3 + $0xbd] sm:$0xff]  ;;  %5424 = vst.msk [vmem:[#allocation3 + $0xd0] sm:$0xff] %vm710_vm0, %v5383_v14  ;;  %v4858_v21 = vadd.f32 %v4770_v60, %v4412_v18  ;;  %v7913_v24 = vpop.f32.mrb[89].mxu1  ;;  %v8041_v28 = vpop.f32.mrb[93].mxu0  ;;  %v6503_v14 = vunpack.c.l.bf16 %v6560_v33  ;;  %v5819_v18 = vsel %vm710_vm0, %v5777_v6, 0.0  ;;  %v5821_v60 = vsel %vm710_vm0, %v5778_v8, 0.0 }
 0x41a   : > { %v6388_v0 = vpack.c.bf16 %v5548_v23, %v5548_v23  ;;  %v4938_v39 = vld [vmem:[#allocation3 + $0xd8] sm:$0xff]  ;;  %v5717_v23 = vadd.f32 %v5716_v54, %v5715_v56 }
 0x41b   : > { %v5384_v36 = vadd.f32 %v10128_v26, %v4938_v39  ;;  %4899 = vst.msk [vmem:[#allocation3 + $0xe8] sm:$0xff] %vm710_vm0, %v4858_v21  ;;  %v5814_v26 = vadd.f32 %v5813_v2, %v5812_v32  ;;  %v6561_v21 = vld [vmem:[%s10038_s12 + $0x40] sm:$0xff]   ;;  %v5779_v2 = vmul.f32 %v6500_v41, %v6500_v41 }
 0x41c   : > { %5558 = vst.msk [vmem:[%s10038_s12 + $0x4c] sm:$0xf] %vm721_vm4, %v6388_v0  ;;  %v4775_v15 = vpop.f32.mrb[90].mxu1  ;;  %v10170_v5 = vpop.f32.mrb[94].mxu0  ;;  %v5559_v17 = vld [vmem:[#allocation3 + $0xc7] sm:$0xff]  ;;  %v5719_v0 = vadd.f32 %v5718_v52, %v5717_v23 }
 0x41d   : > { %5425 = vst.msk [vmem:[#allocation3 + $0xd8] sm:$0xff] %vm710_vm0, %v5384_v36  ;;  %v7916_v38 = vpop.f32.mrb[91].mxu1  ;;  %v8044_v7 = vpop.f32.mrb[95].mxu0  ;;  %v6389_v47 = vpack.c.bf16 %v5559_v17, %v5559_v17  ;;  %v4859_v29 = vadd.f32 %v4775_v15, %v4413_v42  ;;  %v5816_v1 = vadd.f32 %v5815_v50, %v5814_v26  ;;  %v5780_v36 = vmul.f32 %v6503_v14, %v6503_v14 }
 0x41e   : > { %v4939_v46 = vld [vmem:[#allocation3 + $0xe0] sm:$0xff]  ;;  %v5722_v42 = vsel %vm710_vm0, %v6503_v14, 0.0  ;;  %v6507_v38 = vunpack.c.l.bf16 %v6561_v21  ;;  %v5721_v44 = vadd.f32 %v5720_v27, %v5719_v0 }
 0x41f   : > { %v5385_v53 = vadd.f32 %v10139_v3, %v4939_v46  ;;  %5569 = vst.msk [vmem:[%s10038_s12 + $0x50] sm:$0xf] %vm721_vm4, %v6389_v47  ;;  %v5818_v10 = vadd.f32 %v5817_v58, %v5816_v1  ;;  %v5825_v48 = vsel %vm710_vm0, %v5780_v36, 0.0  ;;  %v4418_v1 = vld [vmem:[#allocation3 + $0x118] sm:$0xff] }
 0x420   : > { %v5560_v59 = vld [vmem:[#allocation3 + $0xcf] sm:$0xff]  ;;  %4900 = vst.msk [vmem:[#allocation3 + $0xf0] sm:$0xff] %vm710_vm0, %v4859_v29  ;;  %v4780_v57 = vpop.f32.mrb[92].mxu1  ;;  %v10179_v31 = vpop.f32.mrb[96].mxu0  ;;  %v5823_v29 = vsel %vm710_vm0, %v5779_v2, 0.0  ;;  %v5782_v58 = vmul.f32 %v6507_v38, %v6507_v38  ;;  %v5726_v6 = vsel %vm710_vm0, %v6507_v38, 0.0 }
 0x421   : > { %v6390_v49 = vpack.c.bf16 %v5560_v59, %v5560_v59  ;;  %5426 = vst.msk [vmem:[#allocation3 + $0xe0] sm:$0xff] %vm710_vm0, %v5385_v53  ;;  %v4860_v3 = vadd.f32 %v4780_v57, %v4414_v55  ;;  %v7919_v19 = vpop.f32.mrb[93].mxu1  ;;  %v8047_v11 = vpop.f32.mrb[97].mxu0  ;;  %v5820_v22 = vadd.f32 %v5819_v18, %v5818_v10  ;;  %v5723_v59 = vadd.f32 %v5722_v42, %v5721_v44 }
 0x422   : > { %v4940_v4 = vld [vmem:[#allocation3 + $0xe8] sm:$0xff] }
 0x423   : > { %5570 = vst.msk [vmem:[%s10038_s12 + $0x54] sm:$0xf] %vm721_vm4, %v6390_v49  ;;  %v5386_v51 = vadd.f32 %v10148_v63, %v4940_v4  ;;  %v5822_v43 = vadd.f32 %v5821_v60, %v5820_v22  ;;  %v6508_v4 = vunpack.c.h.bf16 %v6561_v21  ;;  %v4419_v60 = vld [vmem:[#allocation3 + $0x120] sm:$0xff] }
 0x424   : > { %4901 = vst.msk [vmem:[#allocation3 + $0xf8] sm:$0xff] %vm710_vm0, %v4860_v3  ;;  %v4785_v61 = vpop.f32.mrb[94].mxu1  ;;  %v10189_v12 = vpop.f32.mrb[98].mxu0 }
 0x425   : > { %5427 = vst.msk [vmem:[#allocation3 + $0xe8] sm:$0xff] %vm710_vm0, %v5386_v51  ;;  %v7922_v62 = vpop.f32.mrb[95].mxu1  ;;  %v8050_v13 = vpop.f32.mrb[99].mxu0  ;;  %v4861_v63 = vadd.f32 %v4785_v61, %v4415_v16  ;;  %v5824_v9 = vadd.f32 %v5823_v29, %v5822_v43  ;;  %v5829_v16 = vsel %vm710_vm0, %v5782_v58, 0.0  ;;  %v5783_v0 = vmul.f32 %v6508_v4, %v6508_v4  ;;  %v4420_v43 = vld [vmem:[#allocation3 + $0x128] sm:$0xff]  ;;  %v4421_v58 = vld [vmem:[#allocation3 + $0x130] sm:$0xff] }
 0x426   : > { %v5728_v2 = vsel %vm710_vm0, %v6508_v4, 0.0 }
 0x427   : > { %v4941_v20 = vld [vmem:[#allocation3 + $0xf0] sm:$0xff]  ;;  %4902 = vst.msk [vmem:[#allocation3 + $0x100] sm:$0xff] %vm710_vm0, %v4861_v63  ;;  %v5826_v19 = vadd.f32 %v5825_v48, %v5824_v9  ;;  %v5831_v42 = vsel %vm710_vm0, %v5783_v0, 0.0 }
 0x428   : > { %v5571_v24 = vld [vmem:[#allocation3 + $0xd9] sm:$0xff]  ;;  %v5387_v28 = vadd.f32 %v10157_v35, %v4941_v20  ;;  %v4790_v39 = vpop.f32.mrb[96].mxu1  ;;  %v10199_v30 = vpop.f32.mrb[100].mxu0  ;;  %v6504_v35 = vunpack.c.h.bf16 %v6560_v33 }
 0x429   : > { %v6391_v32 = vpack.c.bf16 %v5571_v24, %v5571_v24  ;;  %v4862_v40 = vadd.f32 %v4790_v39, %v4416_v25  ;;  %v7925_v34 = vpop.f32.mrb[97].mxu1  ;;  %v8053_v15 = vpop.f32.mrb[101].mxu0 }
 0x42a   : > { %5428 = vst.msk [vmem:[#allocation3 + $0xf0] sm:$0xff] %vm710_vm0, %v5387_v28  ;;  %v5781_v50 = vmul.f32 %v6504_v35, %v6504_v35  ;;  %v5724_v3 = vsel %vm710_vm0, %v6504_v35, 0.0  ;;  %v6563_v63 = vld [vmem:[%s10038_s12 + $0x50] sm:$0xff]  }
 0x42b   : > { %v4942_v17 = vld [vmem:[#allocation3 + $0xf8] sm:$0xff]  ;;  %5581 = vst.msk [vmem:[%s10038_s12 + $0x58] sm:$0xf] %vm721_vm4, %v6391_v32  ;;  %v5725_v41 = vadd.f32 %v5724_v3, %v5723_v59 }
 0x42c   : > { %v5388_v7 = vadd.f32 %v10170_v5, %v4942_v17  ;;  %4903 = vst.msk [vmem:[#allocation3 + $0x108] sm:$0xff] %vm710_vm0, %v4862_v40  ;;  %v5572_v26 = vld [vmem:[#allocation3 + $0xe1] sm:$0xff]  ;;  %v4795_v47 = vpop.f32.mrb[98].mxu1  ;;  %v10208_v46 = vpop.f32.mrb[102].mxu0  ;;  %v6562_v5 = vld [vmem:[%s10038_s12 + $0x48] sm:$0xff]   ;;  %v5827_v14 = vsel %vm710_vm0, %v5781_v50, 0.0  ;;  %v6515_v40 = vunpack.c.l.bf16 %v6563_v63 }
 0x42d   : > { %v7928_v37 = vpop.f32.mrb[99].mxu1  ;;  %v8056_v53 = vpop.f32.mrb[103].mxu0  ;;  %v6392_v55 = vpack.c.bf16 %v5572_v26, %v5572_v26  ;;  %v4863_v57 = vadd.f32 %v4795_v47, %v4417_v45  ;;  %v6511_v8 = vunpack.c.l.bf16 %v6562_v5  ;;  %v5828_v13 = vadd.f32 %v5827_v14, %v5826_v19 }
 0x42e   : > { %5429 = vst.msk [vmem:[#allocation3 + $0xf8] sm:$0xff] %vm710_vm0, %v5388_v7  ;;  %v4943_v49 = vld [vmem:[#allocation3 + $0x100] sm:$0xff]  ;;  %v5727_v23 = vadd.f32 %v5726_v6, %v5725_v41  ;;  %v6512_v36 = vunpack.c.h.bf16 %v6562_v5  ;;  %v5786_v53 = vmul.f32 %v6515_v40, %v6515_v40  ;;  %v5734_v19 = vsel %vm710_vm0, %v6515_v40, 0.0 }
 0x42f   : > { %5582 = vst.msk [vmem:[%s10038_s12 + $0x5c] sm:$0xf] %vm721_vm4, %v6392_v55  ;;  %v5389_v11 = vadd.f32 %v10179_v31, %v4943_v49  ;;  %v5784_v21 = vmul.f32 %v6511_v8, %v6511_v8  ;;  %v5830_v39 = vadd.f32 %v5829_v16, %v5828_v13  ;;  %v5730_v32 = vsel %vm710_vm0, %v6511_v8, 0.0 }
 0x430   : > { %4904 = vst.msk [vmem:[#allocation3 + $0x110] sm:$0xff] %vm710_vm0, %v4863_v57  ;;  %v4800_v56 = vpop.f32.mrb[100].mxu1  ;;  %v10219_v33 = vpop.f32.mrb[104].mxu0  ;;  %v5729_v15 = vadd.f32 %v5728_v2, %v5727_v23  ;;  %v5732_v5 = vsel %vm710_vm0, %v6512_v36, 0.0  ;;  %v6516_v57 = vunpack.c.h.bf16 %v6563_v63  ;;  %v4422_v23 = vld [vmem:[#allocation3 + $0x138] sm:$0xff] }
 0x431   : > { %v5583_v51 = vld [vmem:[#allocation3 + $0xeb] sm:$0xff]  ;;  %v4864_v10 = vadd.f32 %v4800_v56, %v4418_v1  ;;  %v7931_v61 = vpop.f32.mrb[101].mxu1  ;;  %v8059_v54 = vpop.f32.mrb[105].mxu0  ;;  %5430 = vst.msk [vmem:[#allocation3 + $0x100] sm:$0xff] %vm710_vm0, %v5389_v11  ;;  %v5833_v38 = vsel %vm710_vm0, %v5784_v21, 0.0  ;;  %v5832_v29 = vadd.f32 %v5831_v42, %v5830_v39 }
 0x432   : > { %v6393_v52 = vpack.c.bf16 %v5583_v51, %v5583_v51  ;;  %v5731_v48 = vadd.f32 %v5730_v32, %v5729_v15  ;;  %v5787_v16 = vmul.f32 %v6516_v57, %v6516_v57 }
 0x433   : > { %v4944_v31 = vld [vmem:[#allocation3 + $0x108] sm:$0xff]  ;;  %4905 = vst.msk [vmem:[#allocation3 + $0x118] sm:$0xff] %vm710_vm0, %v4864_v10  ;;  %v5834_v55 = vadd.f32 %v5833_v38, %v5832_v29  ;;  %v5837_v10 = vsel %vm710_vm0, %v5786_v53, 0.0 }
 0x434   : > { %v5390_v62 = vadd.f32 %v10189_v12, %v4944_v31  ;;  %5593 = vst.msk [vmem:[%s10038_s12 + $0x60] sm:$0xf] %vm721_vm4, %v6393_v52  ;;  %v4805_v20 = vpop.f32.mrb[102].mxu1  ;;  %v10230_v22 = vpop.f32.mrb[106].mxu0  ;;  %v5733_v6 = vadd.f32 %v5732_v5, %v5731_v48  ;;  %v5839_v40 = vsel %vm710_vm0, %v5787_v16, 0.0 }
 0x435   : > { %v5584_v18 = vld [vmem:[#allocation3 + $0xf3] sm:$0xff]  ;;  %v4865_v28 = vadd.f32 %v4805_v20, %v4419_v60  ;;  %v7934_v12 = vpop.f32.mrb[103].mxu1  ;;  %v8062_v25 = vpop.f32.mrb[107].mxu0  ;;  %v5736_v60 = vsel %vm710_vm0, %v6516_v57, 0.0 }
 0x436   : > { %v6394_v24 = vpack.c.bf16 %v5584_v18, %v5584_v18  ;;  %5431 = vst.msk [vmem:[#allocation3 + $0x108] sm:$0xff] %vm710_vm0, %v5390_v62  ;;  %v6564_v45 = vld [vmem:[%s10038_s12 + $0x58] sm:$0xff]   ;;  %v5735_v41 = vadd.f32 %v5734_v19, %v5733_v6 }
 0x437   : > { %v4945_v34 = vld [vmem:[#allocation3 + $0x110] sm:$0xff]  ;;  %4906 = vst.msk [vmem:[#allocation3 + $0x120] sm:$0xff] %vm710_vm0, %v4865_v28  ;;  %v6519_v11 = vunpack.c.l.bf16 %v6564_v45 }
 0x438   : > { %5594 = vst.msk [vmem:[%s10038_s12 + $0x64] sm:$0xf] %vm721_vm4, %v6394_v24  ;;  %v5391_v27 = vadd.f32 %v10199_v30, %v4945_v34  ;;  %v4810_v17 = vpop.f32.mrb[104].mxu1  ;;  %v10239_v35 = vpop.f32.mrb[108].mxu0  ;;  %v5595_v7 = vld [vmem:[#allocation3 + $0xfd] sm:$0xff]  ;;  %v5785_v30 = vmul.f32 %v6512_v36, %v6512_v36  ;;  %v6520_v24 = vunpack.c.h.bf16 %v6564_v45  ;;  %v5737_v39 = vadd.f32 %v5736_v60, %v5735_v41 }
 0x439   : > { %v4866_v44 = vadd.f32 %v4810_v17, %v4420_v43  ;;  %v7937_v26 = vpop.f32.mrb[105].mxu1  ;;  %v8065_v47 = vpop.f32.mrb[109].mxu0  ;;  %v6395_v9 = vpack.c.bf16 %v5595_v7, %v5595_v7  ;;  %v5788_v62 = vmul.f32 %v6519_v11, %v6519_v11  ;;  %v5738_v28 = vsel %vm710_vm0, %v6519_v11, 0.0  ;;  %v4423_v36 = vld [vmem:[#allocation3 + $0x140] sm:$0xf] }
 0x43a   : > { %5432 = vst.msk [vmem:[#allocation3 + $0x110] sm:$0xff] %vm710_vm0, %v5391_v27  ;;  %v4946_v37 = vld [vmem:[#allocation3 + $0x118] sm:$0xff]  ;;  %v5835_v51 = vsel %vm710_vm0, %v5785_v30, 0.0  ;;  %v5789_v7 = vmul.f32 %v6520_v24, %v6520_v24  ;;  %v5740_v29 = vsel %vm710_vm0, %v6520_v24, 0.0 }
 0x43b   : > { %v5392_v59 = vadd.f32 %v10208_v46, %v4946_v37  ;;  %4907 = vst.msk [vmem:[#allocation3 + $0x128] sm:$0xff] %vm710_vm0, %v4866_v44  ;;  %v5836_v54 = vadd.f32 %v5835_v51, %v5834_v55  ;;  %v5841_v34 = vsel %vm710_vm0, %v5788_v62, 0.0 }
 0x43c   : > { %v4815_v49 = vpop.f32.mrb[106].mxu1  ;;  %v10248_v3 = vpop.f32.mrb[110].mxu0  ;;  %5605 = vst.msk [vmem:[%s10038_s12 + $0x68] sm:$0xf] %vm721_vm4, %v6395_v9  ;;  %v5843_v53 = vsel %vm710_vm0, %v5789_v7, 0.0 }
 0x43d   : > { %v5596_v50 = vld [vmem:[#allocation3 + $0x105] sm:$0xff]  ;;  %5433 = vst.msk [vmem:[#allocation3 + $0x118] sm:$0xff] %vm710_vm0, %v5392_v59  ;;  %v4867_v46 = vadd.f32 %v4815_v49, %v4421_v58  ;;  %v7940_v56 = vpop.f32.mrb[107].mxu1  ;;  %v8068_v4 = vpop.f32.mrb[111].mxu0  ;;  %v5838_v20 = vadd.f32 %v5837_v10, %v5836_v54 }
 0x43e   : > { %v6396_v1 = vpack.c.bf16 %v5596_v50, %v5596_v50  ;;  %v4947_v8 = vld [vmem:[#allocation3 + $0x120] sm:$0xff] }
 0x43f   : > { %4908 = vst.msk [vmem:[#allocation3 + $0x130] sm:$0xff] %vm710_vm0, %v4867_v46  ;;  %v5393_v61 = vadd.f32 %v10219_v33, %v4947_v8  ;;  %v6565_v52 = vld [vmem:[%s10038_s12 + $0x60] sm:$0xff]   ;;  %v5840_v17 = vadd.f32 %v5839_v40, %v5838_v20 }
 0x440   : > { %5606 = vst.msk [vmem:[%s10038_s12 + $0x6c] sm:$0xf] %vm721_vm4, %v6396_v1  ;;  %v4820_v31 = vpop.f32.mrb[108].mxu1  ;;  %v10261_v14 = vpop.f32.mrb[112].mxu0  ;;  %v6523_v12 = vunpack.c.l.bf16 %v6565_v52  ;;  %v6524_v48 = vunpack.c.h.bf16 %v6565_v52 }
 0x441   : > { %v5607_v13 = vld [vmem:[#allocation3 + $0x10f] sm:$0xff]  ;;  %5434 = vst.msk [vmem:[#allocation3 + $0x120] sm:$0xff] %vm710_vm0, %v5393_v61  ;;  %v7943_v63 = vpop.f32.mrb[109].mxu1  ;;  %v8071_v18 = vpop.f32.mrb[113].mxu0  ;;  %v4868_v33 = vadd.f32 %v4820_v31, %v4422_v23  ;;  %v5842_v47 = vadd.f32 %v5841_v34, %v5840_v17 }
 0x442   : > { %v6397_v0 = vpack.c.bf16 %v5607_v13, %v5607_v13  ;;  %v4948_v21 = vld [vmem:[#allocation3 + $0x128] sm:$0xff]  ;;  %v5790_v44 = vmul.f32 %v6523_v12, %v6523_v12  ;;  %v5742_v45 = vsel %vm710_vm0, %v6523_v12, 0.0  ;;  %v5791_v50 = vmul.f32 %v6524_v48, %v6524_v48 }
 0x443   : > { %v5394_v25 = vadd.f32 %v10230_v22, %v4948_v21  ;;  %4909 = vst.msk [vmem:[#allocation3 + $0x138] sm:$0xff] %vm710_vm0, %v4868_v33  ;;  %v5739_v22 = vadd.f32 %v5738_v28, %v5737_v39  ;;  %v5844_v5 = vadd.f32 %v5843_v53, %v5842_v47  ;;  %v5744_v19 = vsel %vm710_vm0, %v6524_v48, 0.0 }
 0x444   : > { %5617 = vst.msk [vmem:[%s10038_s12 + $0x70] sm:$0xf] %vm721_vm4, %v6397_v0  ;;  %v5608_v2 = vld [vmem:[#allocation3 + $0x117] sm:$0xff]  ;;  %v4825_v32 = vpop.f32.mrb[110].mxu1  ;;  %v5845_v9 = vsel %vm710_vm0, %v5790_v44, 0.0  ;;  %v5847_v10 = vsel %vm710_vm0, %v5791_v50, 0.0 }
 0x445   : > { %v6398_v15 = vpack.c.bf16 %v5608_v2, %v5608_v2  ;;  %5435 = vst.msk [vmem:[#allocation3 + $0x128] sm:$0xff] %vm710_vm0, %v5394_v25  ;;  %v4869_v27 = vadd.f32 %v4825_v32, %v4423_v36  ;;  %v7946_v43 = vpop.f32.mrb[111].mxu1  ;;  %v5741_v30 = vadd.f32 %v5740_v29, %v5739_v22  ;;  %v5846_v11 = vadd.f32 %v5845_v9, %v5844_v5 }
 0x446   : > { %v4949_v38 = vld [vmem:[#allocation3 + $0x130] sm:$0xff] }
 0x447   : > { %v6566_v42 = vld [vmem:[%s10038_s12 + $0x68] sm:$0xff]   ;;  %5618 = vst.msk [vmem:[%s10038_s12 + $0x74] sm:$0xf] %vm721_vm4, %v6398_v15  ;;  %4910 = vst.msk [vmem:[#allocation3 + $0x140] sm:$0xf] %vm721_vm4, %v4869_v27  ;;  %v5395_v26 = vadd.f32 %v10239_v35, %v4949_v38  ;;  %v5743_v55 = vadd.f32 %v5742_v45, %v5741_v30  ;;  %v5848_v41 = vadd.f32 %v5847_v10, %v5846_v11 }
 0x448   : > { %v6527_v37 = vunpack.c.l.bf16 %v6566_v42  ;;  %v6528_v56 = vunpack.c.h.bf16 %v6566_v42 }
 0x449   : > { %5436 = vst.msk [vmem:[#allocation3 + $0x130] sm:$0xff] %vm710_vm0, %v5395_v26 }
 0x44a   : > { %v4950_v59 = vld [vmem:[#allocation3 + $0x138] sm:$0xff]  ;;  %v5792_v58 = vmul.f32 %v6527_v37, %v6527_v37  ;;  %v5746_v4 = vsel %vm710_vm0, %v6527_v37, 0.0  ;;  %v5793_v31 = vmul.f32 %v6528_v56, %v6528_v56  ;;  %v5748_v13 = vsel %vm710_vm0, %v6528_v56, 0.0 }
 0x44b   : > { %v5396_v57 = vadd.f32 %v10248_v3, %v4950_v59  ;;  %v5745_v3 = vadd.f32 %v5744_v19, %v5743_v55 }
 0x44c   : > { %v5619_v35 = vld [vmem:[#allocation3 + $0x121] sm:$0xff]  ;;  %v5849_v61 = vsel %vm710_vm0, %v5792_v58, 0.0  ;;  %v5851_v18 = vsel %vm710_vm0, %v5793_v31, 0.0 }
 0x44d   : > { %v6399_v49 = vpack.c.bf16 %v5619_v35, %v5619_v35  ;;  %5437 = vst.msk [vmem:[#allocation3 + $0x138] sm:$0xff] %vm710_vm0, %v5396_v57  ;;  %v5747_v52 = vadd.f32 %v5746_v4, %v5745_v3  ;;  %v5850_v62 = vadd.f32 %v5849_v61, %v5848_v41 }
 0x44e   : > { %v6567_v1 = vld [vmem:[%s10038_s12 + $0x70] sm:$0xff]  }
 0x44f   : > { %v4951_v46 = vld [vmem:[#allocation3 + $0x140] sm:$0xf]  ;;  %v6531_v6 = vunpack.c.l.bf16 %v6567_v1  ;;  %5629 = vst.msk [vmem:[%s10038_s12 + $0x78] sm:$0xf] %vm721_vm4, %v6399_v49  ;;  %v5749_v63 = vadd.f32 %v5748_v13, %v5747_v52  ;;  %v5852_v20 = vadd.f32 %v5851_v18, %v5850_v62 }
 0x450   : > { %v5397_v8 = vadd.f32 %v10261_v14, %v4951_v46  ;;  %v5620_v51 = vld [vmem:[#allocation3 + $0x129] sm:$0xff]  ;;  %v6532_v14 = vunpack.c.h.bf16 %v6567_v1 }
 0x451   : > { %v6400_v54 = vpack.c.bf16 %v5620_v51, %v5620_v51  ;;  %v5794_v16 = vmul.f32 %v6531_v6, %v6531_v6  ;;  %v5750_v23 = vsel %vm710_vm0, %v6531_v6, 0.0 }
 0x452   : > { %5438 = vst.msk [vmem:[#allocation3 + $0x140] sm:$0xf] %vm721_vm4, %v5397_v8  ;;  %v5751_v0 = vadd.f32 %v5750_v23, %v5749_v63  ;;  %v5795_v33 = vmul.f32 %v6532_v14, %v6532_v14  ;;  %v5752_v25 = vsel %vm710_vm0, %v6532_v14, 0.0 }
 0x453   : > { %5630 = vst.msk [vmem:[%s10038_s12 + $0x7c] sm:$0xf] %vm721_vm4, %v6400_v54  ;;  %v5853_v60 = vsel %vm710_vm0, %v5794_v16, 0.0 }
 0x454   : > { %v5854_v24 = vadd.f32 %v5853_v60, %v5852_v20  ;;  %v5753_v39 = vadd.f32 %v5752_v25, %v5751_v0  ;;  %v5855_v40 = vsel %vm710_vm0, %v5795_v33, 0.0 }
 0x456   : > { %v5856_v15 = vadd.f32 %v5855_v40, %v5854_v24 }
 0x45a   : > { %v6568_v21 = vld [vmem:[%s10038_s12 + $0x78] sm:$0xff]  }
 0x45b   : > { %v6535_v28 = vunpack.c.l.bf16 %v6568_v21  ;;  %v6536_v12 = vunpack.c.h.bf16 %v6568_v21 }
 0x45d   : > { %v5754_v2 = vsel %vm710_vm0, %v6535_v28, 0.0  ;;  %v5796_v36 = vmul.f32 %v6535_v28, %v6535_v28  ;;  %v5797_v32 = vmul.f32 %v6536_v12, %v6536_v12  ;;  %v5756_v27 = vsel %vm710_vm0, %v6536_v12, 0.0 }
 0x45e   : > { %v5755_v34 = vadd.f32 %v5754_v2, %v5753_v39 }
 0x45f   : > { %v5857_v43 = vsel %vm710_vm0, %v5796_v36, 0.0  ;;  %v5859_v42 = vsel %vm710_vm0, %v5797_v32, 0.0 }
 0x460   : > { %v5757_v17 = vadd.f32 %v5756_v27, %v5755_v34  ;;  %v5858_v22 = vadd.f32 %v5857_v43, %v5856_v15 }
 0x462   : > { %v5758_v38 = vrot.slane %v5757_v17, 4  ;;  %v5860_v7 = vadd.f32 %v5859_v42, %v5858_v22 }
 0x464   : > { %v5759_v44 = vadd.f32 %v5758_v38, %v5757_v17  ;;  %v5861_v26 = vrot.slane %v5860_v7, 4 }
 0x466   : > { %v5760_v47 = vrot.slane %v5759_v44, 2  ;;  %v5862_v29 = vadd.f32 %v5861_v26, %v5860_v7 }
 0x468   : > { %v5761_v48 = vadd.f32 %v5760_v47, %v5759_v44  ;;  %v5863_v45 = vrot.slane %v5862_v29, 2 }
 0x46a   : > { %v5762_v37 = vrot.slane %v5761_v48, 1  ;;  %v5864_v30 = vadd.f32 %v5863_v45, %v5862_v29 }
 0x46c   : > { %v5763_v53 = vadd.f32 %v5762_v37, %v5761_v48  ;;  %v5865_v9 = vrot.slane %v5864_v30, 1 }
 0x46e   : > { %5765 = vst.msk [vmem:[%s262_s16] sm:$0x1] %vm5764_vm5, %v5763_v53  ;;  %v5866_v59 = vadd.f32 %v5865_v9, %v5864_v30 }
 0x470   : > { %5867 = vst.msk [vmem:[%s262_s16 + $0x1] sm:$0x1] %vm5764_vm5, %v5866_v59 }
 0x471 PF: > { %s17_s21 = sadd.s32 1, %s8094_s21  }
 0x472   : > { %p14_p4 = scmp.ge.s32.totalorder %s17_s21, 4  }
 0x474   :  { %16 = sbr.rel (!%p14_p4) target bundleno = 1 (0x1), region = 82 }

</bundles_post_ra>
